<compile_context>
chip_gen: v6e
topology: v6e:2x2x1
jax: 0.10.0
libtpu: 0.0.40
codegen_flags: <defaults>
</compile_context>

<pallas_src>
import functools

import jax
import jax.numpy as jnp
from jax.experimental import pallas as pl
from jax.experimental.pallas import tpu as pltpu


_VMEM_SPEC = pl.BlockSpec(memory_space=pltpu.MemorySpace.VMEM)


# ----------------------------------------------------------------------------
# Tiled GEMM + BN (scale/shift) + optional residual + optional ReLU epilogue
# ----------------------------------------------------------------------------
def _gemm_bn_kernel(*refs, relu, has_res):
    if has_res:
        x_ref, w_ref, s_ref, b_ref, r_ref, o_ref, acc_ref = refs
    else:
        x_ref, w_ref, s_ref, b_ref, o_ref, acc_ref = refs
        r_ref = None
    k = pl.program_id(2)

    @pl.when(k == 0)
    def _init():
        acc_ref[...] = jnp.zeros_like(acc_ref)

    acc_ref[...] += jnp.dot(x_ref[...], w_ref[...],
                            preferred_element_type=jnp.float32)

    @pl.when(k == pl.num_programs(2) - 1)
    def _epilogue():
        y = acc_ref[...] * s_ref[...] + b_ref[...]
        if r_ref is not None:
            y = y + r_ref[...].astype(jnp.float32)
        if relu:
            y = jnp.maximum(y, 0.0)
        o_ref[...] = y.astype(o_ref.dtype)


def _pick_tk(K):
    """K tile: multiple of 128 dividing K, or full K (no padding ever needed)."""
    if K <= 512:
        return K
    for cand in (512, 384, 256, 128):
        if K % cand == 0:
            return cand
    return K


def pallas_gemm_bn(x, w, scale, shift, residual=None, relu=False,
                   out_dtype=jnp.bfloat16):
    """x:[M,K] @ w:[K,N] * scale[1,N] + shift[1,N] (+ residual[M,N]) (+ relu)."""
    M, K = x.shape
    K2, N = w.shape
    assert K == K2
    x = x.astype(jnp.bfloat16)
    w = w.astype(jnp.bfloat16)
    scale = scale.reshape(1, N).astype(jnp.float32)
    shift = shift.reshape(1, N).astype(jnp.float32)

    # Tile sizes: conservative enough for v7x's 64 MiB VMEM, (8,128)-legal.
    tm = M if M <= 256 else 256
    tn = N if (N % 128 != 0 or N <= 256) else 256
    tk = _pick_tk(K)
    mt, nt, kt = pl.cdiv(M, tm), pl.cdiv(N, tn), K // tk

    in_specs = [
        pl.BlockSpec((tm, tk), lambda i, j, k: (i, k)),
        pl.BlockSpec((tk, tn), lambda i, j, k: (k, j)),
        pl.BlockSpec((1, tn), lambda i, j, k: (0, j)),
        pl.BlockSpec((1, tn), lambda i, j, k: (0, j)),
    ]
    inputs = [x, w, scale, shift]
    has_res = residual is not None
    if has_res:
        inputs.append(residual.astype(jnp.bfloat16))
        in_specs.append(pl.BlockSpec((tm, tn), lambda i, j, k: (i, j)))

    out_bytes = M * N * jnp.dtype(out_dtype).itemsize
    bytes_accessed = (M * K + K * N) * 2 + out_bytes + (M * N * 2 if has_res else 0)

    return pl.pallas_call(
        functools.partial(_gemm_bn_kernel, relu=relu, has_res=has_res),
        out_shape=jax.ShapeDtypeStruct((M, N), out_dtype),
        grid=(mt, nt, kt),
        in_specs=in_specs,
        out_specs=pl.BlockSpec((tm, tn), lambda i, j, k: (i, j)),
        scratch_shapes=[pltpu.VMEM((tm, tn), jnp.float32)],
        compiler_params=pltpu.CompilerParams(
            dimension_semantics=("parallel", "parallel", "arbitrary")),
        cost_estimate=pl.CostEstimate(
            flops=2 * M * N * K, transcendentals=0,
            bytes_accessed=int(bytes_accessed)),
    )(*inputs)


# ----------------------------------------------------------------------------
# Convolution = im2col (JAX glue, bf16) + fused Pallas GEMM
# ----------------------------------------------------------------------------
def conv_bn(x, w_mat, scale, shift, kh, kw, stride, padding, relu,
            residual=None):
    """NHWC conv via im2col + tiled Pallas GEMM with fused BN/residual/ReLU."""
    N, H, W, Cin = x.shape
    Cout = w_mat.shape[1]
    x = x.astype(jnp.bfloat16)
    x_pad = jnp.pad(x, ((0, 0), (padding, padding), (padding, padding), (0, 0)))
    OH = (H + 2 * padding - kh) // stride + 1
    OW = (W + 2 * padding - kw) // stride + 1

    cols = []
    for dy in range(kh):
        for dx in range(kw):
            hi_y = dy + stride * (OH - 1) + 1
            hi_x = dx + stride * (OW - 1) + 1
            cols.append(x_pad[:, dy:hi_y:stride, dx:hi_x:stride, :])
    patches = cols[0] if len(cols) == 1 else jnp.concatenate(cols, axis=-1)
    a = patches.reshape(N * OH * OW, kh * kw * Cin)
    res2d = residual.reshape(N * OH * OW, Cout) if residual is not None else None
    out2d = pallas_gemm_bn(a, w_mat, scale, shift, res2d, relu)
    return out2d.reshape(N, OH, OW, Cout)


# ----------------------------------------------------------------------------
# MaxPool 3x3 / stride 2 / pad 1 — taps taken in-kernel (no HBM window stack)
# ----------------------------------------------------------------------------
def _maxpool_kernel(x_ref, o_ref, *, OW, C):
    # x_ref block: (1, Hp2, OW+1, 2C) — one full padded sample, W pre-folded.
    # o_ref block: (1, 1, OW, C)      — one output row.
    oh = pl.program_id(1)
    m = None
    for dy in range(3):
        row = x_ref[0, 2 * oh + dy]                    # (OW+1, 2C)
        for dx in range(3):
            c, d = divmod(dx, 2)                       # 2*ow+dx = 2*(ow+c)+d
            tap = row[c:c + OW, d * C:(d + 1) * C]     # (OW, C)
            m = tap if m is None else jnp.maximum(m, tap)
    o_ref[0, 0] = m


def maxpool_3x3_s2_p1(x):
    N, H, W, C = x.shape
    assert H % 2 == 0 and W % 2 == 0 and (2 * C) % 128 == 0
    OH, OW = H // 2, W // 2
    x_pad = jnp.pad(x, ((0, 0), (1, 1), (1, 1), (0, 0)),
                    constant_values=-jnp.inf)
    Hp2 = H + 2                                        # == 2 * (OH + 1)
    # Contiguous (free) reshape: fold W pairs into the channel dim so the
    # kernel only needs contiguous slices for the width taps.
    xr = x_pad.reshape(N, Hp2, OW + 1, 2 * C)
    return pl.pallas_call(
        functools.partial(_maxpool_kernel, OW=OW, C=C),
        out_shape=jax.ShapeDtypeStruct((N, OH, OW, C), x.dtype),
        grid=(N, OH),
        in_specs=[pl.BlockSpec((1, Hp2, OW + 1, 2 * C),
                               lambda n, oh: (n, 0, 0, 0))],
        out_specs=pl.BlockSpec((1, 1, OW, C), lambda n, oh: (n, oh, 0, 0)),
        compiler_params=pltpu.CompilerParams(
            dimension_semantics=("parallel", "arbitrary")),
    )(xr)


# ----------------------------------------------------------------------------
# Global average pool (tiny op — single VMEM-resident kernel)
# ----------------------------------------------------------------------------
def _avgpool_kernel(x_ref, o_ref, *, inv_hw):
    o_ref[...] = jnp.sum(x_ref[...].astype(jnp.float32), axis=1) * inv_hw


def global_avgpool(x):
    N, H, W, C = x.shape
    x3 = x.reshape(N, H * W, C)
    return pl.pallas_call(
        functools.partial(_avgpool_kernel, inv_hw=1.0 / float(H * W)),
        out_shape=jax.ShapeDtypeStruct((N, C), jnp.float32),
        in_specs=[_VMEM_SPEC],
        out_specs=_VMEM_SPEC,
    )(x3)


# ----------------------------------------------------------------------------
# Parameter construction (deterministic, synthetic) — GEMM-ready layout, bf16
# ----------------------------------------------------------------------------
def _conv_w(key, cout, cin, k):
    fan_in = cin * k * k
    w = jax.random.normal(key, (cout, cin, k, k), jnp.float32) * (2.0 / fan_in) ** 0.5
    # (Cout,Cin,KH,KW) -> (KH,KW,Cin,Cout) -> [KH*KW*Cin, Cout], bf16, at init.
    return jnp.transpose(w, (2, 3, 1, 0)).reshape(k * k * cin, cout).astype(jnp.bfloat16)


def _bn_fold(key, c):
    k1, k2, k3, k4 = jax.random.split(key, 4)
    gamma = 1.0 + 0.1 * jax.random.normal(k1, (c,), jnp.float32)
    beta = 0.1 * jax.random.normal(k2, (c,), jnp.float32)
    mean = 0.1 * jax.random.normal(k3, (c,), jnp.float32)
    var = 1.0 + 0.1 * jax.random.uniform(k4, (c,), jnp.float32)
    scale = gamma * jax.lax.rsqrt(var + 1e-5)
    shift = beta - mean * scale
    return scale.reshape(1, c), shift.reshape(1, c)


_LAYER_CFG = [(64, 64, 1), (64, 128, 2), (128, 256, 2), (256, 512, 2)]


def init_resnet18_params(key):
    ks = iter(jax.random.split(key, 128))
    p = {
        "stem_w": _conv_w(next(ks), 64, 3, 7),
        "stem_bn": _bn_fold(next(ks), 64),
    }
    layers = []
    for (cin, cout, stride) in _LAYER_CFG:
        blocks = []
        for bidx in range(2):
            s = stride if bidx == 0 else 1
            cin_b = cin if bidx == 0 else cout
            blk = {
                "conv1_w": _conv_w(next(ks), cout, cin_b, 3),
                "bn1": _bn_fold(next(ks), cout),
                "conv2_w": _conv_w(next(ks), cout, cout, 3),
                "bn2": _bn_fold(next(ks), cout),
            }
            if s != 1 or cin_b != cout:
                blk["ds_w"] = _conv_w(next(ks), cout, cin_b, 1)
                blk["ds_bn"] = _bn_fold(next(ks), cout)
            blocks.append(blk)
        layers.append(blocks)
    p["layers"] = layers
    bound = 1.0 / 512 ** 0.5
    kw_, kb_ = jax.random.split(next(ks))
    p["fc_w"] = jax.random.uniform(kw_, (512, 1000), jnp.float32,
                                   -bound, bound).astype(jnp.bfloat16)
    p["fc_b"] = jax.random.uniform(kb_, (1, 1000), jnp.float32, -bound, bound)
    p["fc_scale"] = jnp.ones((1, 1000), jnp.float32)
    return p


# ----------------------------------------------------------------------------
# Forward pass
# ----------------------------------------------------------------------------
def _basic_block(x, blk, stride):
    if "ds_w" in blk:
        identity = conv_bn(x, blk["ds_w"], *blk["ds_bn"], kh=1, kw=1,
                           stride=stride, padding=0, relu=False)
    else:
        identity = x
    out = conv_bn(x, blk["conv1_w"], *blk["bn1"], kh=3, kw=3,
                  stride=stride, padding=1, relu=True)
    out = conv_bn(out, blk["conv2_w"], *blk["bn2"], kh=3, kw=3,
                  stride=1, padding=1, relu=True, residual=identity)
    return out


def resnet18_forward(params, x_nchw):
    x = jnp.transpose(x_nchw, (0, 2, 3, 1)).astype(jnp.bfloat16)  # NCHW -> NHWC
    x = conv_bn(x, params["stem_w"], *params["stem_bn"], kh=7, kw=7,
                stride=2, padding=3, relu=True)
    x = maxpool_3x3_s2_p1(x)
    for li, blocks in enumerate(params["layers"]):
        layer_stride = _LAYER_CFG[li][2]
        for bi, blk in enumerate(blocks):
            s = layer_stride if bi == 0 else 1
            x = _basic_block(x, blk, s)
    feat = global_avgpool(x)                                      # [N, 512] f32
    logits = pallas_gemm_bn(feat.astype(jnp.bfloat16), params["fc_w"],
                            params["fc_scale"], params["fc_b"],
                            residual=None, relu=False,
                            out_dtype=jnp.float32)
    return logits                                                 # [N, 1000]


# ----------------------------------------------------------------------------
if __name__ == "__main__":
    key = jax.random.PRNGKey(0)
    pkey, xkey = jax.random.split(key)
    params = init_resnet18_params(pkey)

    # Small-but-valid ResNet-18 input (spatial 32 -> 1 at the last stage).
    x = jax.random.normal(xkey, (2, 3, 32, 32), jnp.float32)

    fwd = jax.jit(resnet18_forward)
    logits = fwd(params, x)
    logits = jax.block_until_ready(logits)

    assert logits.shape == (2, 1000), logits.shape
    assert jnp.isfinite(logits).all()
    print("KERNEL_OK")
</pallas_src>

<mosaic_0001>
module attributes {stable_mosaic.version = 11 : i64} {
  func.func @_gemm_bn_kernel(%arg0: i32, %arg1: i32, %arg2: i32, %arg3: memref<256x147xbf16, #tpu.memory_space<vmem>>, %arg4: memref<147x64xbf16, #tpu.memory_space<vmem>>, %arg5: memref<1x64xf32, #tpu.memory_space<vmem>>, %arg6: memref<1x64xf32, #tpu.memory_space<vmem>>, %arg7: memref<256x64xbf16, #tpu.memory_space<vmem>>, %arg8: memref<256x64xf32, #tpu.memory_space<vmem>>) attributes {dimension_semantics = [#tpu.dimension_semantics<parallel>, #tpu.dimension_semantics<parallel>, #tpu.dimension_semantics<arbitrary>], iteration_bounds = array<i64: 2, 1, 1>, scalar_prefetch = 0 : i64, scratch_operands = 1 : i64, tpu.core_type = #tpu.core_type<tc>, window_params = [{transform_indices = @transform_0, window_bounds = array<i64: 256, 147>}, {transform_indices = @transform_1, window_bounds = array<i64: 147, 64>}, {transform_indices = @transform_2, window_bounds = array<i64: 1, 64>}, {transform_indices = @transform_3, window_bounds = array<i64: 1, 64>}, {transform_indices = @transform_4, window_bounds = array<i64: 256, 64>}]} {
    %c0_i32 = arith.constant 0 : i32
    %0 = arith.cmpi eq, %arg2, %c0_i32 : i32
    %1 = arith.extui %0 : i1 to i32
    %c0_i32_0 = arith.constant 0 : i32
    %2 = arith.cmpi ne, %1, %c0_i32_0 : i32
    scf.if %2 {
      %cst_10 = arith.constant 0.000000e+00 : f32
      %12 = vector.broadcast %cst_10 : f32 to vector<256x64xf32>
      %c0_11 = arith.constant 0 : index
      %c0_12 = arith.constant 0 : index
      %13 = vector.load %arg8[%c0_11, %c0_12] : memref<256x64xf32, #tpu.memory_space<vmem>>, vector<256x64xf32>
      tpu.vector_store %arg8[%c0_11, %c0_12], %12 {strides = array<i32>} : memref<256x64xf32, #tpu.memory_space<vmem>>, vector<256x64xf32>,
    } else {
    }
    %c0 = arith.constant 0 : index
    %c0_1 = arith.constant 0 : index
    %3 = vector.load %arg8[%c0, %c0_1] : memref<256x64xf32, #tpu.memory_space<vmem>>, vector<256x64xf32>
    %c0_2 = arith.constant 0 : index
    %c0_3 = arith.constant 0 : index
    %4 = vector.load %arg3[%c0_2, %c0_3] : memref<256x147xbf16, #tpu.memory_space<vmem>>, vector<256x147xbf16>
    %c0_4 = arith.constant 0 : index
    %c0_5 = arith.constant 0 : index
    %5 = vector.load %arg4[%c0_4, %c0_5] : memref<147x64xbf16, #tpu.memory_space<vmem>>, vector<147x64xbf16>
    %cst = arith.constant dense<0.000000e+00> : vector<256x64xf32>
    %6 = tpu.matmul %4, %5, %cst {dimension_numbers = #tpu.dot_dimension_numbers<[1], [0], [0], [1], [0, 0, 1, 1], [], []>} : vector<256x147xbf16>, vector<147x64xbf16>, vector<256x64xf32> -> vector<256x64xf32>
    %7 = arith.addf %3, %6 : vector<256x64xf32>
    %c0_6 = arith.constant 0 : index
    %c0_7 = arith.constant 0 : index
    %8 = vector.load %arg8[%c0_6, %c0_7] : memref<256x64xf32, #tpu.memory_space<vmem>>, vector<256x64xf32>
    tpu.vector_store %arg8[%c0_6, %c0_7], %7 {strides = array<i32>} : memref<256x64xf32, #tpu.memory_space<vmem>>, vector<256x64xf32>,
    %c0_i32_8 = arith.constant 0 : i32
    %9 = arith.cmpi eq, %arg2, %c0_i32_8 : i32
    %10 = arith.extui %9 : i1 to i32
    %c0_i32_9 = arith.constant 0 : i32
    %11 = arith.cmpi ne, %10, %c0_i32_9 : i32
    scf.if %11 {
      %c0_10 = arith.constant 0 : index
      %c0_11 = arith.constant 0 : index
      %12 = vector.load %arg8[%c0_10, %c0_11] : memref<256x64xf32, #tpu.memory_space<vmem>>, vector<256x64xf32>
      %c0_12 = arith.constant 0 : index
      %c0_13 = arith.constant 0 : index
      %13 = vector.load %arg5[%c0_12, %c0_13] : memref<1x64xf32, #tpu.memory_space<vmem>>, vector<1x64xf32>
      %14 = vector.broadcast %13 : vector<1x64xf32> to vector<256x64xf32>
      %15 = arith.mulf %12, %14 : vector<256x64xf32>
      %c0_14 = arith.constant 0 : index
      %c0_15 = arith.constant 0 : index
      %16 = vector.load %arg6[%c0_14, %c0_15] : memref<1x64xf32, #tpu.memory_space<vmem>>, vector<1x64xf32>
      %17 = vector.broadcast %16 : vector<1x64xf32> to vector<256x64xf32>
      %18 = arith.addf %15, %17 : vector<256x64xf32>
      %cst_16 = arith.constant 0.000000e+00 : f32
      %19 = vector.broadcast %cst_16 : f32 to vector<256x64xf32>
      %20 = arith.maximumf %18, %19 : vector<256x64xf32>
      %21 = arith.truncf %20 : vector<256x64xf32> to vector<256x64xbf16>
      %c0_17 = arith.constant 0 : index
      %c0_18 = arith.constant 0 : index
      %22 = vector.load %arg7[%c0_17, %c0_18] : memref<256x64xbf16, #tpu.memory_space<vmem>>, vector<256x64xbf16>
      tpu.vector_store %arg7[%c0_17, %c0_18], %21 {strides = array<i32>} : memref<256x64xbf16, #tpu.memory_space<vmem>>, vector<256x64xbf16>,
    } else {
    }
    return
  }
  func.func @transform_0(%arg0: i32, %arg1: i32, %arg2: i32) -> (i32, i32) {
    %c0_i32 = arith.constant 0 : i32
    return %arg0, %arg2 : i32, i32
  }
  func.func @transform_1(%arg0: i32, %arg1: i32, %arg2: i32) -> (i32, i32) {
    %c0_i32 = arith.constant 0 : i32
    return %arg2, %arg1 : i32, i32
  }
  func.func @transform_2(%arg0: i32, %arg1: i32, %arg2: i32) -> (i32, i32) {
    %c0_i32 = arith.constant 0 : i32
    %c0_i32_0 = arith.constant 0 : i32
    return %c0_i32, %arg1 : i32, i32
  }
  func.func @transform_3(%arg0: i32, %arg1: i32, %arg2: i32) -> (i32, i32) {
    %c0_i32 = arith.constant 0 : i32
    %c0_i32_0 = arith.constant 0 : i32
    return %c0_i32, %arg1 : i32, i32
  }
  func.func @transform_4(%arg0: i32, %arg1: i32, %arg2: i32) -> (i32, i32) {
    %c0_i32 = arith.constant 0 : i32
    return %arg0, %arg1 : i32, i32
  }
}

module attributes {stable_mosaic.version = 11 : i64} {
  func.func @_maxpool_kernel(%arg0: i32, %arg1: i32, %arg2: memref<1x18x9x128xbf16, #tpu.memory_space<vmem>>, %arg3: memref<1x1x8x64xbf16, #tpu.memory_space<vmem>>) attributes {dimension_semantics = [#tpu.dimension_semantics<parallel>, #tpu.dimension_semantics<arbitrary>], iteration_bounds = array<i64: 2, 8>, scalar_prefetch = 0 : i64, scratch_operands = 0 : i64, tpu.core_type = #tpu.core_type<tc>, window_params = [{transform_indices = @transform_0, window_bounds = array<i64: 1, 18, 9, 128>}, {transform_indices = @transform_1, window_bounds = array<i64: 1, 1, 8, 64>}]} {
    %c2_i32 = arith.constant 2 : i32
    %0 = arith.muli %c2_i32, %arg1 : i32
    %c0_i32 = arith.constant 0 : i32
    %1 = arith.addi %0, %c0_i32 : i32
    %c0 = arith.constant 0 : index
    %2 = arith.index_cast %1 : i32 to index
    %c0_0 = arith.constant 0 : index
    %c0_1 = arith.constant 0 : index
    %3 = vector.load %arg2[%c0, %2, %c0_0, %c0_1] : memref<1x18x9x128xbf16, #tpu.memory_space<vmem>>, vector<1x1x9x128xbf16>
    %4 = vector.shape_cast %3 : vector<1x1x9x128xbf16> to vector<9x128xbf16>
    %5 = vector.extract_strided_slice %4 {offsets = [0, 0], sizes = [8, 64], strides = [1, 1]} : vector<9x128xbf16> to vector<8x64xbf16>
    %6 = vector.extract_strided_slice %4 {offsets = [0, 64], sizes = [8, 64], strides = [1, 1]} : vector<9x128xbf16> to vector<8x64xbf16>
    %7 = arith.maximumf %5, %6 : vector<8x64xbf16>
    %8 = vector.extract_strided_slice %4 {offsets = [1, 0], sizes = [8, 64], strides = [1, 1]} : vector<9x128xbf16> to vector<8x64xbf16>
    %9 = arith.maximumf %7, %8 : vector<8x64xbf16>
    %c2_i32_2 = arith.constant 2 : i32
    %10 = arith.muli %c2_i32_2, %arg1 : i32
    %c1_i32 = arith.constant 1 : i32
    %11 = arith.addi %10, %c1_i32 : i32
    %c0_3 = arith.constant 0 : index
    %12 = arith.index_cast %11 : i32 to index
    %c0_4 = arith.constant 0 : index
    %c0_5 = arith.constant 0 : index
    %13 = vector.load %arg2[%c0_3, %12, %c0_4, %c0_5] : memref<1x18x9x128xbf16, #tpu.memory_space<vmem>>, vector<1x1x9x128xbf16>
    %14 = vector.shape_cast %13 : vector<1x1x9x128xbf16> to vector<9x128xbf16>
    %15 = vector.extract_strided_slice %14 {offsets = [0, 0], sizes = [8, 64], strides = [1, 1]} : vector<9x128xbf16> to vector<8x64xbf16>
    %16 = arith.maximumf %9, %15 : vector<8x64xbf16>
    %17 = vector.extract_strided_slice %14 {offsets = [0, 64], sizes = [8, 64], strides = [1, 1]} : vector<9x128xbf16> to vector<8x64xbf16>
    %18 = arith.maximumf %16, %17 : vector<8x64xbf16>
    %19 = vector.extract_strided_slice %14 {offsets = [1, 0], sizes = [8, 64], strides = [1, 1]} : vector<9x128xbf16> to vector<8x64xbf16>
    %20 = arith.maximumf %18, %19 : vector<8x64xbf16>
    %c2_i32_6 = arith.constant 2 : i32
    %21 = arith.muli %c2_i32_6, %arg1 : i32
    %c2_i32_7 = arith.constant 2 : i32
    %22 = arith.addi %21, %c2_i32_7 : i32
    %c0_8 = arith.constant 0 : index
    %23 = arith.index_cast %22 : i32 to index
    %c0_9 = arith.constant 0 : index
    %c0_10 = arith.constant 0 : index
    %24 = vector.load %arg2[%c0_8, %23, %c0_9, %c0_10] : memref<1x18x9x128xbf16, #tpu.memory_space<vmem>>, vector<1x1x9x128xbf16>
    %25 = vector.shape_cast %24 : vector<1x1x9x128xbf16> to vector<9x128xbf16>
    %26 = vector.extract_strided_slice %25 {offsets = [0, 0], sizes = [8, 64], strides = [1, 1]} : vector<9x128xbf16> to vector<8x64xbf16>
    %27 = arith.maximumf %20, %26 : vector<8x64xbf16>
    %28 = vector.extract_strided_slice %25 {offsets = [0, 64], sizes = [8, 64], strides = [1, 1]} : vector<9x128xbf16> to vector<8x64xbf16>
    %29 = arith.maximumf %27, %28 : vector<8x64xbf16>
    %30 = vector.extract_strided_slice %25 {offsets = [1, 0], sizes = [8, 64], strides = [1, 1]} : vector<9x128xbf16> to vector<8x64xbf16>
    %31 = arith.maximumf %29, %30 : vector<8x64xbf16>
    %c0_11 = arith.constant 0 : index
    %c0_12 = arith.constant 0 : index
    %c0_13 = arith.constant 0 : index
    %c0_14 = arith.constant 0 : index
    %32 = vector.load %arg3[%c0_11, %c0_12, %c0_13, %c0_14] : memref<1x1x8x64xbf16, #tpu.memory_space<vmem>>, vector<1x1x8x64xbf16>
    %33 = vector.shape_cast %32 : vector<1x1x8x64xbf16> to vector<8x64xbf16>
    %34 = vector.shape_cast %31 : vector<8x64xbf16> to vector<1x1x8x64xbf16>
    tpu.vector_store %arg3[%c0_11, %c0_12, %c0_13, %c0_14], %34 {strides = array<i32>} : memref<1x1x8x64xbf16, #tpu.memory_space<vmem>>, vector<1x1x8x64xbf16>,
    return
  }
  func.func @transform_0(%arg0: i32, %arg1: i32) -> (i32, i32, i32, i32) {
    %c0_i32 = arith.constant 0 : i32
    %c0_i32_0 = arith.constant 0 : i32
    %c0_i32_1 = arith.constant 0 : i32
    %c0_i32_2 = arith.constant 0 : i32
    return %arg0, %c0_i32, %c0_i32_0, %c0_i32_1 : i32, i32, i32, i32
  }
  func.func @transform_1(%arg0: i32, %arg1: i32) -> (i32, i32, i32, i32) {
    %c0_i32 = arith.constant 0 : i32
    %c0_i32_0 = arith.constant 0 : i32
    %c0_i32_1 = arith.constant 0 : i32
    return %arg0, %arg1, %c0_i32, %c0_i32_0 : i32, i32, i32, i32
  }
}

module attributes {stable_mosaic.version = 11 : i64} {
  func.func @_gemm_bn_kernel(%arg0: i32, %arg1: i32, %arg2: i32, %arg3: memref<128x576xbf16, #tpu.memory_space<vmem>>, %arg4: memref<576x64xbf16, #tpu.memory_space<vmem>>, %arg5: memref<1x64xf32, #tpu.memory_space<vmem>>, %arg6: memref<1x64xf32, #tpu.memory_space<vmem>>, %arg7: memref<128x64xbf16, #tpu.memory_space<vmem>>, %arg8: memref<128x64xf32, #tpu.memory_space<vmem>>) attributes {dimension_semantics = [#tpu.dimension_semantics<parallel>, #tpu.dimension_semantics<parallel>, #tpu.dimension_semantics<arbitrary>], iteration_bounds = array<i64: 1, 1, 1>, scalar_prefetch = 0 : i64, scratch_operands = 1 : i64, tpu.core_type = #tpu.core_type<tc>, window_params = [{transform_indices = @transform_0, window_bounds = array<i64: 128, 576>}, {transform_indices = @transform_1, window_bounds = array<i64: 576, 64>}, {transform_indices = @transform_2, window_bounds = array<i64: 1, 64>}, {transform_indices = @transform_3, window_bounds = array<i64: 1, 64>}, {transform_indices = @transform_4, window_bounds = array<i64: 128, 64>}]} {
    %c0_i32 = arith.constant 0 : i32
    %0 = arith.cmpi eq, %arg2, %c0_i32 : i32
    %1 = arith.extui %0 : i1 to i32
    %c0_i32_0 = arith.constant 0 : i32
    %2 = arith.cmpi ne, %1, %c0_i32_0 : i32
    scf.if %2 {
      %cst_10 = arith.constant 0.000000e+00 : f32
      %12 = vector.broadcast %cst_10 : f32 to vector<128x64xf32>
      %c0_11 = arith.constant 0 : index
      %c0_12 = arith.constant 0 : index
      %13 = vector.load %arg8[%c0_11, %c0_12] : memref<128x64xf32, #tpu.memory_space<vmem>>, vector<128x64xf32>
      tpu.vector_store %arg8[%c0_11, %c0_12], %12 {strides = array<i32>} : memref<128x64xf32, #tpu.memory_space<vmem>>, vector<128x64xf32>,
    } else {
    }
    %c0 = arith.constant 0 : index
    %c0_1 = arith.constant 0 : index
    %3 = vector.load %arg8[%c0, %c0_1] : memref<128x64xf32, #tpu.memory_space<vmem>>, vector<128x64xf32>
    %c0_2 = arith.constant 0 : index
    %c0_3 = arith.constant 0 : index
    %4 = vector.load %arg3[%c0_2, %c0_3] : memref<128x576xbf16, #tpu.memory_space<vmem>>, vector<128x576xbf16>
    %c0_4 = arith.constant 0 : index
    %c0_5 = arith.constant 0 : index
    %5 = vector.load %arg4[%c0_4, %c0_5] : memref<576x64xbf16, #tpu.memory_space<vmem>>, vector<576x64xbf16>
    %cst = arith.constant dense<0.000000e+00> : vector<128x64xf32>
    %6 = tpu.matmul %4, %5, %cst {dimension_numbers = #tpu.dot_dimension_numbers<[1], [0], [0], [1], [0, 0, 1, 1], [], []>} : vector<128x576xbf16>, vector<576x64xbf16>, vector<128x64xf32> -> vector<128x64xf32>
    %7 = arith.addf %3, %6 : vector<128x64xf32>
    %c0_6 = arith.constant 0 : index
    %c0_7 = arith.constant 0 : index
    %8 = vector.load %arg8[%c0_6, %c0_7] : memref<128x64xf32, #tpu.memory_space<vmem>>, vector<128x64xf32>
    tpu.vector_store %arg8[%c0_6, %c0_7], %7 {strides = array<i32>} : memref<128x64xf32, #tpu.memory_space<vmem>>, vector<128x64xf32>,
    %c0_i32_8 = arith.constant 0 : i32
    %9 = arith.cmpi eq, %arg2, %c0_i32_8 : i32
    %10 = arith.extui %9 : i1 to i32
    %c0_i32_9 = arith.constant 0 : i32
    %11 = arith.cmpi ne, %10, %c0_i32_9 : i32
    scf.if %11 {
      %c0_10 = arith.constant 0 : index
      %c0_11 = arith.constant 0 : index
      %12 = vector.load %arg8[%c0_10, %c0_11] : memref<128x64xf32, #tpu.memory_space<vmem>>, vector<128x64xf32>
      %c0_12 = arith.constant 0 : index
      %c0_13 = arith.constant 0 : index
      %13 = vector.load %arg5[%c0_12, %c0_13] : memref<1x64xf32, #tpu.memory_space<vmem>>, vector<1x64xf32>
      %14 = vector.broadcast %13 : vector<1x64xf32> to vector<128x64xf32>
      %15 = arith.mulf %12, %14 : vector<128x64xf32>
      %c0_14 = arith.constant 0 : index
      %c0_15 = arith.constant 0 : index
      %16 = vector.load %arg6[%c0_14, %c0_15] : memref<1x64xf32, #tpu.memory_space<vmem>>, vector<1x64xf32>
      %17 = vector.broadcast %16 : vector<1x64xf32> to vector<128x64xf32>
      %18 = arith.addf %15, %17 : vector<128x64xf32>
      %cst_16 = arith.constant 0.000000e+00 : f32
      %19 = vector.broadcast %cst_16 : f32 to vector<128x64xf32>
      %20 = arith.maximumf %18, %19 : vector<128x64xf32>
      %21 = arith.truncf %20 : vector<128x64xf32> to vector<128x64xbf16>
      %c0_17 = arith.constant 0 : index
      %c0_18 = arith.constant 0 : index
      %22 = vector.load %arg7[%c0_17, %c0_18] : memref<128x64xbf16, #tpu.memory_space<vmem>>, vector<128x64xbf16>
      tpu.vector_store %arg7[%c0_17, %c0_18], %21 {strides = array<i32>} : memref<128x64xbf16, #tpu.memory_space<vmem>>, vector<128x64xbf16>,
    } else {
    }
    return
  }
  func.func @transform_0(%arg0: i32, %arg1: i32, %arg2: i32) -> (i32, i32) {
    %c0_i32 = arith.constant 0 : i32
    return %arg0, %arg2 : i32, i32
  }
  func.func @transform_1(%arg0: i32, %arg1: i32, %arg2: i32) -> (i32, i32) {
    %c0_i32 = arith.constant 0 : i32
    return %arg2, %arg1 : i32, i32
  }
  func.func @transform_2(%arg0: i32, %arg1: i32, %arg2: i32) -> (i32, i32) {
    %c0_i32 = arith.constant 0 : i32
    %c0_i32_0 = arith.constant 0 : i32
    return %c0_i32, %arg1 : i32, i32
  }
  func.func @transform_3(%arg0: i32, %arg1: i32, %arg2: i32) -> (i32, i32) {
    %c0_i32 = arith.constant 0 : i32
    %c0_i32_0 = arith.constant 0 : i32
    return %c0_i32, %arg1 : i32, i32
  }
  func.func @transform_4(%arg0: i32, %arg1: i32, %arg2: i32) -> (i32, i32) {
    %c0_i32 = arith.constant 0 : i32
    return %arg0, %arg1 : i32, i32
  }
}

module attributes {stable_mosaic.version = 11 : i64} {
  func.func @_gemm_bn_kernel(%arg0: i32, %arg1: i32, %arg2: i32, %arg3: memref<128x576xbf16, #tpu.memory_space<vmem>>, %arg4: memref<576x64xbf16, #tpu.memory_space<vmem>>, %arg5: memref<1x64xf32, #tpu.memory_space<vmem>>, %arg6: memref<1x64xf32, #tpu.memory_space<vmem>>, %arg7: memref<128x64xbf16, #tpu.memory_space<vmem>>, %arg8: memref<128x64xbf16, #tpu.memory_space<vmem>>, %arg9: memref<128x64xf32, #tpu.memory_space<vmem>>) attributes {dimension_semantics = [#tpu.dimension_semantics<parallel>, #tpu.dimension_semantics<parallel>, #tpu.dimension_semantics<arbitrary>], iteration_bounds = array<i64: 1, 1, 1>, scalar_prefetch = 0 : i64, scratch_operands = 1 : i64, tpu.core_type = #tpu.core_type<tc>, window_params = [{transform_indices = @transform_0, window_bounds = array<i64: 128, 576>}, {transform_indices = @transform_1, window_bounds = array<i64: 576, 64>}, {transform_indices = @transform_2, window_bounds = array<i64: 1, 64>}, {transform_indices = @transform_3, window_bounds = array<i64: 1, 64>}, {transform_indices = @transform_4, window_bounds = array<i64: 128, 64>}, {transform_indices = @transform_5, window_bounds = array<i64: 128, 64>}]} {
    %c0_i32 = arith.constant 0 : i32
    %0 = arith.cmpi eq, %arg2, %c0_i32 : i32
    %1 = arith.extui %0 : i1 to i32
    %c0_i32_0 = arith.constant 0 : i32
    %2 = arith.cmpi ne, %1, %c0_i32_0 : i32
    scf.if %2 {
      %cst_10 = arith.constant 0.000000e+00 : f32
      %12 = vector.broadcast %cst_10 : f32 to vector<128x64xf32>
      %c0_11 = arith.constant 0 : index
      %c0_12 = arith.constant 0 : index
      %13 = vector.load %arg9[%c0_11, %c0_12] : memref<128x64xf32, #tpu.memory_space<vmem>>, vector<128x64xf32>
      tpu.vector_store %arg9[%c0_11, %c0_12], %12 {strides = array<i32>} : memref<128x64xf32, #tpu.memory_space<vmem>>, vector<128x64xf32>,
    } else {
    }
    %c0 = arith.constant 0 : index
    %c0_1 = arith.constant 0 : index
    %3 = vector.load %arg9[%c0, %c0_1] : memref<128x64xf32, #tpu.memory_space<vmem>>, vector<128x64xf32>
    %c0_2 = arith.constant 0 : index
    %c0_3 = arith.constant 0 : index
    %4 = vector.load %arg3[%c0_2, %c0_3] : memref<128x576xbf16, #tpu.memory_space<vmem>>, vector<128x576xbf16>
    %c0_4 = arith.constant 0 : index
    %c0_5 = arith.constant 0 : index
    %5 = vector.load %arg4[%c0_4, %c0_5] : memref<576x64xbf16, #tpu.memory_space<vmem>>, vector<576x64xbf16>
    %cst = arith.constant dense<0.000000e+00> : vector<128x64xf32>
    %6 = tpu.matmul %4, %5, %cst {dimension_numbers = #tpu.dot_dimension_numbers<[1], [0], [0], [1], [0, 0, 1, 1], [], []>} : vector<128x576xbf16>, vector<576x64xbf16>, vector<128x64xf32> -> vector<128x64xf32>
    %7 = arith.addf %3, %6 : vector<128x64xf32>
    %c0_6 = arith.constant 0 : index
    %c0_7 = arith.constant 0 : index
    %8 = vector.load %arg9[%c0_6, %c0_7] : memref<128x64xf32, #tpu.memory_space<vmem>>, vector<128x64xf32>
    tpu.vector_store %arg9[%c0_6, %c0_7], %7 {strides = array<i32>} : memref<128x64xf32, #tpu.memory_space<vmem>>, vector<128x64xf32>,
    %c0_i32_8 = arith.constant 0 : i32
    %9 = arith.cmpi eq, %arg2, %c0_i32_8 : i32
    %10 = arith.extui %9 : i1 to i32
    %c0_i32_9 = arith.constant 0 : i32
    %11 = arith.cmpi ne, %10, %c0_i32_9 : i32
    scf.if %11 {
      %c0_10 = arith.constant 0 : index
      %c0_11 = arith.constant 0 : index
      %12 = vector.load %arg9[%c0_10, %c0_11] : memref<128x64xf32, #tpu.memory_space<vmem>>, vector<128x64xf32>
      %c0_12 = arith.constant 0 : index
      %c0_13 = arith.constant 0 : index
      %13 = vector.load %arg5[%c0_12, %c0_13] : memref<1x64xf32, #tpu.memory_space<vmem>>, vector<1x64xf32>
      %14 = vector.broadcast %13 : vector<1x64xf32> to vector<128x64xf32>
      %15 = arith.mulf %12, %14 : vector<128x64xf32>
      %c0_14 = arith.constant 0 : index
      %c0_15 = arith.constant 0 : index
      %16 = vector.load %arg6[%c0_14, %c0_15] : memref<1x64xf32, #tpu.memory_space<vmem>>, vector<1x64xf32>
      %17 = vector.broadcast %16 : vector<1x64xf32> to vector<128x64xf32>
      %18 = arith.addf %15, %17 : vector<128x64xf32>
      %c0_16 = arith.constant 0 : index
      %c0_17 = arith.constant 0 : index
      %19 = vector.load %arg7[%c0_16, %c0_17] : memref<128x64xbf16, #tpu.memory_space<vmem>>, vector<128x64xbf16>
      %20 = arith.extf %19 : vector<128x64xbf16> to vector<128x64xf32>
      %21 = arith.addf %18, %20 : vector<128x64xf32>
      %cst_18 = arith.constant 0.000000e+00 : f32
      %22 = vector.broadcast %cst_18 : f32 to vector<128x64xf32>
      %23 = arith.maximumf %21, %22 : vector<128x64xf32>
      %24 = arith.truncf %23 : vector<128x64xf32> to vector<128x64xbf16>
      %c0_19 = arith.constant 0 : index
      %c0_20 = arith.constant 0 : index
      %25 = vector.load %arg8[%c0_19, %c0_20] : memref<128x64xbf16, #tpu.memory_space<vmem>>, vector<128x64xbf16>
      tpu.vector_store %arg8[%c0_19, %c0_20], %24 {strides = array<i32>} : memref<128x64xbf16, #tpu.memory_space<vmem>>, vector<128x64xbf16>,
    } else {
    }
    return
  }
  func.func @transform_0(%arg0: i32, %arg1: i32, %arg2: i32) -> (i32, i32) {
    %c0_i32 = arith.constant 0 : i32
    return %arg0, %arg2 : i32, i32
  }
  func.func @transform_1(%arg0: i32, %arg1: i32, %arg2: i32) -> (i32, i32) {
    %c0_i32 = arith.constant 0 : i32
    return %arg2, %arg1 : i32, i32
  }
  func.func @transform_2(%arg0: i32, %arg1: i32, %arg2: i32) -> (i32, i32) {
    %c0_i32 = arith.constant 0 : i32
    %c0_i32_0 = arith.constant 0 : i32
    return %c0_i32, %arg1 : i32, i32
  }
  func.func @transform_3(%arg0: i32, %arg1: i32, %arg2: i32) -> (i32, i32) {
    %c0_i32 = arith.constant 0 : i32
    %c0_i32_0 = arith.constant 0 : i32
    return %c0_i32, %arg1 : i32, i32
  }
  func.func @transform_4(%arg0: i32, %arg1: i32, %arg2: i32) -> (i32, i32) {
    %c0_i32 = arith.constant 0 : i32
    return %arg0, %arg1 : i32, i32
  }
  func.func @transform_5(%arg0: i32, %arg1: i32, %arg2: i32) -> (i32, i32) {
    %c0_i32 = arith.constant 0 : i32
    return %arg0, %arg1 : i32, i32
  }
}

module attributes {stable_mosaic.version = 11 : i64} {
  func.func @_gemm_bn_kernel(%arg0: i32, %arg1: i32, %arg2: i32, %arg3: memref<32x576xbf16, #tpu.memory_space<vmem>>, %arg4: memref<576x128xbf16, #tpu.memory_space<vmem>>, %arg5: memref<1x128xf32, #tpu.memory_space<vmem>>, %arg6: memref<1x128xf32, #tpu.memory_space<vmem>>, %arg7: memref<32x128xbf16, #tpu.memory_space<vmem>>, %arg8: memref<32x128xf32, #tpu.memory_space<vmem>>) attributes {dimension_semantics = [#tpu.dimension_semantics<parallel>, #tpu.dimension_semantics<parallel>, #tpu.dimension_semantics<arbitrary>], iteration_bounds = array<i64: 1, 1, 1>, scalar_prefetch = 0 : i64, scratch_operands = 1 : i64, tpu.core_type = #tpu.core_type<tc>, window_params = [{transform_indices = @transform_0, window_bounds = array<i64: 32, 576>}, {transform_indices = @transform_1, window_bounds = array<i64: 576, 128>}, {transform_indices = @transform_2, window_bounds = array<i64: 1, 128>}, {transform_indices = @transform_3, window_bounds = array<i64: 1, 128>}, {transform_indices = @transform_4, window_bounds = array<i64: 32, 128>}]} {
    %c0_i32 = arith.constant 0 : i32
    %0 = arith.cmpi eq, %arg2, %c0_i32 : i32
    %1 = arith.extui %0 : i1 to i32
    %c0_i32_0 = arith.constant 0 : i32
    %2 = arith.cmpi ne, %1, %c0_i32_0 : i32
    scf.if %2 {
      %cst_10 = arith.constant 0.000000e+00 : f32
      %12 = vector.broadcast %cst_10 : f32 to vector<32x128xf32>
      %c0_11 = arith.constant 0 : index
      %c0_12 = arith.constant 0 : index
      %13 = vector.load %arg8[%c0_11, %c0_12] : memref<32x128xf32, #tpu.memory_space<vmem>>, vector<32x128xf32>
      tpu.vector_store %arg8[%c0_11, %c0_12], %12 {strides = array<i32>} : memref<32x128xf32, #tpu.memory_space<vmem>>, vector<32x128xf32>,
    } else {
    }
    %c0 = arith.constant 0 : index
    %c0_1 = arith.constant 0 : index
    %3 = vector.load %arg8[%c0, %c0_1] : memref<32x128xf32, #tpu.memory_space<vmem>>, vector<32x128xf32>
    %c0_2 = arith.constant 0 : index
    %c0_3 = arith.constant 0 : index
    %4 = vector.load %arg3[%c0_2, %c0_3] : memref<32x576xbf16, #tpu.memory_space<vmem>>, vector<32x576xbf16>
    %c0_4 = arith.constant 0 : index
    %c0_5 = arith.constant 0 : index
    %5 = vector.load %arg4[%c0_4, %c0_5] : memref<576x128xbf16, #tpu.memory_space<vmem>>, vector<576x128xbf16>
    %cst = arith.constant dense<0.000000e+00> : vector<32x128xf32>
    %6 = tpu.matmul %4, %5, %cst {dimension_numbers = #tpu.dot_dimension_numbers<[1], [0], [0], [1], [0, 0, 1, 1], [], []>} : vector<32x576xbf16>, vector<576x128xbf16>, vector<32x128xf32> -> vector<32x128xf32>
    %7 = arith.addf %3, %6 : vector<32x128xf32>
    %c0_6 = arith.constant 0 : index
    %c0_7 = arith.constant 0 : index
    %8 = vector.load %arg8[%c0_6, %c0_7] : memref<32x128xf32, #tpu.memory_space<vmem>>, vector<32x128xf32>
    tpu.vector_store %arg8[%c0_6, %c0_7], %7 {strides = array<i32>} : memref<32x128xf32, #tpu.memory_space<vmem>>, vector<32x128xf32>,
    %c0_i32_8 = arith.constant 0 : i32
    %9 = arith.cmpi eq, %arg2, %c0_i32_8 : i32
    %10 = arith.extui %9 : i1 to i32
    %c0_i32_9 = arith.constant 0 : i32
    %11 = arith.cmpi ne, %10, %c0_i32_9 : i32
    scf.if %11 {
      %c0_10 = arith.constant 0 : index
      %c0_11 = arith.constant 0 : index
      %12 = vector.load %arg8[%c0_10, %c0_11] : memref<32x128xf32, #tpu.memory_space<vmem>>, vector<32x128xf32>
      %c0_12 = arith.constant 0 : index
      %c0_13 = arith.constant 0 : index
      %13 = vector.load %arg5[%c0_12, %c0_13] : memref<1x128xf32, #tpu.memory_space<vmem>>, vector<1x128xf32>
      %14 = vector.broadcast %13 : vector<1x128xf32> to vector<32x128xf32>
      %15 = arith.mulf %12, %14 : vector<32x128xf32>
      %c0_14 = arith.constant 0 : index
      %c0_15 = arith.constant 0 : index
      %16 = vector.load %arg6[%c0_14, %c0_15] : memref<1x128xf32, #tpu.memory_space<vmem>>, vector<1x128xf32>
      %17 = vector.broadcast %16 : vector<1x128xf32> to vector<32x128xf32>
      %18 = arith.addf %15, %17 : vector<32x128xf32>
      %cst_16 = arith.constant 0.000000e+00 : f32
      %19 = vector.broadcast %cst_16 : f32 to vector<32x128xf32>
      %20 = arith.maximumf %18, %19 : vector<32x128xf32>
      %21 = arith.truncf %20 : vector<32x128xf32> to vector<32x128xbf16>
      %c0_17 = arith.constant 0 : index
      %c0_18 = arith.constant 0 : index
      %22 = vector.load %arg7[%c0_17, %c0_18] : memref<32x128xbf16, #tpu.memory_space<vmem>>, vector<32x128xbf16>
      tpu.vector_store %arg7[%c0_17, %c0_18], %21 {strides = array<i32>} : memref<32x128xbf16, #tpu.memory_space<vmem>>, vector<32x128xbf16>,
    } else {
    }
    return
  }
  func.func @transform_0(%arg0: i32, %arg1: i32, %arg2: i32) -> (i32, i32) {
    %c0_i32 = arith.constant 0 : i32
    return %arg0, %arg2 : i32, i32
  }
  func.func @transform_1(%arg0: i32, %arg1: i32, %arg2: i32) -> (i32, i32) {
    %c0_i32 = arith.constant 0 : i32
    return %arg2, %arg1 : i32, i32
  }
  func.func @transform_2(%arg0: i32, %arg1: i32, %arg2: i32) -> (i32, i32) {
    %c0_i32 = arith.constant 0 : i32
    %c0_i32_0 = arith.constant 0 : i32
    return %c0_i32, %arg1 : i32, i32
  }
  func.func @transform_3(%arg0: i32, %arg1: i32, %arg2: i32) -> (i32, i32) {
    %c0_i32 = arith.constant 0 : i32
    %c0_i32_0 = arith.constant 0 : i32
    return %c0_i32, %arg1 : i32, i32
  }
  func.func @transform_4(%arg0: i32, %arg1: i32, %arg2: i32) -> (i32, i32) {
    %c0_i32 = arith.constant 0 : i32
    return %arg0, %arg1 : i32, i32
  }
}

module attributes {stable_mosaic.version = 11 : i64} {
  func.func @_gemm_bn_kernel(%arg0: i32, %arg1: i32, %arg2: i32, %arg3: memref<32x64xbf16, #tpu.memory_space<vmem>>, %arg4: memref<64x128xbf16, #tpu.memory_space<vmem>>, %arg5: memref<1x128xf32, #tpu.memory_space<vmem>>, %arg6: memref<1x128xf32, #tpu.memory_space<vmem>>, %arg7: memref<32x128xbf16, #tpu.memory_space<vmem>>, %arg8: memref<32x128xf32, #tpu.memory_space<vmem>>) attributes {dimension_semantics = [#tpu.dimension_semantics<parallel>, #tpu.dimension_semantics<parallel>, #tpu.dimension_semantics<arbitrary>], iteration_bounds = array<i64: 1, 1, 1>, scalar_prefetch = 0 : i64, scratch_operands = 1 : i64, tpu.core_type = #tpu.core_type<tc>, window_params = [{transform_indices = @transform_0, window_bounds = array<i64: 32, 64>}, {transform_indices = @transform_1, window_bounds = array<i64: 64, 128>}, {transform_indices = @transform_2, window_bounds = array<i64: 1, 128>}, {transform_indices = @transform_3, window_bounds = array<i64: 1, 128>}, {transform_indices = @transform_4, window_bounds = array<i64: 32, 128>}]} {
    %c0_i32 = arith.constant 0 : i32
    %0 = arith.cmpi eq, %arg2, %c0_i32 : i32
    %1 = arith.extui %0 : i1 to i32
    %c0_i32_0 = arith.constant 0 : i32
    %2 = arith.cmpi ne, %1, %c0_i32_0 : i32
    scf.if %2 {
      %cst_10 = arith.constant 0.000000e+00 : f32
      %12 = vector.broadcast %cst_10 : f32 to vector<32x128xf32>
      %c0_11 = arith.constant 0 : index
      %c0_12 = arith.constant 0 : index
      %13 = vector.load %arg8[%c0_11, %c0_12] : memref<32x128xf32, #tpu.memory_space<vmem>>, vector<32x128xf32>
      tpu.vector_store %arg8[%c0_11, %c0_12], %12 {strides = array<i32>} : memref<32x128xf32, #tpu.memory_space<vmem>>, vector<32x128xf32>,
    } else {
    }
    %c0 = arith.constant 0 : index
    %c0_1 = arith.constant 0 : index
    %3 = vector.load %arg8[%c0, %c0_1] : memref<32x128xf32, #tpu.memory_space<vmem>>, vector<32x128xf32>
    %c0_2 = arith.constant 0 : index
    %c0_3 = arith.constant 0 : index
    %4 = vector.load %arg3[%c0_2, %c0_3] : memref<32x64xbf16, #tpu.memory_space<vmem>>, vector<32x64xbf16>
    %c0_4 = arith.constant 0 : index
    %c0_5 = arith.constant 0 : index
    %5 = vector.load %arg4[%c0_4, %c0_5] : memref<64x128xbf16, #tpu.memory_space<vmem>>, vector<64x128xbf16>
    %cst = arith.constant dense<0.000000e+00> : vector<32x128xf32>
    %6 = tpu.matmul %4, %5, %cst {dimension_numbers = #tpu.dot_dimension_numbers<[1], [0], [0], [1], [0, 0, 1, 1], [], []>} : vector<32x64xbf16>, vector<64x128xbf16>, vector<32x128xf32> -> vector<32x128xf32>
    %7 = arith.addf %3, %6 : vector<32x128xf32>
    %c0_6 = arith.constant 0 : index
    %c0_7 = arith.constant 0 : index
    %8 = vector.load %arg8[%c0_6, %c0_7] : memref<32x128xf32, #tpu.memory_space<vmem>>, vector<32x128xf32>
    tpu.vector_store %arg8[%c0_6, %c0_7], %7 {strides = array<i32>} : memref<32x128xf32, #tpu.memory_space<vmem>>, vector<32x128xf32>,
    %c0_i32_8 = arith.constant 0 : i32
    %9 = arith.cmpi eq, %arg2, %c0_i32_8 : i32
    %10 = arith.extui %9 : i1 to i32
    %c0_i32_9 = arith.constant 0 : i32
    %11 = arith.cmpi ne, %10, %c0_i32_9 : i32
    scf.if %11 {
      %c0_10 = arith.constant 0 : index
      %c0_11 = arith.constant 0 : index
      %12 = vector.load %arg8[%c0_10, %c0_11] : memref<32x128xf32, #tpu.memory_space<vmem>>, vector<32x128xf32>
      %c0_12 = arith.constant 0 : index
      %c0_13 = arith.constant 0 : index
      %13 = vector.load %arg5[%c0_12, %c0_13] : memref<1x128xf32, #tpu.memory_space<vmem>>, vector<1x128xf32>
      %14 = vector.broadcast %13 : vector<1x128xf32> to vector<32x128xf32>
      %15 = arith.mulf %12, %14 : vector<32x128xf32>
      %c0_14 = arith.constant 0 : index
      %c0_15 = arith.constant 0 : index
      %16 = vector.load %arg6[%c0_14, %c0_15] : memref<1x128xf32, #tpu.memory_space<vmem>>, vector<1x128xf32>
      %17 = vector.broadcast %16 : vector<1x128xf32> to vector<32x128xf32>
      %18 = arith.addf %15, %17 : vector<32x128xf32>
      %19 = arith.truncf %18 : vector<32x128xf32> to vector<32x128xbf16>
      %c0_16 = arith.constant 0 : index
      %c0_17 = arith.constant 0 : index
      %20 = vector.load %arg7[%c0_16, %c0_17] : memref<32x128xbf16, #tpu.memory_space<vmem>>, vector<32x128xbf16>
      tpu.vector_store %arg7[%c0_16, %c0_17], %19 {strides = array<i32>} : memref<32x128xbf16, #tpu.memory_space<vmem>>, vector<32x128xbf16>,
    } else {
    }
    return
  }
  func.func @transform_0(%arg0: i32, %arg1: i32, %arg2: i32) -> (i32, i32) {
    %c0_i32 = arith.constant 0 : i32
    return %arg0, %arg2 : i32, i32
  }
  func.func @transform_1(%arg0: i32, %arg1: i32, %arg2: i32) -> (i32, i32) {
    %c0_i32 = arith.constant 0 : i32
    return %arg2, %arg1 : i32, i32
  }
  func.func @transform_2(%arg0: i32, %arg1: i32, %arg2: i32) -> (i32, i32) {
    %c0_i32 = arith.constant 0 : i32
    %c0_i32_0 = arith.constant 0 : i32
    return %c0_i32, %arg1 : i32, i32
  }
  func.func @transform_3(%arg0: i32, %arg1: i32, %arg2: i32) -> (i32, i32) {
    %c0_i32 = arith.constant 0 : i32
    %c0_i32_0 = arith.constant 0 : i32
    return %c0_i32, %arg1 : i32, i32
  }
  func.func @transform_4(%arg0: i32, %arg1: i32, %arg2: i32) -> (i32, i32) {
    %c0_i32 = arith.constant 0 : i32
    return %arg0, %arg1 : i32, i32
  }
}

module attributes {stable_mosaic.version = 11 : i64} {
  func.func @_gemm_bn_kernel(%arg0: i32, %arg1: i32, %arg2: i32, %arg3: memref<32x384xbf16, #tpu.memory_space<vmem>>, %arg4: memref<384x128xbf16, #tpu.memory_space<vmem>>, %arg5: memref<1x128xf32, #tpu.memory_space<vmem>>, %arg6: memref<1x128xf32, #tpu.memory_space<vmem>>, %arg7: memref<32x128xbf16, #tpu.memory_space<vmem>>, %arg8: memref<32x128xbf16, #tpu.memory_space<vmem>>, %arg9: memref<32x128xf32, #tpu.memory_space<vmem>>) attributes {dimension_semantics = [#tpu.dimension_semantics<parallel>, #tpu.dimension_semantics<parallel>, #tpu.dimension_semantics<arbitrary>], iteration_bounds = array<i64: 1, 1, 3>, scalar_prefetch = 0 : i64, scratch_operands = 1 : i64, tpu.core_type = #tpu.core_type<tc>, window_params = [{transform_indices = @transform_0, window_bounds = array<i64: 32, 384>}, {transform_indices = @transform_1, window_bounds = array<i64: 384, 128>}, {transform_indices = @transform_2, window_bounds = array<i64: 1, 128>}, {transform_indices = @transform_3, window_bounds = array<i64: 1, 128>}, {transform_indices = @transform_4, window_bounds = array<i64: 32, 128>}, {transform_indices = @transform_5, window_bounds = array<i64: 32, 128>}]} {
    %c0_i32 = arith.constant 0 : i32
    %0 = arith.cmpi eq, %arg2, %c0_i32 : i32
    %1 = arith.extui %0 : i1 to i32
    %c0_i32_0 = arith.constant 0 : i32
    %2 = arith.cmpi ne, %1, %c0_i32_0 : i32
    scf.if %2 {
      %cst_9 = arith.constant 0.000000e+00 : f32
      %12 = vector.broadcast %cst_9 : f32 to vector<32x128xf32>
      %c0_10 = arith.constant 0 : index
      %c0_11 = arith.constant 0 : index
      %13 = vector.load %arg9[%c0_10, %c0_11] : memref<32x128xf32, #tpu.memory_space<vmem>>, vector<32x128xf32>
      tpu.vector_store %arg9[%c0_10, %c0_11], %12 {strides = array<i32>} : memref<32x128xf32, #tpu.memory_space<vmem>>, vector<32x128xf32>,
    } else {
    }
    %c0 = arith.constant 0 : index
    %c0_1 = arith.constant 0 : index
    %3 = vector.load %arg9[%c0, %c0_1] : memref<32x128xf32, #tpu.memory_space<vmem>>, vector<32x128xf32>
    %c0_2 = arith.constant 0 : index
    %c0_3 = arith.constant 0 : index
    %4 = vector.load %arg3[%c0_2, %c0_3] : memref<32x384xbf16, #tpu.memory_space<vmem>>, vector<32x384xbf16>
    %c0_4 = arith.constant 0 : index
    %c0_5 = arith.constant 0 : index
    %5 = vector.load %arg4[%c0_4, %c0_5] : memref<384x128xbf16, #tpu.memory_space<vmem>>, vector<384x128xbf16>
    %cst = arith.constant dense<0.000000e+00> : vector<32x128xf32>
    %6 = tpu.matmul %4, %5, %cst {dimension_numbers = #tpu.dot_dimension_numbers<[1], [0], [0], [1], [0, 0, 1, 1], [], []>} : vector<32x384xbf16>, vector<384x128xbf16>, vector<32x128xf32> -> vector<32x128xf32>
    %7 = arith.addf %3, %6 : vector<32x128xf32>
    %c0_6 = arith.constant 0 : index
    %c0_7 = arith.constant 0 : index
    %8 = vector.load %arg9[%c0_6, %c0_7] : memref<32x128xf32, #tpu.memory_space<vmem>>, vector<32x128xf32>
    tpu.vector_store %arg9[%c0_6, %c0_7], %7 {strides = array<i32>} : memref<32x128xf32, #tpu.memory_space<vmem>>, vector<32x128xf32>,
    %c2_i32 = arith.constant 2 : i32
    %9 = arith.cmpi eq, %arg2, %c2_i32 : i32
    %10 = arith.extui %9 : i1 to i32
    %c0_i32_8 = arith.constant 0 : i32
    %11 = arith.cmpi ne, %10, %c0_i32_8 : i32
    scf.if %11 {
      %c0_9 = arith.constant 0 : index
      %c0_10 = arith.constant 0 : index
      %12 = vector.load %arg9[%c0_9, %c0_10] : memref<32x128xf32, #tpu.memory_space<vmem>>, vector<32x128xf32>
      %c0_11 = arith.constant 0 : index
      %c0_12 = arith.constant 0 : index
      %13 = vector.load %arg5[%c0_11, %c0_12] : memref<1x128xf32, #tpu.memory_space<vmem>>, vector<1x128xf32>
      %14 = vector.broadcast %13 : vector<1x128xf32> to vector<32x128xf32>
      %15 = arith.mulf %12, %14 : vector<32x128xf32>
      %c0_13 = arith.constant 0 : index
      %c0_14 = arith.constant 0 : index
      %16 = vector.load %arg6[%c0_13, %c0_14] : memref<1x128xf32, #tpu.memory_space<vmem>>, vector<1x128xf32>
      %17 = vector.broadcast %16 : vector<1x128xf32> to vector<32x128xf32>
      %18 = arith.addf %15, %17 : vector<32x128xf32>
      %c0_15 = arith.constant 0 : index
      %c0_16 = arith.constant 0 : index
      %19 = vector.load %arg7[%c0_15, %c0_16] : memref<32x128xbf16, #tpu.memory_space<vmem>>, vector<32x128xbf16>
      %20 = arith.extf %19 : vector<32x128xbf16> to vector<32x128xf32>
      %21 = arith.addf %18, %20 : vector<32x128xf32>
      %cst_17 = arith.constant 0.000000e+00 : f32
      %22 = vector.broadcast %cst_17 : f32 to vector<32x128xf32>
      %23 = arith.maximumf %21, %22 : vector<32x128xf32>
      %24 = arith.truncf %23 : vector<32x128xf32> to vector<32x128xbf16>
      %c0_18 = arith.constant 0 : index
      %c0_19 = arith.constant 0 : index
      %25 = vector.load %arg8[%c0_18, %c0_19] : memref<32x128xbf16, #tpu.memory_space<vmem>>, vector<32x128xbf16>
      tpu.vector_store %arg8[%c0_18, %c0_19], %24 {strides = array<i32>} : memref<32x128xbf16, #tpu.memory_space<vmem>>, vector<32x128xbf16>,
    } else {
    }
    return
  }
  func.func @transform_0(%arg0: i32, %arg1: i32, %arg2: i32) -> (i32, i32) {
    %c0_i32 = arith.constant 0 : i32
    return %arg0, %arg2 : i32, i32
  }
  func.func @transform_1(%arg0: i32, %arg1: i32, %arg2: i32) -> (i32, i32) {
    %c0_i32 = arith.constant 0 : i32
    return %arg2, %arg1 : i32, i32
  }
  func.func @transform_2(%arg0: i32, %arg1: i32, %arg2: i32) -> (i32, i32) {
    %c0_i32 = arith.constant 0 : i32
    %c0_i32_0 = arith.constant 0 : i32
    return %c0_i32, %arg1 : i32, i32
  }
  func.func @transform_3(%arg0: i32, %arg1: i32, %arg2: i32) -> (i32, i32) {
    %c0_i32 = arith.constant 0 : i32
    %c0_i32_0 = arith.constant 0 : i32
    return %c0_i32, %arg1 : i32, i32
  }
  func.func @transform_4(%arg0: i32, %arg1: i32, %arg2: i32) -> (i32, i32) {
    %c0_i32 = arith.constant 0 : i32
    return %arg0, %arg1 : i32, i32
  }
  func.func @transform_5(%arg0: i32, %arg1: i32, %arg2: i32) -> (i32, i32) {
    %c0_i32 = arith.constant 0 : i32
    return %arg0, %arg1 : i32, i32
  }
}

module attributes {stable_mosaic.version = 11 : i64} {
  func.func @_gemm_bn_kernel(%arg0: i32, %arg1: i32, %arg2: i32, %arg3: memref<32x384xbf16, #tpu.memory_space<vmem>>, %arg4: memref<384x128xbf16, #tpu.memory_space<vmem>>, %arg5: memref<1x128xf32, #tpu.memory_space<vmem>>, %arg6: memref<1x128xf32, #tpu.memory_space<vmem>>, %arg7: memref<32x128xbf16, #tpu.memory_space<vmem>>, %arg8: memref<32x128xf32, #tpu.memory_space<vmem>>) attributes {dimension_semantics = [#tpu.dimension_semantics<parallel>, #tpu.dimension_semantics<parallel>, #tpu.dimension_semantics<arbitrary>], iteration_bounds = array<i64: 1, 1, 3>, scalar_prefetch = 0 : i64, scratch_operands = 1 : i64, tpu.core_type = #tpu.core_type<tc>, window_params = [{transform_indices = @transform_0, window_bounds = array<i64: 32, 384>}, {transform_indices = @transform_1, window_bounds = array<i64: 384, 128>}, {transform_indices = @transform_2, window_bounds = array<i64: 1, 128>}, {transform_indices = @transform_3, window_bounds = array<i64: 1, 128>}, {transform_indices = @transform_4, window_bounds = array<i64: 32, 128>}]} {
    %c0_i32 = arith.constant 0 : i32
    %0 = arith.cmpi eq, %arg2, %c0_i32 : i32
    %1 = arith.extui %0 : i1 to i32
    %c0_i32_0 = arith.constant 0 : i32
    %2 = arith.cmpi ne, %1, %c0_i32_0 : i32
    scf.if %2 {
      %cst_9 = arith.constant 0.000000e+00 : f32
      %12 = vector.broadcast %cst_9 : f32 to vector<32x128xf32>
      %c0_10 = arith.constant 0 : index
      %c0_11 = arith.constant 0 : index
      %13 = vector.load %arg8[%c0_10, %c0_11] : memref<32x128xf32, #tpu.memory_space<vmem>>, vector<32x128xf32>
      tpu.vector_store %arg8[%c0_10, %c0_11], %12 {strides = array<i32>} : memref<32x128xf32, #tpu.memory_space<vmem>>, vector<32x128xf32>,
    } else {
    }
    %c0 = arith.constant 0 : index
    %c0_1 = arith.constant 0 : index
    %3 = vector.load %arg8[%c0, %c0_1] : memref<32x128xf32, #tpu.memory_space<vmem>>, vector<32x128xf32>
    %c0_2 = arith.constant 0 : index
    %c0_3 = arith.constant 0 : index
    %4 = vector.load %arg3[%c0_2, %c0_3] : memref<32x384xbf16, #tpu.memory_space<vmem>>, vector<32x384xbf16>
    %c0_4 = arith.constant 0 : index
    %c0_5 = arith.constant 0 : index
    %5 = vector.load %arg4[%c0_4, %c0_5] : memref<384x128xbf16, #tpu.memory_space<vmem>>, vector<384x128xbf16>
    %cst = arith.constant dense<0.000000e+00> : vector<32x128xf32>
    %6 = tpu.matmul %4, %5, %cst {dimension_numbers = #tpu.dot_dimension_numbers<[1], [0], [0], [1], [0, 0, 1, 1], [], []>} : vector<32x384xbf16>, vector<384x128xbf16>, vector<32x128xf32> -> vector<32x128xf32>
    %7 = arith.addf %3, %6 : vector<32x128xf32>
    %c0_6 = arith.constant 0 : index
    %c0_7 = arith.constant 0 : index
    %8 = vector.load %arg8[%c0_6, %c0_7] : memref<32x128xf32, #tpu.memory_space<vmem>>, vector<32x128xf32>
    tpu.vector_store %arg8[%c0_6, %c0_7], %7 {strides = array<i32>} : memref<32x128xf32, #tpu.memory_space<vmem>>, vector<32x128xf32>,
    %c2_i32 = arith.constant 2 : i32
    %9 = arith.cmpi eq, %arg2, %c2_i32 : i32
    %10 = arith.extui %9 : i1 to i32
    %c0_i32_8 = arith.constant 0 : i32
    %11 = arith.cmpi ne, %10, %c0_i32_8 : i32
    scf.if %11 {
      %c0_9 = arith.constant 0 : index
      %c0_10 = arith.constant 0 : index
      %12 = vector.load %arg8[%c0_9, %c0_10] : memref<32x128xf32, #tpu.memory_space<vmem>>, vector<32x128xf32>
      %c0_11 = arith.constant 0 : index
      %c0_12 = arith.constant 0 : index
      %13 = vector.load %arg5[%c0_11, %c0_12] : memref<1x128xf32, #tpu.memory_space<vmem>>, vector<1x128xf32>
      %14 = vector.broadcast %13 : vector<1x128xf32> to vector<32x128xf32>
      %15 = arith.mulf %12, %14 : vector<32x128xf32>
      %c0_13 = arith.constant 0 : index
      %c0_14 = arith.constant 0 : index
      %16 = vector.load %arg6[%c0_13, %c0_14] : memref<1x128xf32, #tpu.memory_space<vmem>>, vector<1x128xf32>
      %17 = vector.broadcast %16 : vector<1x128xf32> to vector<32x128xf32>
      %18 = arith.addf %15, %17 : vector<32x128xf32>
      %cst_15 = arith.constant 0.000000e+00 : f32
      %19 = vector.broadcast %cst_15 : f32 to vector<32x128xf32>
      %20 = arith.maximumf %18, %19 : vector<32x128xf32>
      %21 = arith.truncf %20 : vector<32x128xf32> to vector<32x128xbf16>
      %c0_16 = arith.constant 0 : index
      %c0_17 = arith.constant 0 : index
      %22 = vector.load %arg7[%c0_16, %c0_17] : memref<32x128xbf16, #tpu.memory_space<vmem>>, vector<32x128xbf16>
      tpu.vector_store %arg7[%c0_16, %c0_17], %21 {strides = array<i32>} : memref<32x128xbf16, #tpu.memory_space<vmem>>, vector<32x128xbf16>,
    } else {
    }
    return
  }
  func.func @transform_0(%arg0: i32, %arg1: i32, %arg2: i32) -> (i32, i32) {
    %c0_i32 = arith.constant 0 : i32
    return %arg0, %arg2 : i32, i32
  }
  func.func @transform_1(%arg0: i32, %arg1: i32, %arg2: i32) -> (i32, i32) {
    %c0_i32 = arith.constant 0 : i32
    return %arg2, %arg1 : i32, i32
  }
  func.func @transform_2(%arg0: i32, %arg1: i32, %arg2: i32) -> (i32, i32) {
    %c0_i32 = arith.constant 0 : i32
    %c0_i32_0 = arith.constant 0 : i32
    return %c0_i32, %arg1 : i32, i32
  }
  func.func @transform_3(%arg0: i32, %arg1: i32, %arg2: i32) -> (i32, i32) {
    %c0_i32 = arith.constant 0 : i32
    %c0_i32_0 = arith.constant 0 : i32
    return %c0_i32, %arg1 : i32, i32
  }
  func.func @transform_4(%arg0: i32, %arg1: i32, %arg2: i32) -> (i32, i32) {
    %c0_i32 = arith.constant 0 : i32
    return %arg0, %arg1 : i32, i32
  }
}

module attributes {stable_mosaic.version = 11 : i64} {
  func.func @_gemm_bn_kernel(%arg0: i32, %arg1: i32, %arg2: i32, %arg3: memref<8x384xbf16, #tpu.memory_space<vmem>>, %arg4: memref<384x256xbf16, #tpu.memory_space<vmem>>, %arg5: memref<1x256xf32, #tpu.memory_space<vmem>>, %arg6: memref<1x256xf32, #tpu.memory_space<vmem>>, %arg7: memref<8x256xbf16, #tpu.memory_space<vmem>>, %arg8: memref<8x256xf32, #tpu.memory_space<vmem>>) attributes {dimension_semantics = [#tpu.dimension_semantics<parallel>, #tpu.dimension_semantics<parallel>, #tpu.dimension_semantics<arbitrary>], iteration_bounds = array<i64: 1, 1, 3>, scalar_prefetch = 0 : i64, scratch_operands = 1 : i64, tpu.core_type = #tpu.core_type<tc>, window_params = [{transform_indices = @transform_0, window_bounds = array<i64: 8, 384>}, {transform_indices = @transform_1, window_bounds = array<i64: 384, 256>}, {transform_indices = @transform_2, window_bounds = array<i64: 1, 256>}, {transform_indices = @transform_3, window_bounds = array<i64: 1, 256>}, {transform_indices = @transform_4, window_bounds = array<i64: 8, 256>}]} {
    %c0_i32 = arith.constant 0 : i32
    %0 = arith.cmpi eq, %arg2, %c0_i32 : i32
    %1 = arith.extui %0 : i1 to i32
    %c0_i32_0 = arith.constant 0 : i32
    %2 = arith.cmpi ne, %1, %c0_i32_0 : i32
    scf.if %2 {
      %cst_9 = arith.constant 0.000000e+00 : f32
      %12 = vector.broadcast %cst_9 : f32 to vector<8x256xf32>
      %c0_10 = arith.constant 0 : index
      %c0_11 = arith.constant 0 : index
      %13 = vector.load %arg8[%c0_10, %c0_11] : memref<8x256xf32, #tpu.memory_space<vmem>>, vector<8x256xf32>
      tpu.vector_store %arg8[%c0_10, %c0_11], %12 {strides = array<i32>} : memref<8x256xf32, #tpu.memory_space<vmem>>, vector<8x256xf32>,
    } else {
    }
    %c0 = arith.constant 0 : index
    %c0_1 = arith.constant 0 : index
    %3 = vector.load %arg8[%c0, %c0_1] : memref<8x256xf32, #tpu.memory_space<vmem>>, vector<8x256xf32>
    %c0_2 = arith.constant 0 : index
    %c0_3 = arith.constant 0 : index
    %4 = vector.load %arg3[%c0_2, %c0_3] : memref<8x384xbf16, #tpu.memory_space<vmem>>, vector<8x384xbf16>
    %c0_4 = arith.constant 0 : index
    %c0_5 = arith.constant 0 : index
    %5 = vector.load %arg4[%c0_4, %c0_5] : memref<384x256xbf16, #tpu.memory_space<vmem>>, vector<384x256xbf16>
    %cst = arith.constant dense<0.000000e+00> : vector<8x256xf32>
    %6 = tpu.matmul %4, %5, %cst {dimension_numbers = #tpu.dot_dimension_numbers<[1], [0], [0], [1], [0, 0, 1, 1], [], []>} : vector<8x384xbf16>, vector<384x256xbf16>, vector<8x256xf32> -> vector<8x256xf32>
    %7 = arith.addf %3, %6 : vector<8x256xf32>
    %c0_6 = arith.constant 0 : index
    %c0_7 = arith.constant 0 : index
    %8 = vector.load %arg8[%c0_6, %c0_7] : memref<8x256xf32, #tpu.memory_space<vmem>>, vector<8x256xf32>
    tpu.vector_store %arg8[%c0_6, %c0_7], %7 {strides = array<i32>} : memref<8x256xf32, #tpu.memory_space<vmem>>, vector<8x256xf32>,
    %c2_i32 = arith.constant 2 : i32
    %9 = arith.cmpi eq, %arg2, %c2_i32 : i32
    %10 = arith.extui %9 : i1 to i32
    %c0_i32_8 = arith.constant 0 : i32
    %11 = arith.cmpi ne, %10, %c0_i32_8 : i32
    scf.if %11 {
      %c0_9 = arith.constant 0 : index
      %c0_10 = arith.constant 0 : index
      %12 = vector.load %arg8[%c0_9, %c0_10] : memref<8x256xf32, #tpu.memory_space<vmem>>, vector<8x256xf32>
      %c0_11 = arith.constant 0 : index
      %c0_12 = arith.constant 0 : index
      %13 = vector.load %arg5[%c0_11, %c0_12] : memref<1x256xf32, #tpu.memory_space<vmem>>, vector<1x256xf32>
      %14 = vector.broadcast %13 : vector<1x256xf32> to vector<8x256xf32>
      %15 = arith.mulf %12, %14 : vector<8x256xf32>
      %c0_13 = arith.constant 0 : index
      %c0_14 = arith.constant 0 : index
      %16 = vector.load %arg6[%c0_13, %c0_14] : memref<1x256xf32, #tpu.memory_space<vmem>>, vector<1x256xf32>
      %17 = vector.broadcast %16 : vector<1x256xf32> to vector<8x256xf32>
      %18 = arith.addf %15, %17 : vector<8x256xf32>
      %cst_15 = arith.constant 0.000000e+00 : f32
      %19 = vector.broadcast %cst_15 : f32 to vector<8x256xf32>
      %20 = arith.maximumf %18, %19 : vector<8x256xf32>
      %21 = arith.truncf %20 : vector<8x256xf32> to vector<8x256xbf16>
      %c0_16 = arith.constant 0 : index
      %c0_17 = arith.constant 0 : index
      %22 = vector.load %arg7[%c0_16, %c0_17] : memref<8x256xbf16, #tpu.memory_space<vmem>>, vector<8x256xbf16>
      tpu.vector_store %arg7[%c0_16, %c0_17], %21 {strides = array<i32>} : memref<8x256xbf16, #tpu.memory_space<vmem>>, vector<8x256xbf16>,
    } else {
    }
    return
  }
  func.func @transform_0(%arg0: i32, %arg1: i32, %arg2: i32) -> (i32, i32) {
    %c0_i32 = arith.constant 0 : i32
    return %arg0, %arg2 : i32, i32
  }
  func.func @transform_1(%arg0: i32, %arg1: i32, %arg2: i32) -> (i32, i32) {
    %c0_i32 = arith.constant 0 : i32
    return %arg2, %arg1 : i32, i32
  }
  func.func @transform_2(%arg0: i32, %arg1: i32, %arg2: i32) -> (i32, i32) {
    %c0_i32 = arith.constant 0 : i32
    %c0_i32_0 = arith.constant 0 : i32
    return %c0_i32, %arg1 : i32, i32
  }
  func.func @transform_3(%arg0: i32, %arg1: i32, %arg2: i32) -> (i32, i32) {
    %c0_i32 = arith.constant 0 : i32
    %c0_i32_0 = arith.constant 0 : i32
    return %c0_i32, %arg1 : i32, i32
  }
  func.func @transform_4(%arg0: i32, %arg1: i32, %arg2: i32) -> (i32, i32) {
    %c0_i32 = arith.constant 0 : i32
    return %arg0, %arg1 : i32, i32
  }
}

module attributes {stable_mosaic.version = 11 : i64} {
  func.func @_gemm_bn_kernel(%arg0: i32, %arg1: i32, %arg2: i32, %arg3: memref<8x384xbf16, #tpu.memory_space<vmem>>, %arg4: memref<384x256xbf16, #tpu.memory_space<vmem>>, %arg5: memref<1x256xf32, #tpu.memory_space<vmem>>, %arg6: memref<1x256xf32, #tpu.memory_space<vmem>>, %arg7: memref<8x256xbf16, #tpu.memory_space<vmem>>, %arg8: memref<8x256xf32, #tpu.memory_space<vmem>>) attributes {dimension_semantics = [#tpu.dimension_semantics<parallel>, #tpu.dimension_semantics<parallel>, #tpu.dimension_semantics<arbitrary>], iteration_bounds = array<i64: 1, 1, 6>, scalar_prefetch = 0 : i64, scratch_operands = 1 : i64, tpu.core_type = #tpu.core_type<tc>, window_params = [{transform_indices = @transform_0, window_bounds = array<i64: 8, 384>}, {transform_indices = @transform_1, window_bounds = array<i64: 384, 256>}, {transform_indices = @transform_2, window_bounds = array<i64: 1, 256>}, {transform_indices = @transform_3, window_bounds = array<i64: 1, 256>}, {transform_indices = @transform_4, window_bounds = array<i64: 8, 256>}]} {
    %c0_i32 = arith.constant 0 : i32
    %0 = arith.cmpi eq, %arg2, %c0_i32 : i32
    %1 = arith.extui %0 : i1 to i32
    %c0_i32_0 = arith.constant 0 : i32
    %2 = arith.cmpi ne, %1, %c0_i32_0 : i32
    scf.if %2 {
      %cst_9 = arith.constant 0.000000e+00 : f32
      %12 = vector.broadcast %cst_9 : f32 to vector<8x256xf32>
      %c0_10 = arith.constant 0 : index
      %c0_11 = arith.constant 0 : index
      %13 = vector.load %arg8[%c0_10, %c0_11] : memref<8x256xf32, #tpu.memory_space<vmem>>, vector<8x256xf32>
      tpu.vector_store %arg8[%c0_10, %c0_11], %12 {strides = array<i32>} : memref<8x256xf32, #tpu.memory_space<vmem>>, vector<8x256xf32>,
    } else {
    }
    %c0 = arith.constant 0 : index
    %c0_1 = arith.constant 0 : index
    %3 = vector.load %arg8[%c0, %c0_1] : memref<8x256xf32, #tpu.memory_space<vmem>>, vector<8x256xf32>
    %c0_2 = arith.constant 0 : index
    %c0_3 = arith.constant 0 : index
    %4 = vector.load %arg3[%c0_2, %c0_3] : memref<8x384xbf16, #tpu.memory_space<vmem>>, vector<8x384xbf16>
    %c0_4 = arith.constant 0 : index
    %c0_5 = arith.constant 0 : index
    %5 = vector.load %arg4[%c0_4, %c0_5] : memref<384x256xbf16, #tpu.memory_space<vmem>>, vector<384x256xbf16>
    %cst = arith.constant dense<0.000000e+00> : vector<8x256xf32>
    %6 = tpu.matmul %4, %5, %cst {dimension_numbers = #tpu.dot_dimension_numbers<[1], [0], [0], [1], [0, 0, 1, 1], [], []>} : vector<8x384xbf16>, vector<384x256xbf16>, vector<8x256xf32> -> vector<8x256xf32>
    %7 = arith.addf %3, %6 : vector<8x256xf32>
    %c0_6 = arith.constant 0 : index
    %c0_7 = arith.constant 0 : index
    %8 = vector.load %arg8[%c0_6, %c0_7] : memref<8x256xf32, #tpu.memory_space<vmem>>, vector<8x256xf32>
    tpu.vector_store %arg8[%c0_6, %c0_7], %7 {strides = array<i32>} : memref<8x256xf32, #tpu.memory_space<vmem>>, vector<8x256xf32>,
    %c5_i32 = arith.constant 5 : i32
    %9 = arith.cmpi eq, %arg2, %c5_i32 : i32
    %10 = arith.extui %9 : i1 to i32
    %c0_i32_8 = arith.constant 0 : i32
    %11 = arith.cmpi ne, %10, %c0_i32_8 : i32
    scf.if %11 {
      %c0_9 = arith.constant 0 : index
      %c0_10 = arith.constant 0 : index
      %12 = vector.load %arg8[%c0_9, %c0_10] : memref<8x256xf32, #tpu.memory_space<vmem>>, vector<8x256xf32>
      %c0_11 = arith.constant 0 : index
      %c0_12 = arith.constant 0 : index
      %13 = vector.load %arg5[%c0_11, %c0_12] : memref<1x256xf32, #tpu.memory_space<vmem>>, vector<1x256xf32>
      %14 = vector.broadcast %13 : vector<1x256xf32> to vector<8x256xf32>
      %15 = arith.mulf %12, %14 : vector<8x256xf32>
      %c0_13 = arith.constant 0 : index
      %c0_14 = arith.constant 0 : index
      %16 = vector.load %arg6[%c0_13, %c0_14] : memref<1x256xf32, #tpu.memory_space<vmem>>, vector<1x256xf32>
      %17 = vector.broadcast %16 : vector<1x256xf32> to vector<8x256xf32>
      %18 = arith.addf %15, %17 : vector<8x256xf32>
      %cst_15 = arith.constant 0.000000e+00 : f32
      %19 = vector.broadcast %cst_15 : f32 to vector<8x256xf32>
      %20 = arith.maximumf %18, %19 : vector<8x256xf32>
      %21 = arith.truncf %20 : vector<8x256xf32> to vector<8x256xbf16>
      %c0_16 = arith.constant 0 : index
      %c0_17 = arith.constant 0 : index
      %22 = vector.load %arg7[%c0_16, %c0_17] : memref<8x256xbf16, #tpu.memory_space<vmem>>, vector<8x256xbf16>
      tpu.vector_store %arg7[%c0_16, %c0_17], %21 {strides = array<i32>} : memref<8x256xbf16, #tpu.memory_space<vmem>>, vector<8x256xbf16>,
    } else {
    }
    return
  }
  func.func @transform_0(%arg0: i32, %arg1: i32, %arg2: i32) -> (i32, i32) {
    %c0_i32 = arith.constant 0 : i32
    return %arg0, %arg2 : i32, i32
  }
  func.func @transform_1(%arg0: i32, %arg1: i32, %arg2: i32) -> (i32, i32) {
    %c0_i32 = arith.constant 0 : i32
    return %arg2, %arg1 : i32, i32
  }
  func.func @transform_2(%arg0: i32, %arg1: i32, %arg2: i32) -> (i32, i32) {
    %c0_i32 = arith.constant 0 : i32
    %c0_i32_0 = arith.constant 0 : i32
    return %c0_i32, %arg1 : i32, i32
  }
  func.func @transform_3(%arg0: i32, %arg1: i32, %arg2: i32) -> (i32, i32) {
    %c0_i32 = arith.constant 0 : i32
    %c0_i32_0 = arith.constant 0 : i32
    return %c0_i32, %arg1 : i32, i32
  }
  func.func @transform_4(%arg0: i32, %arg1: i32, %arg2: i32) -> (i32, i32) {
    %c0_i32 = arith.constant 0 : i32
    return %arg0, %arg1 : i32, i32
  }
}

module attributes {stable_mosaic.version = 11 : i64} {
  func.func @_gemm_bn_kernel(%arg0: i32, %arg1: i32, %arg2: i32, %arg3: memref<8x384xbf16, #tpu.memory_space<vmem>>, %arg4: memref<384x256xbf16, #tpu.memory_space<vmem>>, %arg5: memref<1x256xf32, #tpu.memory_space<vmem>>, %arg6: memref<1x256xf32, #tpu.memory_space<vmem>>, %arg7: memref<8x256xbf16, #tpu.memory_space<vmem>>, %arg8: memref<8x256xbf16, #tpu.memory_space<vmem>>, %arg9: memref<8x256xf32, #tpu.memory_space<vmem>>) attributes {dimension_semantics = [#tpu.dimension_semantics<parallel>, #tpu.dimension_semantics<parallel>, #tpu.dimension_semantics<arbitrary>], iteration_bounds = array<i64: 1, 1, 6>, scalar_prefetch = 0 : i64, scratch_operands = 1 : i64, tpu.core_type = #tpu.core_type<tc>, window_params = [{transform_indices = @transform_0, window_bounds = array<i64: 8, 384>}, {transform_indices = @transform_1, window_bounds = array<i64: 384, 256>}, {transform_indices = @transform_2, window_bounds = array<i64: 1, 256>}, {transform_indices = @transform_3, window_bounds = array<i64: 1, 256>}, {transform_indices = @transform_4, window_bounds = array<i64: 8, 256>}, {transform_indices = @transform_5, window_bounds = array<i64: 8, 256>}]} {
    %c0_i32 = arith.constant 0 : i32
    %0 = arith.cmpi eq, %arg2, %c0_i32 : i32
    %1 = arith.extui %0 : i1 to i32
    %c0_i32_0 = arith.constant 0 : i32
    %2 = arith.cmpi ne, %1, %c0_i32_0 : i32
    scf.if %2 {
      %cst_9 = arith.constant 0.000000e+00 : f32
      %12 = vector.broadcast %cst_9 : f32 to vector<8x256xf32>
      %c0_10 = arith.constant 0 : index
      %c0_11 = arith.constant 0 : index
      %13 = vector.load %arg9[%c0_10, %c0_11] : memref<8x256xf32, #tpu.memory_space<vmem>>, vector<8x256xf32>
      tpu.vector_store %arg9[%c0_10, %c0_11], %12 {strides = array<i32>} : memref<8x256xf32, #tpu.memory_space<vmem>>, vector<8x256xf32>,
    } else {
    }
    %c0 = arith.constant 0 : index
    %c0_1 = arith.constant 0 : index
    %3 = vector.load %arg9[%c0, %c0_1] : memref<8x256xf32, #tpu.memory_space<vmem>>, vector<8x256xf32>
    %c0_2 = arith.constant 0 : index
    %c0_3 = arith.constant 0 : index
    %4 = vector.load %arg3[%c0_2, %c0_3] : memref<8x384xbf16, #tpu.memory_space<vmem>>, vector<8x384xbf16>
    %c0_4 = arith.constant 0 : index
    %c0_5 = arith.constant 0 : index
    %5 = vector.load %arg4[%c0_4, %c0_5] : memref<384x256xbf16, #tpu.memory_space<vmem>>, vector<384x256xbf16>
    %cst = arith.constant dense<0.000000e+00> : vector<8x256xf32>
    %6 = tpu.matmul %4, %5, %cst {dimension_numbers = #tpu.dot_dimension_numbers<[1], [0], [0], [1], [0, 0, 1, 1], [], []>} : vector<8x384xbf16>, vector<384x256xbf16>, vector<8x256xf32> -> vector<8x256xf32>
    %7 = arith.addf %3, %6 : vector<8x256xf32>
    %c0_6 = arith.constant 0 : index
    %c0_7 = arith.constant 0 : index
    %8 = vector.load %arg9[%c0_6, %c0_7] : memref<8x256xf32, #tpu.memory_space<vmem>>, vector<8x256xf32>
    tpu.vector_store %arg9[%c0_6, %c0_7], %7 {strides = array<i32>} : memref<8x256xf32, #tpu.memory_space<vmem>>, vector<8x256xf32>,
    %c5_i32 = arith.constant 5 : i32
    %9 = arith.cmpi eq, %arg2, %c5_i32 : i32
    %10 = arith.extui %9 : i1 to i32
    %c0_i32_8 = arith.constant 0 : i32
    %11 = arith.cmpi ne, %10, %c0_i32_8 : i32
    scf.if %11 {
      %c0_9 = arith.constant 0 : index
      %c0_10 = arith.constant 0 : index
      %12 = vector.load %arg9[%c0_9, %c0_10] : memref<8x256xf32, #tpu.memory_space<vmem>>, vector<8x256xf32>
      %c0_11 = arith.constant 0 : index
      %c0_12 = arith.constant 0 : index
      %13 = vector.load %arg5[%c0_11, %c0_12] : memref<1x256xf32, #tpu.memory_space<vmem>>, vector<1x256xf32>
      %14 = vector.broadcast %13 : vector<1x256xf32> to vector<8x256xf32>
      %15 = arith.mulf %12, %14 : vector<8x256xf32>
      %c0_13 = arith.constant 0 : index
      %c0_14 = arith.constant 0 : index
      %16 = vector.load %arg6[%c0_13, %c0_14] : memref<1x256xf32, #tpu.memory_space<vmem>>, vector<1x256xf32>
      %17 = vector.broadcast %16 : vector<1x256xf32> to vector<8x256xf32>
      %18 = arith.addf %15, %17 : vector<8x256xf32>
      %c0_15 = arith.constant 0 : index
      %c0_16 = arith.constant 0 : index
      %19 = vector.load %arg7[%c0_15, %c0_16] : memref<8x256xbf16, #tpu.memory_space<vmem>>, vector<8x256xbf16>
      %20 = arith.extf %19 : vector<8x256xbf16> to vector<8x256xf32>
      %21 = arith.addf %18, %20 : vector<8x256xf32>
      %cst_17 = arith.constant 0.000000e+00 : f32
      %22 = vector.broadcast %cst_17 : f32 to vector<8x256xf32>
      %23 = arith.maximumf %21, %22 : vector<8x256xf32>
      %24 = arith.truncf %23 : vector<8x256xf32> to vector<8x256xbf16>
      %c0_18 = arith.constant 0 : index
      %c0_19 = arith.constant 0 : index
      %25 = vector.load %arg8[%c0_18, %c0_19] : memref<8x256xbf16, #tpu.memory_space<vmem>>, vector<8x256xbf16>
      tpu.vector_store %arg8[%c0_18, %c0_19], %24 {strides = array<i32>} : memref<8x256xbf16, #tpu.memory_space<vmem>>, vector<8x256xbf16>,
    } else {
    }
    return
  }
  func.func @transform_0(%arg0: i32, %arg1: i32, %arg2: i32) -> (i32, i32) {
    %c0_i32 = arith.constant 0 : i32
    return %arg0, %arg2 : i32, i32
  }
  func.func @transform_1(%arg0: i32, %arg1: i32, %arg2: i32) -> (i32, i32) {
    %c0_i32 = arith.constant 0 : i32
    return %arg2, %arg1 : i32, i32
  }
  func.func @transform_2(%arg0: i32, %arg1: i32, %arg2: i32) -> (i32, i32) {
    %c0_i32 = arith.constant 0 : i32
    %c0_i32_0 = arith.constant 0 : i32
    return %c0_i32, %arg1 : i32, i32
  }
  func.func @transform_3(%arg0: i32, %arg1: i32, %arg2: i32) -> (i32, i32) {
    %c0_i32 = arith.constant 0 : i32
    %c0_i32_0 = arith.constant 0 : i32
    return %c0_i32, %arg1 : i32, i32
  }
  func.func @transform_4(%arg0: i32, %arg1: i32, %arg2: i32) -> (i32, i32) {
    %c0_i32 = arith.constant 0 : i32
    return %arg0, %arg1 : i32, i32
  }
  func.func @transform_5(%arg0: i32, %arg1: i32, %arg2: i32) -> (i32, i32) {
    %c0_i32 = arith.constant 0 : i32
    return %arg0, %arg1 : i32, i32
  }
}

module attributes {stable_mosaic.version = 11 : i64} {
  func.func @_gemm_bn_kernel(%arg0: i32, %arg1: i32, %arg2: i32, %arg3: memref<8x128xbf16, #tpu.memory_space<vmem>>, %arg4: memref<128x256xbf16, #tpu.memory_space<vmem>>, %arg5: memref<1x256xf32, #tpu.memory_space<vmem>>, %arg6: memref<1x256xf32, #tpu.memory_space<vmem>>, %arg7: memref<8x256xbf16, #tpu.memory_space<vmem>>, %arg8: memref<8x256xf32, #tpu.memory_space<vmem>>) attributes {dimension_semantics = [#tpu.dimension_semantics<parallel>, #tpu.dimension_semantics<parallel>, #tpu.dimension_semantics<arbitrary>], iteration_bounds = array<i64: 1, 1, 1>, scalar_prefetch = 0 : i64, scratch_operands = 1 : i64, tpu.core_type = #tpu.core_type<tc>, window_params = [{transform_indices = @transform_0, window_bounds = array<i64: 8, 128>}, {transform_indices = @transform_1, window_bounds = array<i64: 128, 256>}, {transform_indices = @transform_2, window_bounds = array<i64: 1, 256>}, {transform_indices = @transform_3, window_bounds = array<i64: 1, 256>}, {transform_indices = @transform_4, window_bounds = array<i64: 8, 256>}]} {
    %c0_i32 = arith.constant 0 : i32
    %0 = arith.cmpi eq, %arg2, %c0_i32 : i32
    %1 = arith.extui %0 : i1 to i32
    %c0_i32_0 = arith.constant 0 : i32
    %2 = arith.cmpi ne, %1, %c0_i32_0 : i32
    scf.if %2 {
      %cst_10 = arith.constant 0.000000e+00 : f32
      %12 = vector.broadcast %cst_10 : f32 to vector<8x256xf32>
      %c0_11 = arith.constant 0 : index
      %c0_12 = arith.constant 0 : index
      %13 = vector.load %arg8[%c0_11, %c0_12] : memref<8x256xf32, #tpu.memory_space<vmem>>, vector<8x256xf32>
      tpu.vector_store %arg8[%c0_11, %c0_12], %12 {strides = array<i32>} : memref<8x256xf32, #tpu.memory_space<vmem>>, vector<8x256xf32>,
    } else {
    }
    %c0 = arith.constant 0 : index
    %c0_1 = arith.constant 0 : index
    %3 = vector.load %arg8[%c0, %c0_1] : memref<8x256xf32, #tpu.memory_space<vmem>>, vector<8x256xf32>
    %c0_2 = arith.constant 0 : index
    %c0_3 = arith.constant 0 : index
    %4 = vector.load %arg3[%c0_2, %c0_3] : memref<8x128xbf16, #tpu.memory_space<vmem>>, vector<8x128xbf16>
    %c0_4 = arith.constant 0 : index
    %c0_5 = arith.constant 0 : index
    %5 = vector.load %arg4[%c0_4, %c0_5] : memref<128x256xbf16, #tpu.memory_space<vmem>>, vector<128x256xbf16>
    %cst = arith.constant dense<0.000000e+00> : vector<8x256xf32>
    %6 = tpu.matmul %4, %5, %cst {dimension_numbers = #tpu.dot_dimension_numbers<[1], [0], [0], [1], [0, 0, 1, 1], [], []>} : vector<8x128xbf16>, vector<128x256xbf16>, vector<8x256xf32> -> vector<8x256xf32>
    %7 = arith.addf %3, %6 : vector<8x256xf32>
    %c0_6 = arith.constant 0 : index
    %c0_7 = arith.constant 0 : index
    %8 = vector.load %arg8[%c0_6, %c0_7] : memref<8x256xf32, #tpu.memory_space<vmem>>, vector<8x256xf32>
    tpu.vector_store %arg8[%c0_6, %c0_7], %7 {strides = array<i32>} : memref<8x256xf32, #tpu.memory_space<vmem>>, vector<8x256xf32>,
    %c0_i32_8 = arith.constant 0 : i32
    %9 = arith.cmpi eq, %arg2, %c0_i32_8 : i32
    %10 = arith.extui %9 : i1 to i32
    %c0_i32_9 = arith.constant 0 : i32
    %11 = arith.cmpi ne, %10, %c0_i32_9 : i32
    scf.if %11 {
      %c0_10 = arith.constant 0 : index
      %c0_11 = arith.constant 0 : index
      %12 = vector.load %arg8[%c0_10, %c0_11] : memref<8x256xf32, #tpu.memory_space<vmem>>, vector<8x256xf32>
      %c0_12 = arith.constant 0 : index
      %c0_13 = arith.constant 0 : index
      %13 = vector.load %arg5[%c0_12, %c0_13] : memref<1x256xf32, #tpu.memory_space<vmem>>, vector<1x256xf32>
      %14 = vector.broadcast %13 : vector<1x256xf32> to vector<8x256xf32>
      %15 = arith.mulf %12, %14 : vector<8x256xf32>
      %c0_14 = arith.constant 0 : index
      %c0_15 = arith.constant 0 : index
      %16 = vector.load %arg6[%c0_14, %c0_15] : memref<1x256xf32, #tpu.memory_space<vmem>>, vector<1x256xf32>
      %17 = vector.broadcast %16 : vector<1x256xf32> to vector<8x256xf32>
      %18 = arith.addf %15, %17 : vector<8x256xf32>
      %19 = arith.truncf %18 : vector<8x256xf32> to vector<8x256xbf16>
      %c0_16 = arith.constant 0 : index
      %c0_17 = arith.constant 0 : index
      %20 = vector.load %arg7[%c0_16, %c0_17] : memref<8x256xbf16, #tpu.memory_space<vmem>>, vector<8x256xbf16>
      tpu.vector_store %arg7[%c0_16, %c0_17], %19 {strides = array<i32>} : memref<8x256xbf16, #tpu.memory_space<vmem>>, vector<8x256xbf16>,
    } else {
    }
    return
  }
  func.func @transform_0(%arg0: i32, %arg1: i32, %arg2: i32) -> (i32, i32) {
    %c0_i32 = arith.constant 0 : i32
    return %arg0, %arg2 : i32, i32
  }
  func.func @transform_1(%arg0: i32, %arg1: i32, %arg2: i32) -> (i32, i32) {
    %c0_i32 = arith.constant 0 : i32
    return %arg2, %arg1 : i32, i32
  }
  func.func @transform_2(%arg0: i32, %arg1: i32, %arg2: i32) -> (i32, i32) {
    %c0_i32 = arith.constant 0 : i32
    %c0_i32_0 = arith.constant 0 : i32
    return %c0_i32, %arg1 : i32, i32
  }
  func.func @transform_3(%arg0: i32, %arg1: i32, %arg2: i32) -> (i32, i32) {
    %c0_i32 = arith.constant 0 : i32
    %c0_i32_0 = arith.constant 0 : i32
    return %c0_i32, %arg1 : i32, i32
  }
  func.func @transform_4(%arg0: i32, %arg1: i32, %arg2: i32) -> (i32, i32) {
    %c0_i32 = arith.constant 0 : i32
    return %arg0, %arg1 : i32, i32
  }
}

module attributes {stable_mosaic.version = 11 : i64} {
  func.func @_gemm_bn_kernel(%arg0: i32, %arg1: i32, %arg2: i32, %arg3: memref<2x384xbf16, #tpu.memory_space<vmem>>, %arg4: memref<384x256xbf16, #tpu.memory_space<vmem>>, %arg5: memref<1x256xf32, #tpu.memory_space<vmem>>, %arg6: memref<1x256xf32, #tpu.memory_space<vmem>>, %arg7: memref<2x256xbf16, #tpu.memory_space<vmem>>, %arg8: memref<2x256xf32, #tpu.memory_space<vmem>>) attributes {dimension_semantics = [#tpu.dimension_semantics<parallel>, #tpu.dimension_semantics<parallel>, #tpu.dimension_semantics<arbitrary>], iteration_bounds = array<i64: 1, 2, 6>, scalar_prefetch = 0 : i64, scratch_operands = 1 : i64, tpu.core_type = #tpu.core_type<tc>, window_params = [{transform_indices = @transform_0, window_bounds = array<i64: 2, 384>}, {transform_indices = @transform_1, window_bounds = array<i64: 384, 256>}, {transform_indices = @transform_2, window_bounds = array<i64: 1, 256>}, {transform_indices = @transform_3, window_bounds = array<i64: 1, 256>}, {transform_indices = @transform_4, window_bounds = array<i64: 2, 256>}]} {
    %c0_i32 = arith.constant 0 : i32
    %0 = arith.cmpi eq, %arg2, %c0_i32 : i32
    %1 = arith.extui %0 : i1 to i32
    %c0_i32_0 = arith.constant 0 : i32
    %2 = arith.cmpi ne, %1, %c0_i32_0 : i32
    scf.if %2 {
      %cst_9 = arith.constant 0.000000e+00 : f32
      %12 = vector.broadcast %cst_9 : f32 to vector<2x256xf32>
      %c0_10 = arith.constant 0 : index
      %c0_11 = arith.constant 0 : index
      %13 = vector.load %arg8[%c0_10, %c0_11] : memref<2x256xf32, #tpu.memory_space<vmem>>, vector<2x256xf32>
      tpu.vector_store %arg8[%c0_10, %c0_11], %12 {strides = array<i32>} : memref<2x256xf32, #tpu.memory_space<vmem>>, vector<2x256xf32>,
    } else {
    }
    %c0 = arith.constant 0 : index
    %c0_1 = arith.constant 0 : index
    %3 = vector.load %arg8[%c0, %c0_1] : memref<2x256xf32, #tpu.memory_space<vmem>>, vector<2x256xf32>
    %c0_2 = arith.constant 0 : index
    %c0_3 = arith.constant 0 : index
    %4 = vector.load %arg3[%c0_2, %c0_3] : memref<2x384xbf16, #tpu.memory_space<vmem>>, vector<2x384xbf16>
    %c0_4 = arith.constant 0 : index
    %c0_5 = arith.constant 0 : index
    %5 = vector.load %arg4[%c0_4, %c0_5] : memref<384x256xbf16, #tpu.memory_space<vmem>>, vector<384x256xbf16>
    %cst = arith.constant dense<0.000000e+00> : vector<2x256xf32>
    %6 = tpu.matmul %4, %5, %cst {dimension_numbers = #tpu.dot_dimension_numbers<[1], [0], [0], [1], [0, 0, 1, 1], [], []>} : vector<2x384xbf16>, vector<384x256xbf16>, vector<2x256xf32> -> vector<2x256xf32>
    %7 = arith.addf %3, %6 : vector<2x256xf32>
    %c0_6 = arith.constant 0 : index
    %c0_7 = arith.constant 0 : index
    %8 = vector.load %arg8[%c0_6, %c0_7] : memref<2x256xf32, #tpu.memory_space<vmem>>, vector<2x256xf32>
    tpu.vector_store %arg8[%c0_6, %c0_7], %7 {strides = array<i32>} : memref<2x256xf32, #tpu.memory_space<vmem>>, vector<2x256xf32>,
    %c5_i32 = arith.constant 5 : i32
    %9 = arith.cmpi eq, %arg2, %c5_i32 : i32
    %10 = arith.extui %9 : i1 to i32
    %c0_i32_8 = arith.constant 0 : i32
    %11 = arith.cmpi ne, %10, %c0_i32_8 : i32
    scf.if %11 {
      %c0_9 = arith.constant 0 : index
      %c0_10 = arith.constant 0 : index
      %12 = vector.load %arg8[%c0_9, %c0_10] : memref<2x256xf32, #tpu.memory_space<vmem>>, vector<2x256xf32>
      %c0_11 = arith.constant 0 : index
      %c0_12 = arith.constant 0 : index
      %13 = vector.load %arg5[%c0_11, %c0_12] : memref<1x256xf32, #tpu.memory_space<vmem>>, vector<1x256xf32>
      %14 = vector.broadcast %13 : vector<1x256xf32> to vector<2x256xf32>
      %15 = arith.mulf %12, %14 : vector<2x256xf32>
      %c0_13 = arith.constant 0 : index
      %c0_14 = arith.constant 0 : index
      %16 = vector.load %arg6[%c0_13, %c0_14] : memref<1x256xf32, #tpu.memory_space<vmem>>, vector<1x256xf32>
      %17 = vector.broadcast %16 : vector<1x256xf32> to vector<2x256xf32>
      %18 = arith.addf %15, %17 : vector<2x256xf32>
      %cst_15 = arith.constant 0.000000e+00 : f32
      %19 = vector.broadcast %cst_15 : f32 to vector<2x256xf32>
      %20 = arith.maximumf %18, %19 : vector<2x256xf32>
      %21 = arith.truncf %20 : vector<2x256xf32> to vector<2x256xbf16>
      %c0_16 = arith.constant 0 : index
      %c0_17 = arith.constant 0 : index
      %22 = vector.load %arg7[%c0_16, %c0_17] : memref<2x256xbf16, #tpu.memory_space<vmem>>, vector<2x256xbf16>
      tpu.vector_store %arg7[%c0_16, %c0_17], %21 {strides = array<i32>} : memref<2x256xbf16, #tpu.memory_space<vmem>>, vector<2x256xbf16>,
    } else {
    }
    return
  }
  func.func @transform_0(%arg0: i32, %arg1: i32, %arg2: i32) -> (i32, i32) {
    %c0_i32 = arith.constant 0 : i32
    return %arg0, %arg2 : i32, i32
  }
  func.func @transform_1(%arg0: i32, %arg1: i32, %arg2: i32) -> (i32, i32) {
    %c0_i32 = arith.constant 0 : i32
    return %arg2, %arg1 : i32, i32
  }
  func.func @transform_2(%arg0: i32, %arg1: i32, %arg2: i32) -> (i32, i32) {
    %c0_i32 = arith.constant 0 : i32
    %c0_i32_0 = arith.constant 0 : i32
    return %c0_i32, %arg1 : i32, i32
  }
  func.func @transform_3(%arg0: i32, %arg1: i32, %arg2: i32) -> (i32, i32) {
    %c0_i32 = arith.constant 0 : i32
    %c0_i32_0 = arith.constant 0 : i32
    return %c0_i32, %arg1 : i32, i32
  }
  func.func @transform_4(%arg0: i32, %arg1: i32, %arg2: i32) -> (i32, i32) {
    %c0_i32 = arith.constant 0 : i32
    return %arg0, %arg1 : i32, i32
  }
}

module attributes {stable_mosaic.version = 11 : i64} {
  func.func @_gemm_bn_kernel(%arg0: i32, %arg1: i32, %arg2: i32, %arg3: memref<2x256xbf16, #tpu.memory_space<vmem>>, %arg4: memref<256x256xbf16, #tpu.memory_space<vmem>>, %arg5: memref<1x256xf32, #tpu.memory_space<vmem>>, %arg6: memref<1x256xf32, #tpu.memory_space<vmem>>, %arg7: memref<2x256xbf16, #tpu.memory_space<vmem>>, %arg8: memref<2x256xf32, #tpu.memory_space<vmem>>) attributes {dimension_semantics = [#tpu.dimension_semantics<parallel>, #tpu.dimension_semantics<parallel>, #tpu.dimension_semantics<arbitrary>], iteration_bounds = array<i64: 1, 2, 1>, scalar_prefetch = 0 : i64, scratch_operands = 1 : i64, tpu.core_type = #tpu.core_type<tc>, window_params = [{transform_indices = @transform_0, window_bounds = array<i64: 2, 256>}, {transform_indices = @transform_1, window_bounds = array<i64: 256, 256>}, {transform_indices = @transform_2, window_bounds = array<i64: 1, 256>}, {transform_indices = @transform_3, window_bounds = array<i64: 1, 256>}, {transform_indices = @transform_4, window_bounds = array<i64: 2, 256>}]} {
    %c0_i32 = arith.constant 0 : i32
    %0 = arith.cmpi eq, %arg2, %c0_i32 : i32
    %1 = arith.extui %0 : i1 to i32
    %c0_i32_0 = arith.constant 0 : i32
    %2 = arith.cmpi ne, %1, %c0_i32_0 : i32
    scf.if %2 {
      %cst_10 = arith.constant 0.000000e+00 : f32
      %12 = vector.broadcast %cst_10 : f32 to vector<2x256xf32>
      %c0_11 = arith.constant 0 : index
      %c0_12 = arith.constant 0 : index
      %13 = vector.load %arg8[%c0_11, %c0_12] : memref<2x256xf32, #tpu.memory_space<vmem>>, vector<2x256xf32>
      tpu.vector_store %arg8[%c0_11, %c0_12], %12 {strides = array<i32>} : memref<2x256xf32, #tpu.memory_space<vmem>>, vector<2x256xf32>,
    } else {
    }
    %c0 = arith.constant 0 : index
    %c0_1 = arith.constant 0 : index
    %3 = vector.load %arg8[%c0, %c0_1] : memref<2x256xf32, #tpu.memory_space<vmem>>, vector<2x256xf32>
    %c0_2 = arith.constant 0 : index
    %c0_3 = arith.constant 0 : index
    %4 = vector.load %arg3[%c0_2, %c0_3] : memref<2x256xbf16, #tpu.memory_space<vmem>>, vector<2x256xbf16>
    %c0_4 = arith.constant 0 : index
    %c0_5 = arith.constant 0 : index
    %5 = vector.load %arg4[%c0_4, %c0_5] : memref<256x256xbf16, #tpu.memory_space<vmem>>, vector<256x256xbf16>
    %cst = arith.constant dense<0.000000e+00> : vector<2x256xf32>
    %6 = tpu.matmul %4, %5, %cst {dimension_numbers = #tpu.dot_dimension_numbers<[1], [0], [0], [1], [0, 0, 1, 1], [], []>} : vector<2x256xbf16>, vector<256x256xbf16>, vector<2x256xf32> -> vector<2x256xf32>
    %7 = arith.addf %3, %6 : vector<2x256xf32>
    %c0_6 = arith.constant 0 : index
    %c0_7 = arith.constant 0 : index
    %8 = vector.load %arg8[%c0_6, %c0_7] : memref<2x256xf32, #tpu.memory_space<vmem>>, vector<2x256xf32>
    tpu.vector_store %arg8[%c0_6, %c0_7], %7 {strides = array<i32>} : memref<2x256xf32, #tpu.memory_space<vmem>>, vector<2x256xf32>,
    %c0_i32_8 = arith.constant 0 : i32
    %9 = arith.cmpi eq, %arg2, %c0_i32_8 : i32
    %10 = arith.extui %9 : i1 to i32
    %c0_i32_9 = arith.constant 0 : i32
    %11 = arith.cmpi ne, %10, %c0_i32_9 : i32
    scf.if %11 {
      %c0_10 = arith.constant 0 : index
      %c0_11 = arith.constant 0 : index
      %12 = vector.load %arg8[%c0_10, %c0_11] : memref<2x256xf32, #tpu.memory_space<vmem>>, vector<2x256xf32>
      %c0_12 = arith.constant 0 : index
      %c0_13 = arith.constant 0 : index
      %13 = vector.load %arg5[%c0_12, %c0_13] : memref<1x256xf32, #tpu.memory_space<vmem>>, vector<1x256xf32>
      %14 = vector.broadcast %13 : vector<1x256xf32> to vector<2x256xf32>
      %15 = arith.mulf %12, %14 : vector<2x256xf32>
      %c0_14 = arith.constant 0 : index
      %c0_15 = arith.constant 0 : index
      %16 = vector.load %arg6[%c0_14, %c0_15] : memref<1x256xf32, #tpu.memory_space<vmem>>, vector<1x256xf32>
      %17 = vector.broadcast %16 : vector<1x256xf32> to vector<2x256xf32>
      %18 = arith.addf %15, %17 : vector<2x256xf32>
      %19 = arith.truncf %18 : vector<2x256xf32> to vector<2x256xbf16>
      %c0_16 = arith.constant 0 : index
      %c0_17 = arith.constant 0 : index
      %20 = vector.load %arg7[%c0_16, %c0_17] : memref<2x256xbf16, #tpu.memory_space<vmem>>, vector<2x256xbf16>
      tpu.vector_store %arg7[%c0_16, %c0_17], %19 {strides = array<i32>} : memref<2x256xbf16, #tpu.memory_space<vmem>>, vector<2x256xbf16>,
    } else {
    }
    return
  }
  func.func @transform_0(%arg0: i32, %arg1: i32, %arg2: i32) -> (i32, i32) {
    %c0_i32 = arith.constant 0 : i32
    return %arg0, %arg2 : i32, i32
  }
  func.func @transform_1(%arg0: i32, %arg1: i32, %arg2: i32) -> (i32, i32) {
    %c0_i32 = arith.constant 0 : i32
    return %arg2, %arg1 : i32, i32
  }
  func.func @transform_2(%arg0: i32, %arg1: i32, %arg2: i32) -> (i32, i32) {
    %c0_i32 = arith.constant 0 : i32
    %c0_i32_0 = arith.constant 0 : i32
    return %c0_i32, %arg1 : i32, i32
  }
  func.func @transform_3(%arg0: i32, %arg1: i32, %arg2: i32) -> (i32, i32) {
    %c0_i32 = arith.constant 0 : i32
    %c0_i32_0 = arith.constant 0 : i32
    return %c0_i32, %arg1 : i32, i32
  }
  func.func @transform_4(%arg0: i32, %arg1: i32, %arg2: i32) -> (i32, i32) {
    %c0_i32 = arith.constant 0 : i32
    return %arg0, %arg1 : i32, i32
  }
}

module attributes {stable_mosaic.version = 11 : i64} {
  func.func @_gemm_bn_kernel(%arg0: i32, %arg1: i32, %arg2: i32, %arg3: memref<2x512xbf16, #tpu.memory_space<vmem>>, %arg4: memref<512x256xbf16, #tpu.memory_space<vmem>>, %arg5: memref<1x256xf32, #tpu.memory_space<vmem>>, %arg6: memref<1x256xf32, #tpu.memory_space<vmem>>, %arg7: memref<2x256xbf16, #tpu.memory_space<vmem>>, %arg8: memref<2x256xbf16, #tpu.memory_space<vmem>>, %arg9: memref<2x256xf32, #tpu.memory_space<vmem>>) attributes {dimension_semantics = [#tpu.dimension_semantics<parallel>, #tpu.dimension_semantics<parallel>, #tpu.dimension_semantics<arbitrary>], iteration_bounds = array<i64: 1, 2, 9>, scalar_prefetch = 0 : i64, scratch_operands = 1 : i64, tpu.core_type = #tpu.core_type<tc>, window_params = [{transform_indices = @transform_0, window_bounds = array<i64: 2, 512>}, {transform_indices = @transform_1, window_bounds = array<i64: 512, 256>}, {transform_indices = @transform_2, window_bounds = array<i64: 1, 256>}, {transform_indices = @transform_3, window_bounds = array<i64: 1, 256>}, {transform_indices = @transform_4, window_bounds = array<i64: 2, 256>}, {transform_indices = @transform_5, window_bounds = array<i64: 2, 256>}]} {
    %c0_i32 = arith.constant 0 : i32
    %0 = arith.cmpi eq, %arg2, %c0_i32 : i32
    %1 = arith.extui %0 : i1 to i32
    %c0_i32_0 = arith.constant 0 : i32
    %2 = arith.cmpi ne, %1, %c0_i32_0 : i32
    scf.if %2 {
      %cst_9 = arith.constant 0.000000e+00 : f32
      %12 = vector.broadcast %cst_9 : f32 to vector<2x256xf32>
      %c0_10 = arith.constant 0 : index
      %c0_11 = arith.constant 0 : index
      %13 = vector.load %arg9[%c0_10, %c0_11] : memref<2x256xf32, #tpu.memory_space<vmem>>, vector<2x256xf32>
      tpu.vector_store %arg9[%c0_10, %c0_11], %12 {strides = array<i32>} : memref<2x256xf32, #tpu.memory_space<vmem>>, vector<2x256xf32>,
    } else {
    }
    %c0 = arith.constant 0 : index
    %c0_1 = arith.constant 0 : index
    %3 = vector.load %arg9[%c0, %c0_1] : memref<2x256xf32, #tpu.memory_space<vmem>>, vector<2x256xf32>
    %c0_2 = arith.constant 0 : index
    %c0_3 = arith.constant 0 : index
    %4 = vector.load %arg3[%c0_2, %c0_3] : memref<2x512xbf16, #tpu.memory_space<vmem>>, vector<2x512xbf16>
    %c0_4 = arith.constant 0 : index
    %c0_5 = arith.constant 0 : index
    %5 = vector.load %arg4[%c0_4, %c0_5] : memref<512x256xbf16, #tpu.memory_space<vmem>>, vector<512x256xbf16>
    %cst = arith.constant dense<0.000000e+00> : vector<2x256xf32>
    %6 = tpu.matmul %4, %5, %cst {dimension_numbers = #tpu.dot_dimension_numbers<[1], [0], [0], [1], [0, 0, 1, 1], [], []>} : vector<2x512xbf16>, vector<512x256xbf16>, vector<2x256xf32> -> vector<2x256xf32>
    %7 = arith.addf %3, %6 : vector<2x256xf32>
    %c0_6 = arith.constant 0 : index
    %c0_7 = arith.constant 0 : index
    %8 = vector.load %arg9[%c0_6, %c0_7] : memref<2x256xf32, #tpu.memory_space<vmem>>, vector<2x256xf32>
    tpu.vector_store %arg9[%c0_6, %c0_7], %7 {strides = array<i32>} : memref<2x256xf32, #tpu.memory_space<vmem>>, vector<2x256xf32>,
    %c8_i32 = arith.constant 8 : i32
    %9 = arith.cmpi eq, %arg2, %c8_i32 : i32
    %10 = arith.extui %9 : i1 to i32
    %c0_i32_8 = arith.constant 0 : i32
    %11 = arith.cmpi ne, %10, %c0_i32_8 : i32
    scf.if %11 {
      %c0_9 = arith.constant 0 : index
      %c0_10 = arith.constant 0 : index
      %12 = vector.load %arg9[%c0_9, %c0_10] : memref<2x256xf32, #tpu.memory_space<vmem>>, vector<2x256xf32>
      %c0_11 = arith.constant 0 : index
      %c0_12 = arith.constant 0 : index
      %13 = vector.load %arg5[%c0_11, %c0_12] : memref<1x256xf32, #tpu.memory_space<vmem>>, vector<1x256xf32>
      %14 = vector.broadcast %13 : vector<1x256xf32> to vector<2x256xf32>
      %15 = arith.mulf %12, %14 : vector<2x256xf32>
      %c0_13 = arith.constant 0 : index
      %c0_14 = arith.constant 0 : index
      %16 = vector.load %arg6[%c0_13, %c0_14] : memref<1x256xf32, #tpu.memory_space<vmem>>, vector<1x256xf32>
      %17 = vector.broadcast %16 : vector<1x256xf32> to vector<2x256xf32>
      %18 = arith.addf %15, %17 : vector<2x256xf32>
      %c0_15 = arith.constant 0 : index
      %c0_16 = arith.constant 0 : index
      %19 = vector.load %arg7[%c0_15, %c0_16] : memref<2x256xbf16, #tpu.memory_space<vmem>>, vector<2x256xbf16>
      %20 = arith.extf %19 : vector<2x256xbf16> to vector<2x256xf32>
      %21 = arith.addf %18, %20 : vector<2x256xf32>
      %cst_17 = arith.constant 0.000000e+00 : f32
      %22 = vector.broadcast %cst_17 : f32 to vector<2x256xf32>
      %23 = arith.maximumf %21, %22 : vector<2x256xf32>
      %24 = arith.truncf %23 : vector<2x256xf32> to vector<2x256xbf16>
      %c0_18 = arith.constant 0 : index
      %c0_19 = arith.constant 0 : index
      %25 = vector.load %arg8[%c0_18, %c0_19] : memref<2x256xbf16, #tpu.memory_space<vmem>>, vector<2x256xbf16>
      tpu.vector_store %arg8[%c0_18, %c0_19], %24 {strides = array<i32>} : memref<2x256xbf16, #tpu.memory_space<vmem>>, vector<2x256xbf16>,
    } else {
    }
    return
  }
  func.func @transform_0(%arg0: i32, %arg1: i32, %arg2: i32) -> (i32, i32) {
    %c0_i32 = arith.constant 0 : i32
    return %arg0, %arg2 : i32, i32
  }
  func.func @transform_1(%arg0: i32, %arg1: i32, %arg2: i32) -> (i32, i32) {
    %c0_i32 = arith.constant 0 : i32
    return %arg2, %arg1 : i32, i32
  }
  func.func @transform_2(%arg0: i32, %arg1: i32, %arg2: i32) -> (i32, i32) {
    %c0_i32 = arith.constant 0 : i32
    %c0_i32_0 = arith.constant 0 : i32
    return %c0_i32, %arg1 : i32, i32
  }
  func.func @transform_3(%arg0: i32, %arg1: i32, %arg2: i32) -> (i32, i32) {
    %c0_i32 = arith.constant 0 : i32
    %c0_i32_0 = arith.constant 0 : i32
    return %c0_i32, %arg1 : i32, i32
  }
  func.func @transform_4(%arg0: i32, %arg1: i32, %arg2: i32) -> (i32, i32) {
    %c0_i32 = arith.constant 0 : i32
    return %arg0, %arg1 : i32, i32
  }
  func.func @transform_5(%arg0: i32, %arg1: i32, %arg2: i32) -> (i32, i32) {
    %c0_i32 = arith.constant 0 : i32
    return %arg0, %arg1 : i32, i32
  }
}

module attributes {stable_mosaic.version = 11 : i64} {
  func.func @_gemm_bn_kernel(%arg0: i32, %arg1: i32, %arg2: i32, %arg3: memref<2x512xbf16, #tpu.memory_space<vmem>>, %arg4: memref<512x256xbf16, #tpu.memory_space<vmem>>, %arg5: memref<1x256xf32, #tpu.memory_space<vmem>>, %arg6: memref<1x256xf32, #tpu.memory_space<vmem>>, %arg7: memref<2x256xbf16, #tpu.memory_space<vmem>>, %arg8: memref<2x256xf32, #tpu.memory_space<vmem>>) attributes {dimension_semantics = [#tpu.dimension_semantics<parallel>, #tpu.dimension_semantics<parallel>, #tpu.dimension_semantics<arbitrary>], iteration_bounds = array<i64: 1, 2, 9>, scalar_prefetch = 0 : i64, scratch_operands = 1 : i64, tpu.core_type = #tpu.core_type<tc>, window_params = [{transform_indices = @transform_0, window_bounds = array<i64: 2, 512>}, {transform_indices = @transform_1, window_bounds = array<i64: 512, 256>}, {transform_indices = @transform_2, window_bounds = array<i64: 1, 256>}, {transform_indices = @transform_3, window_bounds = array<i64: 1, 256>}, {transform_indices = @transform_4, window_bounds = array<i64: 2, 256>}]} {
    %c0_i32 = arith.constant 0 : i32
    %0 = arith.cmpi eq, %arg2, %c0_i32 : i32
    %1 = arith.extui %0 : i1 to i32
    %c0_i32_0 = arith.constant 0 : i32
    %2 = arith.cmpi ne, %1, %c0_i32_0 : i32
    scf.if %2 {
      %cst_9 = arith.constant 0.000000e+00 : f32
      %12 = vector.broadcast %cst_9 : f32 to vector<2x256xf32>
      %c0_10 = arith.constant 0 : index
      %c0_11 = arith.constant 0 : index
      %13 = vector.load %arg8[%c0_10, %c0_11] : memref<2x256xf32, #tpu.memory_space<vmem>>, vector<2x256xf32>
      tpu.vector_store %arg8[%c0_10, %c0_11], %12 {strides = array<i32>} : memref<2x256xf32, #tpu.memory_space<vmem>>, vector<2x256xf32>,
    } else {
    }
    %c0 = arith.constant 0 : index
    %c0_1 = arith.constant 0 : index
    %3 = vector.load %arg8[%c0, %c0_1] : memref<2x256xf32, #tpu.memory_space<vmem>>, vector<2x256xf32>
    %c0_2 = arith.constant 0 : index
    %c0_3 = arith.constant 0 : index
    %4 = vector.load %arg3[%c0_2, %c0_3] : memref<2x512xbf16, #tpu.memory_space<vmem>>, vector<2x512xbf16>
    %c0_4 = arith.constant 0 : index
    %c0_5 = arith.constant 0 : index
    %5 = vector.load %arg4[%c0_4, %c0_5] : memref<512x256xbf16, #tpu.memory_space<vmem>>, vector<512x256xbf16>
    %cst = arith.constant dense<0.000000e+00> : vector<2x256xf32>
    %6 = tpu.matmul %4, %5, %cst {dimension_numbers = #tpu.dot_dimension_numbers<[1], [0], [0], [1], [0, 0, 1, 1], [], []>} : vector<2x512xbf16>, vector<512x256xbf16>, vector<2x256xf32> -> vector<2x256xf32>
    %7 = arith.addf %3, %6 : vector<2x256xf32>
    %c0_6 = arith.constant 0 : index
    %c0_7 = arith.constant 0 : index
    %8 = vector.load %arg8[%c0_6, %c0_7] : memref<2x256xf32, #tpu.memory_space<vmem>>, vector<2x256xf32>
    tpu.vector_store %arg8[%c0_6, %c0_7], %7 {strides = array<i32>} : memref<2x256xf32, #tpu.memory_space<vmem>>, vector<2x256xf32>,
    %c8_i32 = arith.constant 8 : i32
    %9 = arith.cmpi eq, %arg2, %c8_i32 : i32
    %10 = arith.extui %9 : i1 to i32
    %c0_i32_8 = arith.constant 0 : i32
    %11 = arith.cmpi ne, %10, %c0_i32_8 : i32
    scf.if %11 {
      %c0_9 = arith.constant 0 : index
      %c0_10 = arith.constant 0 : index
      %12 = vector.load %arg8[%c0_9, %c0_10] : memref<2x256xf32, #tpu.memory_space<vmem>>, vector<2x256xf32>
      %c0_11 = arith.constant 0 : index
      %c0_12 = arith.constant 0 : index
      %13 = vector.load %arg5[%c0_11, %c0_12] : memref<1x256xf32, #tpu.memory_space<vmem>>, vector<1x256xf32>
      %14 = vector.broadcast %13 : vector<1x256xf32> to vector<2x256xf32>
      %15 = arith.mulf %12, %14 : vector<2x256xf32>
      %c0_13 = arith.constant 0 : index
      %c0_14 = arith.constant 0 : index
      %16 = vector.load %arg6[%c0_13, %c0_14] : memref<1x256xf32, #tpu.memory_space<vmem>>, vector<1x256xf32>
      %17 = vector.broadcast %16 : vector<1x256xf32> to vector<2x256xf32>
      %18 = arith.addf %15, %17 : vector<2x256xf32>
      %cst_15 = arith.constant 0.000000e+00 : f32
      %19 = vector.broadcast %cst_15 : f32 to vector<2x256xf32>
      %20 = arith.maximumf %18, %19 : vector<2x256xf32>
      %21 = arith.truncf %20 : vector<2x256xf32> to vector<2x256xbf16>
      %c0_16 = arith.constant 0 : index
      %c0_17 = arith.constant 0 : index
      %22 = vector.load %arg7[%c0_16, %c0_17] : memref<2x256xbf16, #tpu.memory_space<vmem>>, vector<2x256xbf16>
      tpu.vector_store %arg7[%c0_16, %c0_17], %21 {strides = array<i32>} : memref<2x256xbf16, #tpu.memory_space<vmem>>, vector<2x256xbf16>,
    } else {
    }
    return
  }
  func.func @transform_0(%arg0: i32, %arg1: i32, %arg2: i32) -> (i32, i32) {
    %c0_i32 = arith.constant 0 : i32
    return %arg0, %arg2 : i32, i32
  }
  func.func @transform_1(%arg0: i32, %arg1: i32, %arg2: i32) -> (i32, i32) {
    %c0_i32 = arith.constant 0 : i32
    return %arg2, %arg1 : i32, i32
  }
  func.func @transform_2(%arg0: i32, %arg1: i32, %arg2: i32) -> (i32, i32) {
    %c0_i32 = arith.constant 0 : i32
    %c0_i32_0 = arith.constant 0 : i32
    return %c0_i32, %arg1 : i32, i32
  }
  func.func @transform_3(%arg0: i32, %arg1: i32, %arg2: i32) -> (i32, i32) {
    %c0_i32 = arith.constant 0 : i32
    %c0_i32_0 = arith.constant 0 : i32
    return %c0_i32, %arg1 : i32, i32
  }
  func.func @transform_4(%arg0: i32, %arg1: i32, %arg2: i32) -> (i32, i32) {
    %c0_i32 = arith.constant 0 : i32
    return %arg0, %arg1 : i32, i32
  }
}

module attributes {stable_mosaic.version = 11 : i64} {
  func.func @_avgpool_kernel(%arg0: memref<2x1x512xbf16, #tpu.memory_space<vmem>>, %arg1: memref<2x512xf32, #tpu.memory_space<vmem>>) attributes {dimension_semantics = [], scalar_prefetch = 0 : i64, scratch_operands = 0 : i64, tpu.core_type = #tpu.core_type<tc>} {
    %c0 = arith.constant 0 : index
    %c0_0 = arith.constant 0 : index
    %c0_1 = arith.constant 0 : index
    %0 = vector.load %arg0[%c0, %c0_0, %c0_1] : memref<2x1x512xbf16, #tpu.memory_space<vmem>>, vector<2x1x512xbf16>
    %1 = arith.extf %0 : vector<2x1x512xbf16> to vector<2x1x512xf32>
    %cst = arith.constant dense<0.000000e+00> : vector<2x512xf32>
    %2 = vector.multi_reduction <add>, %1, %cst [1] : vector<2x1x512xf32> to vector<2x512xf32>
    %cst_2 = arith.constant 1.000000e+00 : f32
    %3 = vector.broadcast %cst_2 : f32 to vector<2x512xf32>
    %4 = arith.mulf %2, %3 : vector<2x512xf32>
    %c0_3 = arith.constant 0 : index
    %c0_4 = arith.constant 0 : index
    %5 = vector.load %arg1[%c0_3, %c0_4] : memref<2x512xf32, #tpu.memory_space<vmem>>, vector<2x512xf32>
    tpu.vector_store %arg1[%c0_3, %c0_4], %4 {strides = array<i32>} : memref<2x512xf32, #tpu.memory_space<vmem>>, vector<2x512xf32>,
    return
  }
}

module attributes {stable_mosaic.version = 11 : i64} {
  func.func @_gemm_bn_kernel(%arg0: i32, %arg1: i32, %arg2: i32, %arg3: memref<2x512xbf16, #tpu.memory_space<vmem>>, %arg4: memref<512x1000xbf16, #tpu.memory_space<vmem>>, %arg5: memref<1x1000xf32, #tpu.memory_space<vmem>>, %arg6: memref<1x1000xf32, #tpu.memory_space<vmem>>, %arg7: memref<2x1000xf32, #tpu.memory_space<vmem>>, %arg8: memref<2x1000xf32, #tpu.memory_space<vmem>>) attributes {dimension_semantics = [#tpu.dimension_semantics<parallel>, #tpu.dimension_semantics<parallel>, #tpu.dimension_semantics<arbitrary>], iteration_bounds = array<i64: 1, 1, 1>, scalar_prefetch = 0 : i64, scratch_operands = 1 : i64, tpu.core_type = #tpu.core_type<tc>, window_params = [{transform_indices = @transform_0, window_bounds = array<i64: 2, 512>}, {transform_indices = @transform_1, window_bounds = array<i64: 512, 1000>}, {transform_indices = @transform_2, window_bounds = array<i64: 1, 1000>}, {transform_indices = @transform_3, window_bounds = array<i64: 1, 1000>}, {transform_indices = @transform_4, window_bounds = array<i64: 2, 1000>}]} {
    %c0_i32 = arith.constant 0 : i32
    %0 = arith.cmpi eq, %arg2, %c0_i32 : i32
    %1 = arith.extui %0 : i1 to i32
    %c0_i32_0 = arith.constant 0 : i32
    %2 = arith.cmpi ne, %1, %c0_i32_0 : i32
    scf.if %2 {
      %cst_10 = arith.constant 0.000000e+00 : f32
      %12 = vector.broadcast %cst_10 : f32 to vector<2x1000xf32>
      %c0_11 = arith.constant 0 : index
      %c0_12 = arith.constant 0 : index
      %13 = vector.load %arg8[%c0_11, %c0_12] : memref<2x1000xf32, #tpu.memory_space<vmem>>, vector<2x1000xf32>
      tpu.vector_store %arg8[%c0_11, %c0_12], %12 {strides = array<i32>} : memref<2x1000xf32, #tpu.memory_space<vmem>>, vector<2x1000xf32>,
    } else {
    }
    %c0 = arith.constant 0 : index
    %c0_1 = arith.constant 0 : index
    %3 = vector.load %arg8[%c0, %c0_1] : memref<2x1000xf32, #tpu.memory_space<vmem>>, vector<2x1000xf32>
    %c0_2 = arith.constant 0 : index
    %c0_3 = arith.constant 0 : index
    %4 = vector.load %arg3[%c0_2, %c0_3] : memref<2x512xbf16, #tpu.memory_space<vmem>>, vector<2x512xbf16>
    %c0_4 = arith.constant 0 : index
    %c0_5 = arith.constant 0 : index
    %5 = vector.load %arg4[%c0_4, %c0_5] : memref<512x1000xbf16, #tpu.memory_space<vmem>>, vector<512x1000xbf16>
    %cst = arith.constant dense<0.000000e+00> : vector<2x1000xf32>
    %6 = tpu.matmul %4, %5, %cst {dimension_numbers = #tpu.dot_dimension_numbers<[1], [0], [0], [1], [0, 0, 1, 1], [], []>} : vector<2x512xbf16>, vector<512x1000xbf16>, vector<2x1000xf32> -> vector<2x1000xf32>
    %7 = arith.addf %3, %6 : vector<2x1000xf32>
    %c0_6 = arith.constant 0 : index
    %c0_7 = arith.constant 0 : index
    %8 = vector.load %arg8[%c0_6, %c0_7] : memref<2x1000xf32, #tpu.memory_space<vmem>>, vector<2x1000xf32>
    tpu.vector_store %arg8[%c0_6, %c0_7], %7 {strides = array<i32>} : memref<2x1000xf32, #tpu.memory_space<vmem>>, vector<2x1000xf32>,
    %c0_i32_8 = arith.constant 0 : i32
    %9 = arith.cmpi eq, %arg2, %c0_i32_8 : i32
    %10 = arith.extui %9 : i1 to i32
    %c0_i32_9 = arith.constant 0 : i32
    %11 = arith.cmpi ne, %10, %c0_i32_9 : i32
    scf.if %11 {
      %c0_10 = arith.constant 0 : index
      %c0_11 = arith.constant 0 : index
      %12 = vector.load %arg8[%c0_10, %c0_11] : memref<2x1000xf32, #tpu.memory_space<vmem>>, vector<2x1000xf32>
      %c0_12 = arith.constant 0 : index
      %c0_13 = arith.constant 0 : index
      %13 = vector.load %arg5[%c0_12, %c0_13] : memref<1x1000xf32, #tpu.memory_space<vmem>>, vector<1x1000xf32>
      %14 = vector.broadcast %13 : vector<1x1000xf32> to vector<2x1000xf32>
      %15 = arith.mulf %12, %14 : vector<2x1000xf32>
      %c0_14 = arith.constant 0 : index
      %c0_15 = arith.constant 0 : index
      %16 = vector.load %arg6[%c0_14, %c0_15] : memref<1x1000xf32, #tpu.memory_space<vmem>>, vector<1x1000xf32>
      %17 = vector.broadcast %16 : vector<1x1000xf32> to vector<2x1000xf32>
      %18 = arith.addf %15, %17 : vector<2x1000xf32>
      %c0_16 = arith.constant 0 : index
      %c0_17 = arith.constant 0 : index
      %19 = vector.load %arg7[%c0_16, %c0_17] : memref<2x1000xf32, #tpu.memory_space<vmem>>, vector<2x1000xf32>
      tpu.vector_store %arg7[%c0_16, %c0_17], %18 {strides = array<i32>} : memref<2x1000xf32, #tpu.memory_space<vmem>>, vector<2x1000xf32>,
    } else {
    }
    return
  }
  func.func @transform_0(%arg0: i32, %arg1: i32, %arg2: i32) -> (i32, i32) {
    %c0_i32 = arith.constant 0 : i32
    return %arg0, %arg2 : i32, i32
  }
  func.func @transform_1(%arg0: i32, %arg1: i32, %arg2: i32) -> (i32, i32) {
    %c0_i32 = arith.constant 0 : i32
    return %arg2, %arg1 : i32, i32
  }
  func.func @transform_2(%arg0: i32, %arg1: i32, %arg2: i32) -> (i32, i32) {
    %c0_i32 = arith.constant 0 : i32
    %c0_i32_0 = arith.constant 0 : i32
    return %c0_i32, %arg1 : i32, i32
  }
  func.func @transform_3(%arg0: i32, %arg1: i32, %arg2: i32) -> (i32, i32) {
    %c0_i32 = arith.constant 0 : i32
    %c0_i32_0 = arith.constant 0 : i32
    return %c0_i32, %arg1 : i32, i32
  }
  func.func @transform_4(%arg0: i32, %arg1: i32, %arg2: i32) -> (i32, i32) {
    %c0_i32 = arith.constant 0 : i32
    return %arg0, %arg1 : i32, i32
  }
}

</mosaic_0001>

<bundles_post_ra>
// kernel: resnet18_forward.24
= control target key start
LH: loop header
LB: loop body
LE: loop exit
PB: predicated region body
PF: predicated region fallthrough
CT: control target
= control target key end

     0   :  { %s433_s6 = smov 0   ;;  %s435_s7 = smov 0   ;;  %s511_s0 = inlined_call_operand.vmem [shape: bf16[2,18,9,128], index: 0, kind: input, shape index: {}]   ;;  %s512_s1 = inlined_call_operand.vmem [shape: bf16[2,8,8,64], index: 1, kind: output, shape index: {}]  }
   0x1   :  { %s437_s8 = smov 0   ;;  %s439_s9 = smov 0  }
   0x2   :  { %s441_s10 = smov 0  }
   0x3 LB: > { %s20_s11 = sadd.s32 1, %s412_s8  ;;  %s23_s12 = sadd.s32 1, %s416_s9  ;;  %s420_s10 = sphi %s441_s10, %s11_s10   ;;  %s416_s9 = sphi %s439_s9, %s518_s9   ;;  %s412_s8 = sphi %s437_s8, %s517_s8   ;;  %s408_s7 = sphi %s435_s7, %s516_s7   ;;  %s404_s6 = sphi %s433_s6, %s515_s6  }
   0x4   : > { %p21_p0 = scmp.ge.s32.totalorder %s20_s11, 8  ;;  %p319_p1 = scmp.ge.s32.totalorder %s420_s10, 1 }
   0x5   : > { %p101_p2 = scmp.lt.s32.totalorder %s420_s10, 17 }
   0x6   : > { %s520_s11 = smov (%p21_p0, %s20_s11), 0  ;;  %s522_s12 = smov (!%p21_p0, %s23_s12), %s416_s9 }
   0x7   : > { %p102_p3 = pnand %p319_p1, %p101_p2  ;;  %p25_p4 = scmp.ge.s32.totalorder %s522_s12, 2 }
   0x8   : > { %p124_p5 = scmp.lt.s32.totalorder (!%p102_p3), %s408_s7, 1  ;;  %s337_s14 = sshll.u32 (!%p102_p3), %s404_s6, 4 }
   0x9   : > { %s524_s12 = smov (%p25_p4, %s522_s12), 0  ;;  %105 = sbr.rel (%p102_p3) target bundleno = 152 (0x98), region = 24 }
   0xa   : > { %s422_s19 = smov (!%p102_p3), 64   ;;  %p131_p6 = scmp.lt.s32.totalorder (!%p102_p3), %s404_s6, 7 }
   0xe   : > { %s526_s7 = smov (!%p124_p5, %s408_s7), 1  ;;  %vm148_vm0 = vsmask.f32 3328  ;;  %vm149_vm1 = vsmask.f32 7440  ;;  %s528_s6 = smov (!%p131_p6, %s404_s6), 7 }
   0xf   : > { %s340_s13 = smul.u32 144, %s526_s7  ;;  %vm479_vm2 = vmor %vm148_vm0, %vm149_vm1  ;;  %s321_s20 = sshll.u32 %s526_s7, 3  ;;  %vm223_vm3 = vcmask 519168  }
  0x10   : > { %s134_s21 = sadd.s32 %s321_s20, %s528_s6 }
  0x11   : > { %s128_s17 = scalar_lea.vmem %s511_s0, %s340_s13  ;;  %s322_s22 = sshll.u32 %s134_s21, 2 }
  0x12   : > { %s472_s18 = scalar_lea.vmem %s128_s17, %s337_s14  ;;  %s136_s25 = scalar_lea.vmem %s512_s1, %s322_s22 }
  0x13   : > { %v141_v0 = vld [vmem:[%s472_s18] sm:$0xf]  ;;  %v332_v1 = vld [vmem:[%s472_s18 + $0x10] sm:$0xf]  ;;  %v328_v2 = vld [vmem:[%s472_s18 + $0x8] sm:$0xf] }
  0x14   : > { %144 = vrot.lane.b32.xlu0 %v141_v0, %s422_s19  ;;  %203 = vrot.lane.b32.xlu1 %v332_v1, %s422_s19  ;;  %v152_v3 = vshrl.u32 %v141_v0, 16  ;;  %v155_v4 = vshll.u32 %v141_v0, 16  ;;  %v142_v7 = vld [vmem:[%s472_s18 + $0x4] sm:$0x1]  ;;  %v180_v8 = vshrl.u32 %v328_v2, 16  ;;  %v183_v9 = vshll.u32 %v328_v2, 16 }
  0x15   : > { %v161_v10 = vshll.u32 %v142_v7, 16  ;;  %v329_v14 = vld [vmem:[%s472_s18 + $0xc] sm:$0x1]  ;;  %v208_v15 = vshrl.u32 %v332_v1, 16  ;;  %v211_v16 = vshll.u32 %v332_v1, 16 }
  0x16   : > { %v154_v5 = vrot.slane %v152_v3, 4  ;;  %v157_v6 = vrot.slane %v155_v4, 5  ;;  %v182_v12 = vrot.slane %v180_v8, 4  ;;  %v185_v13 = vrot.slane %v183_v9, 5  ;;  %v333_v27 = vld [vmem:[%s472_s18 + $0x14] sm:$0x1] }
  0x17   : > { %v163_v17 = vrot.slane %v161_v10, 5  ;;  %v189_v21 = vshll.u32 %v329_v14, 16  ;;  %v210_v22 = vrot.slane %v208_v15, 4  ;;  %v213_v23 = vrot.slane %v211_v16, 5 }
  0x18   : > { %175 = vrot.lane.b32.xlu0 %v328_v2, %s422_s19  ;;  %v158_v11 = vor.u32 %v157_v6, %v154_v5  ;;  %v186_v20 = vor.u32 %v185_v13, %v182_v12  ;;  %v217_v32 = vshll.u32 %v333_v27, 16 }
  0x19   : > { %v191_v29 = vrot.slane %v189_v21, 5  ;;  %v214_v33 = vor.u32 %v213_v23, %v210_v22 }
  0x1a   : > { %v159_v18 = vrot.slane %v158_v11, 4  ;;  %v187_v28 = vrot.slane %v186_v20, 4  ;;  %v219_v37 = vrot.slane %v217_v32, 5 }
  0x1b   : > { %v215_v38 = vrot.slane %v214_v33, 4 }
  0x1c   : > { %v164_v25 = vsel %vm479_vm2, %v159_v18, %v163_v17  ;;  %v192_v35 = vsel %vm479_vm2, %v187_v28, %v191_v29 }
  0x1d   : > { %v220_v42 = vsel %vm479_vm2, %v215_v38, %v219_v37 }
  0x86   : > { %v145_v24 = vpop.permute.xlu0 %144  ;;  %v204_v40 = vpop.permute.xlu1 %203 }
  0x87   : > { %v147_v26 = vmax.bf16 %v145_v24, %v141_v0 }
  0x89   : > { %v166_v30 = vmax.bf16 %v164_v25, %v147_v26 }
  0x8a   : > { %v176_v31 = vpop.permute.xlu0 %175 }
  0x8b   : > { %v173_v34 = vmax.bf16 %v328_v2, %v166_v30 }
  0x8d   : > { %v178_v36 = vmax.bf16 %v176_v31, %v173_v34 }
  0x8f   : > { %v194_v39 = vmax.bf16 %v192_v35, %v178_v36 }
  0x91   : > { %v201_v41 = vmax.bf16 %v332_v1, %v194_v39 }
  0x93   : > { %v206_v43 = vmax.bf16 %v204_v40, %v201_v41 }
  0x95   : > { %v222_v44 = vmax.bf16 %v220_v42, %v206_v43 }
  0x97   : > { %224 = vst.msk [vmem:[%s136_s25] sm:$0xf] %vm223_vm3, %v222_v44 }
  0x98 PF: > { %s11_s10 = sadd.s32 1, %s420_s10   ;;  %s515_s6 = smov %s412_s8 }
  0x99   : > { %p8_p7 = scmp.ge.s32.totalorder %s11_s10, 18   ;;  %s516_s7 = smov %s416_s9 }
  0x9a   : > { %s517_s8 = smov %s520_s11  ;;  %s518_s9 = smov %s524_s12 }
  0x9b   :  { %10 = sbr.rel (!%p8_p7) target bundleno = 3 (0x3), region = 57 }

// kernel: resnet18_forward.23
= control target key start
LH: loop header
LB: loop body
LE: loop exit
PB: predicated region body
PF: predicated region fallthrough
CT: control target
= control target key end

     0   :  { %s1641_s15 = smov 0   ;;  %s1643_s16 = smov 0   ;;  %s1984_s0 = inlined_call_operand.vmem [shape: bf16[512,147], index: 0, kind: input, shape index: {}]   ;;  %s1985_s1 = inlined_call_operand.vmem [shape: bf16[147,64], index: 1, kind: input, shape index: {}]   ;;  %s1986_s2 = inlined_call_operand.vmem [shape: f32[1,64], index: 2, kind: input, shape index: {}]   ;;  %s1987_s3 = inlined_call_operand.vmem [shape: f32[1,64], index: 3, kind: input, shape index: {}]   ;;  %s1988_s4 = inlined_call_operand.vmem [shape: bf16[512,64], index: 4, kind: output, shape index: {}]  }
   0x1   :  { %s1645_s17 = smov 0  }
   0x2 LB: > { %s33_s18 = sadd.s32 1, %s1607_s16  ;;  %p1351_p0 = scmp.ge.s32.totalorder %s1611_s17, 1  ;;  %s1611_s17 = sphi %s1645_s17, %s14_s17   ;;  %s1607_s16 = sphi %s1643_s16, %s1990_s16   ;;  %s1603_s15 = sphi %s1641_s15, %s1989_s15  }
   0x3   : > { %p35_p1 = scmp.ge.s32.totalorder %s33_s18, 2  ;;  %p224_p2 = scmp.lt.s32.totalorder %s1611_s17, 3 }
   0x5   : > { %s1992_s18 = smov (%p35_p1, %s33_s18), 0  ;;  %p225_p3 = pnand %p1351_p0, %p224_p2 }
   0x6   : > { %s1352_s25 = sshll.u32 (!%p225_p3), %s1603_s15, 5 }
   0x7   : > { %228 = sbr.rel (%p225_p3) target bundleno = 326 (0x146), region = 36  ;;  %p274_p4 = scmp.lt.s32.totalorder (!%p225_p3), %s1352_s25, 63 }
   0xc   : > { %v1531_v0 = vld [vmem:[%s1985_s1 + $0x38] sm:$0xff]   ;;  %v1613_v1 = vmov 0   ;;  %v1532_v2 = vld [vmem:[%s1985_s1 + $0x30] sm:$0xff]   ;;  %v1533_v3 = vld [vmem:[%s1985_s1 + $0x28] sm:$0xff]   ;;  %s1994_s25 = smov (!%p274_p4, %s1352_s25), 63  ;;  %vm313_vm0 = vcmask 523264  }
   0xd   : > { %686 = vmatprep.subr.bf16.mxu0 %v1613_v1  ;;  %1484 = vmatprep.subr.bf16.mxu1 %v1613_v1  ;;  %v1534_v4 = vld [vmem:[%s1985_s1 + $0x20] sm:$0xff]   ;;  %s1451_s28 = sshll.u32 %s1994_s25, 3  ;;  %v1614_v5 = vmov 0.0   ;;  %v1535_v6 = vld [vmem:[%s1985_s1 + $0x18] sm:$0xff]   ;;  %vm630_vm1 = vcmask 154624   ;;  %v1536_v9 = vld [vmem:[%s1985_s1 + $0x10] sm:$0xff]  }
   0xe   : > { %687 = vmatpush1.bf16.msra.mxu0 %v1531_v0  ;;  %1494 = vmatpush1.bf16.msra.mxu1 %v1531_v0  ;;  %314 = vst.msk [vmem:[#allocation2] sm:$0xff] %vm313_vm0, %v1614_v5  ;;  %315 = vst.msk [vmem:[#allocation2 + $0x8] sm:$0xff] %vm313_vm0, %v1614_v5  ;;  %s1719_s5 = scalar_lea.vmem %s1984_s0, %s1451_s28  ;;  %vm679_vm2 = vcmask 1040384   ;;  %v1537_v10 = vld [vmem:[%s1985_s1 + $0x8] sm:$0xff]   ;;  %vm680_vm3 = vcmask 1041408   ;;  %v1615_v11 = vmov 65535  }
   0xf   : > { %688 = vmatprep.subr.bf16.mxu0 %v1613_v1  ;;  %1485 = vmatprep.subr.bf16.mxu1 %v1613_v1  ;;  %316 = vst.msk [vmem:[#allocation2 + $0x10] sm:$0xff] %vm313_vm0, %v1614_v5  ;;  %317 = vst.msk [vmem:[#allocation2 + $0x18] sm:$0xff] %vm313_vm0, %v1614_v5  ;;  %v1543_v7 = vld [vmem:[%s1719_s5 + $0x4] ss:$8 sps:$4 sm:$0xff]   ;;  %v681_v12 = vsel %vm679_vm2, 4294967295, %v1615_v11  ;;  %s1356_s26 = sshll.u32 %s1994_s25, 2 }
  0x10   : > { %318 = vst.msk [vmem:[#allocation2 + $0x20] sm:$0xff] %vm313_vm0, %v1614_v5  ;;  %319 = vst.msk [vmem:[#allocation2 + $0x28] sm:$0xff] %vm313_vm0, %v1614_v5  ;;  %v1546_v8 = vld [vmem:[%s1719_s5 + $0x84] ss:$8 sps:$4 sm:$0xff]   ;;  %1399 = vmatprep.mubr.msk.bf16.mxu0 %vm630_vm1, %v1543_v7  ;;  %v682_v15 = vsel %vm680_vm3, %v681_v12, 0  ;;  %s1827_s28 = scalar_lea.vmem %s1988_s4, %s1356_s26  ;;  %vm1185_vm4 = vcmask 519168  }
  0x11   : > { %320 = vst.msk [vmem:[#allocation2 + $0x30] sm:$0xff] %vm313_vm0, %v1614_v5  ;;  %321 = vst.msk [vmem:[#allocation2 + $0x38] sm:$0xff] %vm313_vm0, %v1614_v5  ;;  %1407 = vmatprep.mubr.msk.bf16.mxu1 %vm630_vm1, %v1546_v8  ;;  %v1538_v13 = vld [vmem:[%s1985_s1] sm:$0xff]   ;;  %v1539_v14 = vld [vmem:[%s1985_s1 + $0x48] ss:$0 sps:$4 sm:$0x33]  }
  0x12   : > { %689 = vmatpush1.bf16.msra.mxu0 %v1532_v2  ;;  %1495 = vmatpush1.bf16.msra.mxu1 %v1532_v2  ;;  %322 = vst.msk [vmem:[#allocation2 + $0x40] sm:$0xff] %vm313_vm0, %v1614_v5  ;;  %323 = vst.msk [vmem:[#allocation2 + $0x48] sm:$0xff] %vm313_vm0, %v1614_v5  ;;  %v684_v16 = vand.u32 %v1539_v14, %v682_v15  ;;  %v1540_v17 = vld [vmem:[%s1985_s1 + $0x40] sm:$0xff]   ;;  %v1547_v20 = vld [vmem:[%s1719_s5 + $0x14] ss:$8 sps:$4 sm:$0xff]  }
  0x13   : > { %690 = vmatprep.subr.bf16.mxu0 %v1613_v1  ;;  %1486 = vmatprep.subr.bf16.mxu1 %v1613_v1  ;;  %324 = vst.msk [vmem:[#allocation2 + $0x50] sm:$0xff] %vm313_vm0, %v1614_v5  ;;  %325 = vst.msk [vmem:[#allocation2 + $0x58] sm:$0xff] %vm313_vm0, %v1614_v5  ;;  %v1541_v18 = vld [vmem:[%s1719_s5] ss:$8 sps:$4 sm:$0xff]   ;;  %v1549_v21 = vld [vmem:[%s1719_s5 + $0x94] ss:$8 sps:$4 sm:$0xff]  }
  0x14   : > { %326 = vst.msk [vmem:[#allocation2 + $0x60] sm:$0xff] %vm313_vm0, %v1614_v5  ;;  %327 = vst.msk [vmem:[#allocation2 + $0x68] sm:$0xff] %vm313_vm0, %v1614_v5  ;;  %v1544_v19 = vld [vmem:[%s1719_s5 + $0x80] ss:$8 sps:$4 sm:$0xff]   ;;  %v1551_v22 = vld [vmem:[%s1719_s5 + $0x10] ss:$8 sps:$4 sm:$0xff]  }
  0x15   : > { %328 = vst.msk [vmem:[#allocation2 + $0x70] sm:$0xff] %vm313_vm0, %v1614_v5  ;;  %329 = vst.msk [vmem:[#allocation2 + $0x78] sm:$0xff] %vm313_vm0, %v1614_v5  ;;  %v1552_v23 = vld [vmem:[%s1719_s5 + $0x90] ss:$8 sps:$4 sm:$0xff]   ;;  %v1553_v24 = vld [vmem:[%s1719_s5 + $0x24] ss:$8 sps:$4 sm:$0xff]  }
  0x16   : > { %691 = vmatpush1.bf16.msra.mxu0 %v1533_v3  ;;  %1496 = vmatpush1.bf16.msra.mxu1 %v1533_v3  ;;  %330 = vst.msk [vmem:[#allocation2 + $0x80] sm:$0xff] %vm313_vm0, %v1614_v5  ;;  %331 = vst.msk [vmem:[#allocation2 + $0x88] sm:$0xff] %vm313_vm0, %v1614_v5  ;;  %v1555_v25 = vld [vmem:[%s1719_s5 + $0xa4] ss:$8 sps:$4 sm:$0xff]   ;;  %v1557_v26 = vld [vmem:[%s1719_s5 + $0x20] ss:$8 sps:$4 sm:$0xff]  }
  0x17   : > { %692 = vmatprep.subr.bf16.mxu0 %v1613_v1  ;;  %1487 = vmatprep.subr.bf16.mxu1 %v1613_v1  ;;  %332 = vst.msk [vmem:[#allocation2 + $0x90] sm:$0xff] %vm313_vm0, %v1614_v5  ;;  %333 = vst.msk [vmem:[#allocation2 + $0x98] sm:$0xff] %vm313_vm0, %v1614_v5  ;;  %v1558_v27 = vld [vmem:[%s1719_s5 + $0xa0] ss:$8 sps:$4 sm:$0xff]   ;;  %v1559_v28 = vld [vmem:[%s1719_s5 + $0x34] ss:$8 sps:$4 sm:$0xff]  }
  0x18   : > { %334 = vst.msk [vmem:[#allocation2 + $0xa0] sm:$0xff] %vm313_vm0, %v1614_v5  ;;  %335 = vst.msk [vmem:[#allocation2 + $0xa8] sm:$0xff] %vm313_vm0, %v1614_v5  ;;  %v1561_v29 = vld [vmem:[%s1719_s5 + $0xb4] ss:$8 sps:$4 sm:$0xff]   ;;  %v1563_v30 = vld [vmem:[%s1719_s5 + $0x30] ss:$8 sps:$4 sm:$0xff]  }
  0x19   : > { %336 = vst.msk [vmem:[#allocation2 + $0xb0] sm:$0xff] %vm313_vm0, %v1614_v5  ;;  %337 = vst.msk [vmem:[#allocation2 + $0xb8] sm:$0xff] %vm313_vm0, %v1614_v5  ;;  %v1564_v31 = vld [vmem:[%s1719_s5 + $0xb0] ss:$8 sps:$4 sm:$0xff]   ;;  %v1565_v32 = vld [vmem:[%s1719_s5 + $0x44] ss:$8 sps:$4 sm:$0xff]  }
  0x1a   : > { %338 = vst.msk [vmem:[#allocation2 + $0xc0] sm:$0xff] %vm313_vm0, %v1614_v5  ;;  %339 = vst.msk [vmem:[#allocation2 + $0xc8] sm:$0xff] %vm313_vm0, %v1614_v5  ;;  %693 = vmatpush1.bf16.msra.mxu0 %v1534_v4  ;;  %1497 = vmatpush1.bf16.msra.mxu1 %v1534_v4  ;;  %v1567_v33 = vld [vmem:[%s1719_s5 + $0xc4] ss:$8 sps:$4 sm:$0xff]   ;;  %v1569_v34 = vld [vmem:[%s1719_s5 + $0x40] ss:$8 sps:$4 sm:$0xff]  }
  0x1b   : > { %340 = vst.msk [vmem:[#allocation2 + $0xd0] sm:$0xff] %vm313_vm0, %v1614_v5  ;;  %341 = vst.msk [vmem:[#allocation2 + $0xd8] sm:$0xff] %vm313_vm0, %v1614_v5  ;;  %694 = vmatprep.subr.bf16.mxu0 %v1613_v1  ;;  %1488 = vmatprep.subr.bf16.mxu1 %v1613_v1  ;;  %v1570_v35 = vld [vmem:[%s1719_s5 + $0xc0] ss:$8 sps:$4 sm:$0xff]   ;;  %v1571_v36 = vld [vmem:[%s1719_s5 + $0x54] ss:$8 sps:$4 sm:$0xff]  }
  0x1c   : > { %342 = vst.msk [vmem:[#allocation2 + $0xe0] sm:$0xff] %vm313_vm0, %v1614_v5  ;;  %343 = vst.msk [vmem:[#allocation2 + $0xe8] sm:$0xff] %vm313_vm0, %v1614_v5  ;;  %v1573_v37 = vld [vmem:[%s1719_s5 + $0xd4] ss:$8 sps:$4 sm:$0xff]   ;;  %v1575_v38 = vld [vmem:[%s1719_s5 + $0x50] ss:$8 sps:$4 sm:$0xff]  }
  0x1d   : > { %344 = vst.msk [vmem:[#allocation2 + $0xf0] sm:$0xff] %vm313_vm0, %v1614_v5  ;;  %345 = vst.msk [vmem:[#allocation2 + $0xf8] sm:$0xff] %vm313_vm0, %v1614_v5  ;;  %v1576_v39 = vld [vmem:[%s1719_s5 + $0xd0] ss:$8 sps:$4 sm:$0xff]   ;;  %v1577_v40 = vld [vmem:[%s1719_s5 + $0x64] ss:$8 sps:$4 sm:$0xff]  }
  0x1e   : > { %695 = vmatpush1.bf16.msra.mxu0 %v1535_v6  ;;  %1498 = vmatpush1.bf16.msra.mxu1 %v1535_v6  ;;  %v1579_v41 = vld [vmem:[%s1719_s5 + $0xe4] ss:$8 sps:$4 sm:$0xff]   ;;  %v1581_v42 = vld [vmem:[%s1719_s5 + $0x60] ss:$8 sps:$4 sm:$0xff]   ;;  %v1583_v44 = vld [vmem:[%s1719_s5 + $0x74] ss:$8 sps:$4 sm:$0xff]  }
  0x1f   : > { %696 = vmatprep.subr.bf16.mxu0 %v1613_v1  ;;  %1489 = vmatprep.subr.bf16.mxu1 %v1613_v1  ;;  %v1582_v43 = vld [vmem:[%s1719_s5 + $0xe0] ss:$8 sps:$4 sm:$0xff]   ;;  %v1585_v45 = vld [vmem:[%s1719_s5 + $0xf4] ss:$8 sps:$4 sm:$0xff]   ;;  %v1587_v46 = vld [vmem:[%s1719_s5 + $0x70] ss:$8 sps:$4 sm:$0xff]  }
  0x20   : > { %v1588_v47 = vld [vmem:[%s1719_s5 + $0xf0] ss:$8 sps:$4 sm:$0xff]   ;;  %v346_v48 = vld [vmem:[#allocation2] sm:$0xff]  ;;  %v347_v56 = vld [vmem:[#allocation2 + $0x8] sm:$0xff] }
  0x21   : > { %v362_v49 = vld [vmem:[#allocation2 + $0x80] sm:$0xff]  ;;  %v363_v57 = vld [vmem:[#allocation2 + $0x88] sm:$0xff]  ;;  %v348_v0 = vld [vmem:[#allocation2 + $0x10] sm:$0xff] }
  0x22   : > { %697 = vmatpush1.bf16.msra.mxu0 %v1536_v9  ;;  %1499 = vmatpush1.bf16.msra.mxu1 %v1536_v9  ;;  %v1806_v2 = vld [vmem:[%s1986_s2] ss:$0 sm:$0xff]  ;;  %v349_v8 = vld [vmem:[#allocation2 + $0x18] sm:$0xff] }
  0x23   : > { %698 = vmatprep.subr.bf16.mxu0 %v1613_v1  ;;  %1490 = vmatprep.subr.bf16.mxu1 %v1613_v1  ;;  %v1811_v5 = vld [vmem:[%s1987_s3] ss:$0 sm:$0xff] }
  0x26   : > { %699 = vmatpush1.bf16.msra.mxu0 %v1537_v10  ;;  %1500 = vmatpush1.bf16.msra.mxu1 %v1537_v10 }
  0x27   : > { %700 = vmatprep.subr.bf16.mxu0 %v1613_v1  ;;  %1491 = vmatprep.subr.bf16.mxu1 %v1613_v1 }
  0x2a   : > { %701 = vmatpush1.bf16.msra.mxu0 %v1538_v13  ;;  %1501 = vmatpush1.bf16.msra.mxu1 %v1538_v13  ;;  %v365_v13 = vld [vmem:[#allocation2 + $0x98] sm:$0xff] }
  0x2b   : > { %714 = vmatprep.subr.bf16.mxu0 %v1613_v1  ;;  %1492 = vmatprep.subr.bf16.mxu1 %v1613_v1 }
  0x2e   : > { %715 = vmatpush2.bf16.msra.mxu0 %v684_v16  ;;  %1502 = vmatpush2.bf16.msra.mxu1 %v684_v16 }
  0x2f   : > { %716 = vmatprep.subr.bf16.mxu0 %v1613_v1  ;;  %1493 = vmatprep.subr.bf16.mxu1 %v1613_v1  ;;  %v364_v1 = vld [vmem:[#allocation2 + $0x90] sm:$0xff] }
  0x32   : > { %717 = vmatpush2.bf16.msra.mxu0 %v1540_v17  ;;  %1503 = vmatpush2.bf16.msra.mxu1 %v1540_v17 }
  0x35   : > { %719 = vmatmul.mubr.bf16.vlgmr.msra.gmra.mxu0 %v1541_v18  ;;  %783 = vmatmul.mubr.bf16.vlgmr.msra.gmra.mxu1 %v1544_v19 }
  0x36   : > { %1400 = vmatprep.mubr.msk.bf16.mxu0 %vm630_vm1, %v1547_v20  ;;  %1408 = vmatprep.mubr.msk.bf16.mxu1 %vm630_vm1, %v1549_v21 }
  0x3d   : > { %727 = vmatmul.mubr.bf16.gmra.mxu0 %v1551_v22  ;;  %791 = vmatmul.mubr.bf16.gmra.mxu1 %v1552_v23 }
  0x3e   : > { %1401 = vmatprep.mubr.msk.bf16.mxu0 %vm630_vm1, %v1553_v24  ;;  %1409 = vmatprep.mubr.msk.bf16.mxu1 %vm630_vm1, %v1555_v25 }
  0x45   : > { %735 = vmatmul.mubr.bf16.gmra.mxu0 %v1557_v26  ;;  %799 = vmatmul.mubr.bf16.gmra.mxu1 %v1558_v27 }
  0x46   : > { %1402 = vmatprep.mubr.msk.bf16.mxu0 %vm630_vm1, %v1559_v28  ;;  %1410 = vmatprep.mubr.msk.bf16.mxu1 %vm630_vm1, %v1561_v29 }
  0x4d   : > { %743 = vmatmul.mubr.bf16.gmra.mxu0 %v1563_v30  ;;  %807 = vmatmul.mubr.bf16.gmra.mxu1 %v1564_v31  ;;  %v350_v30 = vld [vmem:[#allocation2 + $0x20] sm:$0xff] }
  0x4e   : > { %1403 = vmatprep.mubr.msk.bf16.mxu0 %vm630_vm1, %v1565_v32  ;;  %1411 = vmatprep.mubr.msk.bf16.mxu1 %vm630_vm1, %v1567_v33  ;;  %v366_v31 = vld [vmem:[#allocation2 + $0xa0] sm:$0xff] }
  0x55   : > { %751 = vmatmul.mubr.bf16.gmra.mxu0 %v1569_v34  ;;  %815 = vmatmul.mubr.bf16.gmra.mxu1 %v1570_v35 }
  0x56   : > { %1404 = vmatprep.mubr.msk.bf16.mxu0 %vm630_vm1, %v1571_v36  ;;  %1412 = vmatprep.mubr.msk.bf16.mxu1 %vm630_vm1, %v1573_v37 }
  0x5d   : > { %759 = vmatmul.mubr.bf16.gmra.mxu0 %v1575_v38  ;;  %823 = vmatmul.mubr.bf16.gmra.mxu1 %v1576_v39 }
  0x5e   : > { %1405 = vmatprep.mubr.msk.bf16.mxu0 %vm630_vm1, %v1577_v40  ;;  %1413 = vmatprep.mubr.msk.bf16.mxu1 %vm630_vm1, %v1579_v41 }
  0x65   : > { %767 = vmatmul.mubr.bf16.gmra.mxu0 %v1581_v42  ;;  %831 = vmatmul.mubr.bf16.gmra.mxu1 %v1582_v43 }
  0x66   : > { %1406 = vmatprep.mubr.msk.bf16.mxu0 %vm630_vm1, %v1583_v44  ;;  %1414 = vmatprep.mubr.msk.bf16.mxu1 %vm630_vm1, %v1585_v45 }
  0x6d   : > { %775 = vmatmul.mubr.bf16.gmra.mxu0 %v1587_v46  ;;  %839 = vmatmul.mubr.bf16.gmra.mxu1 %v1588_v47 }
  0xf5   : > { %v720_v50 = vpop.f32.mrf.mxu0  ;;  %v784_v51 = vpop.f32.mrf.mxu1 }
  0xf6   : > { %v847_v52 = vadd.f32 %v720_v50, %v346_v48  ;;  %v863_v53 = vadd.f32 %v784_v51, %v362_v49  ;;  %v351_v48 = vld [vmem:[#allocation2 + $0x28] sm:$0xff] }
  0xf7   : > { %v722_v54 = vpop.f32.mrf.mxu0  ;;  %v786_v55 = vpop.f32.mrf.mxu1  ;;  %v367_v49 = vld [vmem:[#allocation2 + $0xa8] sm:$0xff] }
  0xf8   : > { %880 = vst.msk [vmem:[#allocation2] sm:$0xff] %vm313_vm0, %v847_v52  ;;  %896 = vst.msk [vmem:[#allocation2 + $0x80] sm:$0xff] %vm313_vm0, %v863_v53 }
  0xf9   : > { %v723_v58 = vpop.f32.mrf.mxu0  ;;  %v787_v59 = vpop.f32.mrf.mxu1 }
  0xfa   : > { %v848_v60 = vadd.f32 %v723_v58, %v347_v56  ;;  %v864_v61 = vadd.f32 %v787_v59, %v363_v57 }
  0xfb   : > { %v725_v62 = vpop.f32.mrf.mxu0  ;;  %v789_v63 = vpop.f32.mrf.mxu1 }
  0xfc   : > { %881 = vst.msk [vmem:[#allocation2 + $0x8] sm:$0xff] %vm313_vm0, %v848_v60  ;;  %897 = vst.msk [vmem:[#allocation2 + $0x88] sm:$0xff] %vm313_vm0, %v864_v61 }
  0xfd   : > { %v728_v3 = vpop.f32.mrf.mxu0  ;;  %v792_v4 = vpop.f32.mrf.mxu1 }
  0xfe   : > { %v849_v6 = vadd.f32 %v728_v3, %v348_v0  ;;  %v865_v7 = vadd.f32 %v792_v4, %v364_v1  ;;  %v352_v3 = vld [vmem:[#allocation2 + $0x30] sm:$0xff] }
  0xff   : > { %v915_v9 = vld [vmem:[#allocation2] sm:$0xff]  ;;  %v730_v11 = vpop.f32.mrf.mxu0  ;;  %v794_v12 = vpop.f32.mrf.mxu1  ;;  %v368_v4 = vld [vmem:[#allocation2 + $0xb0] sm:$0xff] }
 0x100   : > { %v931_v10 = vld [vmem:[#allocation2 + $0x80] sm:$0xff]  ;;  %v954_v14 = vmul.f32 %v1806_v2, %v915_v9  ;;  %882 = vst.msk [vmem:[#allocation2 + $0x10] sm:$0xff] %vm313_vm0, %v849_v6  ;;  %898 = vst.msk [vmem:[#allocation2 + $0x90] sm:$0xff] %vm313_vm0, %v865_v7 }
 0x101   : > { %v970_v15 = vmul.f32 %v1806_v2, %v931_v10  ;;  %v731_v16 = vpop.f32.mrf.mxu0  ;;  %v795_v17 = vpop.f32.mrf.mxu1 }
 0x102   : > { %v993_v18 = vadd.f32 %v1811_v5, %v954_v14  ;;  %v850_v20 = vadd.f32 %v731_v16, %v349_v8  ;;  %v866_v21 = vadd.f32 %v795_v17, %v365_v13  ;;  %v353_v16 = vld [vmem:[#allocation2 + $0x38] sm:$0xff] }
 0x103   : > { %v1009_v19 = vadd.f32 %v1811_v5, %v970_v15  ;;  %v916_v22 = vld [vmem:[#allocation2 + $0x8] sm:$0xff]  ;;  %v733_v24 = vpop.f32.mrf.mxu0  ;;  %v797_v25 = vpop.f32.mrf.mxu1  ;;  %v369_v17 = vld [vmem:[#allocation2 + $0xb8] sm:$0xff] }
 0x104   : > { %v932_v23 = vld [vmem:[#allocation2 + $0x88] sm:$0xff]  ;;  %v1025_v26 = vmax.f32 %v993_v18, 0.0  ;;  %v955_v28 = vmul.f32 %v1806_v2, %v916_v22  ;;  %883 = vst.msk [vmem:[#allocation2 + $0x18] sm:$0xff] %vm313_vm0, %v850_v20  ;;  %899 = vst.msk [vmem:[#allocation2 + $0x98] sm:$0xff] %vm313_vm0, %v866_v21 }
 0x105   : > { %v1041_v27 = vmax.f32 %v1009_v19, 0.0  ;;  %v971_v29 = vmul.f32 %v1806_v2, %v932_v23  ;;  %v736_v32 = vpop.f32.mrf.mxu0  ;;  %v800_v33 = vpop.f32.mrf.mxu1 }
 0x106   : > { %v1452_v34 = vpack.c.bf16 %v1025_v26, %v1025_v26  ;;  %v994_v36 = vadd.f32 %v1811_v5, %v955_v28  ;;  %v851_v40 = vadd.f32 %v736_v32, %v350_v30  ;;  %v867_v41 = vadd.f32 %v800_v33, %v366_v31 }
 0x107   : > { %v1468_v35 = vpack.c.bf16 %v1041_v27, %v1041_v27  ;;  %v1010_v37 = vadd.f32 %v1811_v5, %v971_v29  ;;  %v917_v38 = vld [vmem:[#allocation2 + $0x10] sm:$0xff]  ;;  %v738_v42 = vpop.f32.mrf.mxu0  ;;  %v802_v43 = vpop.f32.mrf.mxu1 }
 0x108   : > { %v933_v39 = vld [vmem:[#allocation2 + $0x90] sm:$0xff]  ;;  %1186 = vst.msk [vmem:[%s1827_s28] sm:$0xf] %vm1185_vm4, %v1452_v34  ;;  %v1026_v44 = vmax.f32 %v994_v36, 0.0  ;;  %v956_v46 = vmul.f32 %v1806_v2, %v917_v38  ;;  %v354_v34 = vld [vmem:[#allocation2 + $0x40] sm:$0xff] }
 0x109   : > { %1202 = vst.msk [vmem:[%s1827_s28 + $0x40] sm:$0xf] %vm1185_vm4, %v1468_v35  ;;  %v1042_v45 = vmax.f32 %v1010_v37, 0.0  ;;  %v972_v47 = vmul.f32 %v1806_v2, %v933_v39  ;;  %v739_v50 = vpop.f32.mrf.mxu0  ;;  %v803_v51 = vpop.f32.mrf.mxu1  ;;  %v370_v35 = vld [vmem:[#allocation2 + $0xc0] sm:$0xff] }
 0x10a   : > { %884 = vst.msk [vmem:[#allocation2 + $0x20] sm:$0xff] %vm313_vm0, %v851_v40  ;;  %900 = vst.msk [vmem:[#allocation2 + $0xa0] sm:$0xff] %vm313_vm0, %v867_v41  ;;  %v1453_v52 = vpack.c.bf16 %v1026_v44, %v1026_v44  ;;  %v995_v54 = vadd.f32 %v1811_v5, %v956_v46  ;;  %v852_v58 = vadd.f32 %v739_v50, %v351_v48 }
 0x10b   : > { %v1469_v53 = vpack.c.bf16 %v1042_v45, %v1042_v45  ;;  %v1011_v55 = vadd.f32 %v1811_v5, %v972_v47  ;;  %v918_v56 = vld [vmem:[#allocation2 + $0x18] sm:$0xff]  ;;  %v868_v59 = vadd.f32 %v803_v51, %v367_v49  ;;  %v741_v60 = vpop.f32.mrf.mxu0  ;;  %v805_v61 = vpop.f32.mrf.mxu1 }
 0x10c   : > { %v934_v57 = vld [vmem:[#allocation2 + $0x98] sm:$0xff]  ;;  %1187 = vst.msk [vmem:[%s1827_s28 + $0x4] sm:$0xf] %vm1185_vm4, %v1453_v52  ;;  %v1027_v62 = vmax.f32 %v995_v54, 0.0  ;;  %v957_v0 = vmul.f32 %v1806_v2, %v918_v56  ;;  %v355_v52 = vld [vmem:[#allocation2 + $0x48] sm:$0xff] }
 0x10d   : > { %1203 = vst.msk [vmem:[%s1827_s28 + $0x44] sm:$0xf] %vm1185_vm4, %v1469_v53  ;;  %v1043_v63 = vmax.f32 %v1011_v55, 0.0  ;;  %v973_v1 = vmul.f32 %v1806_v2, %v934_v57  ;;  %v744_v6 = vpop.f32.mrf.mxu0  ;;  %v808_v7 = vpop.f32.mrf.mxu1  ;;  %v371_v53 = vld [vmem:[#allocation2 + $0xc8] sm:$0xff] }
 0x10e   : > { %885 = vst.msk [vmem:[#allocation2 + $0x28] sm:$0xff] %vm313_vm0, %v852_v58  ;;  %901 = vst.msk [vmem:[#allocation2 + $0xa8] sm:$0xff] %vm313_vm0, %v868_v59  ;;  %v1454_v8 = vpack.c.bf16 %v1027_v62, %v1027_v62  ;;  %v996_v10 = vadd.f32 %v1811_v5, %v957_v0  ;;  %v853_v12 = vadd.f32 %v744_v6, %v352_v3  ;;  %v356_v0 = vld [vmem:[#allocation2 + $0x50] sm:$0xff] }
 0x10f   : > { %v1470_v9 = vpack.c.bf16 %v1043_v63, %v1043_v63  ;;  %v1012_v11 = vadd.f32 %v1811_v5, %v973_v1  ;;  %v869_v13 = vadd.f32 %v808_v7, %v368_v4  ;;  %v746_v14 = vpop.f32.mrf.mxu0  ;;  %v810_v15 = vpop.f32.mrf.mxu1 }
 0x110   : > { %1188 = vst.msk [vmem:[%s1827_s28 + $0x8] sm:$0xf] %vm1185_vm4, %v1454_v8  ;;  %v1028_v18 = vmax.f32 %v996_v10, 0.0 }
 0x111   : > { %1204 = vst.msk [vmem:[%s1827_s28 + $0x48] sm:$0xf] %vm1185_vm4, %v1470_v9  ;;  %v1044_v19 = vmax.f32 %v1012_v11, 0.0  ;;  %v919_v20 = vld [vmem:[#allocation2 + $0x20] sm:$0xff]  ;;  %v747_v24 = vpop.f32.mrf.mxu0  ;;  %v811_v25 = vpop.f32.mrf.mxu1  ;;  %v372_v11 = vld [vmem:[#allocation2 + $0xd0] sm:$0xff] }
 0x112   : > { %v935_v21 = vld [vmem:[#allocation2 + $0xa0] sm:$0xff]  ;;  %v958_v22 = vmul.f32 %v1806_v2, %v919_v20  ;;  %886 = vst.msk [vmem:[#allocation2 + $0x30] sm:$0xff] %vm313_vm0, %v853_v12  ;;  %902 = vst.msk [vmem:[#allocation2 + $0xb0] sm:$0xff] %vm313_vm0, %v869_v13  ;;  %v1455_v26 = vpack.c.bf16 %v1028_v18, %v1028_v18  ;;  %v854_v28 = vadd.f32 %v747_v24, %v353_v16 }
 0x113   : > { %v974_v23 = vmul.f32 %v1806_v2, %v935_v21  ;;  %v1471_v27 = vpack.c.bf16 %v1044_v19, %v1044_v19  ;;  %v870_v29 = vadd.f32 %v811_v25, %v369_v17  ;;  %v749_v32 = vpop.f32.mrf.mxu0  ;;  %v813_v33 = vpop.f32.mrf.mxu1 }
 0x114   : > { %v997_v30 = vadd.f32 %v1811_v5, %v958_v22  ;;  %1189 = vst.msk [vmem:[%s1827_s28 + $0xc] sm:$0xf] %vm1185_vm4, %v1455_v26  ;;  %v357_v32 = vld [vmem:[#allocation2 + $0x58] sm:$0xff] }
 0x115   : > { %v1013_v31 = vadd.f32 %v1811_v5, %v974_v23  ;;  %1205 = vst.msk [vmem:[%s1827_s28 + $0x4c] sm:$0xf] %vm1185_vm4, %v1471_v27  ;;  %v920_v36 = vld [vmem:[#allocation2 + $0x28] sm:$0xff]  ;;  %v752_v42 = vpop.f32.mrf.mxu0  ;;  %v816_v43 = vpop.f32.mrf.mxu1  ;;  %v373_v33 = vld [vmem:[#allocation2 + $0xd8] sm:$0xff] }
 0x116   : > { %v936_v37 = vld [vmem:[#allocation2 + $0xa8] sm:$0xff]  ;;  %887 = vst.msk [vmem:[#allocation2 + $0x38] sm:$0xff] %vm313_vm0, %v854_v28  ;;  %903 = vst.msk [vmem:[#allocation2 + $0xb8] sm:$0xff] %vm313_vm0, %v870_v29  ;;  %v1029_v38 = vmax.f32 %v997_v30, 0.0  ;;  %v959_v40 = vmul.f32 %v1806_v2, %v920_v36  ;;  %v855_v44 = vadd.f32 %v752_v42, %v354_v34  ;;  %v871_v45 = vadd.f32 %v816_v43, %v370_v35 }
 0x117   : > { %v1045_v39 = vmax.f32 %v1013_v31, 0.0  ;;  %v975_v41 = vmul.f32 %v1806_v2, %v936_v37  ;;  %v754_v50 = vpop.f32.mrf.mxu0  ;;  %v818_v51 = vpop.f32.mrf.mxu1 }
 0x118   : > { %v1456_v46 = vpack.c.bf16 %v1029_v38, %v1029_v38  ;;  %v998_v48 = vadd.f32 %v1811_v5, %v959_v40  ;;  %888 = vst.msk [vmem:[#allocation2 + $0x40] sm:$0xff] %vm313_vm0, %v855_v44  ;;  %904 = vst.msk [vmem:[#allocation2 + $0xc0] sm:$0xff] %vm313_vm0, %v871_v45  ;;  %v358_v50 = vld [vmem:[#allocation2 + $0x60] sm:$0xff] }
 0x119   : > { %v1472_v47 = vpack.c.bf16 %v1045_v39, %v1045_v39  ;;  %v1014_v49 = vadd.f32 %v1811_v5, %v975_v41  ;;  %v921_v54 = vld [vmem:[#allocation2 + $0x30] sm:$0xff]  ;;  %v755_v60 = vpop.f32.mrf.mxu0  ;;  %v819_v61 = vpop.f32.mrf.mxu1  ;;  %v374_v51 = vld [vmem:[#allocation2 + $0xe0] sm:$0xff] }
 0x11a   : > { %v937_v55 = vld [vmem:[#allocation2 + $0xb0] sm:$0xff]  ;;  %1190 = vst.msk [vmem:[%s1827_s28 + $0x10] sm:$0xf] %vm1185_vm4, %v1456_v46  ;;  %v1030_v56 = vmax.f32 %v998_v48, 0.0  ;;  %v960_v58 = vmul.f32 %v1806_v2, %v921_v54  ;;  %v856_v62 = vadd.f32 %v755_v60, %v355_v52  ;;  %v872_v63 = vadd.f32 %v819_v61, %v371_v53 }
 0x11b   : > { %1206 = vst.msk [vmem:[%s1827_s28 + $0x50] sm:$0xf] %vm1185_vm4, %v1472_v47  ;;  %v1046_v57 = vmax.f32 %v1014_v49, 0.0  ;;  %v976_v59 = vmul.f32 %v1806_v2, %v937_v55  ;;  %v757_v9 = vpop.f32.mrf.mxu0  ;;  %v821_v10 = vpop.f32.mrf.mxu1 }
 0x11c   : > { %v1457_v1 = vpack.c.bf16 %v1030_v56, %v1030_v56  ;;  %v999_v4 = vadd.f32 %v1811_v5, %v960_v58  ;;  %889 = vst.msk [vmem:[#allocation2 + $0x48] sm:$0xff] %vm313_vm0, %v856_v62  ;;  %905 = vst.msk [vmem:[#allocation2 + $0xc8] sm:$0xff] %vm313_vm0, %v872_v63 }
 0x11d   : > { %v1473_v3 = vpack.c.bf16 %v1046_v57, %v1046_v57  ;;  %v1015_v6 = vadd.f32 %v1811_v5, %v976_v59  ;;  %v922_v7 = vld [vmem:[#allocation2 + $0x38] sm:$0xff]  ;;  %v760_v16 = vpop.f32.mrf.mxu0  ;;  %v824_v17 = vpop.f32.mrf.mxu1 }
 0x11e   : > { %v938_v8 = vld [vmem:[#allocation2 + $0xb8] sm:$0xff]  ;;  %v961_v12 = vmul.f32 %v1806_v2, %v922_v7  ;;  %1191 = vst.msk [vmem:[%s1827_s28 + $0x14] sm:$0xf] %vm1185_vm4, %v1457_v1  ;;  %v1031_v14 = vmax.f32 %v999_v4, 0.0  ;;  %v857_v20 = vadd.f32 %v760_v16, %v356_v0  ;;  %v873_v21 = vadd.f32 %v824_v17, %v372_v11  ;;  %v375_v7 = vld [vmem:[#allocation2 + $0xe8] sm:$0xff] }
 0x11f   : > { %v977_v13 = vmul.f32 %v1806_v2, %v938_v8  ;;  %1207 = vst.msk [vmem:[%s1827_s28 + $0x54] sm:$0xf] %vm1185_vm4, %v1473_v3  ;;  %v1047_v15 = vmax.f32 %v1015_v6, 0.0  ;;  %v923_v24 = vld [vmem:[#allocation2 + $0x40] sm:$0xff]  ;;  %v762_v26 = vpop.f32.mrf.mxu0  ;;  %v826_v27 = vpop.f32.mrf.mxu1  ;;  %v359_v6 = vld [vmem:[#allocation2 + $0x68] sm:$0xff] }
 0x120   : > { %v1000_v18 = vadd.f32 %v1811_v5, %v961_v12  ;;  %v1458_v22 = vpack.c.bf16 %v1031_v14, %v1031_v14  ;;  %v939_v25 = vld [vmem:[#allocation2 + $0xc0] sm:$0xff]  ;;  %v962_v30 = vmul.f32 %v1806_v2, %v923_v24  ;;  %890 = vst.msk [vmem:[#allocation2 + $0x50] sm:$0xff] %vm313_vm0, %v857_v20  ;;  %906 = vst.msk [vmem:[#allocation2 + $0xd0] sm:$0xff] %vm313_vm0, %v873_v21 }
 0x121   : > { %v1016_v19 = vadd.f32 %v1811_v5, %v977_v13  ;;  %v1474_v23 = vpack.c.bf16 %v1047_v15, %v1047_v15  ;;  %v978_v31 = vmul.f32 %v1806_v2, %v939_v25  ;;  %v763_v34 = vpop.f32.mrf.mxu0  ;;  %v827_v35 = vpop.f32.mrf.mxu1 }
 0x122   : > { %v1032_v28 = vmax.f32 %v1000_v18, 0.0  ;;  %1192 = vst.msk [vmem:[%s1827_s28 + $0x18] sm:$0xf] %vm1185_vm4, %v1458_v22  ;;  %v1001_v38 = vadd.f32 %v1811_v5, %v962_v30  ;;  %v858_v42 = vadd.f32 %v763_v34, %v357_v32  ;;  %v874_v43 = vadd.f32 %v827_v35, %v373_v33  ;;  %v360_v18 = vld [vmem:[#allocation2 + $0x70] sm:$0xff] }
 0x123   : > { %v1048_v29 = vmax.f32 %v1016_v19, 0.0  ;;  %1208 = vst.msk [vmem:[%s1827_s28 + $0x58] sm:$0xf] %vm1185_vm4, %v1474_v23  ;;  %v1017_v39 = vadd.f32 %v1811_v5, %v978_v31  ;;  %v924_v40 = vld [vmem:[#allocation2 + $0x48] sm:$0xff]  ;;  %v765_v44 = vpop.f32.mrf.mxu0  ;;  %v829_v45 = vpop.f32.mrf.mxu1  ;;  %v376_v19 = vld [vmem:[#allocation2 + $0xf0] sm:$0xff] }
 0x124   : > { %v1459_v36 = vpack.c.bf16 %v1032_v28, %v1032_v28  ;;  %v940_v41 = vld [vmem:[#allocation2 + $0xc8] sm:$0xff]  ;;  %v1033_v46 = vmax.f32 %v1001_v38, 0.0  ;;  %v963_v48 = vmul.f32 %v1806_v2, %v924_v40  ;;  %891 = vst.msk [vmem:[#allocation2 + $0x58] sm:$0xff] %vm313_vm0, %v858_v42  ;;  %907 = vst.msk [vmem:[#allocation2 + $0xd8] sm:$0xff] %vm313_vm0, %v874_v43 }
 0x125   : > { %v1475_v37 = vpack.c.bf16 %v1048_v29, %v1048_v29  ;;  %v1049_v47 = vmax.f32 %v1017_v39, 0.0  ;;  %v979_v49 = vmul.f32 %v1806_v2, %v940_v41  ;;  %v768_v52 = vpop.f32.mrf.mxu0  ;;  %v832_v53 = vpop.f32.mrf.mxu1 }
 0x126   : > { %1193 = vst.msk [vmem:[%s1827_s28 + $0x1c] sm:$0xf] %vm1185_vm4, %v1459_v36  ;;  %v1460_v54 = vpack.c.bf16 %v1033_v46, %v1033_v46  ;;  %v1002_v56 = vadd.f32 %v1811_v5, %v963_v48  ;;  %v859_v60 = vadd.f32 %v768_v52, %v358_v50  ;;  %v875_v61 = vadd.f32 %v832_v53, %v374_v51  ;;  %v361_v36 = vld [vmem:[#allocation2 + $0x78] sm:$0xff] }
 0x127   : > { %1209 = vst.msk [vmem:[%s1827_s28 + $0x5c] sm:$0xf] %vm1185_vm4, %v1475_v37  ;;  %v1476_v55 = vpack.c.bf16 %v1049_v47, %v1049_v47  ;;  %v1018_v57 = vadd.f32 %v1811_v5, %v979_v49  ;;  %v925_v58 = vld [vmem:[#allocation2 + $0x50] sm:$0xff]  ;;  %v770_v62 = vpop.f32.mrf.mxu0  ;;  %v834_v63 = vpop.f32.mrf.mxu1  ;;  %v377_v37 = vld [vmem:[#allocation2 + $0xf8] sm:$0xff] }
 0x128   : > { %v941_v59 = vld [vmem:[#allocation2 + $0xd0] sm:$0xff]  ;;  %1194 = vst.msk [vmem:[%s1827_s28 + $0x20] sm:$0xf] %vm1185_vm4, %v1460_v54  ;;  %v1034_v0 = vmax.f32 %v1002_v56, 0.0  ;;  %v964_v3 = vmul.f32 %v1806_v2, %v925_v58 }
 0x129   : > { %1210 = vst.msk [vmem:[%s1827_s28 + $0x60] sm:$0xf] %vm1185_vm4, %v1476_v55  ;;  %v1050_v1 = vmax.f32 %v1018_v57, 0.0  ;;  %v980_v4 = vmul.f32 %v1806_v2, %v941_v59  ;;  %v771_v8 = vpop.f32.mrf.mxu0  ;;  %v835_v9 = vpop.f32.mrf.mxu1 }
 0x12a   : > { %892 = vst.msk [vmem:[#allocation2 + $0x60] sm:$0xff] %vm313_vm0, %v859_v60  ;;  %908 = vst.msk [vmem:[#allocation2 + $0xe0] sm:$0xff] %vm313_vm0, %v875_v61  ;;  %v1461_v10 = vpack.c.bf16 %v1034_v0, %v1034_v0  ;;  %v1003_v12 = vadd.f32 %v1811_v5, %v964_v3  ;;  %v860_v14 = vadd.f32 %v771_v8, %v359_v6 }
 0x12b   : > { %v1477_v11 = vpack.c.bf16 %v1050_v1, %v1050_v1  ;;  %v1019_v13 = vadd.f32 %v1811_v5, %v980_v4  ;;  %v876_v15 = vadd.f32 %v835_v9, %v375_v7  ;;  %v773_v16 = vpop.f32.mrf.mxu0  ;;  %v837_v17 = vpop.f32.mrf.mxu1  ;;  %v926_v22 = vld [vmem:[#allocation2 + $0x58] sm:$0xff] }
 0x12c   : > { %1195 = vst.msk [vmem:[%s1827_s28 + $0x24] sm:$0xf] %vm1185_vm4, %v1461_v10  ;;  %v1035_v20 = vmax.f32 %v1003_v12, 0.0  ;;  %v942_v23 = vld [vmem:[#allocation2 + $0xd8] sm:$0xff]  ;;  %v965_v24 = vmul.f32 %v1806_v2, %v926_v22 }
 0x12d   : > { %1211 = vst.msk [vmem:[%s1827_s28 + $0x64] sm:$0xf] %vm1185_vm4, %v1477_v11  ;;  %v1051_v21 = vmax.f32 %v1019_v13, 0.0  ;;  %v981_v25 = vmul.f32 %v1806_v2, %v942_v23  ;;  %v776_v26 = vpop.f32.mrf.mxu0  ;;  %v840_v27 = vpop.f32.mrf.mxu1 }
 0x12e   : > { %893 = vst.msk [vmem:[#allocation2 + $0x68] sm:$0xff] %vm313_vm0, %v860_v14  ;;  %909 = vst.msk [vmem:[#allocation2 + $0xe8] sm:$0xff] %vm313_vm0, %v876_v15  ;;  %v1462_v28 = vpack.c.bf16 %v1035_v20, %v1035_v20  ;;  %v861_v30 = vadd.f32 %v776_v26, %v360_v18  ;;  %v877_v31 = vadd.f32 %v840_v27, %v376_v19 }
 0x12f   : > { %v1478_v29 = vpack.c.bf16 %v1051_v21, %v1051_v21  ;;  %v1004_v32 = vadd.f32 %v1811_v5, %v965_v24  ;;  %v1020_v33 = vadd.f32 %v1811_v5, %v981_v25  ;;  %v778_v34 = vpop.f32.mrf.mxu0  ;;  %v842_v35 = vpop.f32.mrf.mxu1 }
 0x130   : > { %1196 = vst.msk [vmem:[%s1827_s28 + $0x28] sm:$0xf] %vm1185_vm4, %v1462_v28 }
 0x131   : > { %1212 = vst.msk [vmem:[%s1827_s28 + $0x68] sm:$0xf] %vm1185_vm4, %v1478_v29  ;;  %v927_v38 = vld [vmem:[#allocation2 + $0x60] sm:$0xff]  ;;  %v1036_v40 = vmax.f32 %v1004_v32, 0.0  ;;  %v1052_v41 = vmax.f32 %v1020_v33, 0.0  ;;  %v779_v44 = vpop.f32.mrf.mxu0  ;;  %v843_v45 = vpop.f32.mrf.mxu1 }
 0x132   : > { %v943_v39 = vld [vmem:[#allocation2 + $0xe0] sm:$0xff]  ;;  %894 = vst.msk [vmem:[#allocation2 + $0x70] sm:$0xff] %vm313_vm0, %v861_v30  ;;  %910 = vst.msk [vmem:[#allocation2 + $0xf0] sm:$0xff] %vm313_vm0, %v877_v31  ;;  %v966_v42 = vmul.f32 %v1806_v2, %v927_v38  ;;  %v862_v46 = vadd.f32 %v779_v44, %v361_v36  ;;  %v878_v47 = vadd.f32 %v843_v45, %v377_v37 }
 0x133   : > { %v982_v43 = vmul.f32 %v1806_v2, %v943_v39  ;;  %v1463_v48 = vpack.c.bf16 %v1036_v40, %v1036_v40  ;;  %v1479_v49 = vpack.c.bf16 %v1052_v41, %v1052_v41  ;;  %v781_v52 = vpop.f32.mrf.mxu0  ;;  %v845_v53 = vpop.f32.mrf.mxu1 }
 0x134   : > { %v1005_v50 = vadd.f32 %v1811_v5, %v966_v42  ;;  %895 = vst.msk [vmem:[#allocation2 + $0x78] sm:$0xff] %vm313_vm0, %v862_v46  ;;  %911 = vst.msk [vmem:[#allocation2 + $0xf8] sm:$0xff] %vm313_vm0, %v878_v47 }
 0x135   : > { %v1021_v51 = vadd.f32 %v1811_v5, %v982_v43  ;;  %v928_v54 = vld [vmem:[#allocation2 + $0x68] sm:$0xff]  ;;  %1197 = vst.msk [vmem:[%s1827_s28 + $0x2c] sm:$0xf] %vm1185_vm4, %v1463_v48  ;;  %1213 = vst.msk [vmem:[%s1827_s28 + $0x6c] sm:$0xf] %vm1185_vm4, %v1479_v49 }
 0x136   : > { %v944_v55 = vld [vmem:[#allocation2 + $0xe8] sm:$0xff]  ;;  %v1037_v56 = vmax.f32 %v1005_v50, 0.0  ;;  %v967_v58 = vmul.f32 %v1806_v2, %v928_v54 }
 0x137   : > { %v1053_v57 = vmax.f32 %v1021_v51, 0.0  ;;  %v983_v59 = vmul.f32 %v1806_v2, %v944_v55 }
 0x138   : > { %v1464_v60 = vpack.c.bf16 %v1037_v56, %v1037_v56  ;;  %v1006_v62 = vadd.f32 %v1811_v5, %v967_v58 }
 0x139   : > { %v1480_v61 = vpack.c.bf16 %v1053_v57, %v1053_v57  ;;  %v1022_v63 = vadd.f32 %v1811_v5, %v983_v59  ;;  %v929_v0 = vld [vmem:[#allocation2 + $0x70] sm:$0xff] }
 0x13a   : > { %v945_v1 = vld [vmem:[#allocation2 + $0xf0] sm:$0xff]  ;;  %v968_v3 = vmul.f32 %v1806_v2, %v929_v0  ;;  %1198 = vst.msk [vmem:[%s1827_s28 + $0x30] sm:$0xf] %vm1185_vm4, %v1464_v60  ;;  %v1038_v6 = vmax.f32 %v1006_v62, 0.0 }
 0x13b   : > { %v984_v4 = vmul.f32 %v1806_v2, %v945_v1  ;;  %1214 = vst.msk [vmem:[%s1827_s28 + $0x70] sm:$0xf] %vm1185_vm4, %v1480_v61  ;;  %v1054_v7 = vmax.f32 %v1022_v63, 0.0  ;;  %v930_v12 = vld [vmem:[#allocation2 + $0x78] sm:$0xff] }
 0x13c   : > { %v1007_v8 = vadd.f32 %v1811_v5, %v968_v3  ;;  %v1465_v10 = vpack.c.bf16 %v1038_v6, %v1038_v6  ;;  %v946_v13 = vld [vmem:[#allocation2 + $0xf8] sm:$0xff]  ;;  %v969_v16 = vmul.f32 %v1806_v2, %v930_v12 }
 0x13d   : > { %v1023_v9 = vadd.f32 %v1811_v5, %v984_v4  ;;  %v1481_v11 = vpack.c.bf16 %v1054_v7, %v1054_v7  ;;  %v985_v17 = vmul.f32 %v1806_v2, %v946_v13 }
 0x13e   : > { %v1039_v14 = vmax.f32 %v1007_v8, 0.0  ;;  %1199 = vst.msk [vmem:[%s1827_s28 + $0x34] sm:$0xf] %vm1185_vm4, %v1465_v10  ;;  %v1008_v20 = vadd.f32 %v1811_v5, %v969_v16 }
 0x13f   : > { %v1055_v15 = vmax.f32 %v1023_v9, 0.0  ;;  %1215 = vst.msk [vmem:[%s1827_s28 + $0x74] sm:$0xf] %vm1185_vm4, %v1481_v11  ;;  %v1024_v21 = vadd.f32 %v1811_v5, %v985_v17 }
 0x140   : > { %v1466_v18 = vpack.c.bf16 %v1039_v14, %v1039_v14  ;;  %v1040_v22 = vmax.f32 %v1008_v20, 0.0 }
 0x141   : > { %v1482_v19 = vpack.c.bf16 %v1055_v15, %v1055_v15  ;;  %v1056_v23 = vmax.f32 %v1024_v21, 0.0 }
 0x142   : > { %1200 = vst.msk [vmem:[%s1827_s28 + $0x38] sm:$0xf] %vm1185_vm4, %v1466_v18  ;;  %v1467_v24 = vpack.c.bf16 %v1040_v22, %v1040_v22 }
 0x143   : > { %1216 = vst.msk [vmem:[%s1827_s28 + $0x78] sm:$0xf] %vm1185_vm4, %v1482_v19  ;;  %v1483_v25 = vpack.c.bf16 %v1056_v23, %v1056_v23 }
 0x144   : > { %1201 = vst.msk [vmem:[%s1827_s28 + $0x3c] sm:$0xf] %vm1185_vm4, %v1467_v24 }
 0x145   : > { %1217 = vst.msk [vmem:[%s1827_s28 + $0x7c] sm:$0xf] %vm1185_vm4, %v1483_v25 }
 0x146 PF: > { %s14_s17 = sadd.s32 1, %s1611_s17   ;;  %s1989_s15 = smov %s1607_s16 }
 0x147   : > { %p11_p5 = scmp.ge.s32.totalorder %s14_s17, 4   ;;  %s1990_s16 = smov %s1992_s18 }
 0x149   :  { %13 = sbr.rel (!%p11_p5) target bundleno = 2 (0x2), region = 83 }

// kernel: resnet18_forward.25
= control target key start
LH: loop header
LB: loop body
LE: loop exit
PB: predicated region body
PF: predicated region fallthrough
CT: control target
= control target key end

     0   :  { %vm22_vm0 = vcmask 523264   ;;  %vm1084_vm1 = vcmask 519168   ;;  %s1939_s1 = inlined_call_operand.vmem [shape: bf16[576,64], index: 1, kind: input, shape index: {}]   ;;  %s1940_s0 = inlined_call_operand.vmem [shape: bf16[128,576], index: 0, kind: input, shape index: {}]   ;;  %s1941_s2 = inlined_call_operand.vmem [shape: f32[1,64], index: 2, kind: input, shape index: {}]   ;;  %s1942_s3 = inlined_call_operand.vmem [shape: f32[1,64], index: 3, kind: input, shape index: {}]   ;;  %s1943_s4 = inlined_call_operand.vmem [shape: bf16[128,64], index: 4, kind: output, shape index: {}]  }
   0x1   :  { %v1396_v0 = vld [vmem:[%s1939_s1 + $0x78] sm:$0xff]   ;;  %v1400_v4 = vld [vmem:[%s1939_s1 + $0x70] sm:$0xff]   ;;  %v1404_v8 = vld [vmem:[%s1939_s1 + $0x68] sm:$0xff]  }
   0x2   :  { %v1397_v1 = vld [vmem:[%s1939_s1 + $0xf8] sm:$0xff]   ;;  %1223 = vmatprep.subr.bf16.mxu0 %v1396_v0  ;;  %v1401_v5 = vld [vmem:[%s1939_s1 + $0xf0] sm:$0xff]   ;;  %v1405_v9 = vld [vmem:[%s1939_s1 + $0xe8] sm:$0xff]  }
   0x3   :  { %v1398_v2 = vld [vmem:[%s1939_s1 + $0x38] sm:$0xff]   ;;  %1287 = vmatprep.subr.bf16.mxu1 %v1397_v1  ;;  %v1402_v6 = vld [vmem:[%s1939_s1 + $0x30] sm:$0xff]   ;;  %v1406_v10 = vld [vmem:[%s1939_s1 + $0x28] sm:$0xff]  }
   0x4   :  { %v1399_v3 = vld [vmem:[%s1939_s1 + $0xb8] sm:$0xff]   ;;  %1224 = vmatpush3.bf16.msra.mxu0 %v1398_v2  ;;  %v1403_v7 = vld [vmem:[%s1939_s1 + $0xb0] sm:$0xff]   ;;  %v1407_v11 = vld [vmem:[%s1939_s1 + $0xa8] sm:$0xff]  }
   0x5   :  { %1288 = vmatpush3.bf16.msra.mxu1 %v1399_v3  ;;  %1225 = vmatprep.subr.bf16.mxu0 %v1400_v4  ;;  %v1408_v12 = vld [vmem:[%s1939_s1 + $0x60] sm:$0xff]   ;;  %v1412_v16 = vld [vmem:[%s1939_s1 + $0x58] sm:$0xff]   ;;  %v1416_v20 = vld [vmem:[%s1939_s1 + $0x50] sm:$0xff]  }
   0x6   :  { %1289 = vmatprep.subr.bf16.mxu1 %v1401_v5  ;;  %v1409_v13 = vld [vmem:[%s1939_s1 + $0xe0] sm:$0xff]   ;;  %v1413_v17 = vld [vmem:[%s1939_s1 + $0xd8] sm:$0xff]   ;;  %v1417_v21 = vld [vmem:[%s1939_s1 + $0xd0] sm:$0xff]  }
   0x7   :  { %v1410_v14 = vld [vmem:[%s1939_s1 + $0x20] sm:$0xff]   ;;  %v1414_v18 = vld [vmem:[%s1939_s1 + $0x18] sm:$0xff]   ;;  %v1418_v22 = vld [vmem:[%s1939_s1 + $0x10] sm:$0xff]  }
   0x8   :  { %1226 = vmatpush3.bf16.msra.mxu0 %v1402_v6  ;;  %v1411_v15 = vld [vmem:[%s1939_s1 + $0xa0] sm:$0xff]   ;;  %v1415_v19 = vld [vmem:[%s1939_s1 + $0x98] sm:$0xff]   ;;  %v1419_v23 = vld [vmem:[%s1939_s1 + $0x90] sm:$0xff]  }
   0x9   :  { %1290 = vmatpush3.bf16.msra.mxu1 %v1403_v7  ;;  %1227 = vmatprep.subr.bf16.mxu0 %v1404_v8  ;;  %v1420_v24 = vld [vmem:[%s1939_s1 + $0x48] sm:$0xff]   ;;  %v1424_v28 = vld [vmem:[%s1939_s1 + $0x40] sm:$0xff]   ;;  %v1434_v36 = vld [vmem:[%s1939_s1 + $0x118] sm:$0xff]  }
   0xa   :  { %1291 = vmatprep.subr.bf16.mxu1 %v1405_v9  ;;  %v1421_v25 = vld [vmem:[%s1939_s1 + $0xc8] sm:$0xff]   ;;  %v1425_v29 = vld [vmem:[%s1939_s1 + $0xc0] sm:$0xff]   ;;  %v1447_v42 = vld [vmem:[%s1939_s1 + $0x110] sm:$0xff]  }
   0xb   :  { %v1422_v26 = vld [vmem:[%s1939_s1 + $0x8] sm:$0xff]   ;;  %v1426_v30 = vld [vmem:[%s1939_s1] sm:$0xff]   ;;  %v1443_v43 = vld [vmem:[%s1940_s0 + $0x5c] ss:$20 sps:$4 sm:$0xff]  }
   0xc   :  { %1228 = vmatpush3.bf16.msra.mxu0 %v1406_v10  ;;  %v1423_v27 = vld [vmem:[%s1939_s1 + $0x88] sm:$0xff]   ;;  %v1427_v31 = vld [vmem:[%s1939_s1 + $0x80] sm:$0xff]   ;;  %v1448_v47 = vld [vmem:[%s1940_s0 + $0x7c] ss:$20 sps:$4 sm:$0xff]  }
   0xd   :  { %1292 = vmatpush3.bf16.msra.mxu1 %v1407_v11  ;;  %1229 = vmatprep.subr.bf16.mxu0 %v1408_v12  ;;  %v1428_v32 = vld [vmem:[%s1940_s0] ss:$20 sps:$4 sm:$0xff]   ;;  %v1430_v33 = vld [vmem:[%s1940_s0 + $0x4] ss:$20 sps:$4 sm:$0xff]   ;;  %v1431_v34 = vld [vmem:[%s1940_s0 + $0x8] ss:$20 sps:$4 sm:$0xff]  }
   0xe   :  { %1293 = vmatprep.subr.bf16.mxu1 %v1409_v13  ;;  %v1433_v35 = vld [vmem:[%s1940_s0 + $0xc] ss:$20 sps:$4 sm:$0xff]   ;;  %648 = vmatprep.mubr.bf16.mxu0 %v1430_v33  ;;  %v1437_v38 = vld [vmem:[%s1940_s0 + $0x34] ss:$20 sps:$4 sm:$0xff]   ;;  %v1440_v40 = vld [vmem:[%s1940_s0 + $0x30] ss:$20 sps:$4 sm:$0xff]  }
   0xf   :  { %745 = vmatprep.mubr.bf16.mxu1 %v1433_v35  ;;  %v1435_v37 = vld [vmem:[%s1940_s0 + $0x2c] ss:$20 sps:$4 sm:$0xff]   ;;  %v1439_v39 = vld [vmem:[%s1940_s0 + $0x28] ss:$20 sps:$4 sm:$0xff]   ;;  %v1445_v44 = vld [vmem:[%s1940_s0 + $0x50] ss:$20 sps:$4 sm:$0xff]  }
  0x10   :  { %1230 = vmatpush3.bf16.msra.mxu0 %v1410_v14  ;;  %v1441_v41 = vld [vmem:[%s1940_s0 + $0x54] ss:$20 sps:$4 sm:$0xff]   ;;  %v1446_v45 = vld [vmem:[%s1940_s0 + $0x58] ss:$20 sps:$4 sm:$0xff]   ;;  %v1473_v49 = vld [vmem:[%s1939_s1 + $0x100] sm:$0xff]   ;;  %v1488_v12 = vmov 0.0  }
  0x11   :  { %1294 = vmatpush3.bf16.msra.mxu1 %v1411_v15  ;;  %1231 = vmatprep.subr.bf16.mxu0 %v1412_v16  ;;  %v1460_v46 = vld [vmem:[%s1939_s1 + $0x108] sm:$0xff]   ;;  %v1450_v48 = vld [vmem:[%s1940_s0 + $0x84] ss:$20 sps:$4 sm:$0xff]   ;;  %v1453_v51 = vld [vmem:[%s1940_s0 + $0x80] ss:$20 sps:$4 sm:$0xff]   ;;  %25 = vst.msk [vmem:[#allocation2 + $0x10] sm:$0xff] %vm22_vm0, %v1488_v12 }
  0x12   :  { %1295 = vmatprep.subr.bf16.mxu1 %v1413_v17  ;;  %v1452_v50 = vld [vmem:[%s1940_s0 + $0x78] ss:$20 sps:$4 sm:$0xff]   ;;  %v1458_v54 = vld [vmem:[%s1940_s0 + $0xa0] ss:$20 sps:$4 sm:$0xff]   ;;  %v1459_v55 = vld [vmem:[%s1940_s0 + $0xa8] ss:$20 sps:$4 sm:$0xff]  }
  0x13   :  { %v1454_v52 = vld [vmem:[%s1940_s0 + $0xa4] ss:$20 sps:$4 sm:$0xff]   ;;  %v1456_v53 = vld [vmem:[%s1940_s0 + $0xac] ss:$20 sps:$4 sm:$0xff]   ;;  %v1463_v57 = vld [vmem:[%s1940_s0 + $0xd4] ss:$20 sps:$4 sm:$0xff]  }
  0x14   :  { %1232 = vmatpush3.bf16.msra.mxu0 %v1414_v18  ;;  %v1461_v56 = vld [vmem:[%s1940_s0 + $0xcc] ss:$20 sps:$4 sm:$0xff]   ;;  %v1465_v58 = vld [vmem:[%s1940_s0 + $0xc8] ss:$20 sps:$4 sm:$0xff]   ;;  %v1466_v59 = vld [vmem:[%s1940_s0 + $0xd0] ss:$20 sps:$4 sm:$0xff]  }
  0x15   :  { %1296 = vmatpush3.bf16.msra.mxu1 %v1415_v19  ;;  %1233 = vmatprep.subr.bf16.mxu0 %v1416_v20  ;;  %v1467_v60 = vld [vmem:[%s1940_s0 + $0xf4] ss:$20 sps:$4 sm:$0xff]   ;;  %v1469_v61 = vld [vmem:[%s1940_s0 + $0xfc] ss:$20 sps:$4 sm:$0xff]   ;;  %v1472_v63 = vld [vmem:[%s1940_s0 + $0xf8] ss:$20 sps:$4 sm:$0xff]  }
  0x16   :  { %1297 = vmatprep.subr.bf16.mxu1 %v1417_v21  ;;  %v1471_v62 = vld [vmem:[%s1940_s0 + $0xf0] ss:$20 sps:$4 sm:$0xff]   ;;  %v1478_v2 = vld [vmem:[%s1940_s0 + $0x118] ss:$20 sps:$4 sm:$0xff]   ;;  %v1479_v3 = vld [vmem:[%s1940_s0 + $0x120] ss:$20 sps:$4 sm:$0xff]  }
  0x17   :  { %v1474_v0 = vld [vmem:[%s1940_s0 + $0x11c] ss:$20 sps:$4 sm:$0xff]   ;;  %v1476_v1 = vld [vmem:[%s1940_s0 + $0x124] ss:$20 sps:$4 sm:$0xff]   ;;  %v1484_v8 = vld [vmem:[%s1940_s0 + $0x60] ss:$20 sps:$4 sm:$0xff]  }
  0x18   :  { %1234 = vmatpush3.bf16.msra.mxu0 %v1418_v22  ;;  %v1480_v4 = vld [vmem:[%s1940_s0 + $0x10] ss:$20 sps:$4 sm:$0xff]   ;;  %v1482_v6 = vld [vmem:[%s1940_s0 + $0x38] ss:$20 sps:$4 sm:$0xff]   ;;  %v1485_v9 = vld [vmem:[%s1940_s0 + $0x100] ss:$20 sps:$4 sm:$0xff]  }
  0x19   :  { %1298 = vmatpush3.bf16.msra.mxu1 %v1419_v23  ;;  %1235 = vmatprep.subr.bf16.mxu0 %v1420_v24  ;;  %v1481_v5 = vld [vmem:[%s1940_s0 + $0xb0] ss:$20 sps:$4 sm:$0xff]   ;;  %v1483_v7 = vld [vmem:[%s1940_s0 + $0xd8] ss:$20 sps:$4 sm:$0xff]   ;;  %v1486_v10 = vld [vmem:[%s1940_s0 + $0x88] ss:$20 sps:$4 sm:$0xff]  }
  0x1a   :  { %1299 = vmatprep.subr.bf16.mxu1 %v1421_v25  ;;  %v1487_v11 = vld [vmem:[%s1940_s0 + $0x128] ss:$20 sps:$4 sm:$0xff]   ;;  %23 = vst.msk [vmem:[#allocation2] sm:$0xff] %vm22_vm0, %v1488_v12  ;;  %24 = vst.msk [vmem:[#allocation2 + $0x8] sm:$0xff] %vm22_vm0, %v1488_v12 }
  0x1b   :  { %26 = vst.msk [vmem:[#allocation2 + $0x18] sm:$0xff] %vm22_vm0, %v1488_v12  ;;  %27 = vst.msk [vmem:[#allocation2 + $0x20] sm:$0xff] %vm22_vm0, %v1488_v12 }
  0x1c   :  { %1236 = vmatpush3.bf16.msra.mxu0 %v1422_v26  ;;  %28 = vst.msk [vmem:[#allocation2 + $0x28] sm:$0xff] %vm22_vm0, %v1488_v12  ;;  %29 = vst.msk [vmem:[#allocation2 + $0x30] sm:$0xff] %vm22_vm0, %v1488_v12 }
  0x1d   :  { %1300 = vmatpush3.bf16.msra.mxu1 %v1423_v27  ;;  %1237 = vmatprep.subr.bf16.mxu0 %v1424_v28  ;;  %30 = vst.msk [vmem:[#allocation2 + $0x38] sm:$0xff] %vm22_vm0, %v1488_v12  ;;  %31 = vst.msk [vmem:[#allocation2 + $0x40] sm:$0xff] %vm22_vm0, %v1488_v12 }
  0x1e   :  { %1301 = vmatprep.subr.bf16.mxu1 %v1425_v29  ;;  %32 = vst.msk [vmem:[#allocation2 + $0x48] sm:$0xff] %vm22_vm0, %v1488_v12  ;;  %33 = vst.msk [vmem:[#allocation2 + $0x50] sm:$0xff] %vm22_vm0, %v1488_v12 }
  0x1f   :  { %34 = vst.msk [vmem:[#allocation2 + $0x58] sm:$0xff] %vm22_vm0, %v1488_v12  ;;  %35 = vst.msk [vmem:[#allocation2 + $0x60] sm:$0xff] %vm22_vm0, %v1488_v12 }
  0x20   :  { %1238 = vmatpush3.bf16.msra.mxu0 %v1426_v30  ;;  %36 = vst.msk [vmem:[#allocation2 + $0x68] sm:$0xff] %vm22_vm0, %v1488_v12  ;;  %37 = vst.msk [vmem:[#allocation2 + $0x70] sm:$0xff] %vm22_vm0, %v1488_v12 }
  0x21   :  { %1302 = vmatpush3.bf16.msra.mxu1 %v1427_v31  ;;  %1363 = vmatprep.subr.bf16.mxu0 %v1434_v36  ;;  %38 = vst.msk [vmem:[#allocation2 + $0x78] sm:$0xff] %vm22_vm0, %v1488_v12 }
  0x22   :  { %1387 = vmatprep.subr.bf16.mxu1 %v1434_v36 }
  0x23   :  { %649 = vmatmul.mubr.bf16.vlgmr.msra.gmra.mxu0 %v1428_v32 }
  0x24   :  { %746 = vmatmul.mubr.bf16.vlgmr.msra.gmra.mxu1 %v1431_v34  ;;  %1364 = vmatpush3.bf16.msra.mxu0 %v1434_v36 }
  0x25   :  { %1391 = vmatpush3.bf16.msra.mxu1 %v1434_v36  ;;  %656 = vmatprep.mubr.bf16.mxu0 %v1435_v37 }
  0x26   :  { %753 = vmatprep.mubr.bf16.mxu1 %v1437_v38  ;;  %1365 = vmatprep.subr.bf16.mxu0 %v1447_v42 }
  0x27   :  { %1388 = vmatprep.subr.bf16.mxu1 %v1447_v42 }
  0x28   :  { %1366 = vmatpush3.bf16.msra.mxu0 %v1447_v42 }
  0x29   :  { %1392 = vmatpush3.bf16.msra.mxu1 %v1447_v42  ;;  %1367 = vmatprep.subr.bf16.mxu0 %v1460_v46 }
  0x2a   :  { %1389 = vmatprep.subr.bf16.mxu1 %v1460_v46 }
  0x2b   :  { %657 = vmatmul.mubr.bf16.gmra.mxu0 %v1439_v39 }
  0x2c   :  { %754 = vmatmul.mubr.bf16.gmra.mxu1 %v1440_v40  ;;  %664 = vmatprep.mubr.bf16.mxu0 %v1441_v41 }
  0x2d   :  { %761 = vmatprep.mubr.bf16.mxu1 %v1443_v43  ;;  %1368 = vmatpush3.bf16.msra.mxu0 %v1460_v46 }
  0x2e   :  { %1393 = vmatpush3.bf16.msra.mxu1 %v1460_v46  ;;  %1369 = vmatprep.subr.bf16.mxu0 %v1473_v49 }
  0x2f   :  { %1390 = vmatprep.subr.bf16.mxu1 %v1473_v49 }
  0x31   :  { %1370 = vmatpush3.bf16.msra.mxu0 %v1473_v49 }
  0x32   :  { %1394 = vmatpush3.bf16.msra.mxu1 %v1473_v49 }
  0x33   :  { %665 = vmatmul.mubr.bf16.gmra.mxu0 %v1445_v44 }
  0x34   :  { %762 = vmatmul.mubr.bf16.gmra.mxu1 %v1446_v45  ;;  %672 = vmatprep.mubr.bf16.mxu0 %v1448_v47 }
  0x35   :  { %769 = vmatprep.mubr.bf16.mxu1 %v1450_v48 }
  0x3b   :  { %673 = vmatmul.mubr.bf16.gmra.mxu0 %v1452_v50 }
  0x3c   :  { %770 = vmatmul.mubr.bf16.gmra.mxu1 %v1453_v51  ;;  %680 = vmatprep.mubr.bf16.mxu0 %v1454_v52 }
  0x3d   :  { %777 = vmatprep.mubr.bf16.mxu1 %v1456_v53 }
  0x43   :  { %681 = vmatmul.mubr.bf16.gmra.mxu0 %v1458_v54 }
  0x44   :  { %778 = vmatmul.mubr.bf16.gmra.mxu1 %v1459_v55  ;;  %688 = vmatprep.mubr.bf16.mxu0 %v1461_v56 }
  0x45   :  { %785 = vmatprep.mubr.bf16.mxu1 %v1463_v57 }
  0x4b   :  { %689 = vmatmul.mubr.bf16.gmra.mxu0 %v1465_v58 }
  0x4c   :  { %786 = vmatmul.mubr.bf16.gmra.mxu1 %v1466_v59  ;;  %696 = vmatprep.mubr.bf16.mxu0 %v1467_v60 }
  0x4d   :  { %793 = vmatprep.mubr.bf16.mxu1 %v1469_v61 }
  0x53   :  { %697 = vmatmul.mubr.bf16.gmra.mxu0 %v1471_v62 }
  0x54   :  { %794 = vmatmul.mubr.bf16.gmra.mxu1 %v1472_v63  ;;  %704 = vmatprep.mubr.bf16.mxu0 %v1474_v0 }
  0x55   :  { %801 = vmatprep.mubr.bf16.mxu1 %v1476_v1 }
  0x5b   :  { %705 = vmatmul.mubr.bf16.gmra.mxu0 %v1478_v2 }
  0x5c   :  { %802 = vmatmul.mubr.bf16.gmra.mxu1 %v1479_v3  ;;  %1371 = vmatprep.mubr.msk.bf16.mxu0 %vm22_vm0, %v1480_v4 }
  0x5d   :  { %1379 = vmatprep.mubr.msk.bf16.mxu1 %vm22_vm0, %v1481_v5 }
  0x63   :  { %1372 = vmatmul.mubr.msk.bf16.vlgmr.msra.gmra.mxu0 %vm22_vm0, %v1482_v6 }
  0x64   :  { %1380 = vmatmul.mubr.msk.bf16.vlgmr.msra.gmra.mxu1 %vm22_vm0, %v1483_v7  ;;  %1375 = vmatprep.mubr.msk.bf16.mxu0 %vm22_vm0, %v1484_v8 }
  0x65   :  { %1383 = vmatprep.mubr.msk.bf16.mxu1 %vm22_vm0, %v1485_v9 }
  0x6b   :  { %1376 = vmatmul.mubr.msk.bf16.gmra.mxu0 %vm22_vm0, %v1486_v10 }
  0x6c   :  { %1384 = vmatmul.mubr.msk.bf16.gmra.mxu1 %vm22_vm0, %v1487_v11 }
  0xe3   :  { %v1239_v13 = vpop.f32.mrf.mxu0 }
  0xe4   :  { %v1303_v14 = vpop.f32.mrf.mxu1 }
  0xe5   :  { %v1240_v15 = vpop.f32.mrf.mxu0 }
  0xe6   :  { %v1304_v16 = vpop.f32.mrf.mxu1  ;;  %v1241_v7 = vadd.f32 %v1240_v15, %v1239_v13 }
  0xe7   :  { %v1242_v17 = vpop.f32.mrf.mxu0  ;;  %v1305_v8 = vadd.f32 %v1304_v16, %v1303_v14 }
  0xe8   :  { %v1306_v18 = vpop.f32.mrf.mxu1 }
  0xe9   :  { %v1243_v19 = vpop.f32.mrf.mxu0  ;;  %v748_v16 = vadd.f32 %v1305_v8, %v1241_v7 }
  0xea   :  { %v1307_v20 = vpop.f32.mrf.mxu1  ;;  %v1244_v10 = vadd.f32 %v1243_v19, %v1242_v17 }
  0xeb   :  { %v1245_v21 = vpop.f32.mrf.mxu0  ;;  %v1308_v11 = vadd.f32 %v1307_v20, %v1306_v18 }
  0xec   :  { %v1309_v22 = vpop.f32.mrf.mxu1 }
  0xed   :  { %v1246_v23 = vpop.f32.mrf.mxu0  ;;  %v751_v17 = vadd.f32 %v1308_v11, %v1244_v10 }
  0xee   :  { %v1310_v24 = vpop.f32.mrf.mxu1  ;;  %v1247_v12 = vadd.f32 %v1246_v23, %v1245_v21  ;;  %v41_v21 = vld [vmem:[#allocation2 + $0x10] sm:$0xff] }
  0xef   :  { %v1248_v25 = vpop.f32.mrf.mxu0 }
  0xf0   :  { %v1312_v26 = vpop.f32.mrf.mxu1 }
  0xf1   :  { %v1249_v27 = vpop.f32.mrf.mxu0 }
  0xf2   :  { %v1313_v28 = vpop.f32.mrf.mxu1 }
  0xf3   :  { %v1251_v29 = vpop.f32.mrf.mxu0 }
  0xf4   :  { %v1315_v30 = vpop.f32.mrf.mxu1 }
  0xf5   :  { %v1252_v31 = vpop.f32.mrf.mxu0 }
  0xf6   :  { %v1316_v32 = vpop.f32.mrf.mxu1 }
  0xf7   :  { %v1766_v33 = vpop.f32.mrf.mxu0 }
  0xf8   :  { %v1768_v34 = vpop.f32.mrf.mxu1 }
  0xf9   :  { %1944 = vst [vmem:[#allocation3_spill] sm:$0xff] %v1768_v34  ;;  %v1770_v35 = vpop.f32.mrf.mxu0 }
  0xfa   :  { %1945 = vst [vmem:[#allocation4_spill] sm:$0xff] %v1770_v35  ;;  %v1772_v36 = vpop.f32.mrf.mxu1 }
  0xfb   :  { %1946 = vst [vmem:[#allocation5_spill] sm:$0xff] %v1772_v36  ;;  %v1257_v37 = vpop.f32.mrf.mxu0  ;;  %v1311_v36 = vadd.f32 %v1310_v24, %v1309_v22 }
  0xfc   :  { %v1321_v38 = vpop.f32.mrf.mxu1 }
  0xfd   :  { %v1258_v39 = vpop.f32.mrf.mxu0  ;;  %v756_v15 = vadd.f32 %v1311_v36, %v1247_v12 }
  0xfe   :  { %v1322_v40 = vpop.f32.mrf.mxu1  ;;  %v1259_v13 = vadd.f32 %v1258_v39, %v1257_v37  ;;  %v39_v37 = vld [vmem:[#allocation2] sm:$0xff] }
  0xff   :  { %v1774_v41 = vpop.f32.mrf.mxu0  ;;  %v1323_v18 = vadd.f32 %v1322_v40, %v1321_v38 }
 0x100   :  { %1947 = vst [vmem:[#allocation6_spill] sm:$0xff] %v1774_v41  ;;  %v1776_v42 = vpop.f32.mrf.mxu1  ;;  %v1253_v41 = vadd.f32 %v1252_v31, %v1251_v29 }
 0x101   :  { %1948 = vst [vmem:[#allocation7_spill] sm:$0xff] %v1776_v42  ;;  %v1778_v43 = vpop.f32.mrf.mxu0  ;;  %v1957_v24 = vld [vmem:[#allocation4_spill] sm:$0xff] }
 0x102   :  { %1949 = vst [vmem:[#allocation8_spill] sm:$0xff] %v1778_v43  ;;  %v1780_v44 = vpop.f32.mrf.mxu1 }
 0x103   :  { %1950 = vst [vmem:[#allocation9_spill] sm:$0xff] %v1780_v44  ;;  %v1263_v45 = vpop.f32.mrf.mxu0 }
 0x104   :  { %v1327_v46 = vpop.f32.mrf.mxu1 }
 0x105   :  { %v1264_v47 = vpop.f32.mrf.mxu0 }
 0x106   :  { %v1328_v48 = vpop.f32.mrf.mxu1 }
 0x107   :  { %v1266_v49 = vpop.f32.mrf.mxu0 }
 0x108   :  { %v1330_v50 = vpop.f32.mrf.mxu1 }
 0x109   :  { %v1267_v51 = vpop.f32.mrf.mxu0 }
 0x10a   :  { %v1331_v52 = vpop.f32.mrf.mxu1  ;;  %v1268_v31 = vadd.f32 %v1267_v51, %v1266_v49 }
 0x10b   :  { %v1269_v53 = vpop.f32.mrf.mxu0 }
 0x10c   :  { %v1333_v54 = vpop.f32.mrf.mxu1 }
 0x10d   :  { %v1270_v55 = vpop.f32.mrf.mxu0 }
 0x10e   :  { %v1334_v56 = vpop.f32.mrf.mxu1  ;;  %v1271_v44 = vadd.f32 %v1270_v55, %v1269_v53  ;;  %v42_v53 = vld [vmem:[#allocation2 + $0x18] sm:$0xff] }
 0x10f   :  { %v1272_v57 = vpop.f32.mrf.mxu0  ;;  %v1335_v42 = vadd.f32 %v1334_v56, %v1333_v54  ;;  %v772_v56 = vadd.f32 %v1323_v18, %v1259_v13  ;;  %v45_v18 = vld [vmem:[#allocation2 + $0x30] sm:$0xff] }
 0x110   :  { %v1336_v58 = vpop.f32.mrf.mxu1 }
 0x111   :  { %v1273_v59 = vpop.f32.mrf.mxu0  ;;  %v788_v23 = vadd.f32 %v1335_v42, %v1271_v44  ;;  %v47_v44 = vld [vmem:[#allocation2 + $0x40] sm:$0xff] }
 0x112   :  { %v1337_v60 = vpop.f32.mrf.mxu1  ;;  %v1274_v19 = vadd.f32 %v1273_v59, %v1272_v57  ;;  %v1960_v59 = vld [vmem:[#allocation6_spill] sm:$0xff] }
 0x113   :  { %v1782_v61 = vpop.f32.mrf.mxu0  ;;  %v1338_v20 = vadd.f32 %v1337_v60, %v1336_v58  ;;  %v50_v58 = vld [vmem:[#allocation2 + $0x58] sm:$0xff]  ;;  %v1961_v60 = vld [vmem:[#allocation8_spill] sm:$0xff] }
 0x114   :  { %1951 = vst [vmem:[#allocation10_spill] sm:$0xff] %v1782_v61  ;;  %v1784_v62 = vpop.f32.mrf.mxu1  ;;  %v1329_v61 = vadd.f32 %v1328_v48, %v1327_v46 }
 0x115   :  { %1952 = vst [vmem:[#allocation11_spill] sm:$0xff] %v1784_v62  ;;  %v1276_v63 = vpop.f32.mrf.mxu0  ;;  %v791_v55 = vadd.f32 %v1338_v20, %v1274_v19  ;;  %v1964_v20 = vld [vmem:[#allocation3_spill] sm:$0xff] }
 0x116   :  { %v1340_v0 = vpop.f32.mrf.mxu1 }
 0x117   :  { %v1786_v1 = vpop.f32.mrf.mxu0 }
 0x118   :  { %1953 = vst [vmem:[#allocation12_spill] sm:$0xff] %v1786_v1  ;;  %v1788_v2 = vpop.f32.mrf.mxu1  ;;  %v1250_v1 = vadd.f32 %v1249_v27, %v1248_v25  ;;  %v1798_v25 = vadd.f32 %v1957_v24, %v1766_v33  ;;  %v49_v27 = vld [vmem:[#allocation2 + $0x50] sm:$0xff] }
 0x119   :  { %1954 = vst [vmem:[#allocation13_spill] sm:$0xff] %v1788_v2  ;;  %v1790_v3 = vpop.f32.mrf.mxu0  ;;  %v1314_v2 = vadd.f32 %v1313_v28, %v1312_v26 }
 0x11a   :  { %1955 = vst [vmem:[#allocation14_spill] sm:$0xff] %v1790_v3  ;;  %v1792_v4 = vpop.f32.mrf.mxu1  ;;  %v1317_v3 = vadd.f32 %v1316_v32, %v1315_v30  ;;  %v1332_v32 = vadd.f32 %v1331_v52, %v1330_v50 }
 0x11b   :  { %1956 = vst [vmem:[#allocation15_spill] sm:$0xff] %v1792_v4  ;;  %v1281_v5 = vpop.f32.mrf.mxu0  ;;  %v1265_v4 = vadd.f32 %v1264_v47, %v1263_v45  ;;  %v759_v29 = vadd.f32 %v1314_v2, %v1250_v1 }
 0x11c   :  { %v1345_v6 = vpop.f32.mrf.mxu1  ;;  %v1800_v30 = vadd.f32 %v1317_v3, %v1253_v41  ;;  %v1958_v41 = vld [vmem:[#allocation10_spill] sm:$0xff]  ;;  %v1959_v49 = vld [vmem:[#allocation11_spill] sm:$0xff]  ;;  %v40_v3 = vld [vmem:[#allocation2 + $0x8] sm:$0xff] }
 0x11d   :  { %v1282_v9 = vpop.f32.mrf.mxu0  ;;  %v780_v39 = vadd.f32 %v1329_v61, %v1265_v4  ;;  %v1277_v57 = vadd.f32 %v1276_v63, %v1958_v41  ;;  %v1341_v50 = vadd.f32 %v1340_v0, %v1959_v49  ;;  %v1262_v61 = vadd.f32 %v1961_v60, %v1960_v59  ;;  %v1963_v63 = vld [vmem:[#allocation9_spill] sm:$0xff]  ;;  %v54_v49 = vld [vmem:[#allocation2 + $0x78] sm:$0xff]  ;;  %v44_v60 = vld [vmem:[#allocation2 + $0x28] sm:$0xff] }
 0x11e   :  { %v1346_v34 = vpop.f32.mrf.mxu1  ;;  %v1283_v40 = vadd.f32 %v1282_v9, %v1281_v5  ;;  %v783_v5 = vadd.f32 %v1332_v32, %v1268_v31  ;;  %v48_v9 = vld [vmem:[#allocation2 + $0x48] sm:$0xff]  ;;  %v1823_v31 = vld [vmem:[%s1941_s2] ss:$0 sm:$0xff] }
 0x11f   :  { %v1794_v43 = vpop.f32.mrf.mxu0  ;;  %v1347_v45 = vadd.f32 %v1346_v34, %v1345_v6  ;;  %v1962_v6 = vld [vmem:[#allocation7_spill] sm:$0xff] }
 0x120   :  { %v1348_v62 = vpop.f32.mrf.mxu1  ;;  %v1326_v7 = vadd.f32 %v1963_v63, %v1962_v6 }
 0x121   :  { %v1285_v35 = vpop.f32.mrf.mxu0  ;;  %v804_v11 = vadd.f32 %v1347_v45, %v1283_v40  ;;  %v51_v45 = vld [vmem:[#allocation2 + $0x60] sm:$0xff] }
 0x122   :  { %v1349_v14 = vpop.f32.mrf.mxu1  ;;  %v1286_v12 = vadd.f32 %v1285_v35, %v1794_v43  ;;  %v1968_v43 = vld [vmem:[#allocation13_spill] sm:$0xff] }
 0x123   :  { %v1373_v22 = vpop.f32.mrf.mxu0  ;;  %v1350_v13 = vadd.f32 %v1349_v14, %v1348_v62  ;;  %v1969_v62 = vld [vmem:[#allocation15_spill] sm:$0xff] }
 0x124   :  { %v853_v26 = vadd.f32 %v1373_v22, %v756_v15  ;;  %v1381_v28 = vpop.f32.mrf.mxu1  ;;  %v1344_v14 = vadd.f32 %v1969_v62, %v1968_v43 }
 0x125   :  { %v885_v36 = vadd.f32 %v1381_v28, %v788_v23  ;;  %v844_v38 = vpop.f32.mrf.mxu0  ;;  %v1966_v28 = vld [vmem:[#allocation12_spill] sm:$0xff] }
 0x126   :  { %v909_v46 = vadd.f32 %v853_v26, %v41_v21  ;;  %v845_v42 = vadd.f32 %v844_v38, %v748_v16  ;;  %v876_v47 = vpop.f32.mrf.mxu1  ;;  %v1965_v21 = vld [vmem:[#allocation5_spill] sm:$0xff] }
 0x127   :  { %v917_v33 = vadd.f32 %v885_v36, %v49_v27  ;;  %v877_v48 = vadd.f32 %v876_v47, %v780_v39  ;;  %v1374_v54 = vpop.f32.mrf.mxu0  ;;  %v1320_v22 = vadd.f32 %v1965_v21, %v1964_v20  ;;  %v796_v27 = vadd.f32 %v1341_v50, %v1277_v57  ;;  %v1831_v47 = vld [vmem:[%s1942_s3] ss:$0 sm:$0xff] }
 0x128   :  { %925 = vst.msk [vmem:[#allocation2 + $0x10] sm:$0xff] %vm22_vm0, %v909_v46  ;;  %v907_v51 = vadd.f32 %v845_v42, %v39_v37  ;;  %v856_v52 = vadd.f32 %v1374_v54, %v759_v29  ;;  %v1382_v34 = vpop.f32.mrf.mxu1  ;;  %v1967_v29 = vld [vmem:[#allocation14_spill] sm:$0xff]  ;;  %v43_v37 = vld [vmem:[#allocation2 + $0x20] sm:$0xff]  ;;  %v775_v42 = vadd.f32 %v1326_v7, %v1262_v61 }
 0x129   :  { %933 = vst.msk [vmem:[#allocation2 + $0x50] sm:$0xff] %vm22_vm0, %v917_v33  ;;  %v915_v1 = vadd.f32 %v877_v48, %v47_v44  ;;  %v888_v2 = vadd.f32 %v1382_v34, %v791_v55  ;;  %v847_v4 = vpop.f32.mrf.mxu0  ;;  %v1280_v35 = vadd.f32 %v1967_v29, %v1966_v28  ;;  %v807_v55 = vadd.f32 %v1350_v13, %v1286_v12 }
 0x12a   :  { %923 = vst.msk [vmem:[#allocation2] sm:$0xff] %vm22_vm0, %v907_v51  ;;  %v910_v0 = vadd.f32 %v856_v52, %v42_v53  ;;  %v848_v8 = vadd.f32 %v847_v4, %v751_v17  ;;  %v879_v10 = vpop.f32.mrf.mxu1  ;;  %v53_v17 = vld [vmem:[#allocation2 + $0x70] sm:$0xff]  ;;  %v46_v53 = vld [vmem:[#allocation2 + $0x38] sm:$0xff]  ;;  %v767_v51 = vadd.f32 %v1320_v22, %v1798_v25  ;;  %v52_v25 = vld [vmem:[#allocation2 + $0x68] sm:$0xff] }
 0x12b   :  { %931 = vst.msk [vmem:[#allocation2 + $0x40] sm:$0xff] %vm22_vm0, %v915_v1  ;;  %v918_v15 = vadd.f32 %v888_v2, %v50_v58  ;;  %v880_v16 = vadd.f32 %v879_v10, %v783_v5  ;;  %v1377_v19 = vpop.f32.mrf.mxu0  ;;  %v799_v1 = vadd.f32 %v1344_v14, %v1280_v35 }
 0x12c   :  { %926 = vst.msk [vmem:[#allocation2 + $0x18] sm:$0xff] %vm22_vm0, %v910_v0  ;;  %v908_v23 = vadd.f32 %v848_v8, %v40_v3  ;;  %v869_v24 = vadd.f32 %v1377_v19, %v772_v56  ;;  %v1385_v26 = vpop.f32.mrf.mxu1 }
 0x12d   :  { %934 = vst.msk [vmem:[#allocation2 + $0x58] sm:$0xff] %vm22_vm0, %v918_v15  ;;  %v916_v32 = vadd.f32 %v880_v16, %v48_v9  ;;  %v901_v36 = vadd.f32 %v1385_v26, %v804_v11  ;;  %v860_v38 = vpop.f32.mrf.mxu0 }
 0x12e   :  { %924 = vst.msk [vmem:[#allocation2 + $0x8] sm:$0xff] %vm22_vm0, %v908_v23  ;;  %v913_v39 = vadd.f32 %v869_v24, %v45_v18  ;;  %v861_v40 = vadd.f32 %v860_v38, %v1800_v30  ;;  %v892_v46 = vpop.f32.mrf.mxu1 }
 0x12f   :  { %v944_v44 = vld [vmem:[#allocation2 + $0x10] sm:$0xff]  ;;  %932 = vst.msk [vmem:[#allocation2 + $0x48] sm:$0xff] %vm22_vm0, %v916_v32  ;;  %v921_v33 = vadd.f32 %v901_v36, %v53_v17  ;;  %v893_v48 = vadd.f32 %v892_v46, %v796_v27  ;;  %v1378_v54 = vpop.f32.mrf.mxu0 }
 0x130   :  { %v967_v56 = vmul.f32 %v1823_v31, %v944_v44  ;;  %v952_v30 = vld [vmem:[#allocation2 + $0x50] sm:$0xff]  ;;  %929 = vst.msk [vmem:[#allocation2 + $0x30] sm:$0xff] %vm22_vm0, %v913_v39  ;;  %v911_v41 = vadd.f32 %v861_v40, %v43_v37  ;;  %v872_v57 = vadd.f32 %v1378_v54, %v775_v42  ;;  %v1386_v50 = vpop.f32.mrf.mxu1 }
 0x131   :  { %v975_v52 = vmul.f32 %v1823_v31, %v952_v30  ;;  %v942_v58 = vld [vmem:[#allocation2] sm:$0xff]  ;;  %937 = vst.msk [vmem:[#allocation2 + $0x70] sm:$0xff] %vm22_vm0, %v921_v33  ;;  %v919_v34 = vadd.f32 %v893_v48, %v51_v45  ;;  %v904_v59 = vadd.f32 %v1386_v50, %v807_v55  ;;  %v863_v61 = vpop.f32.mrf.mxu0 }
 0x132   :  { %v990_v2 = vadd.f32 %v1831_v47, %v967_v56  ;;  %v965_v3 = vmul.f32 %v1823_v31, %v942_v58  ;;  %v950_v4 = vld [vmem:[#allocation2 + $0x40] sm:$0xff]  ;;  %927 = vst.msk [vmem:[#allocation2 + $0x20] sm:$0xff] %vm22_vm0, %v911_v41  ;;  %v914_v5 = vadd.f32 %v872_v57, %v46_v53  ;;  %v864_v6 = vadd.f32 %v863_v61, %v767_v51  ;;  %v895_v63 = vpop.f32.mrf.mxu1 }
 0x133   :  { %v998_v7 = vadd.f32 %v1831_v47, %v975_v52  ;;  %v973_v0 = vmul.f32 %v1823_v31, %v950_v4  ;;  %v945_v8 = vld [vmem:[#allocation2 + $0x18] sm:$0xff]  ;;  %935 = vst.msk [vmem:[#allocation2 + $0x60] sm:$0xff] %vm22_vm0, %v919_v34  ;;  %v922_v9 = vadd.f32 %v904_v59, %v54_v49  ;;  %v896_v10 = vadd.f32 %v895_v63, %v799_v1 }
 0x134   :  { %v1006_v11 = vmax.f32 %v990_v2, 0.0  ;;  %v988_v12 = vadd.f32 %v1831_v47, %v965_v3  ;;  %v968_v13 = vmul.f32 %v1823_v31, %v945_v8  ;;  %v953_v15 = vld [vmem:[#allocation2 + $0x58] sm:$0xff]  ;;  %930 = vst.msk [vmem:[#allocation2 + $0x38] sm:$0xff] %vm22_vm0, %v914_v5  ;;  %v912_v16 = vadd.f32 %v864_v6, %v44_v60 }
 0x135   :  { %v1014_v18 = vmax.f32 %v998_v7, 0.0  ;;  %v996_v19 = vadd.f32 %v1831_v47, %v973_v0  ;;  %v976_v20 = vmul.f32 %v1823_v31, %v953_v15  ;;  %v943_v21 = vld [vmem:[#allocation2 + $0x8] sm:$0xff]  ;;  %938 = vst.msk [vmem:[#allocation2 + $0x78] sm:$0xff] %vm22_vm0, %v922_v9  ;;  %v920_v22 = vadd.f32 %v896_v10, %v52_v25 }
 0x136   :  { %v1209_v23 = vpack.c.bf16 %v1006_v11, %v1006_v11  ;;  %v1004_v24 = vmax.f32 %v988_v12, 0.0  ;;  %v991_v17 = vadd.f32 %v1831_v47, %v968_v13  ;;  %v966_v26 = vmul.f32 %v1823_v31, %v943_v21  ;;  %v951_v27 = vld [vmem:[#allocation2 + $0x48] sm:$0xff]  ;;  %928 = vst.msk [vmem:[#allocation2 + $0x28] sm:$0xff] %vm22_vm0, %v912_v16 }
 0x137   :  { %v1217_v28 = vpack.c.bf16 %v1014_v18, %v1014_v18  ;;  %v1012_v29 = vmax.f32 %v996_v19, 0.0  ;;  %v999_v35 = vadd.f32 %v1831_v47, %v976_v20  ;;  %v974_v43 = vmul.f32 %v1823_v31, %v951_v27  ;;  %v948_v62 = vld [vmem:[#allocation2 + $0x30] sm:$0xff]  ;;  %936 = vst.msk [vmem:[#allocation2 + $0x68] sm:$0xff] %vm22_vm0, %v920_v22 }
 0x138   :  { %1087 = vst.msk [vmem:[%s1943_s4 + $0x8] sm:$0xf] %vm1084_vm1, %v1209_v23  ;;  %v1207_v14 = vpack.c.bf16 %v1004_v24, %v1004_v24  ;;  %v1007_v32 = vmax.f32 %v991_v17, 0.0  ;;  %v989_v36 = vadd.f32 %v1831_v47, %v966_v26  ;;  %v971_v37 = vmul.f32 %v1823_v31, %v948_v62  ;;  %v956_v38 = vld [vmem:[#allocation2 + $0x70] sm:$0xff] }
 0x139   :  { %1095 = vst.msk [vmem:[%s1943_s4 + $0x28] sm:$0xf] %vm1084_vm1, %v1217_v28  ;;  %v1215_v39 = vpack.c.bf16 %v1012_v29, %v1012_v29  ;;  %v1015_v40 = vmax.f32 %v999_v35, 0.0  ;;  %v997_v45 = vadd.f32 %v1831_v47, %v974_v43  ;;  %v979_v46 = vmul.f32 %v1823_v31, %v956_v38  ;;  %v946_v42 = vld [vmem:[#allocation2 + $0x20] sm:$0xff] }
 0x13a   :  { %1085 = vst.msk [vmem:[%s1943_s4] sm:$0xf] %vm1084_vm1, %v1207_v14  ;;  %v1210_v44 = vpack.c.bf16 %v1007_v32, %v1007_v32  ;;  %v1005_v33 = vmax.f32 %v989_v36, 0.0  ;;  %v994_v48 = vadd.f32 %v1831_v47, %v971_v37  ;;  %v969_v53 = vmul.f32 %v1823_v31, %v946_v42  ;;  %v954_v54 = vld [vmem:[#allocation2 + $0x60] sm:$0xff] }
 0x13b   :  { %1093 = vst.msk [vmem:[%s1943_s4 + $0x20] sm:$0xf] %vm1084_vm1, %v1215_v39  ;;  %v1218_v55 = vpack.c.bf16 %v1015_v40, %v1015_v40  ;;  %v1013_v56 = vmax.f32 %v997_v45, 0.0  ;;  %v1002_v30 = vadd.f32 %v1831_v47, %v979_v46  ;;  %v977_v41 = vmul.f32 %v1823_v31, %v954_v54  ;;  %v949_v57 = vld [vmem:[#allocation2 + $0x38] sm:$0xff] }
 0x13c   :  { %1088 = vst.msk [vmem:[%s1943_s4 + $0xc] sm:$0xf] %vm1084_vm1, %v1210_v44  ;;  %v1208_v49 = vpack.c.bf16 %v1005_v33, %v1005_v33  ;;  %v1010_v50 = vmax.f32 %v994_v48, 0.0  ;;  %v992_v51 = vadd.f32 %v1831_v47, %v969_v53  ;;  %v972_v52 = vmul.f32 %v1823_v31, %v949_v57  ;;  %v957_v58 = vld [vmem:[#allocation2 + $0x78] sm:$0xff] }
 0x13d   :  { %1096 = vst.msk [vmem:[%s1943_s4 + $0x2c] sm:$0xf] %vm1084_vm1, %v1218_v55  ;;  %v1216_v34 = vpack.c.bf16 %v1013_v56, %v1013_v56  ;;  %v1018_v59 = vmax.f32 %v1002_v30, 0.0  ;;  %v1000_v60 = vadd.f32 %v1831_v47, %v977_v41  ;;  %v980_v61 = vmul.f32 %v1823_v31, %v957_v58  ;;  %v947_v1 = vld [vmem:[#allocation2 + $0x28] sm:$0xff] }
 0x13e   :  { %1086 = vst.msk [vmem:[%s1943_s4 + $0x4] sm:$0xf] %vm1084_vm1, %v1208_v49  ;;  %v1213_v2 = vpack.c.bf16 %v1010_v50, %v1010_v50  ;;  %v1008_v3 = vmax.f32 %v992_v51, 0.0  ;;  %v995_v4 = vadd.f32 %v1831_v47, %v972_v52  ;;  %v970_v5 = vmul.f32 %v1823_v31, %v947_v1  ;;  %v955_v6 = vld [vmem:[#allocation2 + $0x68] sm:$0xff] }
 0x13f   :  { %1094 = vst.msk [vmem:[%s1943_s4 + $0x24] sm:$0xf] %vm1084_vm1, %v1216_v34  ;;  %v1221_v25 = vpack.c.bf16 %v1018_v59, %v1018_v59  ;;  %v1016_v63 = vmax.f32 %v1000_v60, 0.0  ;;  %v1003_v7 = vadd.f32 %v1831_v47, %v980_v61  ;;  %v978_v0 = vmul.f32 %v1823_v31, %v955_v6 }
 0x140   :  { %1091 = vst.msk [vmem:[%s1943_s4 + $0x18] sm:$0xf] %vm1084_vm1, %v1213_v2  ;;  %v1211_v8 = vpack.c.bf16 %v1008_v3, %v1008_v3  ;;  %v1011_v9 = vmax.f32 %v995_v4, 0.0  ;;  %v993_v10 = vadd.f32 %v1831_v47, %v970_v5 }
 0x141   :  { %1099 = vst.msk [vmem:[%s1943_s4 + $0x38] sm:$0xf] %vm1084_vm1, %v1221_v25  ;;  %v1219_v11 = vpack.c.bf16 %v1016_v63, %v1016_v63  ;;  %v1019_v12 = vmax.f32 %v1003_v7, 0.0  ;;  %v1001_v13 = vadd.f32 %v1831_v47, %v978_v0 }
 0x142   :  { %1089 = vst.msk [vmem:[%s1943_s4 + $0x10] sm:$0xf] %vm1084_vm1, %v1211_v8  ;;  %v1214_v31 = vpack.c.bf16 %v1011_v9, %v1011_v9  ;;  %v1009_v15 = vmax.f32 %v993_v10, 0.0 }
 0x143   :  { %1097 = vst.msk [vmem:[%s1943_s4 + $0x30] sm:$0xf] %vm1084_vm1, %v1219_v11  ;;  %v1222_v16 = vpack.c.bf16 %v1019_v12, %v1019_v12  ;;  %v1017_v18 = vmax.f32 %v1001_v13, 0.0 }
 0x144   :  { %1092 = vst.msk [vmem:[%s1943_s4 + $0x1c] sm:$0xf] %vm1084_vm1, %v1214_v31  ;;  %v1212_v47 = vpack.c.bf16 %v1009_v15, %v1009_v15 }
 0x145   :  { %1100 = vst.msk [vmem:[%s1943_s4 + $0x3c] sm:$0xf] %vm1084_vm1, %v1222_v16  ;;  %v1220_v19 = vpack.c.bf16 %v1017_v18, %v1017_v18 }
 0x146   :  { %1090 = vst.msk [vmem:[%s1943_s4 + $0x14] sm:$0xf] %vm1084_vm1, %v1212_v47 }
 0x147   :  { %1098 = vst.msk [vmem:[%s1943_s4 + $0x34] sm:$0xf] %vm1084_vm1, %v1220_v19 }

// kernel: resnet18_forward.26
= control target key start
LH: loop header
LB: loop body
LE: loop exit
PB: predicated region body
PF: predicated region fallthrough
CT: control target
= control target key end

     0   :  { %vm25_vm0 = vcmask 523264   ;;  %vm1135_vm1 = vcmask 519168   ;;  %s2221_s1 = inlined_call_operand.vmem [shape: bf16[576,64], index: 1, kind: input, shape index: {}]   ;;  %s2222_s0 = inlined_call_operand.vmem [shape: bf16[128,576], index: 0, kind: input, shape index: {}]   ;;  %s2223_s4 = inlined_call_operand.vmem [shape: bf16[128,64], index: 4, kind: input, shape index: {}]   ;;  %s2224_s2 = inlined_call_operand.vmem [shape: f32[1,64], index: 2, kind: input, shape index: {}]   ;;  %s2225_s3 = inlined_call_operand.vmem [shape: f32[1,64], index: 3, kind: input, shape index: {}]   ;;  %s2226_s5 = inlined_call_operand.vmem [shape: bf16[128,64], index: 5, kind: output, shape index: {}]  }
   0x1   :  { %v1486_v0 = vld [vmem:[%s2221_s1 + $0x78] sm:$0xff]   ;;  %v1490_v4 = vld [vmem:[%s2221_s1 + $0x70] sm:$0xff]   ;;  %v1494_v8 = vld [vmem:[%s2221_s1 + $0x68] sm:$0xff]  }
   0x2   :  { %v1487_v1 = vld [vmem:[%s2221_s1 + $0xf8] sm:$0xff]   ;;  %1313 = vmatprep.subr.bf16.mxu0 %v1486_v0  ;;  %v1491_v5 = vld [vmem:[%s2221_s1 + $0xf0] sm:$0xff]   ;;  %v1495_v9 = vld [vmem:[%s2221_s1 + $0xe8] sm:$0xff]  }
   0x3   :  { %v1488_v2 = vld [vmem:[%s2221_s1 + $0x38] sm:$0xff]   ;;  %1377 = vmatprep.subr.bf16.mxu1 %v1487_v1  ;;  %v1492_v6 = vld [vmem:[%s2221_s1 + $0x30] sm:$0xff]   ;;  %v1496_v10 = vld [vmem:[%s2221_s1 + $0x28] sm:$0xff]  }
   0x4   :  { %v1489_v3 = vld [vmem:[%s2221_s1 + $0xb8] sm:$0xff]   ;;  %1314 = vmatpush3.bf16.msra.mxu0 %v1488_v2  ;;  %v1493_v7 = vld [vmem:[%s2221_s1 + $0xb0] sm:$0xff]   ;;  %v1497_v11 = vld [vmem:[%s2221_s1 + $0xa8] sm:$0xff]  }
   0x5   :  { %1378 = vmatpush3.bf16.msra.mxu1 %v1489_v3  ;;  %1315 = vmatprep.subr.bf16.mxu0 %v1490_v4  ;;  %v1498_v12 = vld [vmem:[%s2221_s1 + $0x60] sm:$0xff]   ;;  %v1502_v16 = vld [vmem:[%s2221_s1 + $0x58] sm:$0xff]   ;;  %v1506_v20 = vld [vmem:[%s2221_s1 + $0x50] sm:$0xff]  }
   0x6   :  { %1379 = vmatprep.subr.bf16.mxu1 %v1491_v5  ;;  %v1499_v13 = vld [vmem:[%s2221_s1 + $0xe0] sm:$0xff]   ;;  %v1503_v17 = vld [vmem:[%s2221_s1 + $0xd8] sm:$0xff]   ;;  %v1507_v21 = vld [vmem:[%s2221_s1 + $0xd0] sm:$0xff]  }
   0x7   :  { %v1500_v14 = vld [vmem:[%s2221_s1 + $0x20] sm:$0xff]   ;;  %v1504_v18 = vld [vmem:[%s2221_s1 + $0x18] sm:$0xff]   ;;  %v1508_v22 = vld [vmem:[%s2221_s1 + $0x10] sm:$0xff]  }
   0x8   :  { %1316 = vmatpush3.bf16.msra.mxu0 %v1492_v6  ;;  %v1501_v15 = vld [vmem:[%s2221_s1 + $0xa0] sm:$0xff]   ;;  %v1505_v19 = vld [vmem:[%s2221_s1 + $0x98] sm:$0xff]   ;;  %v1509_v23 = vld [vmem:[%s2221_s1 + $0x90] sm:$0xff]  }
   0x9   :  { %1380 = vmatpush3.bf16.msra.mxu1 %v1493_v7  ;;  %1317 = vmatprep.subr.bf16.mxu0 %v1494_v8  ;;  %v1510_v24 = vld [vmem:[%s2221_s1 + $0x48] sm:$0xff]   ;;  %v1514_v28 = vld [vmem:[%s2221_s1 + $0x40] sm:$0xff]   ;;  %v1524_v36 = vld [vmem:[%s2221_s1 + $0x118] sm:$0xff]  }
   0xa   :  { %1381 = vmatprep.subr.bf16.mxu1 %v1495_v9  ;;  %v1511_v25 = vld [vmem:[%s2221_s1 + $0xc8] sm:$0xff]   ;;  %v1515_v29 = vld [vmem:[%s2221_s1 + $0xc0] sm:$0xff]   ;;  %v1537_v42 = vld [vmem:[%s2221_s1 + $0x110] sm:$0xff]  }
   0xb   :  { %v1512_v26 = vld [vmem:[%s2221_s1 + $0x8] sm:$0xff]   ;;  %v1516_v30 = vld [vmem:[%s2221_s1] sm:$0xff]   ;;  %v1533_v43 = vld [vmem:[%s2222_s0 + $0x5c] ss:$20 sps:$4 sm:$0xff]  }
   0xc   :  { %1318 = vmatpush3.bf16.msra.mxu0 %v1496_v10  ;;  %v1513_v27 = vld [vmem:[%s2221_s1 + $0x88] sm:$0xff]   ;;  %v1517_v31 = vld [vmem:[%s2221_s1 + $0x80] sm:$0xff]   ;;  %v1538_v47 = vld [vmem:[%s2222_s0 + $0x7c] ss:$20 sps:$4 sm:$0xff]  }
   0xd   :  { %1382 = vmatpush3.bf16.msra.mxu1 %v1497_v11  ;;  %1319 = vmatprep.subr.bf16.mxu0 %v1498_v12  ;;  %v1518_v32 = vld [vmem:[%s2222_s0] ss:$20 sps:$4 sm:$0xff]   ;;  %v1520_v33 = vld [vmem:[%s2222_s0 + $0x4] ss:$20 sps:$4 sm:$0xff]   ;;  %v1521_v34 = vld [vmem:[%s2222_s0 + $0x8] ss:$20 sps:$4 sm:$0xff]  }
   0xe   :  { %1383 = vmatprep.subr.bf16.mxu1 %v1499_v13  ;;  %v1523_v35 = vld [vmem:[%s2222_s0 + $0xc] ss:$20 sps:$4 sm:$0xff]   ;;  %651 = vmatprep.mubr.bf16.mxu0 %v1520_v33  ;;  %v1527_v38 = vld [vmem:[%s2222_s0 + $0x34] ss:$20 sps:$4 sm:$0xff]   ;;  %v1530_v40 = vld [vmem:[%s2222_s0 + $0x30] ss:$20 sps:$4 sm:$0xff]  }
   0xf   :  { %748 = vmatprep.mubr.bf16.mxu1 %v1523_v35  ;;  %v1525_v37 = vld [vmem:[%s2222_s0 + $0x2c] ss:$20 sps:$4 sm:$0xff]   ;;  %v1529_v39 = vld [vmem:[%s2222_s0 + $0x28] ss:$20 sps:$4 sm:$0xff]   ;;  %v1535_v44 = vld [vmem:[%s2222_s0 + $0x50] ss:$20 sps:$4 sm:$0xff]  }
  0x10   :  { %1320 = vmatpush3.bf16.msra.mxu0 %v1500_v14  ;;  %v1531_v41 = vld [vmem:[%s2222_s0 + $0x54] ss:$20 sps:$4 sm:$0xff]   ;;  %v1536_v45 = vld [vmem:[%s2222_s0 + $0x58] ss:$20 sps:$4 sm:$0xff]   ;;  %v1563_v49 = vld [vmem:[%s2221_s1 + $0x100] sm:$0xff]   ;;  %v1578_v12 = vmov 0.0  }
  0x11   :  { %1384 = vmatpush3.bf16.msra.mxu1 %v1501_v15  ;;  %1321 = vmatprep.subr.bf16.mxu0 %v1502_v16  ;;  %v1550_v46 = vld [vmem:[%s2221_s1 + $0x108] sm:$0xff]   ;;  %v1540_v48 = vld [vmem:[%s2222_s0 + $0x84] ss:$20 sps:$4 sm:$0xff]   ;;  %v1543_v51 = vld [vmem:[%s2222_s0 + $0x80] ss:$20 sps:$4 sm:$0xff]   ;;  %28 = vst.msk [vmem:[#allocation2 + $0x10] sm:$0xff] %vm25_vm0, %v1578_v12 }
  0x12   :  { %1385 = vmatprep.subr.bf16.mxu1 %v1503_v17  ;;  %v1542_v50 = vld [vmem:[%s2222_s0 + $0x78] ss:$20 sps:$4 sm:$0xff]   ;;  %v1548_v54 = vld [vmem:[%s2222_s0 + $0xa0] ss:$20 sps:$4 sm:$0xff]   ;;  %v1549_v55 = vld [vmem:[%s2222_s0 + $0xa8] ss:$20 sps:$4 sm:$0xff]  }
  0x13   :  { %v1544_v52 = vld [vmem:[%s2222_s0 + $0xa4] ss:$20 sps:$4 sm:$0xff]   ;;  %v1546_v53 = vld [vmem:[%s2222_s0 + $0xac] ss:$20 sps:$4 sm:$0xff]   ;;  %v1553_v57 = vld [vmem:[%s2222_s0 + $0xd4] ss:$20 sps:$4 sm:$0xff]  }
  0x14   :  { %1322 = vmatpush3.bf16.msra.mxu0 %v1504_v18  ;;  %v1551_v56 = vld [vmem:[%s2222_s0 + $0xcc] ss:$20 sps:$4 sm:$0xff]   ;;  %v1555_v58 = vld [vmem:[%s2222_s0 + $0xc8] ss:$20 sps:$4 sm:$0xff]   ;;  %v1556_v59 = vld [vmem:[%s2222_s0 + $0xd0] ss:$20 sps:$4 sm:$0xff]  }
  0x15   :  { %1386 = vmatpush3.bf16.msra.mxu1 %v1505_v19  ;;  %1323 = vmatprep.subr.bf16.mxu0 %v1506_v20  ;;  %v1557_v60 = vld [vmem:[%s2222_s0 + $0xf4] ss:$20 sps:$4 sm:$0xff]   ;;  %v1559_v61 = vld [vmem:[%s2222_s0 + $0xfc] ss:$20 sps:$4 sm:$0xff]   ;;  %v1562_v63 = vld [vmem:[%s2222_s0 + $0xf8] ss:$20 sps:$4 sm:$0xff]  }
  0x16   :  { %1387 = vmatprep.subr.bf16.mxu1 %v1507_v21  ;;  %v1561_v62 = vld [vmem:[%s2222_s0 + $0xf0] ss:$20 sps:$4 sm:$0xff]   ;;  %v1568_v2 = vld [vmem:[%s2222_s0 + $0x118] ss:$20 sps:$4 sm:$0xff]   ;;  %v1569_v3 = vld [vmem:[%s2222_s0 + $0x120] ss:$20 sps:$4 sm:$0xff]  }
  0x17   :  { %v1564_v0 = vld [vmem:[%s2222_s0 + $0x11c] ss:$20 sps:$4 sm:$0xff]   ;;  %v1566_v1 = vld [vmem:[%s2222_s0 + $0x124] ss:$20 sps:$4 sm:$0xff]   ;;  %v1574_v8 = vld [vmem:[%s2222_s0 + $0x60] ss:$20 sps:$4 sm:$0xff]  }
  0x18   :  { %1324 = vmatpush3.bf16.msra.mxu0 %v1508_v22  ;;  %v1570_v4 = vld [vmem:[%s2222_s0 + $0x10] ss:$20 sps:$4 sm:$0xff]   ;;  %v1572_v6 = vld [vmem:[%s2222_s0 + $0x38] ss:$20 sps:$4 sm:$0xff]   ;;  %v1575_v9 = vld [vmem:[%s2222_s0 + $0x100] ss:$20 sps:$4 sm:$0xff]  }
  0x19   :  { %1388 = vmatpush3.bf16.msra.mxu1 %v1509_v23  ;;  %1325 = vmatprep.subr.bf16.mxu0 %v1510_v24  ;;  %v1571_v5 = vld [vmem:[%s2222_s0 + $0xb0] ss:$20 sps:$4 sm:$0xff]   ;;  %v1573_v7 = vld [vmem:[%s2222_s0 + $0xd8] ss:$20 sps:$4 sm:$0xff]   ;;  %v1576_v10 = vld [vmem:[%s2222_s0 + $0x88] ss:$20 sps:$4 sm:$0xff]  }
  0x1a   :  { %1389 = vmatprep.subr.bf16.mxu1 %v1511_v25  ;;  %v1577_v11 = vld [vmem:[%s2222_s0 + $0x128] ss:$20 sps:$4 sm:$0xff]   ;;  %26 = vst.msk [vmem:[#allocation2] sm:$0xff] %vm25_vm0, %v1578_v12  ;;  %27 = vst.msk [vmem:[#allocation2 + $0x8] sm:$0xff] %vm25_vm0, %v1578_v12 }
  0x1b   :  { %29 = vst.msk [vmem:[#allocation2 + $0x18] sm:$0xff] %vm25_vm0, %v1578_v12  ;;  %30 = vst.msk [vmem:[#allocation2 + $0x20] sm:$0xff] %vm25_vm0, %v1578_v12 }
  0x1c   :  { %1326 = vmatpush3.bf16.msra.mxu0 %v1512_v26  ;;  %31 = vst.msk [vmem:[#allocation2 + $0x28] sm:$0xff] %vm25_vm0, %v1578_v12  ;;  %32 = vst.msk [vmem:[#allocation2 + $0x30] sm:$0xff] %vm25_vm0, %v1578_v12 }
  0x1d   :  { %1390 = vmatpush3.bf16.msra.mxu1 %v1513_v27  ;;  %1327 = vmatprep.subr.bf16.mxu0 %v1514_v28  ;;  %33 = vst.msk [vmem:[#allocation2 + $0x38] sm:$0xff] %vm25_vm0, %v1578_v12  ;;  %34 = vst.msk [vmem:[#allocation2 + $0x40] sm:$0xff] %vm25_vm0, %v1578_v12 }
  0x1e   :  { %1391 = vmatprep.subr.bf16.mxu1 %v1515_v29  ;;  %35 = vst.msk [vmem:[#allocation2 + $0x48] sm:$0xff] %vm25_vm0, %v1578_v12  ;;  %36 = vst.msk [vmem:[#allocation2 + $0x50] sm:$0xff] %vm25_vm0, %v1578_v12 }
  0x1f   :  { %37 = vst.msk [vmem:[#allocation2 + $0x58] sm:$0xff] %vm25_vm0, %v1578_v12  ;;  %38 = vst.msk [vmem:[#allocation2 + $0x60] sm:$0xff] %vm25_vm0, %v1578_v12 }
  0x20   :  { %1328 = vmatpush3.bf16.msra.mxu0 %v1516_v30  ;;  %39 = vst.msk [vmem:[#allocation2 + $0x68] sm:$0xff] %vm25_vm0, %v1578_v12  ;;  %40 = vst.msk [vmem:[#allocation2 + $0x70] sm:$0xff] %vm25_vm0, %v1578_v12 }
  0x21   :  { %1392 = vmatpush3.bf16.msra.mxu1 %v1517_v31  ;;  %1453 = vmatprep.subr.bf16.mxu0 %v1524_v36  ;;  %41 = vst.msk [vmem:[#allocation2 + $0x78] sm:$0xff] %vm25_vm0, %v1578_v12 }
  0x22   :  { %1477 = vmatprep.subr.bf16.mxu1 %v1524_v36 }
  0x23   :  { %652 = vmatmul.mubr.bf16.vlgmr.msra.gmra.mxu0 %v1518_v32 }
  0x24   :  { %749 = vmatmul.mubr.bf16.vlgmr.msra.gmra.mxu1 %v1521_v34  ;;  %1454 = vmatpush3.bf16.msra.mxu0 %v1524_v36 }
  0x25   :  { %1481 = vmatpush3.bf16.msra.mxu1 %v1524_v36  ;;  %659 = vmatprep.mubr.bf16.mxu0 %v1525_v37 }
  0x26   :  { %756 = vmatprep.mubr.bf16.mxu1 %v1527_v38  ;;  %1455 = vmatprep.subr.bf16.mxu0 %v1537_v42 }
  0x27   :  { %1478 = vmatprep.subr.bf16.mxu1 %v1537_v42 }
  0x28   :  { %1456 = vmatpush3.bf16.msra.mxu0 %v1537_v42 }
  0x29   :  { %1482 = vmatpush3.bf16.msra.mxu1 %v1537_v42  ;;  %1457 = vmatprep.subr.bf16.mxu0 %v1550_v46 }
  0x2a   :  { %1479 = vmatprep.subr.bf16.mxu1 %v1550_v46 }
  0x2b   :  { %660 = vmatmul.mubr.bf16.gmra.mxu0 %v1529_v39 }
  0x2c   :  { %757 = vmatmul.mubr.bf16.gmra.mxu1 %v1530_v40  ;;  %667 = vmatprep.mubr.bf16.mxu0 %v1531_v41 }
  0x2d   :  { %764 = vmatprep.mubr.bf16.mxu1 %v1533_v43  ;;  %1458 = vmatpush3.bf16.msra.mxu0 %v1550_v46 }
  0x2e   :  { %1483 = vmatpush3.bf16.msra.mxu1 %v1550_v46  ;;  %1459 = vmatprep.subr.bf16.mxu0 %v1563_v49 }
  0x2f   :  { %1480 = vmatprep.subr.bf16.mxu1 %v1563_v49 }
  0x31   :  { %1460 = vmatpush3.bf16.msra.mxu0 %v1563_v49 }
  0x32   :  { %1484 = vmatpush3.bf16.msra.mxu1 %v1563_v49 }
  0x33   :  { %668 = vmatmul.mubr.bf16.gmra.mxu0 %v1535_v44 }
  0x34   :  { %765 = vmatmul.mubr.bf16.gmra.mxu1 %v1536_v45  ;;  %675 = vmatprep.mubr.bf16.mxu0 %v1538_v47 }
  0x35   :  { %772 = vmatprep.mubr.bf16.mxu1 %v1540_v48 }
  0x3b   :  { %676 = vmatmul.mubr.bf16.gmra.mxu0 %v1542_v50 }
  0x3c   :  { %773 = vmatmul.mubr.bf16.gmra.mxu1 %v1543_v51  ;;  %683 = vmatprep.mubr.bf16.mxu0 %v1544_v52 }
  0x3d   :  { %780 = vmatprep.mubr.bf16.mxu1 %v1546_v53 }
  0x43   :  { %684 = vmatmul.mubr.bf16.gmra.mxu0 %v1548_v54 }
  0x44   :  { %781 = vmatmul.mubr.bf16.gmra.mxu1 %v1549_v55  ;;  %691 = vmatprep.mubr.bf16.mxu0 %v1551_v56 }
  0x45   :  { %788 = vmatprep.mubr.bf16.mxu1 %v1553_v57 }
  0x4b   :  { %692 = vmatmul.mubr.bf16.gmra.mxu0 %v1555_v58 }
  0x4c   :  { %789 = vmatmul.mubr.bf16.gmra.mxu1 %v1556_v59  ;;  %699 = vmatprep.mubr.bf16.mxu0 %v1557_v60 }
  0x4d   :  { %796 = vmatprep.mubr.bf16.mxu1 %v1559_v61 }
  0x53   :  { %700 = vmatmul.mubr.bf16.gmra.mxu0 %v1561_v62 }
  0x54   :  { %797 = vmatmul.mubr.bf16.gmra.mxu1 %v1562_v63  ;;  %707 = vmatprep.mubr.bf16.mxu0 %v1564_v0 }
  0x55   :  { %804 = vmatprep.mubr.bf16.mxu1 %v1566_v1 }
  0x5b   :  { %708 = vmatmul.mubr.bf16.gmra.mxu0 %v1568_v2  ;;  %v1950_v2 = vld [vmem:[%s2223_s4 + $0x8] sm:$0xff]  }
  0x5c   :  { %805 = vmatmul.mubr.bf16.gmra.mxu1 %v1569_v3  ;;  %1461 = vmatprep.mubr.msk.bf16.mxu0 %vm25_vm0, %v1570_v4  ;;  %v1957_v4 = vld [vmem:[%s2223_s4 + $0x28] sm:$0xff]  }
  0x5d   :  { %1469 = vmatprep.mubr.msk.bf16.mxu1 %vm25_vm0, %v1571_v5  ;;  %v1962_v5 = vld [vmem:[%s2223_s4] sm:$0xff]  }
  0x5e   :  { %2238 = vst [vmem:[#allocation10_spill] sm:$0xff] %v1962_v5 }
  0x63   :  { %1462 = vmatmul.mubr.msk.bf16.vlgmr.msra.gmra.mxu0 %vm25_vm0, %v1572_v6  ;;  %v1967_v6 = vld [vmem:[%s2223_s4 + $0x20] sm:$0xff]  }
  0x64   :  { %1470 = vmatmul.mubr.msk.bf16.vlgmr.msra.gmra.mxu1 %vm25_vm0, %v1573_v7  ;;  %1465 = vmatprep.mubr.msk.bf16.mxu0 %vm25_vm0, %v1574_v8  ;;  %2239 = vst [vmem:[#allocation11_spill] sm:$0xff] %v1967_v6 }
  0x65   :  { %1473 = vmatprep.mubr.msk.bf16.mxu1 %vm25_vm0, %v1575_v9  ;;  %v1976_v9 = vld [vmem:[%s2223_s4 + $0x18] sm:$0xff]  }
  0x6b   :  { %1466 = vmatmul.mubr.msk.bf16.gmra.mxu0 %vm25_vm0, %v1576_v10  ;;  %v1981_v10 = vld [vmem:[%s2223_s4 + $0x38] sm:$0xff]  }
  0x6c   :  { %1474 = vmatmul.mubr.msk.bf16.gmra.mxu1 %vm25_vm0, %v1577_v11 }
  0xe3   :  { %v1861_v13 = vpop.f32.mrf.mxu0 }
  0xe4   :  { %v1863_v14 = vpop.f32.mrf.mxu1 }
  0xe5   :  { %v1865_v15 = vpop.f32.mrf.mxu0 }
  0xe6   :  { %v1867_v16 = vpop.f32.mrf.mxu1 }
  0xe7   :  { %v1869_v17 = vpop.f32.mrf.mxu0 }
  0xe8   :  { %v1871_v18 = vpop.f32.mrf.mxu1 }
  0xe9   :  { %v1873_v19 = vpop.f32.mrf.mxu0 }
  0xea   :  { %v1875_v20 = vpop.f32.mrf.mxu1 }
  0xeb   :  { %v1877_v21 = vpop.f32.mrf.mxu0  ;;  %v1398_v12 = vadd.f32 %v1875_v20, %v1871_v18 }
  0xec   :  { %v1879_v22 = vpop.f32.mrf.mxu1 }
  0xed   :  { %v1881_v23 = vpop.f32.mrf.mxu0 }
  0xee   :  { %v1883_v24 = vpop.f32.mrf.mxu1  ;;  %v1337_v6 = vadd.f32 %v1881_v23, %v1877_v21 }
  0xef   :  { %v1885_v25 = vpop.f32.mrf.mxu0 }
  0xf0   :  { %v1887_v26 = vpop.f32.mrf.mxu1 }
  0xf1   :  { %v1889_v27 = vpop.f32.mrf.mxu0 }
  0xf2   :  { %v1891_v28 = vpop.f32.mrf.mxu1 }
  0xf3   :  { %v1893_v29 = vpop.f32.mrf.mxu0  ;;  %v1404_v18 = vadd.f32 %v1891_v28, %v1887_v26 }
  0xf4   :  { %v1895_v30 = vpop.f32.mrf.mxu1 }
  0xf5   :  { %v1897_v31 = vpop.f32.mrf.mxu0 }
  0xf6   :  { %v1899_v32 = vpop.f32.mrf.mxu1 }
  0xf7   :  { %v1901_v33 = vpop.f32.mrf.mxu0  ;;  %v1407_v20 = vadd.f32 %v1899_v32, %v1895_v30 }
  0xf8   :  { %v1903_v34 = vpop.f32.mrf.mxu1 }
  0xf9   :  { %2231 = vst [vmem:[#allocation3_spill] sm:$0xff] %v1903_v34  ;;  %v1905_v35 = vpop.f32.mrf.mxu0  ;;  %v1395_v34 = vadd.f32 %v1867_v16, %v1863_v14 }
  0xfa   :  { %v1907_v36 = vpop.f32.mrf.mxu1 }
  0xfb   :  { %2232 = vst [vmem:[#allocation4_spill] sm:$0xff] %v1907_v36  ;;  %v1909_v37 = vpop.f32.mrf.mxu0 }
  0xfc   :  { %v1911_v38 = vpop.f32.mrf.mxu1 }
  0xfd   :  { %v1913_v39 = vpop.f32.mrf.mxu0 }
  0xfe   :  { %v1915_v40 = vpop.f32.mrf.mxu1  ;;  %v1349_v26 = vadd.f32 %v1913_v39, %v1909_v37 }
  0xff   :  { %v1917_v41 = vpop.f32.mrf.mxu0  ;;  %v1413_v30 = vadd.f32 %v1915_v40, %v1911_v38 }
 0x100   :  { %v1919_v42 = vpop.f32.mrf.mxu1 }
 0x101   :  { %2233 = vst [vmem:[#allocation5_spill] sm:$0xff] %v1919_v42  ;;  %v1921_v43 = vpop.f32.mrf.mxu0 }
 0x102   :  { %2234 = vst [vmem:[#allocation6_spill] sm:$0xff] %v1921_v43  ;;  %v1923_v44 = vpop.f32.mrf.mxu1  ;;  %v1994_v43 = vld [vmem:[%s2223_s4 + $0x10] sm:$0xff]  }
 0x103   :  { %2235 = vst [vmem:[#allocation7_spill] sm:$0xff] %v1923_v44  ;;  %v1925_v45 = vpop.f32.mrf.mxu0  ;;  %v1284_v44 = vunpack.c.l.bf16 %v1994_v43 }
 0x104   :  { %v1927_v46 = vpop.f32.mrf.mxu1 }
 0x105   :  { %v1354_v47 = vpop.f32.mrf.mxu0 }
 0x106   :  { %v1418_v48 = vpop.f32.mrf.mxu1 }
 0x107   :  { %v1929_v49 = vpop.f32.mrf.mxu0  ;;  %v1419_v23 = vadd.f32 %v1418_v48, %v1927_v46  ;;  %v2039_v48 = vadd.f32 %v1905_v35, %v1901_v33 }
 0x108   :  { %v1931_v50 = vpop.f32.mrf.mxu1 }
 0x109   :  { %v1933_v51 = vpop.f32.mrf.mxu0 }
 0x10a   :  { %v1935_v52 = vpop.f32.mrf.mxu1 }
 0x10b   :  { %v1359_v53 = vpop.f32.mrf.mxu0  ;;  %v1422_v38 = vadd.f32 %v1935_v52, %v1931_v50  ;;  %v53_v52 = vld [vmem:[#allocation2 + $0x58] sm:$0xff] }
 0x10c   :  { %v1423_v54 = vpop.f32.mrf.mxu1 }
 0x10d   :  { %v1360_v55 = vpop.f32.mrf.mxu0 }
 0x10e   :  { %v1424_v56 = vpop.f32.mrf.mxu1  ;;  %v1361_v5 = vadd.f32 %v1360_v55, %v1359_v53  ;;  %v1289_v53 = vunpack.c.h.bf16 %v1976_v9 }
 0x10f   :  { %v1362_v57 = vpop.f32.mrf.mxu0  ;;  %v1425_v14 = vadd.f32 %v1424_v56, %v1423_v54  ;;  %v52_v56 = vld [vmem:[#allocation2 + $0x50] sm:$0xff] }
 0x110   :  { %v1426_v58 = vpop.f32.mrf.mxu1 }
 0x111   :  { %v1363_v59 = vpop.f32.mrf.mxu0  ;;  %v791_v46 = vadd.f32 %v1425_v14, %v1361_v5  ;;  %v50_v5 = vld [vmem:[#allocation2 + $0x40] sm:$0xff] }
 0x112   :  { %v1427_v60 = vpop.f32.mrf.mxu1  ;;  %v1364_v32 = vadd.f32 %v1363_v59, %v1362_v57  ;;  %v42_v57 = vld [vmem:[#allocation2] sm:$0xff] }
 0x113   :  { %v1937_v61 = vpop.f32.mrf.mxu0  ;;  %v1428_v54 = vadd.f32 %v1427_v60, %v1426_v58 }
 0x114   :  { %v1939_v62 = vpop.f32.mrf.mxu1 }
 0x115   :  { %v1941_v63 = vpop.f32.mrf.mxu0 }
 0x116   :  { %v1943_v0 = vpop.f32.mrf.mxu1 }
 0x117   :  { %v1945_v1 = vpop.f32.mrf.mxu0  ;;  %v1431_v50 = vadd.f32 %v1943_v0, %v1939_v62 }
 0x118   :  { %2236 = vst [vmem:[#allocation8_spill] sm:$0xff] %v1945_v1  ;;  %v1952_v3 = vpop.f32.mrf.mxu1  ;;  %v1999_v1 = vld [vmem:[%s2223_s4 + $0x30] sm:$0xff]  }
 0x119   :  { %2237 = vst [vmem:[#allocation9_spill] sm:$0xff] %v1952_v3  ;;  %v1969_v7 = vpop.f32.mrf.mxu0  ;;  %v1334_v3 = vadd.f32 %v1873_v19, %v1869_v17  ;;  %v1300_v42 = vunpack.c.l.bf16 %v1999_v1  ;;  %v1340_v17 = vadd.f32 %v1889_v27, %v1885_v25  ;;  %v1343_v19 = vadd.f32 %v1897_v31, %v1893_v29 }
 0x11a   :  { %2240 = vst [vmem:[#allocation12_spill] sm:$0xff] %v1969_v7  ;;  %v1971_v8 = vpop.f32.mrf.mxu1  ;;  %v1331_v7 = vadd.f32 %v1865_v15, %v1861_v13  ;;  %v1401_v13 = vadd.f32 %v1883_v24, %v1879_v22  ;;  %v1355_v22 = vadd.f32 %v1354_v47, %v1925_v45  ;;  %v44_v45 = vld [vmem:[#allocation2 + $0x10] sm:$0xff] }
 0x11b   :  { %2241 = vst [vmem:[#allocation13_spill] sm:$0xff] %v1971_v8  ;;  %v1371_v11 = vpop.f32.mrf.mxu0  ;;  %v754_v31 = vadd.f32 %v1398_v12, %v1334_v3  ;;  %v762_v37 = vadd.f32 %v1404_v18, %v1340_v17  ;;  %v2041_v39 = vadd.f32 %v1407_v20, %v1343_v19  ;;  %v794_v17 = vadd.f32 %v1428_v54, %v1364_v32 }
 0x11c   :  { %v1435_v8 = vpop.f32.mrf.mxu1  ;;  %v759_v28 = vadd.f32 %v1401_v13, %v1337_v6  ;;  %v751_v29 = vadd.f32 %v1395_v34, %v1331_v7  ;;  %v1358_v34 = vadd.f32 %v1933_v51, %v1929_v49  ;;  %v783_v59 = vadd.f32 %v1419_v23, %v1355_v22  ;;  %v45_v13 = vld [vmem:[#allocation2 + $0x18] sm:$0xff]  ;;  %v43_v22 = vld [vmem:[#allocation2 + $0x8] sm:$0xff] }
 0x11d   :  { %v1372_v36 = vpop.f32.mrf.mxu0  ;;  %v775_v18 = vadd.f32 %v1413_v30, %v1349_v26  ;;  %v1367_v49 = vadd.f32 %v1941_v63, %v1937_v61  ;;  %v2243_v61 = vld [vmem:[#allocation5_spill] sm:$0xff]  ;;  %v2244_v63 = vld [vmem:[#allocation7_spill] sm:$0xff] }
 0x11e   :  { %v1436_v15 = vpop.f32.mrf.mxu1  ;;  %v1373_v60 = vadd.f32 %v1372_v36, %v1371_v11  ;;  %v2242_v11 = vld [vmem:[#allocation6_spill] sm:$0xff]  ;;  %v1416_v26 = vadd.f32 %v2244_v63, %v2243_v61 }
 0x11f   :  { %v2015_v16 = vpop.f32.mrf.mxu0  ;;  %v1437_v3 = vadd.f32 %v1436_v15, %v1435_v8  ;;  %v1352_v15 = vadd.f32 %v2242_v11, %v1917_v41 }
 0x120   :  { %v2027_v21 = vpop.f32.mrf.mxu1 }
 0x121   :  { %v1375_v24 = vpop.f32.mrf.mxu0  ;;  %v807_v30 = vadd.f32 %v1437_v3, %v1373_v60  ;;  %v2071_v60 = vld [vmem:[%s2224_s2] ss:$0 sm:$0xff] }
 0x122   :  { %v1439_v27 = vpop.f32.mrf.mxu1  ;;  %v1376_v32 = vadd.f32 %v1375_v24, %v2015_v16  ;;  %v2248_v16 = vld [vmem:[#allocation12_spill] sm:$0xff] }
 0x123   :  { %v1463_v47 = vpop.f32.mrf.mxu0  ;;  %v1440_v41 = vadd.f32 %v1439_v27, %v2027_v21  ;;  %v2249_v21 = vld [vmem:[#allocation9_spill] sm:$0xff] }
 0x124   :  { %v856_v55 = vadd.f32 %v1463_v47, %v759_v28  ;;  %v1471_v25 = vpop.f32.mrf.mxu1  ;;  %v51_v28 = vld [vmem:[#allocation2 + $0x48] sm:$0xff]  ;;  %v48_v47 = vld [vmem:[#allocation2 + $0x30] sm:$0xff] }
 0x125   :  { %v888_v40 = vadd.f32 %v1471_v25, %v791_v46  ;;  %v847_v58 = vpop.f32.mrf.mxu0  ;;  %v786_v25 = vadd.f32 %v1422_v38, %v1358_v34  ;;  %v56_v38 = vld [vmem:[#allocation2 + $0x70] sm:$0xff] }
 0x126   :  { %v912_v33 = vadd.f32 %v856_v55, %v44_v45  ;;  %v848_v35 = vadd.f32 %v847_v58, %v751_v29  ;;  %v879_v6 = vpop.f32.mrf.mxu1  ;;  %v2245_v55 = vld [vmem:[#allocation3_spill] sm:$0xff]  ;;  %v2247_v58 = vld [vmem:[#allocation8_spill] sm:$0xff]  ;;  %v2250_v27 = vld [vmem:[#allocation13_spill] sm:$0xff] }
 0x127   :  { %v920_v7 = vadd.f32 %v888_v40, %v52_v56  ;;  %v880_v12 = vadd.f32 %v879_v6, %v783_v59  ;;  %v1464_v14 = vpop.f32.mrf.mxu0  ;;  %v2246_v56 = vld [vmem:[#allocation4_spill] sm:$0xff]  ;;  %v1370_v24 = vadd.f32 %v2248_v16, %v2247_v58  ;;  %v1434_v59 = vadd.f32 %v2250_v27, %v2249_v21 }
 0x128   :  { %928 = vst.msk [vmem:[#allocation2 + $0x10] sm:$0xff] %vm25_vm0, %v912_v33  ;;  %v910_v36 = vadd.f32 %v848_v35, %v42_v57  ;;  %v859_v51 = vadd.f32 %v1464_v14, %v762_v37  ;;  %v1472_v8 = vpop.f32.mrf.mxu1  ;;  %v1410_v37 = vadd.f32 %v2246_v56, %v2245_v55  ;;  %v799_v57 = vadd.f32 %v1431_v50, %v1367_v49  ;;  %v46_v35 = vld [vmem:[#allocation2 + $0x20] sm:$0xff] }
 0x129   :  { %936 = vst.msk [vmem:[#allocation2 + $0x50] sm:$0xff] %vm25_vm0, %v920_v7  ;;  %v918_v19 = vadd.f32 %v880_v12, %v50_v5  ;;  %v891_v20 = vadd.f32 %v1472_v8, %v794_v17  ;;  %v850_v23 = vpop.f32.mrf.mxu0  ;;  %v54_v12 = vld [vmem:[#allocation2 + $0x60] sm:$0xff]  ;;  %v778_v14 = vadd.f32 %v1416_v26, %v1352_v15  ;;  %v1285_v17 = vunpack.c.h.bf16 %v1994_v43 }
 0x12a   :  { %926 = vst.msk [vmem:[#allocation2] sm:$0xff] %vm25_vm0, %v910_v36  ;;  %v913_v62 = vadd.f32 %v859_v51, %v45_v13  ;;  %v851_v0 = vadd.f32 %v850_v23, %v754_v31  ;;  %v882_v29 = vpop.f32.mrf.mxu1  ;;  %v2080_v49 = vld [vmem:[%s2225_s3] ss:$0 sm:$0xff]  ;;  %v49_v51 = vld [vmem:[#allocation2 + $0x38] sm:$0xff]  ;;  %v810_v8 = vadd.f32 %v1440_v41, %v1376_v32 }
 0x12b   :  { %934 = vst.msk [vmem:[#allocation2 + $0x40] sm:$0xff] %vm25_vm0, %v918_v19  ;;  %v921_v54 = vadd.f32 %v891_v20, %v53_v52  ;;  %v883_v45 = vadd.f32 %v882_v29, %v786_v25  ;;  %v1467_v46 = vpop.f32.mrf.mxu0  ;;  %v770_v25 = vadd.f32 %v1410_v37, %v2039_v48  ;;  %v802_v29 = vadd.f32 %v1434_v59, %v1370_v24  ;;  %v55_v48 = vld [vmem:[#allocation2 + $0x68] sm:$0xff] }
 0x12c   :  { %929 = vst.msk [vmem:[#allocation2 + $0x18] sm:$0xff] %vm25_vm0, %v913_v62  ;;  %v911_v34 = vadd.f32 %v851_v0, %v43_v22  ;;  %v872_v31 = vadd.f32 %v1467_v46, %v775_v18  ;;  %v1475_v40 = vpop.f32.mrf.mxu1  ;;  %v57_v22 = vld [vmem:[#allocation2 + $0x78] sm:$0xff]  ;;  %v47_v0 = vld [vmem:[#allocation2 + $0x28] sm:$0xff]  ;;  %v2252_v24 = vunpack.c.l.bf16 %v1957_v4 }
 0x12d   :  { %937 = vst.msk [vmem:[#allocation2 + $0x58] sm:$0xff] %vm25_vm0, %v921_v54  ;;  %v919_v3 = vadd.f32 %v883_v45, %v51_v28  ;;  %v904_v33 = vadd.f32 %v1475_v40, %v807_v30  ;;  %v863_v5 = vpop.f32.mrf.mxu0 }
 0x12e   :  { %927 = vst.msk [vmem:[#allocation2 + $0x8] sm:$0xff] %vm25_vm0, %v911_v34  ;;  %v916_v6 = vadd.f32 %v872_v31, %v48_v47  ;;  %v864_v7 = vadd.f32 %v863_v5, %v2041_v39  ;;  %v895_v13 = vpop.f32.mrf.mxu1  ;;  %v1301_v39 = vunpack.c.h.bf16 %v1999_v1  ;;  %v2251_v31 = vunpack.c.l.bf16 %v1950_v2  ;;  %v2253_v5 = vld [vmem:[#allocation10_spill] sm:$0xff] }
 0x12f   :  { %v947_v18 = vld [vmem:[#allocation2 + $0x10] sm:$0xff]  ;;  %935 = vst.msk [vmem:[#allocation2 + $0x48] sm:$0xff] %vm25_vm0, %v919_v3  ;;  %v924_v50 = vadd.f32 %v904_v33, %v56_v38  ;;  %v896_v36 = vadd.f32 %v895_v13, %v799_v57  ;;  %v1468_v52 = vpop.f32.mrf.mxu0 }
 0x130   :  { %v970_v11 = vmul.f32 %v2071_v60, %v947_v18  ;;  %v955_v15 = vld [vmem:[#allocation2 + $0x50] sm:$0xff]  ;;  %932 = vst.msk [vmem:[#allocation2 + $0x30] sm:$0xff] %vm25_vm0, %v916_v6  ;;  %v914_v19 = vadd.f32 %v864_v7, %v46_v35  ;;  %v875_v20 = vadd.f32 %v1468_v52, %v778_v14  ;;  %v1476_v23 = vpop.f32.mrf.mxu1  ;;  %v2254_v6 = vunpack.c.l.bf16 %v2253_v5 }
 0x131   :  { %v978_v61 = vmul.f32 %v2071_v60, %v955_v15  ;;  %v945_v63 = vld [vmem:[#allocation2] sm:$0xff]  ;;  %940 = vst.msk [vmem:[#allocation2 + $0x70] sm:$0xff] %vm25_vm0, %v924_v50  ;;  %v922_v26 = vadd.f32 %v896_v36, %v54_v12  ;;  %v907_v62 = vadd.f32 %v1476_v23, %v810_v8  ;;  %v866_v28 = vpop.f32.mrf.mxu0 }
 0x132   :  { %v993_v30 = vadd.f32 %v2080_v49, %v970_v11  ;;  %v968_v32 = vmul.f32 %v2071_v60, %v945_v63  ;;  %v953_v41 = vld [vmem:[#allocation2 + $0x40] sm:$0xff]  ;;  %930 = vst.msk [vmem:[#allocation2 + $0x20] sm:$0xff] %vm25_vm0, %v914_v19  ;;  %v917_v54 = vadd.f32 %v875_v20, %v49_v51  ;;  %v867_v45 = vadd.f32 %v866_v28, %v770_v25  ;;  %v898_v47 = vpop.f32.mrf.mxu1 }
 0x133   :  { %v1001_v46 = vadd.f32 %v2080_v49, %v978_v61  ;;  %v976_v55 = vmul.f32 %v2071_v60, %v953_v41  ;;  %v948_v56 = vld [vmem:[#allocation2 + $0x18] sm:$0xff]  ;;  %938 = vst.msk [vmem:[#allocation2 + $0x60] sm:$0xff] %vm25_vm0, %v922_v26  ;;  %v925_v37 = vadd.f32 %v907_v62, %v57_v22  ;;  %v899_v34 = vadd.f32 %v898_v47, %v802_v29  ;;  %v2255_v50 = vld [vmem:[#allocation11_spill] sm:$0xff] }
 0x134   :  { %v1041_v38 = vadd.f32 %v2251_v31, %v993_v30  ;;  %v991_v40 = vadd.f32 %v2080_v49, %v968_v32  ;;  %v971_v57 = vmul.f32 %v2071_v60, %v948_v56  ;;  %v956_v58 = vld [vmem:[#allocation2 + $0x58] sm:$0xff]  ;;  %933 = vst.msk [vmem:[#allocation2 + $0x38] sm:$0xff] %vm25_vm0, %v917_v54  ;;  %v915_v16 = vadd.f32 %v867_v45, %v47_v0 }
 0x135   :  { %v1049_v21 = vadd.f32 %v2252_v24, %v1001_v46  ;;  %v999_v27 = vadd.f32 %v2080_v49, %v976_v55  ;;  %v979_v59 = vmul.f32 %v2071_v60, %v956_v58  ;;  %v946_v3 = vld [vmem:[#allocation2 + $0x8] sm:$0xff]  ;;  %941 = vst.msk [vmem:[#allocation2 + $0x78] sm:$0xff] %vm25_vm0, %v925_v37  ;;  %v923_v33 = vadd.f32 %v899_v34, %v55_v48 }
 0x136   :  { %v1057_v35 = vmax.f32 %v1041_v38, 0.0  ;;  %v1039_v7 = vadd.f32 %v2254_v6, %v991_v40  ;;  %v994_v12 = vadd.f32 %v2080_v49, %v971_v57  ;;  %v969_v13 = vmul.f32 %v2071_v60, %v946_v3  ;;  %v954_v14 = vld [vmem:[#allocation2 + $0x48] sm:$0xff]  ;;  %931 = vst.msk [vmem:[#allocation2 + $0x28] sm:$0xff] %vm25_vm0, %v915_v16 }
 0x137   :  { %v1065_v18 = vmax.f32 %v1049_v21, 0.0  ;;  %v2256_v36 = vunpack.c.l.bf16 %v2255_v50  ;;  %v1002_v52 = vadd.f32 %v2080_v49, %v979_v59  ;;  %v977_v8 = vmul.f32 %v2071_v60, %v954_v14  ;;  %v951_v11 = vld [vmem:[#allocation2 + $0x30] sm:$0xff]  ;;  %939 = vst.msk [vmem:[#allocation2 + $0x68] sm:$0xff] %vm25_vm0, %v923_v33 }
 0x138   :  { %v1260_v15 = vpack.c.bf16 %v1057_v35, %v1057_v35  ;;  %v1055_v19 = vmax.f32 %v1039_v7, 0.0  ;;  %v2257_v20 = vunpack.c.h.bf16 %v1950_v2  ;;  %v992_v23 = vadd.f32 %v2080_v49, %v969_v13  ;;  %v959_v25 = vld [vmem:[#allocation2 + $0x70] sm:$0xff] }
 0x139   :  { %v1047_v51 = vadd.f32 %v2256_v36, %v999_v27  ;;  %v1268_v61 = vpack.c.bf16 %v1065_v18, %v1065_v18  ;;  %v2258_v26 = vunpack.c.h.bf16 %v1957_v4  ;;  %v1000_v0 = vadd.f32 %v2080_v49, %v977_v8  ;;  %v949_v28 = vld [vmem:[#allocation2 + $0x20] sm:$0xff] }
 0x13a   :  { %v1042_v22 = vadd.f32 %v2257_v20, %v994_v12  ;;  %1138 = vst.msk [vmem:[%s2226_s5 + $0x8] sm:$0xf] %vm1135_vm1, %v1260_v15  ;;  %v1258_v29 = vpack.c.bf16 %v1055_v19, %v1055_v19  ;;  %v2259_v2 = vunpack.c.h.bf16 %v2253_v5  ;;  %v974_v41 = vmul.f32 %v2071_v60, %v951_v11  ;;  %v957_v54 = vld [vmem:[#allocation2 + $0x60] sm:$0xff] }
 0x13b   :  { %v1063_v63 = vmax.f32 %v1047_v51, 0.0  ;;  %v1050_v62 = vadd.f32 %v2258_v26, %v1002_v52  ;;  %1146 = vst.msk [vmem:[%s2226_s5 + $0x28] sm:$0xf] %vm1135_vm1, %v1268_v61  ;;  %v2260_v48 = vunpack.c.h.bf16 %v2255_v50  ;;  %v982_v46 = vmul.f32 %v2071_v60, %v959_v25  ;;  %v952_v55 = vld [vmem:[#allocation2 + $0x38] sm:$0xff] }
 0x13c   :  { %v1058_v30 = vmax.f32 %v1042_v22, 0.0  ;;  %v1040_v32 = vadd.f32 %v2259_v2, %v992_v23  ;;  %1136 = vst.msk [vmem:[%s2226_s5] sm:$0xf] %vm1135_vm1, %v1258_v29  ;;  %v997_v34 = vadd.f32 %v2080_v49, %v974_v41  ;;  %v972_v31 = vmul.f32 %v2071_v60, %v949_v28  ;;  %v960_v38 = vld [vmem:[#allocation2 + $0x78] sm:$0xff] }
 0x13d   :  { %v1266_v4 = vpack.c.bf16 %v1063_v63, %v1063_v63  ;;  %v1066_v45 = vmax.f32 %v1050_v62, 0.0  ;;  %v1048_v47 = vadd.f32 %v2260_v48, %v1000_v0  ;;  %v1005_v58 = vadd.f32 %v2080_v49, %v982_v46  ;;  %v950_v24 = vld [vmem:[#allocation2 + $0x28] sm:$0xff] }
 0x13e   :  { %v1261_v56 = vpack.c.bf16 %v1058_v30, %v1058_v30  ;;  %v1056_v37 = vmax.f32 %v1040_v32, 0.0  ;;  %v980_v16 = vmul.f32 %v2071_v60, %v957_v54  ;;  %v2261_v27 = vunpack.c.l.bf16 %v1976_v9  ;;  %v958_v35 = vld [vmem:[#allocation2 + $0x68] sm:$0xff] }
 0x13f   :  { %1144 = vst.msk [vmem:[%s2226_s5 + $0x20] sm:$0xf] %vm1135_vm1, %v1266_v4  ;;  %v1269_v40 = vpack.c.bf16 %v1066_v45, %v1066_v45  ;;  %v1064_v57 = vmax.f32 %v1048_v47, 0.0  ;;  %v995_v3 = vadd.f32 %v2080_v49, %v972_v31  ;;  %v975_v33 = vmul.f32 %v2071_v60, %v952_v55 }
 0x140   :  { %1139 = vst.msk [vmem:[%s2226_s5 + $0xc] sm:$0xf] %vm1135_vm1, %v1261_v56  ;;  %v1259_v21 = vpack.c.bf16 %v1056_v37, %v1056_v37  ;;  %v1045_v59 = vadd.f32 %v2261_v27, %v997_v34  ;;  %v2262_v6 = vunpack.c.l.bf16 %v1981_v10  ;;  %v1003_v12 = vadd.f32 %v2080_v49, %v980_v16 }
 0x141   :  { %1147 = vst.msk [vmem:[%s2226_s5 + $0x2c] sm:$0xf] %vm1135_vm1, %v1269_v40  ;;  %v1267_v5 = vpack.c.bf16 %v1064_v57, %v1064_v57  ;;  %v983_v13 = vmul.f32 %v2071_v60, %v960_v38  ;;  %v1043_v18 = vadd.f32 %v1284_v44, %v995_v3  ;;  %v998_v50 = vadd.f32 %v2080_v49, %v975_v33 }
 0x142   :  { %v1053_v7 = vadd.f32 %v2262_v6, %v1005_v58  ;;  %1137 = vst.msk [vmem:[%s2226_s5 + $0x4] sm:$0xf] %vm1135_vm1, %v1259_v21  ;;  %v1061_v14 = vmax.f32 %v1045_v59, 0.0  ;;  %v973_v36 = vmul.f32 %v2071_v60, %v950_v24  ;;  %v1051_v52 = vadd.f32 %v1300_v42, %v1003_v12 }
 0x143   :  { %1145 = vst.msk [vmem:[%s2226_s5 + $0x24] sm:$0xf] %vm1135_vm1, %v1267_v5  ;;  %v1006_v8 = vadd.f32 %v2080_v49, %v983_v13  ;;  %v981_v11 = vmul.f32 %v2071_v60, %v958_v35  ;;  %v1059_v19 = vmax.f32 %v1043_v18, 0.0  ;;  %v1046_v44 = vadd.f32 %v1289_v53, %v998_v50 }
 0x144   :  { %v1069_v51 = vmax.f32 %v1053_v7, 0.0  ;;  %v1264_v15 = vpack.c.bf16 %v1061_v14, %v1061_v14  ;;  %v996_v20 = vadd.f32 %v2080_v49, %v973_v36  ;;  %v1067_v23 = vmax.f32 %v1051_v52, 0.0 }
 0x145   :  { %v2263_v25 = vunpack.c.h.bf16 %v1981_v10  ;;  %v1004_v63 = vadd.f32 %v2080_v49, %v981_v11  ;;  %v1262_v42 = vpack.c.bf16 %v1059_v19, %v1059_v19  ;;  %v1062_v60 = vmax.f32 %v1046_v44, 0.0 }
 0x146   :  { %v1272_v22 = vpack.c.bf16 %v1069_v51, %v1069_v51  ;;  %1142 = vst.msk [vmem:[%s2226_s5 + $0x18] sm:$0xf] %vm1135_vm1, %v1264_v15  ;;  %v1044_v9 = vadd.f32 %v1285_v17, %v996_v20  ;;  %v1270_v53 = vpack.c.bf16 %v1067_v23, %v1067_v23 }
 0x147   :  { %v1054_v61 = vadd.f32 %v2263_v25, %v1006_v8  ;;  %v1052_v49 = vadd.f32 %v1301_v39, %v1004_v63  ;;  %1140 = vst.msk [vmem:[%s2226_s5 + $0x10] sm:$0xf] %vm1135_vm1, %v1262_v42  ;;  %v1265_v26 = vpack.c.bf16 %v1062_v60, %v1062_v60 }
 0x148   :  { %1150 = vst.msk [vmem:[%s2226_s5 + $0x38] sm:$0xf] %vm1135_vm1, %v1272_v22  ;;  %v1060_v62 = vmax.f32 %v1044_v9, 0.0  ;;  %1148 = vst.msk [vmem:[%s2226_s5 + $0x30] sm:$0xf] %vm1135_vm1, %v1270_v53 }
 0x149   :  { %v1070_v10 = vmax.f32 %v1054_v61, 0.0  ;;  %v1068_v17 = vmax.f32 %v1052_v49, 0.0  ;;  %1143 = vst.msk [vmem:[%s2226_s5 + $0x1c] sm:$0xf] %vm1135_vm1, %v1265_v26 }
 0x14a   :  { %v1263_v1 = vpack.c.bf16 %v1060_v62, %v1060_v62 }
 0x14b   :  { %v1273_v43 = vpack.c.bf16 %v1070_v10, %v1070_v10  ;;  %v1271_v39 = vpack.c.bf16 %v1068_v17, %v1068_v17 }
 0x14c   :  { %1141 = vst.msk [vmem:[%s2226_s5 + $0x14] sm:$0xf] %vm1135_vm1, %v1263_v1 }
 0x14d   :  { %1151 = vst.msk [vmem:[%s2226_s5 + $0x3c] sm:$0xf] %vm1135_vm1, %v1273_v43  ;;  %1149 = vst.msk [vmem:[%s2226_s5 + $0x34] sm:$0xf] %vm1135_vm1, %v1271_v39 }

// kernel: resnet18_forward.30
= control target key start
LH: loop header
LB: loop body
LE: loop exit
PB: predicated region body
PF: predicated region fallthrough
CT: control target
= control target key end

     0   :  { %vm380_vm0 = vcmask 523264   ;;  %s967_s1 = inlined_call_operand.vmem [shape: bf16[576,128], index: 1, kind: input, shape index: {}]   ;;  %s968_s0 = inlined_call_operand.vmem [shape: bf16[32,576], index: 0, kind: input, shape index: {}]   ;;  %s969_s2 = inlined_call_operand.vmem [shape: f32[1,128], index: 2, kind: input, shape index: {}]   ;;  %s970_s3 = inlined_call_operand.vmem [shape: f32[1,128], index: 3, kind: input, shape index: {}]   ;;  %s971_s4 = inlined_call_operand.vmem [shape: bf16[32,128], index: 4, kind: output, shape index: {}]  }
   0x1   :  { %v742_v0 = vld [vmem:[%s967_s1 + $0x78] sm:$0xff]   ;;  %v746_v4 = vld [vmem:[%s967_s1 + $0x70] sm:$0xff]   ;;  %v750_v8 = vld [vmem:[%s967_s1 + $0x68] sm:$0xff]  }
   0x2   :  { %v743_v1 = vld [vmem:[%s967_s1 + $0xf8] sm:$0xff]   ;;  %668 = vmatprep.subr.bf16.mxu0 %v742_v0  ;;  %v747_v5 = vld [vmem:[%s967_s1 + $0xf0] sm:$0xff]   ;;  %v751_v9 = vld [vmem:[%s967_s1 + $0xe8] sm:$0xff]  }
   0x3   :  { %v744_v2 = vld [vmem:[%s967_s1 + $0x38] sm:$0xff]   ;;  %696 = vmatprep.subr.bf16.mxu1 %v743_v1  ;;  %v748_v6 = vld [vmem:[%s967_s1 + $0x30] sm:$0xff]   ;;  %v752_v10 = vld [vmem:[%s967_s1 + $0x28] sm:$0xff]  }
   0x4   :  { %v745_v3 = vld [vmem:[%s967_s1 + $0xb8] sm:$0xff]   ;;  %669 = vmatpush3.bf16.msra.mxu0 %v744_v2  ;;  %v749_v7 = vld [vmem:[%s967_s1 + $0xb0] sm:$0xff]   ;;  %v753_v11 = vld [vmem:[%s967_s1 + $0xa8] sm:$0xff]  }
   0x5   :  { %697 = vmatpush3.bf16.msra.mxu1 %v745_v3  ;;  %670 = vmatprep.subr.bf16.mxu0 %v746_v4  ;;  %v754_v12 = vld [vmem:[%s967_s1 + $0x60] sm:$0xff]   ;;  %v758_v16 = vld [vmem:[%s967_s1 + $0x58] sm:$0xff]   ;;  %v762_v20 = vld [vmem:[%s967_s1 + $0x50] sm:$0xff]  }
   0x6   :  { %698 = vmatprep.subr.bf16.mxu1 %v747_v5  ;;  %v755_v13 = vld [vmem:[%s967_s1 + $0xe0] sm:$0xff]   ;;  %v759_v17 = vld [vmem:[%s967_s1 + $0xd8] sm:$0xff]   ;;  %v763_v21 = vld [vmem:[%s967_s1 + $0xd0] sm:$0xff]  }
   0x7   :  { %v756_v14 = vld [vmem:[%s967_s1 + $0x20] sm:$0xff]   ;;  %v760_v18 = vld [vmem:[%s967_s1 + $0x18] sm:$0xff]   ;;  %v764_v22 = vld [vmem:[%s967_s1 + $0x10] sm:$0xff]  }
   0x8   :  { %671 = vmatpush3.bf16.msra.mxu0 %v748_v6  ;;  %v757_v15 = vld [vmem:[%s967_s1 + $0xa0] sm:$0xff]   ;;  %v761_v19 = vld [vmem:[%s967_s1 + $0x98] sm:$0xff]   ;;  %v765_v23 = vld [vmem:[%s967_s1 + $0x90] sm:$0xff]  }
   0x9   :  { %699 = vmatpush3.bf16.msra.mxu1 %v749_v7  ;;  %672 = vmatprep.subr.bf16.mxu0 %v750_v8  ;;  %v766_v24 = vld [vmem:[%s967_s1 + $0x48] sm:$0xff]   ;;  %v770_v28 = vld [vmem:[%s967_s1 + $0x40] sm:$0xff]   ;;  %v780_v36 = vld [vmem:[%s967_s1 + $0x118] sm:$0xff]  }
   0xa   :  { %700 = vmatprep.subr.bf16.mxu1 %v751_v9  ;;  %v767_v25 = vld [vmem:[%s967_s1 + $0xc8] sm:$0xff]   ;;  %v771_v29 = vld [vmem:[%s967_s1 + $0xc0] sm:$0xff]   ;;  %v781_v37 = vld [vmem:[%s967_s1 + $0x110] sm:$0xff]  }
   0xb   :  { %v768_v26 = vld [vmem:[%s967_s1 + $0x8] sm:$0xff]   ;;  %v772_v30 = vld [vmem:[%s967_s1] sm:$0xff]  }
   0xc   :  { %673 = vmatpush3.bf16.msra.mxu0 %v752_v10  ;;  %v769_v27 = vld [vmem:[%s967_s1 + $0x88] sm:$0xff]   ;;  %v773_v31 = vld [vmem:[%s967_s1 + $0x80] sm:$0xff]  }
   0xd   :  { %701 = vmatpush3.bf16.msra.mxu1 %v753_v11  ;;  %674 = vmatprep.subr.bf16.mxu0 %v754_v12  ;;  %v774_v32 = vld [vmem:[%s968_s0] ss:$20 sps:$4 sm:$0xff]   ;;  %v776_v33 = vld [vmem:[%s968_s0 + $0x4] ss:$20 sps:$4 sm:$0xff]   ;;  %v777_v34 = vld [vmem:[%s968_s0 + $0x8] ss:$20 sps:$4 sm:$0xff]  }
   0xe   :  { %702 = vmatprep.subr.bf16.mxu1 %v755_v13  ;;  %v779_v35 = vld [vmem:[%s968_s0 + $0xc] ss:$20 sps:$4 sm:$0xff]   ;;  %419 = vmatprep.mubr.bf16.mxu0 %v776_v33  ;;  %v784_v39 = vld [vmem:[%s968_s0 + $0x34] ss:$20 sps:$4 sm:$0xff]   ;;  %v787_v42 = vld [vmem:[%s968_s0 + $0x30] ss:$20 sps:$4 sm:$0xff]  }
   0xf   :  { %468 = vmatprep.mubr.bf16.mxu1 %v779_v35  ;;  %v782_v38 = vld [vmem:[%s968_s0 + $0x2c] ss:$20 sps:$4 sm:$0xff]   ;;  %v786_v40 = vld [vmem:[%s968_s0 + $0x28] ss:$20 sps:$4 sm:$0xff]   ;;  %v790_v43 = vld [vmem:[%s968_s0 + $0x10] ss:$20 sps:$4 sm:$0xff]  }
  0x10   :  { %675 = vmatpush3.bf16.msra.mxu0 %v756_v14  ;;  %v788_v41 = vld [vmem:[%s967_s1 + $0x108] sm:$0xff]   ;;  %v789_v44 = vld [vmem:[%s967_s1 + $0x100] sm:$0xff]  }
  0x11   :  { %703 = vmatpush3.bf16.msra.mxu1 %v757_v15  ;;  %676 = vmatprep.subr.bf16.mxu0 %v758_v16  ;;  %v791_v45 = vld [vmem:[%s968_s0 + $0x38] ss:$20 sps:$4 sm:$0xff]   ;;  %v647_v6 = vld [vmem:[%s969_s2] ss:$0 sm:$0xff] }
  0x12   :  { %704 = vmatprep.subr.bf16.mxu1 %v759_v17  ;;  %v648_v15 = vld [vmem:[%s970_s3] ss:$0 sm:$0xff] }
  0x14   :  { %677 = vmatpush3.bf16.msra.mxu0 %v760_v18 }
  0x15   :  { %705 = vmatpush3.bf16.msra.mxu1 %v761_v19  ;;  %678 = vmatprep.subr.bf16.mxu0 %v762_v20 }
  0x16   :  { %706 = vmatprep.subr.bf16.mxu1 %v763_v21 }
  0x18   :  { %679 = vmatpush3.bf16.msra.mxu0 %v764_v22 }
  0x19   :  { %707 = vmatpush3.bf16.msra.mxu1 %v765_v23  ;;  %680 = vmatprep.subr.bf16.mxu0 %v766_v24 }
  0x1a   :  { %708 = vmatprep.subr.bf16.mxu1 %v767_v25 }
  0x1c   :  { %681 = vmatpush3.bf16.msra.mxu0 %v768_v26 }
  0x1d   :  { %709 = vmatpush3.bf16.msra.mxu1 %v769_v27  ;;  %682 = vmatprep.subr.bf16.mxu0 %v770_v28 }
  0x1e   :  { %710 = vmatprep.subr.bf16.mxu1 %v771_v29 }
  0x20   :  { %683 = vmatpush3.bf16.msra.mxu0 %v772_v30 }
  0x21   :  { %711 = vmatpush3.bf16.msra.mxu1 %v773_v31  ;;  %730 = vmatprep.subr.bf16.mxu0 %v780_v36 }
  0x23   :  { %420 = vmatmul.mubr.bf16.vlgmr.msra.gmra.mxu0 %v774_v32 }
  0x24   :  { %469 = vmatmul.mubr.bf16.vlgmr.msra.gmra.mxu1 %v777_v34  ;;  %731 = vmatpush3.bf16.msra.mxu0 %v780_v36 }
  0x25   :  { %732 = vmatprep.subr.bf16.mxu0 %v781_v37  ;;  %427 = vmatprep.mubr.bf16.mxu0 %v782_v38 }
  0x26   :  { %476 = vmatprep.mubr.bf16.mxu1 %v784_v39 }
  0x28   :  { %733 = vmatpush3.bf16.msra.mxu0 %v781_v37 }
  0x29   :  { %734 = vmatprep.subr.bf16.mxu0 %v788_v41 }
  0x2b   :  { %428 = vmatmul.mubr.bf16.gmra.mxu0 %v786_v40 }
  0x2c   :  { %477 = vmatmul.mubr.bf16.gmra.mxu1 %v787_v42  ;;  %738 = vmatprep.mubr.msk.bf16.mxu0 %vm380_vm0, %v790_v43 }
  0x2d   :  { %735 = vmatpush3.bf16.msra.mxu0 %v788_v41 }
  0x2e   :  { %736 = vmatprep.subr.bf16.mxu0 %v789_v44 }
  0x31   :  { %737 = vmatpush3.bf16.msra.mxu0 %v789_v44 }
  0x34   :  { %739 = vmatmul.mubr.msk.bf16.vlgmr.msra.gmra.mxu0 %vm380_vm0, %v791_v45 }
  0xe3   :  { %v684_v46 = vpop.f32.mrf.mxu0 }
  0xe4   :  { %v712_v47 = vpop.f32.mrf.mxu1 }
  0xe5   :  { %v685_v48 = vpop.f32.mrf.mxu0 }
  0xe6   :  { %v713_v49 = vpop.f32.mrf.mxu1  ;;  %v686_v62 = vadd.f32 %v685_v48, %v684_v46 }
  0xe7   :  { %v687_v50 = vpop.f32.mrf.mxu0  ;;  %v714_v63 = vadd.f32 %v713_v49, %v712_v47 }
  0xe8   :  { %v715_v51 = vpop.f32.mrf.mxu1 }
  0xe9   :  { %v688_v52 = vpop.f32.mrf.mxu0  ;;  %v471_v10 = vadd.f32 %v714_v63, %v686_v62 }
  0xea   :  { %v716_v53 = vpop.f32.mrf.mxu1  ;;  %v689_v7 = vadd.f32 %v688_v52, %v687_v50 }
  0xeb   :  { %v690_v54 = vpop.f32.mrf.mxu0  ;;  %v717_v8 = vadd.f32 %v716_v53, %v715_v51 }
  0xec   :  { %v718_v55 = vpop.f32.mrf.mxu1 }
  0xed   :  { %v691_v56 = vpop.f32.mrf.mxu0  ;;  %v474_v19 = vadd.f32 %v717_v8, %v689_v7 }
  0xee   :  { %v719_v57 = vpop.f32.mrf.mxu1  ;;  %v692_v58 = vadd.f32 %v691_v56, %v690_v54 }
  0xef   :  { %v720_v59 = vadd.f32 %v719_v57, %v718_v55  ;;  %v693_v60 = vpop.f32.mrf.mxu0 }
  0xf0   :  { %v721_v61 = vpop.f32.mrf.mxu1 }
  0xf1   :  { %v694_v0 = vpop.f32.mrf.mxu0  ;;  %v479_v4 = vadd.f32 %v720_v59, %v692_v58 }
  0xf2   :  { %v722_v1 = vpop.f32.mrf.mxu1  ;;  %v695_v2 = vadd.f32 %v694_v0, %v693_v60 }
  0xf3   :  { %v723_v3 = vadd.f32 %v722_v1, %v721_v61 }
  0xf4   :  { %v740_v5 = vpop.f32.mrf.mxu0 }
  0xf5   :  { %v528_v9 = vadd.f32 %v740_v5, %v479_v4  ;;  %v482_v14 = vadd.f32 %v723_v3, %v695_v2 }
  0xf6   :  { %v519_v11 = vpop.f32.mrf.mxu0 }
  0xf7   :  { %v558_v12 = vmul.f32 %v647_v6, %v528_v9  ;;  %v520_v13 = vadd.f32 %v519_v11, %v471_v10 }
  0xf8   :  { %v741_v16 = vpop.f32.mrf.mxu0 }
  0xf9   :  { %v556_v17 = vmul.f32 %v647_v6, %v520_v13  ;;  %v531_v18 = vadd.f32 %v741_v16, %v482_v14  ;;  %v569_v21 = vadd.f32 %v648_v15, %v558_v12 }
  0xfa   :  { %v522_v20 = vpop.f32.mrf.mxu0 }
  0xfb   :  { %v559_v22 = vmul.f32 %v647_v6, %v531_v18  ;;  %v523_v23 = vadd.f32 %v522_v20, %v474_v19  ;;  %v567_v24 = vadd.f32 %v648_v15, %v556_v17  ;;  %v573_v27 = vmax.f32 %v569_v21, 0.0 }
  0xfd   :  { %v570_v25 = vadd.f32 %v648_v15, %v559_v22  ;;  %v557_v26 = vmul.f32 %v647_v6, %v523_v23  ;;  %v571_v30 = vmax.f32 %v567_v24, 0.0 }
  0xff   :  { %v574_v28 = vmax.f32 %v570_v25, 0.0  ;;  %v568_v29 = vadd.f32 %v648_v15, %v557_v26 }
 0x101   :  { %v665_v31 = vpack.c.bf16 %v574_v28, %v573_v27  ;;  %v572_v32 = vmax.f32 %v568_v29, 0.0 }
 0x103   :  { %667 = vst [vmem:[%s971_s4 + $0x8] sm:$0xff] %v665_v31   ;;  %v660_v33 = vpack.c.bf16 %v572_v32, %v571_v30 }
 0x105   :  { %661 = vst [vmem:[%s971_s4] sm:$0xff] %v660_v33  }

// kernel: resnet18_forward.29
= control target key start
LH: loop header
LB: loop body
LE: loop exit
PB: predicated region body
PF: predicated region fallthrough
CT: control target
= control target key end

     0   :  { %vm76_vm0 = vcmask 523264   ;;  %s301_s1 = inlined_call_operand.vmem [shape: bf16[64,128], index: 1, kind: input, shape index: {}]   ;;  %s302_s0 = inlined_call_operand.vmem [shape: bf16[32,64], index: 0, kind: input, shape index: {}]   ;;  %s303_s2 = inlined_call_operand.vmem [shape: f32[1,128], index: 2, kind: input, shape index: {}]   ;;  %s304_s3 = inlined_call_operand.vmem [shape: f32[1,128], index: 3, kind: input, shape index: {}]   ;;  %s305_s4 = inlined_call_operand.vmem [shape: bf16[32,128], index: 4, kind: output, shape index: {}]  }
   0x1   :  { %v240_v0 = vld [vmem:[%s301_s1 + $0x18] sm:$0xff]   ;;  %v241_v1 = vld [vmem:[%s301_s1 + $0x10] sm:$0xff]   ;;  %v242_v2 = vld [vmem:[%s301_s1 + $0x8] sm:$0xff]  }
   0x2   :  { %228 = vmatprep.subr.bf16.mxu0 %v240_v0  ;;  %v244_v3 = vld [vmem:[%s302_s0] sm:$0xff]   ;;  %v245_v5 = vld [vmem:[%s302_s0 + $0x8] sm:$0xff]  }
   0x3   :  { %229 = vmatpush3.bf16.msra.mxu0 %v240_v0  ;;  %236 = vmatprep.mubr.msk.bf16.mxu0 %vm76_vm0, %v244_v3  ;;  %v243_v4 = vld [vmem:[%s301_s1] sm:$0xff]  }
   0x4   :  { %230 = vmatprep.subr.bf16.mxu0 %v241_v1  ;;  %v201_v7 = vld [vmem:[%s303_s2] ss:$0 sm:$0xff] }
   0x5   :  { %v202_v10 = vld [vmem:[%s304_s3] ss:$0 sm:$0xff] }
   0x7   :  { %231 = vmatpush3.bf16.msra.mxu0 %v241_v1 }
   0x8   :  { %232 = vmatprep.subr.bf16.mxu0 %v242_v2 }
   0xb   :  { %233 = vmatpush3.bf16.msra.mxu0 %v242_v2 }
   0xc   :  { %234 = vmatprep.subr.bf16.mxu0 %v243_v4 }
   0xf   :  { %235 = vmatpush3.bf16.msra.mxu0 %v243_v4 }
  0x12   :  { %237 = vmatmul.mubr.msk.bf16.vlgmr.msra.gmra.mxu0 %vm76_vm0, %v245_v5 }
  0xd2   :  { %v238_v6 = vpop.f32.mrf.mxu0 }
  0xd3   :  { %v156_v9 = vmul.f32 %v238_v6, %v201_v7 }
  0xd4   :  { %v117_v8 = vpop.f32.mrf.mxu0 }
  0xd5   :  { %v154_v12 = vmul.f32 %v201_v7, %v117_v8  ;;  %v167_v15 = vadd.f32 %v202_v10, %v156_v9 }
  0xd6   :  { %v239_v11 = vpop.f32.mrf.mxu0 }
  0xd7   :  { %v157_v13 = vmul.f32 %v239_v11, %v201_v7  ;;  %v165_v18 = vadd.f32 %v202_v10, %v154_v12 }
  0xd8   :  { %v120_v14 = vpop.f32.mrf.mxu0 }
  0xd9   :  { %v168_v16 = vadd.f32 %v202_v10, %v157_v13  ;;  %v155_v17 = vmul.f32 %v201_v7, %v120_v14 }
  0xdb   :  { %v219_v19 = vpack.c.bf16 %v168_v16, %v167_v15  ;;  %v166_v20 = vadd.f32 %v202_v10, %v155_v17 }
  0xdd   :  { %221 = vst [vmem:[%s305_s4 + $0x8] sm:$0xff] %v219_v19   ;;  %v214_v21 = vpack.c.bf16 %v166_v20, %v165_v18 }
  0xdf   :  { %215 = vst [vmem:[%s305_s4] sm:$0xff] %v214_v21  }

// kernel: resnet18_forward.31
= control target key start
LH: loop header
LB: loop body
LE: loop exit
PB: predicated region body
PF: predicated region fallthrough
CT: control target
= control target key end

     0   :  { %10 = vsyncpa [#allocation5], 0  ;;  %s1511_s0 = inlined_call_operand.vmem [shape: bf16[32,1152], index: 0, kind: input, shape index: {}]   ;;  %s1512_s1 = inlined_call_operand.vmem [shape: bf16[1152,128], index: 1, kind: input, shape index: {}]   ;;  %s1513_s2 = inlined_call_operand.hbm [shape: f32[1,128], index: 2, kind: input, shape index: {}]   ;;  %s1514_s3 = inlined_call_operand.hbm [shape: f32[1,128], index: 3, kind: input, shape index: {}]   ;;  %s1515_s4 = inlined_call_operand.vmem [shape: bf16[32,128], index: 4, kind: input, shape index: {}]   ;;  %s1516_s5 = inlined_call_operand.vmem [shape: bf16[32,128], index: 5, kind: output, shape index: {}]  }
   0x1   :  { %11 = vsyncpa [#allocation7], 0  ;;  %s1347_s18 = smov 0   ;;  %s1349_s19 = smov 0  }
   0x2   :  { %s1351_s20 = smov 0   ;;  %s1353_s21 = smov 0  }
   0x3   :  { %s1355_s22 = smov 0  }
   0x4 LB: > { %s974_s23 = sadd.s32 4294967295, %s1312_s22   ;;  %s29_s24 = sadd.s32 1, %s1308_s21  ;;  %s1312_s22 = sphi %s1355_s22, %s17_s22   ;;  %s1308_s21 = sphi %s1353_s21, %s1529_s21   ;;  %s1304_s20 = sphi %s1351_s20, %s1528_s20   ;;  %s1300_s19 = sphi %s1349_s19, %s1527_s19   ;;  %s1296_s18 = sphi %s1347_s18, %s1526_s18  }
   0x5   : > { %p30_p0 = scmp.ge.s32.totalorder %s29_s24, 3  ;;  %s45_s25 = sadd.s32 1, %s1300_s19 }
   0x6   : > { %p52_p1 = scmp.ne.s32.totalorder %s1300_s19, %s1296_s18  ;;  %p53_p2 = scmp.eq.s32.totalorder %s1312_s22, 0 }
   0x7   : > { %s1531_s24 = smov (%p30_p0, %s29_s24), 0  ;;  %p975_p4 = scmp.ge.s32.totalorder %s1312_s22, 1 }
   0x8   : > { %p1380_p3 = por %p53_p2, %p52_p1  ;;  %s41_s27 = ssub.s32 %s1308_s21, %s1531_s24 }
   0x9   : > { %p205_p5 = scmp.lt.s32.totalorder %s1312_s22, 4  ;;  %p43_p6 = scmp.eq.s32.totalorder %s41_s27, 0 }
   0xa   : > { %p1392_p8 = scmp.eq.s32.totalorder %s974_s23, 0  ;;  %s1314_s6 = smov [#allocation4]  }
   0xb   : > { %p1388_p7 = pnand %p975_p4, %p205_p5  ;;  %s220_s7 = sshll.u32 %s1314_s6, 4  ;;  %s221_s7 = int_to_ptr.vmem [resolvable:$true] %s220_s7 }
   0xc   : > { %s1522_s29 = scalar_select %p1392_p8, 1, 0 }
   0xd   : > { %s1521_s28 = scalar_select %p1388_p7, 1, 0 }
   0xe   : > { %s1397_s30 = scalar_select %p43_p6, %s1300_s19, %s45_s25  }
   0xf   : > { %p1128_p9 = pneg %p1388_p7  ;;  %s1315_s9 = smov [#allocation6]  }
  0x10   : > { %s233_s10 = sshll.u32 %s1315_s9, 4  ;;  %s1225_s11 = scalar_lea.vmem %s221_s7, 16  ;;  %s234_s10 = int_to_ptr.vmem [resolvable:$true] %s233_s10 }
  0x11   : > { %p1403_p10 = pnand %p1392_p8, %p1128_p9  ;;  %p1226_p12 = scmp.ne.s32.totalorder %s221_s7, %s1225_s11 }
  0x12   : > { %s1232_s12 = scalar_lea.vmem %s221_s7, 32  ;;  %p1233_p1 = scmp.lt.s32.totalorder %s221_s7, %s221_s7 }
  0x13   : > { %p1216_p11 = pneg %p1403_p10  ;;  %p1234_p2 = scmp.lt.s32.totalorder %s1232_s12, %s1225_s11 }
  0x15   : > { %p1228_p13 = pnand %p1226_p12, %p1216_p11  ;;  %p1235_p4 = por %p1234_p2, %p1233_p1 }
  0x17   : > { %p1229_p0 = pneg %p1228_p13 }
  0x19   : > { %p1236_p5 = pnand %p1235_p4, %p1229_p0 }
  0x1b   : > { %1239 = shalt.err (!%p1236_p5)
}
  0x1c   : > { %1131 = dma.hbm_to_vmem [thread:$0]  (!%p1403_p10), %s1513_s2, 16, %s221_s7, [#allocation5]  }
  0x1d   : > { %s1251_s15 = scalar_lea.vmem %s234_s10, 16  ;;  %s1258_s16 = scalar_lea.vmem %s234_s10, 32 }
  0x1e   : > { %p1252_p6 = scmp.ne.s32.totalorder %s234_s10, %s1251_s15  ;;  %p1259_p13 = scmp.lt.s32.totalorder %s234_s10, %s234_s10 }
  0x1f   : > { %p1260_p8 = scmp.lt.s32.totalorder %s1258_s16, %s1251_s15 }
  0x20   : > { %p1254_p9 = pnand %p1252_p6, %p1216_p11 }
  0x21   : > { %p1261_p7 = por %p1260_p8, %p1259_p13 }
  0x22   : > { %p1255_p12 = pneg %p1254_p9 }
  0x24   : > { %p1262_p1 = pnand %p1261_p7, %p1255_p12 }
  0x26   : > { %1265 = shalt.err (!%p1262_p1)
}
  0x27   : > { %1134 = dma.hbm_to_vmem [thread:$0]  (!%p1403_p10), %s1514_s3, 16, %s234_s10, [#allocation7]  }
  0x28   : > { %p979_p0 = scmp.ge.s32.totalorder %s1312_s22, 3 }
  0x2a   : > { %252 = sbr.rel (%p979_p0) target bundleno = 56 (0x38), region = 28 }
  0x2f   : > { %255 = sbr.rel (!%p1380_p3) target bundleno = 56 (0x38), region = 32  ;;  %s257_s25 = sand.u32 (%p1380_p3), 1, %s1300_s19  }
  0x30   : > { %s1035_s27 = smul.u32 (%p1380_p3), 12, %s1308_s21 }
  0x31   : > { %s1118_s6 = smul.u32 (%p1380_p3), 48, %s257_s25 }
  0x32   : > { %s265_s11 = scalar_lea.vmem (%p1380_p3), %s1511_s0, %s1035_s27 }
  0x33   : > { %v280_v0 = vld [vmem:[%s265_s11] sm:$0xff] (%p1380_p3)  ;;  %v284_v2 = vld [vmem:[%s265_s11 + $0x48] sm:$0xff] (%p1380_p3)  ;;  %s259_s8 = scalar_lea.vmem (%p1380_p3), [#allocation3], %s1118_s6  ;;  %v985_v6 = vld [vmem:[%s265_s11 + $0x50] sm:$0xf] (%p1380_p3) }
  0x34   : > { %v282_v1 = vld [vmem:[%s265_s11 + $0x24] sm:$0xff]  ;;  %281 = vst [vmem:[%s259_s8] sm:$0xff] %v280_v0  ;;  %285 = vst [vmem:[%s259_s8 + $0x18] sm:$0xff] %v284_v2  ;;  %v286_v3 = vld [vmem:[%s265_s11 + $0x6c] sm:$0xff] }
  0x35   : > { %283 = vst [vmem:[%s259_s8 + $0xc] sm:$0xff] %v282_v1  ;;  %v981_v4 = vld [vmem:[%s265_s11 + $0x8] sm:$0xf]  ;;  %v983_v5 = vld [vmem:[%s265_s11 + $0x2c] sm:$0xf]  ;;  %287 = vst [vmem:[%s259_s8 + $0x24] sm:$0xff] %v286_v3 }
  0x36   : > { %982 = vst [vmem:[%s259_s8 + $0x8] sm:$0xf] %v981_v4  ;;  %984 = vst [vmem:[%s259_s8 + $0x14] sm:$0xf] %v983_v5  ;;  %v987_v7 = vld [vmem:[%s265_s11 + $0x74] sm:$0xf] }
  0x37   : > { %986 = vst [vmem:[%s259_s8 + $0x20] sm:$0xf] %v985_v6  ;;  %988 = vst [vmem:[%s259_s8 + $0x2c] sm:$0xf] %v987_v7 }
  0x38 PF: > { %p1524_p3 = scmp.ne.s32.totalorder %s1521_s28, 0 }
  0x39   : > { %s327_s26 = sand.u32 (!%p1524_p3), 1, %s1296_s18   ;;  %p1525_p7 = scmp.ne.s32.totalorder (!%p1524_p3), %s1522_s29, 0 }
  0x3a   : > { %324 = sbr.rel (%p1524_p3) target bundleno = 341 (0x155), region = 62 }
  0x3b   : > { %s1119_s10 = smul.u32 (!%p1524_p3), 48, %s327_s26 }
  0x3d   : > { %s1436_s12 = scalar_lea.vmem (!%p1524_p3), [#allocation3], %s1119_s10 }
  0x3f   : > { %1287 = dma.done.wait (%p1525_p7), [#allocation5], 16  }
  0x40   : > { %1289 = vsyncadd (%p1525_p7), [#allocation5], 4294967280 }
  0x41   : > { %1291 = dma.done.wait (%p1525_p7), [#allocation7], 16  }
  0x42   : > { %1293 = vsyncadd (%p1525_p7), [#allocation7], 4294967280  ;;  %s383_s28 = smul.u32 48, %s1304_s20  ;;  %p993_p10 = scmp.ne.s32.totalorder %s1304_s20, 0 }
  0x44   : > { %p384_p8 = scmp.lt.s32.totalorder %s383_s28, 143  ;;  %414 = sbr.rel (%p993_p10) target bundleno = 76 (0x4c), region = 78 }
  0x46   : > { %s1533_s28 = smov (!%p384_p8, %s383_s28), 143 }
  0x47   : > { %s992_s13 = sshll.u32 %s1533_s28, 2 }
  0x48   : > { %s1450_s15 = scalar_lea.vmem %s1512_s1, %s992_s13 }
  0x49   : > { %v1316_v8 = vmov 0.0  }
  0x4a   : > { %415 = vst [vmem:[#allocation2 + $0x10] sm:$0xff] %v1316_v8  ;;  %416 = vst [vmem:[#allocation2] sm:$0xff] %v1316_v8 }
  0x4b   : > { %417 = vst [vmem:[#allocation2 + $0x18] sm:$0xff] %v1316_v8  ;;  %418 = vst [vmem:[#allocation2 + $0x8] sm:$0xff] %v1316_v8 }
  0x4c PF: > { %v1182_v9 = vld [vmem:[%s1450_s15 + $0x78] sm:$0xff]   ;;  %v1185_v12 = vld [vmem:[%s1450_s15 + $0x70] sm:$0xff]   ;;  %v1188_v15 = vld [vmem:[%s1450_s15 + $0x68] sm:$0xff]   ;;  %p1024_p11 = scmp.ne.s32.totalorder %s1304_s20, 2 }
  0x4d   : > { %v1183_v10 = vld [vmem:[%s1450_s15 + $0x38] sm:$0xff]   ;;  %1060 = vmatprep.subr.bf16.mxu0 %v1182_v9  ;;  %v1186_v13 = vld [vmem:[%s1450_s15 + $0x30] sm:$0xff]   ;;  %v1189_v16 = vld [vmem:[%s1450_s15 + $0x28] sm:$0xff]  }
  0x4e   : > { %v1184_v11 = vld [vmem:[%s1450_s15 + $0xb8] sm:$0xff]   ;;  %1061 = vmatpush3.bf16.msra.mxu0 %v1183_v10  ;;  %v1187_v14 = vld [vmem:[%s1450_s15 + $0xb0] sm:$0xff]   ;;  %v1190_v17 = vld [vmem:[%s1450_s15 + $0xa8] sm:$0xff]  }
  0x4f   : > { %1098 = vmatprep.subr.bf16.mxu1 %v1184_v11  ;;  %1062 = vmatprep.subr.bf16.mxu0 %v1185_v12  ;;  %v1191_v18 = vld [vmem:[%s1450_s15 + $0x60] sm:$0xff]   ;;  %v1194_v21 = vld [vmem:[%s1450_s15 + $0x58] sm:$0xff]   ;;  %v1197_v24 = vld [vmem:[%s1450_s15 + $0x50] sm:$0xff]  }
  0x50   : > { %1099 = vmatpush3.bf16.msra.mxu1 %v1184_v11  ;;  %v1192_v19 = vld [vmem:[%s1450_s15 + $0x20] sm:$0xff]   ;;  %v1196_v22 = vld [vmem:[%s1450_s15 + $0x98] sm:$0xff]   ;;  %v1199_v25 = vld [vmem:[%s1450_s15 + $0x90] sm:$0xff]  }
  0x51   : > { %1100 = vmatprep.subr.bf16.mxu1 %v1187_v14  ;;  %v1193_v20 = vld [vmem:[%s1450_s15 + $0xa0] sm:$0xff]   ;;  %v1195_v23 = vld [vmem:[%s1450_s15 + $0x18] sm:$0xff]   ;;  %v1198_v26 = vld [vmem:[%s1450_s15 + $0x10] sm:$0xff]  }
  0x52   : > { %1063 = vmatpush3.bf16.msra.mxu0 %v1186_v13  ;;  %v1200_v27 = vld [vmem:[%s1450_s15 + $0x48] sm:$0xff]   ;;  %v1203_v30 = vld [vmem:[%s1450_s15 + $0x40] sm:$0xff]   ;;  %v419_v44 = vld [vmem:[#allocation2 + $0x10] sm:$0xff] }
  0x53   : > { %1064 = vmatprep.subr.bf16.mxu0 %v1188_v15  ;;  %v1201_v28 = vld [vmem:[%s1450_s15 + $0x8] sm:$0xff]   ;;  %v1205_v31 = vld [vmem:[%s1450_s15 + $0x80] sm:$0xff]   ;;  %v421_v58 = vld [vmem:[#allocation2 + $0x18] sm:$0xff] }
  0x54   : > { %1101 = vmatpush3.bf16.msra.mxu1 %v1187_v14  ;;  %v1202_v29 = vld [vmem:[%s1450_s15 + $0x88] sm:$0xff]   ;;  %v1208_v32 = vld [vmem:[%s1436_s12 + $0x4] ss:$12 sps:$4 sm:$0xff]  }
  0x55   : > { %1102 = vmatprep.subr.bf16.mxu1 %v1190_v17  ;;  %v1209_v33 = vld [vmem:[%s1436_s12 + $0x8] ss:$12 sps:$4 sm:$0xff]   ;;  %687 = vmatprep.mubr.bf16.mxu0 %v1208_v32  ;;  %v1206_v35 = vld [vmem:[%s1436_s12] ss:$12 sps:$4 sm:$0xff]   ;;  %v1213_v38 = vld [vmem:[%s1436_s12 + $0x18] ss:$12 sps:$4 sm:$0xff]  }
  0x56   : > { %1065 = vmatpush3.bf16.msra.mxu0 %v1189_v16  ;;  %v1204_v34 = vld [vmem:[%s1450_s15] sm:$0xff]   ;;  %1114 = vmatprep.mubr.bf16.mxu1 %v1209_v33  ;;  %v1211_v36 = vld [vmem:[%s1436_s12 + $0x1c] ss:$12 sps:$4 sm:$0xff]  }
  0x57   : > { %1066 = vmatprep.subr.bf16.mxu0 %v1191_v18  ;;  %v1210_v37 = vld [vmem:[%s1436_s12 + $0x20] ss:$12 sps:$4 sm:$0xff]  }
  0x58   : > { %1103 = vmatpush3.bf16.msra.mxu1 %v1190_v17  ;;  %v420_v52 = vld [vmem:[#allocation2] sm:$0xff]  ;;  %v422_v0 = vld [vmem:[#allocation2 + $0x8] sm:$0xff] }
  0x59   : > { %1104 = vmatprep.subr.bf16.mxu1 %v1193_v20 }
  0x5a   : > { %1067 = vmatpush3.bf16.msra.mxu0 %v1192_v19 }
  0x5b   : > { %1068 = vmatprep.subr.bf16.mxu0 %v1194_v21 }
  0x5c   : > { %1105 = vmatpush3.bf16.msra.mxu1 %v1193_v20 }
  0x5d   : > { %1106 = vmatprep.subr.bf16.mxu1 %v1196_v22 }
  0x5e   : > { %1069 = vmatpush3.bf16.msra.mxu0 %v1195_v23 }
  0x5f   : > { %1070 = vmatprep.subr.bf16.mxu0 %v1197_v24 }
  0x60   : > { %1107 = vmatpush3.bf16.msra.mxu1 %v1196_v22 }
  0x61   : > { %1108 = vmatprep.subr.bf16.mxu1 %v1199_v25 }
  0x62   : > { %1071 = vmatpush3.bf16.msra.mxu0 %v1198_v26 }
  0x63   : > { %1072 = vmatprep.subr.bf16.mxu0 %v1200_v27 }
  0x64   : > { %1109 = vmatpush3.bf16.msra.mxu1 %v1199_v25 }
  0x65   : > { %1110 = vmatprep.subr.bf16.mxu1 %v1202_v29 }
  0x66   : > { %1073 = vmatpush3.bf16.msra.mxu0 %v1201_v28 }
  0x67   : > { %1074 = vmatprep.subr.bf16.mxu0 %v1203_v30 }
  0x68   : > { %1111 = vmatpush3.bf16.msra.mxu1 %v1202_v29 }
  0x69   : > { %1112 = vmatprep.subr.bf16.mxu1 %v1205_v31 }
  0x6a   : > { %1075 = vmatpush3.bf16.msra.mxu0 %v1204_v34 }
  0x6c   : > { %1113 = vmatpush3.bf16.msra.mxu1 %v1205_v31 }
  0x6d   : > { %688 = vmatmul.mubr.bf16.vlgmr.msra.gmra.mxu0 %v1206_v35 }
  0x6e   : > { %695 = vmatprep.mubr.bf16.mxu0 %v1211_v36 }
  0x6f   : > { %1115 = vmatmul.mubr.bf16.vlgmr.msra.gmra.mxu1 %v1210_v37 }
  0x75   : > { %696 = vmatmul.mubr.bf16.gmra.mxu0 %v1213_v38 }
 0x12d   : > { %v1076_v39 = vpop.f32.mrf.mxu0 }
 0x12f   : > { %v1077_v40 = vpop.f32.mrf.mxu0  ;;  %v1116_v41 = vpop.f32.mrf.mxu1 }
 0x130   : > { %v1078_v42 = vadd.f32 %v1077_v40, %v1076_v39 }
 0x131   : > { %v1079_v43 = vpop.f32.mrf.mxu0  ;;  %v738_v45 = vpop.f32.mrf.mxu1 }
 0x132   : > { %v739_v46 = vadd.f32 %v1078_v42, %v738_v45 }
 0x133   : > { %v1080_v47 = vpop.f32.mrf.mxu0  ;;  %v1117_v48 = vpop.f32.mrf.mxu1 }
 0x134   : > { %v753_v49 = vadd.f32 %v739_v46, %v419_v44  ;;  %v1081_v50 = vadd.f32 %v1080_v47, %v1079_v43 }
 0x135   : > { %v1082_v51 = vpop.f32.mrf.mxu0  ;;  %v741_v53 = vpop.f32.mrf.mxu1 }
 0x136   : > { %757 = vst [vmem:[#allocation2 + $0x10] sm:$0xff] %v753_v49  ;;  %v742_v54 = vadd.f32 %v1081_v50, %v741_v53 }
 0x137   : > { %v1083_v55 = vpop.f32.mrf.mxu0 }
 0x138   : > { %v754_v56 = vadd.f32 %v742_v54, %v420_v52  ;;  %v1084_v57 = vadd.f32 %v1083_v55, %v1082_v51 }
 0x139   : > { %v1085_v59 = vpop.f32.mrf.mxu0 }
 0x13a   : > { %758 = vst [vmem:[#allocation2] sm:$0xff] %v754_v56  ;;  %v747_v60 = vadd.f32 %v1116_v41, %v1084_v57 }
 0x13b   : > { %v1086_v61 = vpop.f32.mrf.mxu0 }
 0x13c   : > { %v755_v62 = vadd.f32 %v747_v60, %v421_v58  ;;  %v1087_v63 = vadd.f32 %v1086_v61, %v1085_v59 }
 0x13e   : > { %759 = vst [vmem:[#allocation2 + $0x18] sm:$0xff] %v755_v62  ;;  %v750_v1 = vadd.f32 %v1117_v48, %v1087_v63  ;;  %764 = sbr.rel (%p1024_p11) target bundleno = 341 (0x155), region = 82 }
 0x140   : > { %v756_v2 = vadd.f32 %v750_v1, %v422_v0 }
 0x142   : > { %760 = vst [vmem:[#allocation2 + $0x8] sm:$0xff] %v756_v2 }
 0x143   : > { %v765_v3 = vld [vmem:[#allocation2 + $0x10] sm:$0xff]  ;;  %v766_v4 = vld [vmem:[#allocation2] sm:$0xff]  ;;  %v1058_v15 = vld [vmem:[%s1515_s4 + $0x8] sm:$0xff]  }
 0x144   : > { %v1025_v5 = vld [vmem:[#allocation4] ss:$0 sm:$0xff]  ;;  %v1026_v8 = vld [vmem:[#allocation6] ss:$0 sm:$0xff]  ;;  %v1046_v19 = vunpack.c.l.bf16 %v1058_v15  ;;  %v1047_v21 = vunpack.c.h.bf16 %v1058_v15 }
 0x145   : > { %v776_v6 = vmul.f32 %v1025_v5, %v765_v3  ;;  %v777_v7 = vmul.f32 %v1025_v5, %v766_v4  ;;  %v1041_v9 = vld [vmem:[%s1515_s4] sm:$0xff]   ;;  %v767_v10 = vld [vmem:[#allocation2 + $0x18] sm:$0xff] }
 0x146   : > { %v1042_v11 = vunpack.c.l.bf16 %v1041_v9  ;;  %v1043_v12 = vunpack.c.h.bf16 %v1041_v9  ;;  %v778_v14 = vmul.f32 %v1025_v5, %v767_v10 }
 0x147   : > { %v787_v16 = vadd.f32 %v1026_v8, %v776_v6  ;;  %v788_v17 = vadd.f32 %v1026_v8, %v777_v7 }
 0x148   : > { %v789_v20 = vadd.f32 %v1026_v8, %v778_v14 }
 0x149   : > { %v768_v13 = vld [vmem:[#allocation2 + $0x8] sm:$0xff]  ;;  %v799_v22 = vadd.f32 %v1042_v11, %v787_v16  ;;  %v800_v23 = vadd.f32 %v1043_v12, %v788_v17 }
 0x14a   : > { %v779_v18 = vmul.f32 %v1025_v5, %v768_v13  ;;  %v801_v25 = vadd.f32 %v1046_v19, %v789_v20 }
 0x14b   : > { %v803_v26 = vmax.f32 %v799_v22, 0.0  ;;  %v804_v27 = vmax.f32 %v800_v23, 0.0 }
 0x14c   : > { %v790_v24 = vadd.f32 %v1026_v8, %v779_v18  ;;  %v805_v29 = vmax.f32 %v801_v25, 0.0 }
 0x14d   : > { %v1051_v30 = vpack.c.bf16 %v804_v27, %v803_v26 }
 0x14e   : > { %v802_v28 = vadd.f32 %v1047_v21, %v790_v24 }
 0x14f   : > { %1052 = vst [vmem:[%s1516_s5] sm:$0xff] %v1051_v30  }
 0x150   : > { %v806_v31 = vmax.f32 %v802_v28, 0.0 }
 0x152   : > { %v1056_v32 = vpack.c.bf16 %v806_v31, %v805_v29 }
 0x154   : > { %1059 = vst [vmem:[%s1516_s5 + $0x8] sm:$0xff] %v1056_v32  }
 0x155 PF: > { %s17_s22 = sadd.s32 1, %s1312_s22   ;;  %s1526_s18 = smov %s1300_s19 }
 0x156   : > { %p14_p2 = scmp.ge.s32.totalorder %s17_s22, 5   ;;  %s1527_s19 = smov %s1397_s30 }
 0x157   : > { %s1528_s20 = smov %s1308_s21  ;;  %s1529_s21 = smov %s1531_s24 }
 0x158   :  { %16 = sbr.rel (!%p14_p2) target bundleno = 4 (0x4), region = 132 }
 0x15d   :  { %855 = vsyncpa [#allocation5], 1 }
 0x15e   :  { %857 = vsyncpa [#allocation5 + $0x1], 1 }
 0x15f   :  { %858 = vsyncpa [#allocation7], 1 }

// kernel: resnet18_forward.32
= control target key start
LH: loop header
LB: loop body
LE: loop exit
PB: predicated region body
PF: predicated region fallthrough
CT: control target
= control target key end

     0   :  { %s1143_s15 = smov 0   ;;  %s1145_s16 = smov 0   ;;  %s1256_s0 = inlined_call_operand.vmem [shape: bf16[32,1152], index: 0, kind: input, shape index: {}]   ;;  %s1257_s1 = inlined_call_operand.vmem [shape: bf16[1152,128], index: 1, kind: input, shape index: {}]   ;;  %s1258_s2 = inlined_call_operand.vmem [shape: f32[1,128], index: 2, kind: input, shape index: {}]   ;;  %s1259_s3 = inlined_call_operand.vmem [shape: f32[1,128], index: 3, kind: input, shape index: {}]   ;;  %s1260_s4 = inlined_call_operand.vmem [shape: bf16[32,128], index: 4, kind: output, shape index: {}]  }
   0x1   :  { %s1147_s17 = smov 0   ;;  %s1149_s18 = smov 0  }
   0x2   :  { %s1151_s19 = smov 0  }
   0x3 LB: > { %s26_s20 = sadd.s32 1, %s1111_s18  ;;  %p49_p1 = scmp.ne.s32.totalorder %s1103_s16, %s1099_s15  ;;  %s1115_s19 = sphi %s1151_s19, %s14_s19   ;;  %s1111_s18 = sphi %s1149_s18, %s1264_s18   ;;  %s1107_s17 = sphi %s1147_s17, %s1263_s17   ;;  %s1103_s16 = sphi %s1145_s16, %s1262_s16   ;;  %s1099_s15 = sphi %s1143_s15, %s1261_s15  }
   0x4   : > { %p27_p0 = scmp.ge.s32.totalorder %s26_s20, 3  ;;  %p50_p2 = scmp.eq.s32.totalorder %s1115_s19, 0 }
   0x5   : > { %s42_s22 = sadd.s32 1, %s1103_s16  ;;  %p874_p5 = scmp.ge.s32.totalorder %s1115_s19, 3 }
   0x6   : > { %s1266_s20 = smov (%p27_p0, %s26_s20), 0  ;;  %p51_p3 = por %p50_p2, %p49_p1 }
   0x7   : > { %s38_s21 = ssub.s32 %s1111_s18, %s1266_s20  ;;  %195 = sbr.rel (%p874_p5) target bundleno = 21 (0x15), region = 24 }
   0x8   : > { %p40_p4 = scmp.eq.s32.totalorder %s38_s21, 0 }
   0xa   : > { %s1178_s23 = scalar_select %p40_p4, %s1103_s16, %s42_s22  }
   0xc   : > { %198 = sbr.rel (!%p51_p3) target bundleno = 21 (0x15), region = 28  ;;  %s200_s24 = sand.u32 (%p51_p3), 1, %s1103_s16  }
   0xd   : > { %s928_s25 = smul.u32 (%p51_p3), 12, %s1111_s18 }
   0xe   : > { %s1002_s26 = smul.u32 (%p51_p3), 48, %s200_s24 }
   0xf   : > { %s208_s29 = scalar_lea.vmem (%p51_p3), %s1256_s0, %s928_s25 }
  0x10   : > { %v223_v0 = vld [vmem:[%s208_s29] sm:$0xff] (%p51_p3)  ;;  %v227_v2 = vld [vmem:[%s208_s29 + $0x48] sm:$0xff] (%p51_p3)  ;;  %s202_s30 = scalar_lea.vmem (%p51_p3), [#allocation3], %s1002_s26  ;;  %v880_v6 = vld [vmem:[%s208_s29 + $0x50] sm:$0xf] (%p51_p3) }
  0x11   : > { %v225_v1 = vld [vmem:[%s208_s29 + $0x24] sm:$0xff]  ;;  %224 = vst [vmem:[%s202_s30] sm:$0xff] %v223_v0  ;;  %228 = vst [vmem:[%s202_s30 + $0x18] sm:$0xff] %v227_v2  ;;  %v229_v3 = vld [vmem:[%s208_s29 + $0x6c] sm:$0xff] }
  0x12   : > { %226 = vst [vmem:[%s202_s30 + $0xc] sm:$0xff] %v225_v1  ;;  %v876_v4 = vld [vmem:[%s208_s29 + $0x8] sm:$0xf]  ;;  %v878_v5 = vld [vmem:[%s208_s29 + $0x2c] sm:$0xf]  ;;  %230 = vst [vmem:[%s202_s30 + $0x24] sm:$0xff] %v229_v3 }
  0x13   : > { %877 = vst [vmem:[%s202_s30 + $0x8] sm:$0xf] %v876_v4  ;;  %879 = vst [vmem:[%s202_s30 + $0x14] sm:$0xf] %v878_v5  ;;  %v882_v7 = vld [vmem:[%s208_s29 + $0x74] sm:$0xf] }
  0x14   : > { %881 = vst [vmem:[%s202_s30 + $0x20] sm:$0xf] %v880_v6  ;;  %883 = vst [vmem:[%s202_s30 + $0x2c] sm:$0xf] %v882_v7 }
  0x15 PF: > { %p884_p6 = scmp.ge.s32.totalorder %s1115_s19, 1  ;;  %p263_p7 = scmp.lt.s32.totalorder %s1115_s19, 4 }
  0x17   : > { %p264_p8 = pnand %p884_p6, %p263_p7 }
  0x18   : > { %s270_s5 = sand.u32 (!%p264_p8), 1, %s1099_s15   ;;  %s314_s6 = smul.u32 (!%p264_p8), 48, %s1107_s17 }
  0x19   : > { %267 = sbr.rel (%p264_p8) target bundleno = 301 (0x12d), region = 58  ;;  %p886_p10 = scmp.ne.s32.totalorder (!%p264_p8), %s1107_s17, 0 }
  0x1a   : > { %s1003_s7 = smul.u32 (!%p264_p8), 48, %s270_s5  ;;  %p315_p9 = scmp.lt.s32.totalorder (!%p264_p8), %s314_s6, 143 }
  0x1c   : > { %s1195_s12 = scalar_lea.vmem (!%p264_p8), [#allocation3], %s1003_s7 }
  0x1e   : > { %s1268_s6 = smov (!%p315_p9, %s314_s6), 143  ;;  %342 = sbr.rel (%p886_p10) target bundleno = 38 (0x26), region = 66 }
  0x1f   : > { %s885_s8 = sshll.u32 %s1268_s6, 2 }
  0x20   : > { %s1193_s11 = scalar_lea.vmem %s1257_s1, %s885_s8 }
  0x23   : > { %v1117_v8 = vmov 0.0  }
  0x24   : > { %343 = vst [vmem:[#allocation2 + $0x10] sm:$0xff] %v1117_v8  ;;  %344 = vst [vmem:[#allocation2] sm:$0xff] %v1117_v8 }
  0x25   : > { %345 = vst [vmem:[#allocation2 + $0x18] sm:$0xff] %v1117_v8  ;;  %346 = vst [vmem:[#allocation2 + $0x8] sm:$0xff] %v1117_v8 }
  0x26 PF: > { %v1045_v9 = vld [vmem:[%s1193_s11 + $0x78] sm:$0xff]   ;;  %v1048_v12 = vld [vmem:[%s1193_s11 + $0x70] sm:$0xff]   ;;  %v1051_v15 = vld [vmem:[%s1193_s11 + $0x68] sm:$0xff]   ;;  %p917_p11 = scmp.ne.s32.totalorder %s1107_s17, 2 }
  0x27   : > { %v1046_v10 = vld [vmem:[%s1193_s11 + $0x38] sm:$0xff]   ;;  %944 = vmatprep.subr.bf16.mxu0 %v1045_v9  ;;  %v1049_v13 = vld [vmem:[%s1193_s11 + $0x30] sm:$0xff]   ;;  %v1052_v16 = vld [vmem:[%s1193_s11 + $0x28] sm:$0xff]  }
  0x28   : > { %v1047_v11 = vld [vmem:[%s1193_s11 + $0xb8] sm:$0xff]   ;;  %945 = vmatpush3.bf16.msra.mxu0 %v1046_v10  ;;  %v1050_v14 = vld [vmem:[%s1193_s11 + $0xb0] sm:$0xff]   ;;  %v1053_v17 = vld [vmem:[%s1193_s11 + $0xa8] sm:$0xff]  }
  0x29   : > { %982 = vmatprep.subr.bf16.mxu1 %v1047_v11  ;;  %946 = vmatprep.subr.bf16.mxu0 %v1048_v12  ;;  %v1054_v18 = vld [vmem:[%s1193_s11 + $0x60] sm:$0xff]   ;;  %v1057_v21 = vld [vmem:[%s1193_s11 + $0x58] sm:$0xff]   ;;  %v1060_v24 = vld [vmem:[%s1193_s11 + $0x50] sm:$0xff]  }
  0x2a   : > { %983 = vmatpush3.bf16.msra.mxu1 %v1047_v11  ;;  %v1055_v19 = vld [vmem:[%s1193_s11 + $0x20] sm:$0xff]   ;;  %v1059_v22 = vld [vmem:[%s1193_s11 + $0x98] sm:$0xff]   ;;  %v1062_v25 = vld [vmem:[%s1193_s11 + $0x90] sm:$0xff]  }
  0x2b   : > { %984 = vmatprep.subr.bf16.mxu1 %v1050_v14  ;;  %v1056_v20 = vld [vmem:[%s1193_s11 + $0xa0] sm:$0xff]   ;;  %v1058_v23 = vld [vmem:[%s1193_s11 + $0x18] sm:$0xff]   ;;  %v1061_v26 = vld [vmem:[%s1193_s11 + $0x10] sm:$0xff]  }
  0x2c   : > { %947 = vmatpush3.bf16.msra.mxu0 %v1049_v13  ;;  %v1063_v27 = vld [vmem:[%s1193_s11 + $0x48] sm:$0xff]   ;;  %v1066_v30 = vld [vmem:[%s1193_s11 + $0x40] sm:$0xff]   ;;  %v347_v44 = vld [vmem:[#allocation2 + $0x10] sm:$0xff] }
  0x2d   : > { %948 = vmatprep.subr.bf16.mxu0 %v1051_v15  ;;  %v1064_v28 = vld [vmem:[%s1193_s11 + $0x8] sm:$0xff]   ;;  %v1068_v31 = vld [vmem:[%s1193_s11 + $0x80] sm:$0xff]   ;;  %v349_v58 = vld [vmem:[#allocation2 + $0x18] sm:$0xff] }
  0x2e   : > { %985 = vmatpush3.bf16.msra.mxu1 %v1050_v14  ;;  %v1065_v29 = vld [vmem:[%s1193_s11 + $0x88] sm:$0xff]   ;;  %v1071_v32 = vld [vmem:[%s1195_s12 + $0x4] ss:$12 sps:$4 sm:$0xff]  }
  0x2f   : > { %986 = vmatprep.subr.bf16.mxu1 %v1053_v17  ;;  %v1072_v33 = vld [vmem:[%s1195_s12 + $0x8] ss:$12 sps:$4 sm:$0xff]   ;;  %615 = vmatprep.mubr.bf16.mxu0 %v1071_v32  ;;  %v1069_v35 = vld [vmem:[%s1195_s12] ss:$12 sps:$4 sm:$0xff]   ;;  %v1076_v38 = vld [vmem:[%s1195_s12 + $0x18] ss:$12 sps:$4 sm:$0xff]  }
  0x30   : > { %949 = vmatpush3.bf16.msra.mxu0 %v1052_v16  ;;  %v1067_v34 = vld [vmem:[%s1193_s11] sm:$0xff]   ;;  %998 = vmatprep.mubr.bf16.mxu1 %v1072_v33  ;;  %v1074_v36 = vld [vmem:[%s1195_s12 + $0x1c] ss:$12 sps:$4 sm:$0xff]  }
  0x31   : > { %950 = vmatprep.subr.bf16.mxu0 %v1054_v18  ;;  %v1073_v37 = vld [vmem:[%s1195_s12 + $0x20] ss:$12 sps:$4 sm:$0xff]  }
  0x32   : > { %987 = vmatpush3.bf16.msra.mxu1 %v1053_v17  ;;  %v348_v52 = vld [vmem:[#allocation2] sm:$0xff]  ;;  %v350_v0 = vld [vmem:[#allocation2 + $0x8] sm:$0xff] }
  0x33   : > { %988 = vmatprep.subr.bf16.mxu1 %v1056_v20 }
  0x34   : > { %951 = vmatpush3.bf16.msra.mxu0 %v1055_v19 }
  0x35   : > { %952 = vmatprep.subr.bf16.mxu0 %v1057_v21 }
  0x36   : > { %989 = vmatpush3.bf16.msra.mxu1 %v1056_v20 }
  0x37   : > { %990 = vmatprep.subr.bf16.mxu1 %v1059_v22 }
  0x38   : > { %953 = vmatpush3.bf16.msra.mxu0 %v1058_v23 }
  0x39   : > { %954 = vmatprep.subr.bf16.mxu0 %v1060_v24 }
  0x3a   : > { %991 = vmatpush3.bf16.msra.mxu1 %v1059_v22 }
  0x3b   : > { %992 = vmatprep.subr.bf16.mxu1 %v1062_v25 }
  0x3c   : > { %955 = vmatpush3.bf16.msra.mxu0 %v1061_v26 }
  0x3d   : > { %956 = vmatprep.subr.bf16.mxu0 %v1063_v27 }
  0x3e   : > { %993 = vmatpush3.bf16.msra.mxu1 %v1062_v25 }
  0x3f   : > { %994 = vmatprep.subr.bf16.mxu1 %v1065_v29 }
  0x40   : > { %957 = vmatpush3.bf16.msra.mxu0 %v1064_v28 }
  0x41   : > { %958 = vmatprep.subr.bf16.mxu0 %v1066_v30 }
  0x42   : > { %995 = vmatpush3.bf16.msra.mxu1 %v1065_v29 }
  0x43   : > { %996 = vmatprep.subr.bf16.mxu1 %v1068_v31 }
  0x44   : > { %959 = vmatpush3.bf16.msra.mxu0 %v1067_v34 }
  0x46   : > { %997 = vmatpush3.bf16.msra.mxu1 %v1068_v31 }
  0x47   : > { %616 = vmatmul.mubr.bf16.vlgmr.msra.gmra.mxu0 %v1069_v35 }
  0x48   : > { %623 = vmatprep.mubr.bf16.mxu0 %v1074_v36 }
  0x49   : > { %999 = vmatmul.mubr.bf16.vlgmr.msra.gmra.mxu1 %v1073_v37 }
  0x4f   : > { %624 = vmatmul.mubr.bf16.gmra.mxu0 %v1076_v38 }
 0x107   : > { %v960_v39 = vpop.f32.mrf.mxu0 }
 0x109   : > { %v961_v40 = vpop.f32.mrf.mxu0  ;;  %v1000_v41 = vpop.f32.mrf.mxu1 }
 0x10a   : > { %v962_v42 = vadd.f32 %v961_v40, %v960_v39 }
 0x10b   : > { %v963_v43 = vpop.f32.mrf.mxu0  ;;  %v666_v45 = vpop.f32.mrf.mxu1 }
 0x10c   : > { %v667_v46 = vadd.f32 %v962_v42, %v666_v45 }
 0x10d   : > { %v964_v47 = vpop.f32.mrf.mxu0  ;;  %v1001_v48 = vpop.f32.mrf.mxu1 }
 0x10e   : > { %v681_v49 = vadd.f32 %v667_v46, %v347_v44  ;;  %v965_v50 = vadd.f32 %v964_v47, %v963_v43 }
 0x10f   : > { %v966_v51 = vpop.f32.mrf.mxu0  ;;  %v669_v53 = vpop.f32.mrf.mxu1 }
 0x110   : > { %685 = vst [vmem:[#allocation2 + $0x10] sm:$0xff] %v681_v49  ;;  %v670_v54 = vadd.f32 %v965_v50, %v669_v53 }
 0x111   : > { %v967_v55 = vpop.f32.mrf.mxu0 }
 0x112   : > { %v682_v56 = vadd.f32 %v670_v54, %v348_v52  ;;  %v968_v57 = vadd.f32 %v967_v55, %v966_v51 }
 0x113   : > { %v969_v59 = vpop.f32.mrf.mxu0 }
 0x114   : > { %686 = vst [vmem:[#allocation2] sm:$0xff] %v682_v56  ;;  %v675_v60 = vadd.f32 %v1000_v41, %v968_v57 }
 0x115   : > { %v970_v61 = vpop.f32.mrf.mxu0 }
 0x116   : > { %v683_v62 = vadd.f32 %v675_v60, %v349_v58  ;;  %v971_v63 = vadd.f32 %v970_v61, %v969_v59 }
 0x118   : > { %687 = vst [vmem:[#allocation2 + $0x18] sm:$0xff] %v683_v62  ;;  %v678_v1 = vadd.f32 %v1001_v48, %v971_v63  ;;  %692 = sbr.rel (%p917_p11) target bundleno = 301 (0x12d), region = 70 }
 0x11a   : > { %v684_v2 = vadd.f32 %v678_v1, %v350_v0 }
 0x11c   : > { %688 = vst [vmem:[#allocation2 + $0x8] sm:$0xff] %v684_v2 }
 0x11d   : > { %v693_v3 = vld [vmem:[#allocation2 + $0x10] sm:$0xff]  ;;  %v694_v4 = vld [vmem:[#allocation2] sm:$0xff] }
 0x11e   : > { %v918_v5 = vld [vmem:[%s1258_s2] ss:$0 sm:$0xff] }
 0x11f   : > { %v704_v6 = vmul.f32 %v918_v5, %v693_v3  ;;  %v705_v7 = vmul.f32 %v918_v5, %v694_v4  ;;  %v919_v8 = vld [vmem:[%s1259_s3] ss:$0 sm:$0xff]  ;;  %v695_v9 = vld [vmem:[#allocation2 + $0x18] sm:$0xff] }
 0x120   : > { %v706_v11 = vmul.f32 %v918_v5, %v695_v9 }
 0x121   : > { %v715_v13 = vadd.f32 %v919_v8, %v704_v6  ;;  %v716_v14 = vadd.f32 %v919_v8, %v705_v7 }
 0x122   : > { %v717_v15 = vadd.f32 %v919_v8, %v706_v11 }
 0x123   : > { %v696_v10 = vld [vmem:[#allocation2 + $0x8] sm:$0xff]  ;;  %v719_v17 = vmax.f32 %v715_v13, 0.0  ;;  %v720_v18 = vmax.f32 %v716_v14, 0.0 }
 0x124   : > { %v707_v12 = vmul.f32 %v918_v5, %v696_v10  ;;  %v721_v19 = vmax.f32 %v717_v15, 0.0 }
 0x125   : > { %v936_v21 = vpack.c.bf16 %v720_v18, %v719_v17 }
 0x126   : > { %v718_v16 = vadd.f32 %v919_v8, %v707_v12 }
 0x127   : > { %937 = vst [vmem:[%s1260_s4] sm:$0xff] %v936_v21  }
 0x128   : > { %v722_v20 = vmax.f32 %v718_v16, 0.0 }
 0x12a   : > { %v941_v22 = vpack.c.bf16 %v722_v20, %v721_v19 }
 0x12c   : > { %943 = vst [vmem:[%s1260_s4 + $0x8] sm:$0xff] %v941_v22  }
 0x12d PF: > { %s14_s19 = sadd.s32 1, %s1115_s19   ;;  %s1261_s15 = smov %s1103_s16 }
 0x12e   : > { %p11_p12 = scmp.ge.s32.totalorder %s14_s19, 5   ;;  %s1262_s16 = smov %s1178_s23 }
 0x12f   : > { %s1263_s17 = smov %s1111_s18  ;;  %s1264_s18 = smov %s1266_s20 }
 0x130   :  { %13 = sbr.rel (!%p11_p12) target bundleno = 3 (0x3), region = 120 }

// kernel: resnet18_forward.35
= control target key start
LH: loop header
LB: loop body
LE: loop exit
PB: predicated region body
PF: predicated region fallthrough
CT: control target
= control target key end

     0   :  { %s1114_s15 = smov 0   ;;  %s1116_s16 = smov 0   ;;  %s1216_s0 = inlined_call_operand.vmem [shape: bf16[8,1152], index: 0, kind: input, shape index: {}]   ;;  %s1217_s1 = inlined_call_operand.vmem [shape: bf16[1152,256], index: 1, kind: input, shape index: {}]   ;;  %s1218_s2 = inlined_call_operand.vmem [shape: f32[1,256], index: 2, kind: input, shape index: {}]   ;;  %s1219_s3 = inlined_call_operand.vmem [shape: f32[1,256], index: 3, kind: input, shape index: {}]   ;;  %s1220_s4 = inlined_call_operand.vmem [shape: bf16[8,256], index: 4, kind: output, shape index: {}]  }
   0x1   :  { %s1118_s17 = smov 0  }
   0x2 LB: > { %s26_s18 = sadd.s32 1, %s1081_s16  ;;  %p898_p0 = scmp.ge.s32.totalorder %s1085_s17, 1  ;;  %s1085_s17 = sphi %s1118_s17, %s14_s17   ;;  %s1081_s16 = sphi %s1116_s16, %s1222_s16   ;;  %s1077_s15 = sphi %s1114_s15, %s1221_s15  }
   0x3   : > { %p27_p1 = scmp.ge.s32.totalorder %s26_s18, 3  ;;  %p229_p2 = scmp.lt.s32.totalorder %s1085_s17, 4 }
   0x5   : > { %s1224_s18 = smov (%p27_p1, %s26_s18), 0  ;;  %p230_p3 = pnand %p898_p0, %p229_p2 }
   0x6   : > { %s281_s19 = smul.u32 (!%p230_p3), 3, %s1077_s15  ;;  %p902_p6 = scmp.ne.s32.totalorder (!%p230_p3), %s1077_s15, 0 }
   0x7   : > { %233 = sbr.rel (%p230_p3) target bundleno = 304 (0x130), region = 36 }
   0x8   : > { %s291_s20 = smul.u32 (!%p230_p3), 48, %s1077_s15  ;;  %p284_p4 = scmp.lt.s32.totalorder (!%p230_p3), %s281_s19, 8 }
   0xa   : > { %p293_p5 = scmp.lt.s32.totalorder (!%p230_p3), %s291_s20, 143 }
   0xc   : > { %s1226_s19 = smov (!%p284_p4, %s281_s19), 8  ;;  %s1228_s20 = smov (!%p293_p5, %s291_s20), 143 }
   0xd   : > { %s899_s21 = sshll.u32 %s1226_s19, 2  ;;  %s960_s25 = sshll.u32 %s1228_s20, 3 }
   0xe   : > { %s1139_s24 = scalar_lea.vmem %s1216_s0, %s899_s21  ;;  %s1144_s28 = scalar_lea.vmem %s1217_s1, %s960_s25 }
   0xf   : > { %327 = sbr.rel (%p902_p6) target bundleno = 22 (0x16), region = 40 }
  0x14   : > { %v1087_v0 = vmov 0.0  }
  0x15   : > { %328 = vst [vmem:[#allocation2] sm:$0xff] %v1087_v0  ;;  %329 = vst [vmem:[#allocation2 + $0x8] sm:$0xff] %v1087_v0 }
  0x16 PF: > { %v988_v1 = vld [vmem:[%s1144_s28 + $0x74] ss:$8 sps:$4 sm:$0xff]   ;;  %v990_v2 = vld [vmem:[%s1144_s28 + $0x70] ss:$8 sps:$4 sm:$0xff]   ;;  %v1088_v3 = vmov 0   ;;  %v332_v34 = vld [vmem:[%s1139_s24] sm:$0xff] }
  0x17   : > { %706 = vmatprep.mubr.bf16.mxu1 %v1088_v3  ;;  %633 = vmatprep.subr.bf16.mxu0 %v988_v1  ;;  %v991_v4 = vld [vmem:[%s1144_s28 + $0x64] ss:$8 sps:$4 sm:$0xff]   ;;  %v993_v5 = vld [vmem:[%s1144_s28 + $0x60] ss:$8 sps:$4 sm:$0xff]   ;;  %v994_v6 = vld [vmem:[%s1144_s28 + $0x54] ss:$8 sps:$4 sm:$0xff]   ;;  %v904_v36 = vcombine.high %v332_v34, %v332_v34  ;;  %v903_v53 = vcombine.low %v332_v34, %v332_v34 }
  0x18   : > { %634 = vmatpush1.bf16.msra.mxu0 %v990_v2  ;;  %v996_v7 = vld [vmem:[%s1144_s28 + $0x50] ss:$8 sps:$4 sm:$0xff]   ;;  %v997_v8 = vld [vmem:[%s1144_s28 + $0x44] ss:$8 sps:$4 sm:$0xff]   ;;  %v1009_v9 = vld [vmem:[%s1144_s28 + $0x174] ss:$8 sps:$4 sm:$0xff]  }
  0x19   : > { %635 = vmatprep.subr.bf16.mxu0 %v991_v4  ;;  %v1011_v10 = vld [vmem:[%s1144_s28 + $0x170] ss:$8 sps:$4 sm:$0xff]   ;;  %v999_v11 = vld [vmem:[%s1144_s28 + $0x40] ss:$8 sps:$4 sm:$0xff]   ;;  %v1000_v12 = vld [vmem:[%s1144_s28 + $0x34] ss:$8 sps:$4 sm:$0xff]   ;;  %674 = vmatprep.subr.bf16.mxu1 %v1009_v9 }
  0x1a   : > { %v1015_v13 = vld [vmem:[%s1144_s28 + $0x164] ss:$8 sps:$4 sm:$0xff]   ;;  %675 = vmatpush1.bf16.msra.mxu1 %v1011_v10  ;;  %v1017_v14 = vld [vmem:[%s1144_s28 + $0x160] ss:$8 sps:$4 sm:$0xff]   ;;  %v1002_v15 = vld [vmem:[%s1144_s28 + $0x30] ss:$8 sps:$4 sm:$0xff]   ;;  %665 = vmatprep.mubr.bf16.mxu0 %v904_v36 }
  0x1b   : > { %676 = vmatprep.subr.bf16.mxu1 %v1015_v13  ;;  %v1021_v16 = vld [vmem:[%s1144_s28 + $0x154] ss:$8 sps:$4 sm:$0xff]   ;;  %v1003_v17 = vld [vmem:[%s1144_s28 + $0x24] ss:$8 sps:$4 sm:$0xff]   ;;  %v1023_v18 = vld [vmem:[%s1144_s28 + $0x150] ss:$8 sps:$4 sm:$0xff]  }
  0x1c   : > { %636 = vmatpush1.bf16.msra.mxu0 %v993_v5  ;;  %v1027_v19 = vld [vmem:[%s1144_s28 + $0x144] ss:$8 sps:$4 sm:$0xff]   ;;  %v1005_v20 = vld [vmem:[%s1144_s28 + $0x20] ss:$8 sps:$4 sm:$0xff]   ;;  %v1006_v21 = vld [vmem:[%s1144_s28 + $0x14] ss:$8 sps:$4 sm:$0xff]  }
  0x1d   : > { %637 = vmatprep.subr.bf16.mxu0 %v994_v6  ;;  %v1029_v22 = vld [vmem:[%s1144_s28 + $0x140] ss:$8 sps:$4 sm:$0xff]   ;;  %v1033_v23 = vld [vmem:[%s1144_s28 + $0x134] ss:$8 sps:$4 sm:$0xff]   ;;  %v1008_v24 = vld [vmem:[%s1144_s28 + $0x10] ss:$8 sps:$4 sm:$0xff]  }
  0x1e   : > { %677 = vmatpush1.bf16.msra.mxu1 %v1017_v14  ;;  %v1012_v25 = vld [vmem:[%s1144_s28 + $0x4] ss:$8 sps:$4 sm:$0xff]   ;;  %v1035_v26 = vld [vmem:[%s1144_s28 + $0x130] ss:$8 sps:$4 sm:$0xff]   ;;  %v1014_v28 = vld [vmem:[%s1144_s28] ss:$8 sps:$4 sm:$0xff]  }
  0x1f   : > { %678 = vmatprep.subr.bf16.mxu1 %v1021_v16  ;;  %v1039_v27 = vld [vmem:[%s1144_s28 + $0x124] ss:$8 sps:$4 sm:$0xff]   ;;  %v1018_v29 = vld [vmem:[%s1144_s28 + $0xf4] ss:$8 sps:$4 sm:$0xff]   ;;  %v1041_v30 = vld [vmem:[%s1144_s28 + $0x120] ss:$8 sps:$4 sm:$0xff]  }
  0x20   : > { %638 = vmatpush1.bf16.msra.mxu0 %v996_v7  ;;  %v1045_v31 = vld [vmem:[%s1144_s28 + $0x114] ss:$8 sps:$4 sm:$0xff]   ;;  %v1020_v32 = vld [vmem:[%s1144_s28 + $0xf0] ss:$8 sps:$4 sm:$0xff]   ;;  %v1024_v33 = vld [vmem:[%s1144_s28 + $0xe4] ss:$8 sps:$4 sm:$0xff]  }
  0x21   : > { %639 = vmatprep.subr.bf16.mxu0 %v997_v8  ;;  %v1047_v35 = vld [vmem:[%s1144_s28 + $0x110] ss:$8 sps:$4 sm:$0xff]   ;;  %v1051_v37 = vld [vmem:[%s1144_s28 + $0x104] ss:$8 sps:$4 sm:$0xff]   ;;  %v1026_v38 = vld [vmem:[%s1144_s28 + $0xe0] ss:$8 sps:$4 sm:$0xff]  }
  0x22   : > { %679 = vmatpush1.bf16.msra.mxu1 %v1023_v18  ;;  %v1030_v39 = vld [vmem:[%s1144_s28 + $0xd4] ss:$8 sps:$4 sm:$0xff]   ;;  %v1053_v40 = vld [vmem:[%s1144_s28 + $0x100] ss:$8 sps:$4 sm:$0xff]   ;;  %v1032_v41 = vld [vmem:[%s1144_s28 + $0xd0] ss:$8 sps:$4 sm:$0xff]  }
  0x23   : > { %680 = vmatprep.subr.bf16.mxu1 %v1027_v19  ;;  %v1036_v42 = vld [vmem:[%s1144_s28 + $0xc4] ss:$8 sps:$4 sm:$0xff]   ;;  %v1057_v43 = vld [vmem:[%s1139_s24 + $0x8] ss:$0 sps:$4 sm:$0xff]   ;;  %v1042_v45 = vld [vmem:[%s1144_s28 + $0xb4] ss:$8 sps:$4 sm:$0xff]  }
  0x24   : > { %640 = vmatpush1.bf16.msra.mxu0 %v999_v11  ;;  %v1038_v44 = vld [vmem:[%s1144_s28 + $0xc0] ss:$8 sps:$4 sm:$0xff]   ;;  %v1044_v46 = vld [vmem:[%s1144_s28 + $0xb0] ss:$8 sps:$4 sm:$0xff]   ;;  %v1048_v47 = vld [vmem:[%s1144_s28 + $0xa4] ss:$8 sps:$4 sm:$0xff]  }
  0x25   : > { %641 = vmatprep.subr.bf16.mxu0 %v1000_v12  ;;  %v1050_v48 = vld [vmem:[%s1144_s28 + $0xa0] ss:$8 sps:$4 sm:$0xff]   ;;  %v1054_v49 = vld [vmem:[%s1144_s28 + $0x94] ss:$8 sps:$4 sm:$0xff]   ;;  %v1056_v50 = vld [vmem:[%s1144_s28 + $0x90] ss:$8 sps:$4 sm:$0xff]  }
  0x26   : > { %681 = vmatpush1.bf16.msra.mxu1 %v1029_v22  ;;  %v1058_v51 = vld [vmem:[%s1144_s28 + $0x84] ss:$8 sps:$4 sm:$0xff]   ;;  %v1060_v52 = vld [vmem:[%s1144_s28 + $0x80] ss:$8 sps:$4 sm:$0xff]   ;;  %p954_p7 = scmp.ne.s32.totalorder %s1077_s15, 2 }
  0x27   : > { %682 = vmatprep.subr.bf16.mxu1 %v1033_v23  ;;  %v330_v58 = vld [vmem:[#allocation2] sm:$0xff]  ;;  %v331_v61 = vld [vmem:[#allocation2 + $0x8] sm:$0xff] }
  0x28   : > { %642 = vmatpush1.bf16.msra.mxu0 %v1002_v15 }
  0x29   : > { %643 = vmatprep.subr.bf16.mxu0 %v1003_v17 }
  0x2a   : > { %683 = vmatpush1.bf16.msra.mxu1 %v1035_v26 }
  0x2b   : > { %684 = vmatprep.subr.bf16.mxu1 %v1039_v27 }
  0x2c   : > { %644 = vmatpush1.bf16.msra.mxu0 %v1005_v20 }
  0x2d   : > { %645 = vmatprep.subr.bf16.mxu0 %v1006_v21 }
  0x2e   : > { %685 = vmatpush1.bf16.msra.mxu1 %v1041_v30 }
  0x2f   : > { %686 = vmatprep.subr.bf16.mxu1 %v1045_v31 }
  0x30   : > { %646 = vmatpush1.bf16.msra.mxu0 %v1008_v24 }
  0x31   : > { %647 = vmatprep.subr.bf16.mxu0 %v1012_v25 }
  0x32   : > { %687 = vmatpush1.bf16.msra.mxu1 %v1047_v35 }
  0x33   : > { %688 = vmatprep.subr.bf16.mxu1 %v1051_v37 }
  0x34   : > { %648 = vmatpush1.bf16.msra.mxu0 %v1014_v28 }
  0x35   : > { %649 = vmatprep.subr.bf16.mxu0 %v1018_v29 }
  0x36   : > { %689 = vmatpush1.bf16.msra.mxu1 %v1053_v40 }
  0x38   : > { %650 = vmatpush2.bf16.msra.mxu0 %v1020_v32 }
  0x39   : > { %651 = vmatprep.subr.bf16.mxu0 %v1024_v33  ;;  %707 = vmatmul.mubr.bf16.vlgmr.msra.gmra.mxu1 %v1057_v43 }
  0x3c   : > { %652 = vmatpush2.bf16.msra.mxu0 %v1026_v38 }
  0x3d   : > { %653 = vmatprep.subr.bf16.mxu0 %v1030_v39 }
  0x40   : > { %654 = vmatpush2.bf16.msra.mxu0 %v1032_v41 }
  0x41   : > { %655 = vmatprep.subr.bf16.mxu0 %v1036_v42 }
  0x44   : > { %656 = vmatpush2.bf16.msra.mxu0 %v1038_v44 }
  0x45   : > { %657 = vmatprep.subr.bf16.mxu0 %v1042_v45 }
  0x48   : > { %658 = vmatpush2.bf16.msra.mxu0 %v1044_v46 }
  0x49   : > { %659 = vmatprep.subr.bf16.mxu0 %v1048_v47 }
  0x4c   : > { %660 = vmatpush2.bf16.msra.mxu0 %v1050_v48 }
  0x4d   : > { %661 = vmatprep.subr.bf16.mxu0 %v1054_v49 }
  0x50   : > { %662 = vmatpush2.bf16.msra.mxu0 %v1056_v50 }
  0x51   : > { %663 = vmatprep.subr.bf16.mxu0 %v1058_v51 }
  0x54   : > { %664 = vmatpush2.bf16.msra.mxu0 %v1060_v52 }
  0x57   : > { %666 = vmatmul.mubr.bf16.vlgmr.msra.gmra.mxu0 %v903_v53 }
  0xf9   : > { %v708_v54 = vpop.f32.mrf.mxu1 }
  0xfb   : > { %v710_v55 = vpop.f32.mrf.mxu1 }
  0xfd   : > { %v712_v56 = vpop.f32.mrf.mxu1 }
  0xff   : > { %v713_v57 = vpop.f32.mrf.mxu1 }
 0x117   : > { %v667_v59 = vpop.f32.mrf.mxu0 }
 0x118   : > { %v709_v60 = vadd.f32 %v708_v54, %v667_v59 }
 0x119   : > { %v669_v62 = vpop.f32.mrf.mxu0 }
 0x11a   : > { %v715_v63 = vadd.f32 %v709_v60, %v330_v58  ;;  %v711_v0 = vadd.f32 %v710_v55, %v669_v62  ;;  %722 = sbr.rel (%p954_p7) target bundleno = 304 (0x130), region = 44 }
 0x11b   : > { %v671_v1 = vpop.f32.mrf.mxu0 }
 0x11c   : > { %717 = vst [vmem:[#allocation2] sm:$0xff] %v715_v63  ;;  %v716_v2 = vadd.f32 %v711_v0, %v331_v61 }
 0x11d   : > { %v672_v3 = vpop.f32.mrf.mxu0 }
 0x11e   : > { %718 = vst [vmem:[#allocation2 + $0x8] sm:$0xff] %v716_v2 }
 0x11f   : > { %v727_v4 = vlaneseq  ;;  %v725_v6 = vld [vmem:[%s1218_s2] sm:$0x3] }
 0x120   : > { %v739_v7 = vld [vmem:[%s1219_s3] sm:$0x3] }
 0x121   : > { %v728_v5 = vshrl.u32 %v727_v4, 7 }
 0x123   : > { %v729_v8 = vsub.s32 0, %v728_v5  ;;  %v733_v9 = vsub.s32 1, %v728_v5  ;;  %v723_v10 = vld [vmem:[#allocation2] sm:$0xff] }
 0x125   : > { %v724_v11 = vld [vmem:[#allocation2 + $0x8] sm:$0xff]  ;;  %v730_v12 = vrot.slane %v725_v6, %v729_v8  ;;  %v734_v13 = vrot.slane %v725_v6, %v733_v9  ;;  %v744_v14 = vrot.slane %v739_v7, %v729_v8  ;;  %v748_v15 = vrot.slane %v739_v7, %v733_v9 }
 0x127   : > { %v737_v16 = vmul.f32 %v730_v12, %v723_v10  ;;  %v738_v17 = vmul.f32 %v734_v13, %v724_v11 }
 0x129   : > { %v751_v18 = vadd.f32 %v744_v14, %v737_v16  ;;  %v752_v19 = vadd.f32 %v748_v15, %v738_v17 }
 0x12b   : > { %v753_v20 = vmax.f32 %v751_v18, 0.0  ;;  %v754_v21 = vmax.f32 %v752_v19, 0.0 }
 0x12d   : > { %v961_v22 = vpack.c.bf16 %v754_v21, %v753_v20 }
 0x12f   : > { %763 = vst [vmem:[%s1220_s4] sm:$0xff] %v961_v22 }
 0x130 PF: > { %s14_s17 = sadd.s32 1, %s1085_s17   ;;  %s1221_s15 = smov %s1081_s16 }
 0x131   : > { %p11_p8 = scmp.ge.s32.totalorder %s14_s17, 5   ;;  %s1222_s16 = smov %s1224_s18 }
 0x133   :  { %13 = sbr.rel (!%p11_p8) target bundleno = 2 (0x2), region = 83 }

// kernel: resnet18_forward.34
= control target key start
LH: loop header
LB: loop body
LE: loop exit
PB: predicated region body
PF: predicated region fallthrough
CT: control target
= control target key end

     0   :  { %v257_v1 = vmov 0   ;;  %v175_v18 = vlaneseq  ;;  %s343_s1 = inlined_call_operand.vmem [shape: bf16[128,256], index: 1, kind: input, shape index: {}]   ;;  %s344_s0 = inlined_call_operand.vmem [shape: bf16[8,128], index: 0, kind: input, shape index: {}]   ;;  %s345_s2 = inlined_call_operand.vmem [shape: f32[1,256], index: 2, kind: input, shape index: {}]   ;;  %s346_s3 = inlined_call_operand.vmem [shape: f32[1,256], index: 3, kind: input, shape index: {}]   ;;  %s347_s4 = inlined_call_operand.vmem [shape: bf16[8,256], index: 4, kind: output, shape index: {}]  }
   0x1   :  { %v233_v0 = vld [vmem:[%s343_s1 + $0x74] ss:$8 sps:$4 sm:$0xff]   ;;  %155 = vmatprep.mubr.bf16.mxu0 %v257_v1  ;;  %v235_v2 = vld [vmem:[%s343_s1 + $0x70] ss:$8 sps:$4 sm:$0xff]   ;;  %v236_v3 = vld [vmem:[%s343_s1 + $0x64] ss:$8 sps:$4 sm:$0xff]  }
   0x2   :  { %123 = vmatprep.subr.bf16.mxu0 %v233_v0  ;;  %v238_v4 = vld [vmem:[%s343_s1 + $0x60] ss:$8 sps:$4 sm:$0xff]   ;;  %v239_v5 = vld [vmem:[%s343_s1 + $0x54] ss:$8 sps:$4 sm:$0xff]   ;;  %v241_v6 = vld [vmem:[%s343_s1 + $0x50] ss:$8 sps:$4 sm:$0xff]  }
   0x3   :  { %124 = vmatpush1.bf16.msra.mxu0 %v235_v2  ;;  %v242_v7 = vld [vmem:[%s343_s1 + $0x44] ss:$8 sps:$4 sm:$0xff]   ;;  %v244_v8 = vld [vmem:[%s343_s1 + $0x40] ss:$8 sps:$4 sm:$0xff]   ;;  %v245_v9 = vld [vmem:[%s343_s1 + $0x34] ss:$8 sps:$4 sm:$0xff]  }
   0x4   :  { %125 = vmatprep.subr.bf16.mxu0 %v236_v3  ;;  %v247_v10 = vld [vmem:[%s343_s1 + $0x30] ss:$8 sps:$4 sm:$0xff]   ;;  %v248_v11 = vld [vmem:[%s343_s1 + $0x24] ss:$8 sps:$4 sm:$0xff]   ;;  %v250_v12 = vld [vmem:[%s343_s1 + $0x20] ss:$8 sps:$4 sm:$0xff]  }
   0x5   :  { %v251_v13 = vld [vmem:[%s343_s1 + $0x14] ss:$8 sps:$4 sm:$0xff]   ;;  %v253_v14 = vld [vmem:[%s343_s1 + $0x10] ss:$8 sps:$4 sm:$0xff]   ;;  %v254_v15 = vld [vmem:[%s343_s1 + $0x4] ss:$8 sps:$4 sm:$0xff]  }
   0x6   :  { %v256_v16 = vld [vmem:[%s343_s1] ss:$8 sps:$4 sm:$0xff]   ;;  %v176_v19 = vshrl.u32 %v175_v18, 7 }
   0x7   :  { %126 = vmatpush1.bf16.msra.mxu0 %v238_v4  ;;  %v26_v17 = vld [vmem:[%s344_s0] sm:$0xf] }
   0x8   :  { %127 = vmatprep.subr.bf16.mxu0 %v239_v5  ;;  %v177_v20 = vsub.s32 0, %v176_v19  ;;  %v173_v21 = vld [vmem:[%s345_s2] sm:$0x3]  ;;  %v181_v22 = vsub.s32 1, %v176_v19 }
   0x9   :  { %v187_v24 = vld [vmem:[%s346_s3] sm:$0x3] }
   0xa   :  { %v178_v23 = vrot.slane %v173_v21, %v177_v20  ;;  %v182_v25 = vrot.slane %v173_v21, %v181_v22  ;;  %v192_v28 = vrot.slane %v187_v24, %v177_v20  ;;  %v196_v29 = vrot.slane %v187_v24, %v181_v22 }
   0xb   :  { %128 = vmatpush1.bf16.msra.mxu0 %v241_v6 }
   0xc   :  { %129 = vmatprep.subr.bf16.mxu0 %v242_v7 }
   0xf   :  { %130 = vmatpush1.bf16.msra.mxu0 %v244_v8 }
  0x10   :  { %131 = vmatprep.subr.bf16.mxu0 %v245_v9 }
  0x13   :  { %132 = vmatpush1.bf16.msra.mxu0 %v247_v10 }
  0x14   :  { %133 = vmatprep.subr.bf16.mxu0 %v248_v11 }
  0x17   :  { %134 = vmatpush1.bf16.msra.mxu0 %v250_v12 }
  0x18   :  { %135 = vmatprep.subr.bf16.mxu0 %v251_v13 }
  0x1b   :  { %136 = vmatpush1.bf16.msra.mxu0 %v253_v14 }
  0x1c   :  { %137 = vmatprep.subr.bf16.mxu0 %v254_v15 }
  0x1f   :  { %138 = vmatpush1.bf16.msra.mxu0 %v256_v16 }
  0x22   :  { %156 = vmatmul.mubr.bf16.vlgmr.msra.gmra.mxu0 %v26_v17 }
  0xe2   :  { %v157_v26 = vpop.f32.mrf.mxu0 }
  0xe3   :  { %v185_v27 = vmul.f32 %v178_v23, %v157_v26 }
  0xe4   :  { %v159_v30 = vpop.f32.mrf.mxu0 }
  0xe5   :  { %v186_v31 = vmul.f32 %v182_v25, %v159_v30  ;;  %v199_v33 = vadd.f32 %v192_v28, %v185_v27 }
  0xe6   :  { %v161_v32 = vpop.f32.mrf.mxu0 }
  0xe7   :  { %v200_v34 = vadd.f32 %v196_v29, %v186_v31 }
  0xe8   :  { %v162_v35 = vpop.f32.mrf.mxu0 }
  0xe9   :  { %v231_v36 = vpack.c.bf16 %v200_v34, %v199_v33 }
  0xeb   :  { %209 = vst [vmem:[%s347_s4] sm:$0xff] %v231_v36 }

// kernel: resnet18_forward.37
= control target key start
LH: loop header
LB: loop body
LE: loop exit
PB: predicated region body
PF: predicated region fallthrough
CT: control target
= control target key end

     0   :  { %s1114_s15 = smov 0   ;;  %s1116_s16 = smov 0   ;;  %s1216_s0 = inlined_call_operand.vmem [shape: bf16[8,2304], index: 0, kind: input, shape index: {}]   ;;  %s1217_s1 = inlined_call_operand.vmem [shape: bf16[2304,256], index: 1, kind: input, shape index: {}]   ;;  %s1218_s2 = inlined_call_operand.vmem [shape: f32[1,256], index: 2, kind: input, shape index: {}]   ;;  %s1219_s3 = inlined_call_operand.vmem [shape: f32[1,256], index: 3, kind: input, shape index: {}]   ;;  %s1220_s4 = inlined_call_operand.vmem [shape: bf16[8,256], index: 4, kind: output, shape index: {}]  }
   0x1   :  { %s1118_s17 = smov 0  }
   0x2 LB: > { %s26_s18 = sadd.s32 1, %s1081_s16  ;;  %p898_p0 = scmp.ge.s32.totalorder %s1085_s17, 1  ;;  %s1085_s17 = sphi %s1118_s17, %s14_s17   ;;  %s1081_s16 = sphi %s1116_s16, %s1222_s16   ;;  %s1077_s15 = sphi %s1114_s15, %s1221_s15  }
   0x3   : > { %p27_p1 = scmp.ge.s32.totalorder %s26_s18, 6  ;;  %p229_p2 = scmp.lt.s32.totalorder %s1085_s17, 7 }
   0x5   : > { %s1224_s18 = smov (%p27_p1, %s26_s18), 0  ;;  %p230_p3 = pnand %p898_p0, %p229_p2 }
   0x6   : > { %s281_s19 = smul.u32 (!%p230_p3), 3, %s1077_s15  ;;  %p902_p6 = scmp.ne.s32.totalorder (!%p230_p3), %s1077_s15, 0 }
   0x7   : > { %233 = sbr.rel (%p230_p3) target bundleno = 304 (0x130), region = 36 }
   0x8   : > { %s291_s20 = smul.u32 (!%p230_p3), 48, %s1077_s15  ;;  %p284_p4 = scmp.lt.s32.totalorder (!%p230_p3), %s281_s19, 17 }
   0xa   : > { %p293_p5 = scmp.lt.s32.totalorder (!%p230_p3), %s291_s20, 287 }
   0xc   : > { %s1226_s19 = smov (!%p284_p4, %s281_s19), 17  ;;  %s1228_s20 = smov (!%p293_p5, %s291_s20), 287 }
   0xd   : > { %s899_s21 = sshll.u32 %s1226_s19, 2  ;;  %s960_s25 = sshll.u32 %s1228_s20, 3 }
   0xe   : > { %s1139_s24 = scalar_lea.vmem %s1216_s0, %s899_s21  ;;  %s1144_s28 = scalar_lea.vmem %s1217_s1, %s960_s25 }
   0xf   : > { %327 = sbr.rel (%p902_p6) target bundleno = 22 (0x16), region = 40 }
  0x14   : > { %v1087_v0 = vmov 0.0  }
  0x15   : > { %328 = vst [vmem:[#allocation2] sm:$0xff] %v1087_v0  ;;  %329 = vst [vmem:[#allocation2 + $0x8] sm:$0xff] %v1087_v0 }
  0x16 PF: > { %v988_v1 = vld [vmem:[%s1144_s28 + $0x74] ss:$8 sps:$4 sm:$0xff]   ;;  %v990_v2 = vld [vmem:[%s1144_s28 + $0x70] ss:$8 sps:$4 sm:$0xff]   ;;  %v1088_v3 = vmov 0   ;;  %v332_v34 = vld [vmem:[%s1139_s24] sm:$0xff] }
  0x17   : > { %706 = vmatprep.mubr.bf16.mxu1 %v1088_v3  ;;  %633 = vmatprep.subr.bf16.mxu0 %v988_v1  ;;  %v991_v4 = vld [vmem:[%s1144_s28 + $0x64] ss:$8 sps:$4 sm:$0xff]   ;;  %v993_v5 = vld [vmem:[%s1144_s28 + $0x60] ss:$8 sps:$4 sm:$0xff]   ;;  %v994_v6 = vld [vmem:[%s1144_s28 + $0x54] ss:$8 sps:$4 sm:$0xff]   ;;  %v904_v36 = vcombine.high %v332_v34, %v332_v34  ;;  %v903_v53 = vcombine.low %v332_v34, %v332_v34 }
  0x18   : > { %634 = vmatpush1.bf16.msra.mxu0 %v990_v2  ;;  %v996_v7 = vld [vmem:[%s1144_s28 + $0x50] ss:$8 sps:$4 sm:$0xff]   ;;  %v997_v8 = vld [vmem:[%s1144_s28 + $0x44] ss:$8 sps:$4 sm:$0xff]   ;;  %v1009_v9 = vld [vmem:[%s1144_s28 + $0x174] ss:$8 sps:$4 sm:$0xff]  }
  0x19   : > { %635 = vmatprep.subr.bf16.mxu0 %v991_v4  ;;  %v1011_v10 = vld [vmem:[%s1144_s28 + $0x170] ss:$8 sps:$4 sm:$0xff]   ;;  %v999_v11 = vld [vmem:[%s1144_s28 + $0x40] ss:$8 sps:$4 sm:$0xff]   ;;  %v1000_v12 = vld [vmem:[%s1144_s28 + $0x34] ss:$8 sps:$4 sm:$0xff]   ;;  %674 = vmatprep.subr.bf16.mxu1 %v1009_v9 }
  0x1a   : > { %v1015_v13 = vld [vmem:[%s1144_s28 + $0x164] ss:$8 sps:$4 sm:$0xff]   ;;  %675 = vmatpush1.bf16.msra.mxu1 %v1011_v10  ;;  %v1017_v14 = vld [vmem:[%s1144_s28 + $0x160] ss:$8 sps:$4 sm:$0xff]   ;;  %v1002_v15 = vld [vmem:[%s1144_s28 + $0x30] ss:$8 sps:$4 sm:$0xff]   ;;  %665 = vmatprep.mubr.bf16.mxu0 %v904_v36 }
  0x1b   : > { %676 = vmatprep.subr.bf16.mxu1 %v1015_v13  ;;  %v1021_v16 = vld [vmem:[%s1144_s28 + $0x154] ss:$8 sps:$4 sm:$0xff]   ;;  %v1003_v17 = vld [vmem:[%s1144_s28 + $0x24] ss:$8 sps:$4 sm:$0xff]   ;;  %v1023_v18 = vld [vmem:[%s1144_s28 + $0x150] ss:$8 sps:$4 sm:$0xff]  }
  0x1c   : > { %636 = vmatpush1.bf16.msra.mxu0 %v993_v5  ;;  %v1027_v19 = vld [vmem:[%s1144_s28 + $0x144] ss:$8 sps:$4 sm:$0xff]   ;;  %v1005_v20 = vld [vmem:[%s1144_s28 + $0x20] ss:$8 sps:$4 sm:$0xff]   ;;  %v1006_v21 = vld [vmem:[%s1144_s28 + $0x14] ss:$8 sps:$4 sm:$0xff]  }
  0x1d   : > { %637 = vmatprep.subr.bf16.mxu0 %v994_v6  ;;  %v1029_v22 = vld [vmem:[%s1144_s28 + $0x140] ss:$8 sps:$4 sm:$0xff]   ;;  %v1033_v23 = vld [vmem:[%s1144_s28 + $0x134] ss:$8 sps:$4 sm:$0xff]   ;;  %v1008_v24 = vld [vmem:[%s1144_s28 + $0x10] ss:$8 sps:$4 sm:$0xff]  }
  0x1e   : > { %677 = vmatpush1.bf16.msra.mxu1 %v1017_v14  ;;  %v1012_v25 = vld [vmem:[%s1144_s28 + $0x4] ss:$8 sps:$4 sm:$0xff]   ;;  %v1035_v26 = vld [vmem:[%s1144_s28 + $0x130] ss:$8 sps:$4 sm:$0xff]   ;;  %v1014_v28 = vld [vmem:[%s1144_s28] ss:$8 sps:$4 sm:$0xff]  }
  0x1f   : > { %678 = vmatprep.subr.bf16.mxu1 %v1021_v16  ;;  %v1039_v27 = vld [vmem:[%s1144_s28 + $0x124] ss:$8 sps:$4 sm:$0xff]   ;;  %v1018_v29 = vld [vmem:[%s1144_s28 + $0xf4] ss:$8 sps:$4 sm:$0xff]   ;;  %v1041_v30 = vld [vmem:[%s1144_s28 + $0x120] ss:$8 sps:$4 sm:$0xff]  }
  0x20   : > { %638 = vmatpush1.bf16.msra.mxu0 %v996_v7  ;;  %v1045_v31 = vld [vmem:[%s1144_s28 + $0x114] ss:$8 sps:$4 sm:$0xff]   ;;  %v1020_v32 = vld [vmem:[%s1144_s28 + $0xf0] ss:$8 sps:$4 sm:$0xff]   ;;  %v1024_v33 = vld [vmem:[%s1144_s28 + $0xe4] ss:$8 sps:$4 sm:$0xff]  }
  0x21   : > { %639 = vmatprep.subr.bf16.mxu0 %v997_v8  ;;  %v1047_v35 = vld [vmem:[%s1144_s28 + $0x110] ss:$8 sps:$4 sm:$0xff]   ;;  %v1051_v37 = vld [vmem:[%s1144_s28 + $0x104] ss:$8 sps:$4 sm:$0xff]   ;;  %v1026_v38 = vld [vmem:[%s1144_s28 + $0xe0] ss:$8 sps:$4 sm:$0xff]  }
  0x22   : > { %679 = vmatpush1.bf16.msra.mxu1 %v1023_v18  ;;  %v1030_v39 = vld [vmem:[%s1144_s28 + $0xd4] ss:$8 sps:$4 sm:$0xff]   ;;  %v1053_v40 = vld [vmem:[%s1144_s28 + $0x100] ss:$8 sps:$4 sm:$0xff]   ;;  %v1032_v41 = vld [vmem:[%s1144_s28 + $0xd0] ss:$8 sps:$4 sm:$0xff]  }
  0x23   : > { %680 = vmatprep.subr.bf16.mxu1 %v1027_v19  ;;  %v1036_v42 = vld [vmem:[%s1144_s28 + $0xc4] ss:$8 sps:$4 sm:$0xff]   ;;  %v1057_v43 = vld [vmem:[%s1139_s24 + $0x8] ss:$0 sps:$4 sm:$0xff]   ;;  %v1042_v45 = vld [vmem:[%s1144_s28 + $0xb4] ss:$8 sps:$4 sm:$0xff]  }
  0x24   : > { %640 = vmatpush1.bf16.msra.mxu0 %v999_v11  ;;  %v1038_v44 = vld [vmem:[%s1144_s28 + $0xc0] ss:$8 sps:$4 sm:$0xff]   ;;  %v1044_v46 = vld [vmem:[%s1144_s28 + $0xb0] ss:$8 sps:$4 sm:$0xff]   ;;  %v1048_v47 = vld [vmem:[%s1144_s28 + $0xa4] ss:$8 sps:$4 sm:$0xff]  }
  0x25   : > { %641 = vmatprep.subr.bf16.mxu0 %v1000_v12  ;;  %v1050_v48 = vld [vmem:[%s1144_s28 + $0xa0] ss:$8 sps:$4 sm:$0xff]   ;;  %v1054_v49 = vld [vmem:[%s1144_s28 + $0x94] ss:$8 sps:$4 sm:$0xff]   ;;  %v1056_v50 = vld [vmem:[%s1144_s28 + $0x90] ss:$8 sps:$4 sm:$0xff]  }
  0x26   : > { %681 = vmatpush1.bf16.msra.mxu1 %v1029_v22  ;;  %v1058_v51 = vld [vmem:[%s1144_s28 + $0x84] ss:$8 sps:$4 sm:$0xff]   ;;  %v1060_v52 = vld [vmem:[%s1144_s28 + $0x80] ss:$8 sps:$4 sm:$0xff]   ;;  %p954_p7 = scmp.ne.s32.totalorder %s1077_s15, 5 }
  0x27   : > { %682 = vmatprep.subr.bf16.mxu1 %v1033_v23  ;;  %v330_v58 = vld [vmem:[#allocation2] sm:$0xff]  ;;  %v331_v61 = vld [vmem:[#allocation2 + $0x8] sm:$0xff] }
  0x28   : > { %642 = vmatpush1.bf16.msra.mxu0 %v1002_v15 }
  0x29   : > { %643 = vmatprep.subr.bf16.mxu0 %v1003_v17 }
  0x2a   : > { %683 = vmatpush1.bf16.msra.mxu1 %v1035_v26 }
  0x2b   : > { %684 = vmatprep.subr.bf16.mxu1 %v1039_v27 }
  0x2c   : > { %644 = vmatpush1.bf16.msra.mxu0 %v1005_v20 }
  0x2d   : > { %645 = vmatprep.subr.bf16.mxu0 %v1006_v21 }
  0x2e   : > { %685 = vmatpush1.bf16.msra.mxu1 %v1041_v30 }
  0x2f   : > { %686 = vmatprep.subr.bf16.mxu1 %v1045_v31 }
  0x30   : > { %646 = vmatpush1.bf16.msra.mxu0 %v1008_v24 }
  0x31   : > { %647 = vmatprep.subr.bf16.mxu0 %v1012_v25 }
  0x32   : > { %687 = vmatpush1.bf16.msra.mxu1 %v1047_v35 }
  0x33   : > { %688 = vmatprep.subr.bf16.mxu1 %v1051_v37 }
  0x34   : > { %648 = vmatpush1.bf16.msra.mxu0 %v1014_v28 }
  0x35   : > { %649 = vmatprep.subr.bf16.mxu0 %v1018_v29 }
  0x36   : > { %689 = vmatpush1.bf16.msra.mxu1 %v1053_v40 }
  0x38   : > { %650 = vmatpush2.bf16.msra.mxu0 %v1020_v32 }
  0x39   : > { %651 = vmatprep.subr.bf16.mxu0 %v1024_v33  ;;  %707 = vmatmul.mubr.bf16.vlgmr.msra.gmra.mxu1 %v1057_v43 }
  0x3c   : > { %652 = vmatpush2.bf16.msra.mxu0 %v1026_v38 }
  0x3d   : > { %653 = vmatprep.subr.bf16.mxu0 %v1030_v39 }
  0x40   : > { %654 = vmatpush2.bf16.msra.mxu0 %v1032_v41 }
  0x41   : > { %655 = vmatprep.subr.bf16.mxu0 %v1036_v42 }
  0x44   : > { %656 = vmatpush2.bf16.msra.mxu0 %v1038_v44 }
  0x45   : > { %657 = vmatprep.subr.bf16.mxu0 %v1042_v45 }
  0x48   : > { %658 = vmatpush2.bf16.msra.mxu0 %v1044_v46 }
  0x49   : > { %659 = vmatprep.subr.bf16.mxu0 %v1048_v47 }
  0x4c   : > { %660 = vmatpush2.bf16.msra.mxu0 %v1050_v48 }
  0x4d   : > { %661 = vmatprep.subr.bf16.mxu0 %v1054_v49 }
  0x50   : > { %662 = vmatpush2.bf16.msra.mxu0 %v1056_v50 }
  0x51   : > { %663 = vmatprep.subr.bf16.mxu0 %v1058_v51 }
  0x54   : > { %664 = vmatpush2.bf16.msra.mxu0 %v1060_v52 }
  0x57   : > { %666 = vmatmul.mubr.bf16.vlgmr.msra.gmra.mxu0 %v903_v53 }
  0xf9   : > { %v708_v54 = vpop.f32.mrf.mxu1 }
  0xfb   : > { %v710_v55 = vpop.f32.mrf.mxu1 }
  0xfd   : > { %v712_v56 = vpop.f32.mrf.mxu1 }
  0xff   : > { %v713_v57 = vpop.f32.mrf.mxu1 }
 0x117   : > { %v667_v59 = vpop.f32.mrf.mxu0 }
 0x118   : > { %v709_v60 = vadd.f32 %v708_v54, %v667_v59 }
 0x119   : > { %v669_v62 = vpop.f32.mrf.mxu0 }
 0x11a   : > { %v715_v63 = vadd.f32 %v709_v60, %v330_v58  ;;  %v711_v0 = vadd.f32 %v710_v55, %v669_v62  ;;  %722 = sbr.rel (%p954_p7) target bundleno = 304 (0x130), region = 44 }
 0x11b   : > { %v671_v1 = vpop.f32.mrf.mxu0 }
 0x11c   : > { %717 = vst [vmem:[#allocation2] sm:$0xff] %v715_v63  ;;  %v716_v2 = vadd.f32 %v711_v0, %v331_v61 }
 0x11d   : > { %v672_v3 = vpop.f32.mrf.mxu0 }
 0x11e   : > { %718 = vst [vmem:[#allocation2 + $0x8] sm:$0xff] %v716_v2 }
 0x11f   : > { %v727_v4 = vlaneseq  ;;  %v725_v6 = vld [vmem:[%s1218_s2] sm:$0x3] }
 0x120   : > { %v739_v7 = vld [vmem:[%s1219_s3] sm:$0x3] }
 0x121   : > { %v728_v5 = vshrl.u32 %v727_v4, 7 }
 0x123   : > { %v729_v8 = vsub.s32 0, %v728_v5  ;;  %v733_v9 = vsub.s32 1, %v728_v5  ;;  %v723_v10 = vld [vmem:[#allocation2] sm:$0xff] }
 0x125   : > { %v724_v11 = vld [vmem:[#allocation2 + $0x8] sm:$0xff]  ;;  %v730_v12 = vrot.slane %v725_v6, %v729_v8  ;;  %v734_v13 = vrot.slane %v725_v6, %v733_v9  ;;  %v744_v14 = vrot.slane %v739_v7, %v729_v8  ;;  %v748_v15 = vrot.slane %v739_v7, %v733_v9 }
 0x127   : > { %v737_v16 = vmul.f32 %v730_v12, %v723_v10  ;;  %v738_v17 = vmul.f32 %v734_v13, %v724_v11 }
 0x129   : > { %v751_v18 = vadd.f32 %v744_v14, %v737_v16  ;;  %v752_v19 = vadd.f32 %v748_v15, %v738_v17 }
 0x12b   : > { %v753_v20 = vmax.f32 %v751_v18, 0.0  ;;  %v754_v21 = vmax.f32 %v752_v19, 0.0 }
 0x12d   : > { %v961_v22 = vpack.c.bf16 %v754_v21, %v753_v20 }
 0x12f   : > { %763 = vst [vmem:[%s1220_s4] sm:$0xff] %v961_v22 }
 0x130 PF: > { %s14_s17 = sadd.s32 1, %s1085_s17   ;;  %s1221_s15 = smov %s1081_s16 }
 0x131   : > { %p11_p8 = scmp.ge.s32.totalorder %s14_s17, 8   ;;  %s1222_s16 = smov %s1224_s18 }
 0x133   :  { %13 = sbr.rel (!%p11_p8) target bundleno = 2 (0x2), region = 83 }

// kernel: resnet18_forward.36
= control target key start
LH: loop header
LB: loop body
LE: loop exit
PB: predicated region body
PF: predicated region fallthrough
CT: control target
= control target key end

     0   :  { %s1209_s18 = smov 0   ;;  %s1211_s19 = smov 0   ;;  %s1314_s0 = inlined_call_operand.vmem [shape: bf16[8,2304], index: 0, kind: input, shape index: {}]   ;;  %s1315_s1 = inlined_call_operand.vmem [shape: bf16[2304,256], index: 1, kind: input, shape index: {}]   ;;  %s1316_s2 = inlined_call_operand.vmem [shape: f32[1,256], index: 2, kind: input, shape index: {}]   ;;  %s1317_s3 = inlined_call_operand.vmem [shape: f32[1,256], index: 3, kind: input, shape index: {}]   ;;  %s1318_s4 = inlined_call_operand.vmem [shape: bf16[8,256], index: 4, kind: input, shape index: {}]   ;;  %s1319_s5 = inlined_call_operand.vmem [shape: bf16[8,256], index: 5, kind: output, shape index: {}]  }
   0x1   :  { %s1213_s20 = smov 0  }
   0x2 LB: > { %s27_s21 = sadd.s32 1, %s1171_s19  ;;  %p988_p0 = scmp.ge.s32.totalorder %s1175_s20, 1  ;;  %s1175_s20 = sphi %s1213_s20, %s15_s20   ;;  %s1171_s19 = sphi %s1211_s19, %s1321_s19   ;;  %s1167_s18 = sphi %s1209_s18, %s1320_s18  }
   0x3   : > { %p28_p1 = scmp.ge.s32.totalorder %s27_s21, 6  ;;  %p271_p2 = scmp.lt.s32.totalorder %s1175_s20, 7 }
   0x5   : > { %s1323_s21 = smov (%p28_p1, %s27_s21), 0  ;;  %p272_p3 = pnand %p988_p0, %p271_p2 }
   0x6   : > { %s334_s22 = smul.u32 (!%p272_p3), 3, %s1167_s18  ;;  %p992_p6 = scmp.ne.s32.totalorder (!%p272_p3), %s1167_s18, 0 }
   0x7   : > { %275 = sbr.rel (%p272_p3) target bundleno = 306 (0x132), region = 40 }
   0x8   : > { %s344_s23 = smul.u32 (!%p272_p3), 48, %s1167_s18  ;;  %p337_p4 = scmp.lt.s32.totalorder (!%p272_p3), %s334_s22, 17 }
   0xa   : > { %p346_p5 = scmp.lt.s32.totalorder (!%p272_p3), %s344_s23, 287 }
   0xc   : > { %s1325_s22 = smov (!%p337_p4, %s334_s22), 17  ;;  %s1327_s23 = smov (!%p346_p5, %s344_s23), 287 }
   0xd   : > { %s989_s24 = sshll.u32 %s1325_s22, 2  ;;  %s1050_s28 = sshll.u32 %s1327_s23, 3 }
   0xe   : > { %s1234_s27 = scalar_lea.vmem %s1314_s0, %s989_s24  ;;  %s1239_s6 = scalar_lea.vmem %s1315_s1, %s1050_s28 }
   0xf   : > { %390 = sbr.rel (%p992_p6) target bundleno = 22 (0x16), region = 44 }
  0x14   : > { %v1177_v0 = vmov 0.0  }
  0x15   : > { %391 = vst [vmem:[#allocation2] sm:$0xff] %v1177_v0  ;;  %392 = vst [vmem:[#allocation2 + $0x8] sm:$0xff] %v1177_v0 }
  0x16 PF: > { %v1078_v1 = vld [vmem:[%s1239_s6 + $0x74] ss:$8 sps:$4 sm:$0xff]   ;;  %v1080_v2 = vld [vmem:[%s1239_s6 + $0x70] ss:$8 sps:$4 sm:$0xff]   ;;  %v1178_v3 = vmov 0   ;;  %v395_v34 = vld [vmem:[%s1234_s27] sm:$0xff] }
  0x17   : > { %769 = vmatprep.mubr.bf16.mxu1 %v1178_v3  ;;  %696 = vmatprep.subr.bf16.mxu0 %v1078_v1  ;;  %v1081_v4 = vld [vmem:[%s1239_s6 + $0x64] ss:$8 sps:$4 sm:$0xff]   ;;  %v1083_v5 = vld [vmem:[%s1239_s6 + $0x60] ss:$8 sps:$4 sm:$0xff]   ;;  %v1084_v6 = vld [vmem:[%s1239_s6 + $0x54] ss:$8 sps:$4 sm:$0xff]   ;;  %v994_v36 = vcombine.high %v395_v34, %v395_v34  ;;  %v993_v53 = vcombine.low %v395_v34, %v395_v34 }
  0x18   : > { %697 = vmatpush1.bf16.msra.mxu0 %v1080_v2  ;;  %v1086_v7 = vld [vmem:[%s1239_s6 + $0x50] ss:$8 sps:$4 sm:$0xff]   ;;  %v1087_v8 = vld [vmem:[%s1239_s6 + $0x44] ss:$8 sps:$4 sm:$0xff]   ;;  %v1099_v9 = vld [vmem:[%s1239_s6 + $0x174] ss:$8 sps:$4 sm:$0xff]  }
  0x19   : > { %698 = vmatprep.subr.bf16.mxu0 %v1081_v4  ;;  %v1101_v10 = vld [vmem:[%s1239_s6 + $0x170] ss:$8 sps:$4 sm:$0xff]   ;;  %v1089_v11 = vld [vmem:[%s1239_s6 + $0x40] ss:$8 sps:$4 sm:$0xff]   ;;  %v1090_v12 = vld [vmem:[%s1239_s6 + $0x34] ss:$8 sps:$4 sm:$0xff]   ;;  %737 = vmatprep.subr.bf16.mxu1 %v1099_v9 }
  0x1a   : > { %v1105_v13 = vld [vmem:[%s1239_s6 + $0x164] ss:$8 sps:$4 sm:$0xff]   ;;  %738 = vmatpush1.bf16.msra.mxu1 %v1101_v10  ;;  %v1107_v14 = vld [vmem:[%s1239_s6 + $0x160] ss:$8 sps:$4 sm:$0xff]   ;;  %v1092_v15 = vld [vmem:[%s1239_s6 + $0x30] ss:$8 sps:$4 sm:$0xff]   ;;  %728 = vmatprep.mubr.bf16.mxu0 %v994_v36 }
  0x1b   : > { %739 = vmatprep.subr.bf16.mxu1 %v1105_v13  ;;  %v1111_v16 = vld [vmem:[%s1239_s6 + $0x154] ss:$8 sps:$4 sm:$0xff]   ;;  %v1093_v17 = vld [vmem:[%s1239_s6 + $0x24] ss:$8 sps:$4 sm:$0xff]   ;;  %v1113_v18 = vld [vmem:[%s1239_s6 + $0x150] ss:$8 sps:$4 sm:$0xff]  }
  0x1c   : > { %699 = vmatpush1.bf16.msra.mxu0 %v1083_v5  ;;  %v1117_v19 = vld [vmem:[%s1239_s6 + $0x144] ss:$8 sps:$4 sm:$0xff]   ;;  %v1095_v20 = vld [vmem:[%s1239_s6 + $0x20] ss:$8 sps:$4 sm:$0xff]   ;;  %v1096_v21 = vld [vmem:[%s1239_s6 + $0x14] ss:$8 sps:$4 sm:$0xff]  }
  0x1d   : > { %700 = vmatprep.subr.bf16.mxu0 %v1084_v6  ;;  %v1119_v22 = vld [vmem:[%s1239_s6 + $0x140] ss:$8 sps:$4 sm:$0xff]   ;;  %v1123_v23 = vld [vmem:[%s1239_s6 + $0x134] ss:$8 sps:$4 sm:$0xff]   ;;  %v1098_v24 = vld [vmem:[%s1239_s6 + $0x10] ss:$8 sps:$4 sm:$0xff]  }
  0x1e   : > { %740 = vmatpush1.bf16.msra.mxu1 %v1107_v14  ;;  %v1102_v25 = vld [vmem:[%s1239_s6 + $0x4] ss:$8 sps:$4 sm:$0xff]   ;;  %v1125_v26 = vld [vmem:[%s1239_s6 + $0x130] ss:$8 sps:$4 sm:$0xff]   ;;  %v1104_v28 = vld [vmem:[%s1239_s6] ss:$8 sps:$4 sm:$0xff]  }
  0x1f   : > { %741 = vmatprep.subr.bf16.mxu1 %v1111_v16  ;;  %v1129_v27 = vld [vmem:[%s1239_s6 + $0x124] ss:$8 sps:$4 sm:$0xff]   ;;  %v1108_v29 = vld [vmem:[%s1239_s6 + $0xf4] ss:$8 sps:$4 sm:$0xff]   ;;  %v1131_v30 = vld [vmem:[%s1239_s6 + $0x120] ss:$8 sps:$4 sm:$0xff]  }
  0x20   : > { %701 = vmatpush1.bf16.msra.mxu0 %v1086_v7  ;;  %v1135_v31 = vld [vmem:[%s1239_s6 + $0x114] ss:$8 sps:$4 sm:$0xff]   ;;  %v1110_v32 = vld [vmem:[%s1239_s6 + $0xf0] ss:$8 sps:$4 sm:$0xff]   ;;  %v1114_v33 = vld [vmem:[%s1239_s6 + $0xe4] ss:$8 sps:$4 sm:$0xff]  }
  0x21   : > { %702 = vmatprep.subr.bf16.mxu0 %v1087_v8  ;;  %v1137_v35 = vld [vmem:[%s1239_s6 + $0x110] ss:$8 sps:$4 sm:$0xff]   ;;  %v1141_v37 = vld [vmem:[%s1239_s6 + $0x104] ss:$8 sps:$4 sm:$0xff]   ;;  %v1116_v38 = vld [vmem:[%s1239_s6 + $0xe0] ss:$8 sps:$4 sm:$0xff]  }
  0x22   : > { %742 = vmatpush1.bf16.msra.mxu1 %v1113_v18  ;;  %v1120_v39 = vld [vmem:[%s1239_s6 + $0xd4] ss:$8 sps:$4 sm:$0xff]   ;;  %v1143_v40 = vld [vmem:[%s1239_s6 + $0x100] ss:$8 sps:$4 sm:$0xff]   ;;  %v1122_v41 = vld [vmem:[%s1239_s6 + $0xd0] ss:$8 sps:$4 sm:$0xff]  }
  0x23   : > { %743 = vmatprep.subr.bf16.mxu1 %v1117_v19  ;;  %v1126_v42 = vld [vmem:[%s1239_s6 + $0xc4] ss:$8 sps:$4 sm:$0xff]   ;;  %v1147_v43 = vld [vmem:[%s1234_s27 + $0x8] ss:$0 sps:$4 sm:$0xff]   ;;  %v1132_v45 = vld [vmem:[%s1239_s6 + $0xb4] ss:$8 sps:$4 sm:$0xff]  }
  0x24   : > { %703 = vmatpush1.bf16.msra.mxu0 %v1089_v11  ;;  %v1128_v44 = vld [vmem:[%s1239_s6 + $0xc0] ss:$8 sps:$4 sm:$0xff]   ;;  %v1134_v46 = vld [vmem:[%s1239_s6 + $0xb0] ss:$8 sps:$4 sm:$0xff]   ;;  %v1138_v47 = vld [vmem:[%s1239_s6 + $0xa4] ss:$8 sps:$4 sm:$0xff]  }
  0x25   : > { %704 = vmatprep.subr.bf16.mxu0 %v1090_v12  ;;  %v1140_v48 = vld [vmem:[%s1239_s6 + $0xa0] ss:$8 sps:$4 sm:$0xff]   ;;  %v1144_v49 = vld [vmem:[%s1239_s6 + $0x94] ss:$8 sps:$4 sm:$0xff]   ;;  %v1146_v50 = vld [vmem:[%s1239_s6 + $0x90] ss:$8 sps:$4 sm:$0xff]  }
  0x26   : > { %744 = vmatpush1.bf16.msra.mxu1 %v1119_v22  ;;  %v1148_v51 = vld [vmem:[%s1239_s6 + $0x84] ss:$8 sps:$4 sm:$0xff]   ;;  %v1150_v52 = vld [vmem:[%s1239_s6 + $0x80] ss:$8 sps:$4 sm:$0xff]   ;;  %p1044_p7 = scmp.ne.s32.totalorder %s1167_s18, 5 }
  0x27   : > { %745 = vmatprep.subr.bf16.mxu1 %v1123_v23  ;;  %v393_v58 = vld [vmem:[#allocation2] sm:$0xff]  ;;  %v394_v61 = vld [vmem:[#allocation2 + $0x8] sm:$0xff] }
  0x28   : > { %705 = vmatpush1.bf16.msra.mxu0 %v1092_v15 }
  0x29   : > { %706 = vmatprep.subr.bf16.mxu0 %v1093_v17 }
  0x2a   : > { %746 = vmatpush1.bf16.msra.mxu1 %v1125_v26 }
  0x2b   : > { %747 = vmatprep.subr.bf16.mxu1 %v1129_v27 }
  0x2c   : > { %707 = vmatpush1.bf16.msra.mxu0 %v1095_v20 }
  0x2d   : > { %708 = vmatprep.subr.bf16.mxu0 %v1096_v21 }
  0x2e   : > { %748 = vmatpush1.bf16.msra.mxu1 %v1131_v30 }
  0x2f   : > { %749 = vmatprep.subr.bf16.mxu1 %v1135_v31 }
  0x30   : > { %709 = vmatpush1.bf16.msra.mxu0 %v1098_v24 }
  0x31   : > { %710 = vmatprep.subr.bf16.mxu0 %v1102_v25 }
  0x32   : > { %750 = vmatpush1.bf16.msra.mxu1 %v1137_v35 }
  0x33   : > { %751 = vmatprep.subr.bf16.mxu1 %v1141_v37 }
  0x34   : > { %711 = vmatpush1.bf16.msra.mxu0 %v1104_v28 }
  0x35   : > { %712 = vmatprep.subr.bf16.mxu0 %v1108_v29 }
  0x36   : > { %752 = vmatpush1.bf16.msra.mxu1 %v1143_v40 }
  0x38   : > { %713 = vmatpush2.bf16.msra.mxu0 %v1110_v32 }
  0x39   : > { %714 = vmatprep.subr.bf16.mxu0 %v1114_v33  ;;  %770 = vmatmul.mubr.bf16.vlgmr.msra.gmra.mxu1 %v1147_v43 }
  0x3c   : > { %715 = vmatpush2.bf16.msra.mxu0 %v1116_v38 }
  0x3d   : > { %716 = vmatprep.subr.bf16.mxu0 %v1120_v39 }
  0x40   : > { %717 = vmatpush2.bf16.msra.mxu0 %v1122_v41 }
  0x41   : > { %718 = vmatprep.subr.bf16.mxu0 %v1126_v42 }
  0x44   : > { %719 = vmatpush2.bf16.msra.mxu0 %v1128_v44 }
  0x45   : > { %720 = vmatprep.subr.bf16.mxu0 %v1132_v45 }
  0x48   : > { %721 = vmatpush2.bf16.msra.mxu0 %v1134_v46 }
  0x49   : > { %722 = vmatprep.subr.bf16.mxu0 %v1138_v47 }
  0x4c   : > { %723 = vmatpush2.bf16.msra.mxu0 %v1140_v48 }
  0x4d   : > { %724 = vmatprep.subr.bf16.mxu0 %v1144_v49 }
  0x50   : > { %725 = vmatpush2.bf16.msra.mxu0 %v1146_v50 }
  0x51   : > { %726 = vmatprep.subr.bf16.mxu0 %v1148_v51 }
  0x54   : > { %727 = vmatpush2.bf16.msra.mxu0 %v1150_v52 }
  0x57   : > { %729 = vmatmul.mubr.bf16.vlgmr.msra.gmra.mxu0 %v993_v53 }
  0xf9   : > { %v771_v54 = vpop.f32.mrf.mxu1 }
  0xfb   : > { %v773_v55 = vpop.f32.mrf.mxu1 }
  0xfd   : > { %v775_v56 = vpop.f32.mrf.mxu1 }
  0xff   : > { %v776_v57 = vpop.f32.mrf.mxu1 }
 0x117   : > { %v730_v59 = vpop.f32.mrf.mxu0 }
 0x118   : > { %v772_v60 = vadd.f32 %v771_v54, %v730_v59 }
 0x119   : > { %v732_v62 = vpop.f32.mrf.mxu0 }
 0x11a   : > { %v778_v63 = vadd.f32 %v772_v60, %v393_v58  ;;  %v774_v0 = vadd.f32 %v773_v55, %v732_v62  ;;  %785 = sbr.rel (%p1044_p7) target bundleno = 306 (0x132), region = 48 }
 0x11b   : > { %v734_v1 = vpop.f32.mrf.mxu0 }
 0x11c   : > { %780 = vst [vmem:[#allocation2] sm:$0xff] %v778_v63  ;;  %v779_v2 = vadd.f32 %v774_v0, %v394_v61 }
 0x11d   : > { %v735_v3 = vpop.f32.mrf.mxu0 }
 0x11e   : > { %781 = vst [vmem:[#allocation2 + $0x8] sm:$0xff] %v779_v2 }
 0x11f   : > { %v790_v4 = vlaneseq  ;;  %v788_v6 = vld [vmem:[%s1316_s2] sm:$0x3] }
 0x120   : > { %v802_v7 = vld [vmem:[%s1317_s3] sm:$0x3] }
 0x121   : > { %v791_v5 = vshrl.u32 %v790_v4, 7  ;;  %v816_v12 = vld [vmem:[%s1318_s4] sm:$0xff] }
 0x122   : > { %v817_v19 = vunpack.c.l.bf16 %v816_v12  ;;  %v818_v20 = vunpack.c.h.bf16 %v816_v12 }
 0x123   : > { %v792_v8 = vsub.s32 0, %v791_v5  ;;  %v796_v9 = vsub.s32 1, %v791_v5  ;;  %v786_v10 = vld [vmem:[#allocation2] sm:$0xff] }
 0x125   : > { %v787_v11 = vld [vmem:[#allocation2 + $0x8] sm:$0xff]  ;;  %v793_v13 = vrot.slane %v788_v6, %v792_v8  ;;  %v797_v14 = vrot.slane %v788_v6, %v796_v9  ;;  %v807_v15 = vrot.slane %v802_v7, %v792_v8  ;;  %v811_v16 = vrot.slane %v802_v7, %v796_v9 }
 0x127   : > { %v800_v17 = vmul.f32 %v793_v13, %v786_v10  ;;  %v801_v18 = vmul.f32 %v797_v14, %v787_v11 }
 0x129   : > { %v814_v21 = vadd.f32 %v807_v15, %v800_v17  ;;  %v815_v22 = vadd.f32 %v811_v16, %v801_v18 }
 0x12b   : > { %v819_v23 = vadd.f32 %v817_v19, %v814_v21  ;;  %v820_v24 = vadd.f32 %v818_v20, %v815_v22 }
 0x12d   : > { %v821_v25 = vmax.f32 %v819_v23, 0.0  ;;  %v822_v26 = vmax.f32 %v820_v24, 0.0 }
 0x12f   : > { %v1051_v27 = vpack.c.bf16 %v822_v26, %v821_v25 }
 0x131   : > { %831 = vst [vmem:[%s1319_s5] sm:$0xff] %v1051_v27 }
 0x132 PF: > { %s15_s20 = sadd.s32 1, %s1175_s20   ;;  %s1320_s18 = smov %s1171_s19 }
 0x133   : > { %p12_p8 = scmp.ge.s32.totalorder %s15_s20, 8   ;;  %s1321_s19 = smov %s1323_s21 }
 0x135   :  { %14 = sbr.rel (!%p12_p8) target bundleno = 2 (0x2), region = 90 }

// kernel: resnet18_forward.39
= control target key start
LH: loop header
LB: loop body
LE: loop exit
PB: predicated region body
PF: predicated region fallthrough
CT: control target
= control target key end

     0   :  { %s1151_s15 = smov 0   ;;  %s1153_s16 = smov 0   ;;  %s1348_s0 = inlined_call_operand.vmem [shape: bf16[2,256], index: 0, kind: input, shape index: {}]   ;;  %s1349_s1 = inlined_call_operand.vmem [shape: bf16[256,512], index: 1, kind: input, shape index: {}]   ;;  %s1350_s2 = inlined_call_operand.vmem [shape: f32[1,512], index: 2, kind: input, shape index: {}]   ;;  %s1351_s3 = inlined_call_operand.vmem [shape: f32[1,512], index: 3, kind: input, shape index: {}]   ;;  %s1352_s4 = inlined_call_operand.vmem [shape: bf16[2,512], index: 4, kind: output, shape index: {}]  }
   0x1   :  { %s1155_s17 = smov 0   ;;  %s1157_s18 = smov 0  }
   0x2   :  { %s1159_s19 = smov 0  }
   0x3 LB: > { %s29_s20 = sadd.s32 1, %s1117_s18  ;;  %p77_p1 = scmp.ne.s32.totalorder %s1109_s16, %s1105_s15  ;;  %s1121_s19 = sphi %s1159_s19, %s14_s19   ;;  %s1117_s18 = sphi %s1157_s18, %s1356_s18   ;;  %s1113_s17 = sphi %s1155_s17, %s1355_s17   ;;  %s1109_s16 = sphi %s1153_s16, %s1354_s16   ;;  %s1105_s15 = sphi %s1151_s15, %s1353_s15  }
   0x4   : > { %p31_p0 = scmp.ge.s32.totalorder %s29_s20, 2  ;;  %p78_p2 = scmp.eq.s32.totalorder %s1121_s19, 0 }
   0x5   : > { %s70_s22 = sadd.s32 1, %s1109_s16  ;;  %p945_p5 = scmp.ge.s32.totalorder %s1121_s19, 2 }
   0x6   : > { %s1358_s20 = smov (%p31_p0, %s29_s20), 0  ;;  %p79_p3 = por %p78_p2, %p77_p1 }
   0x7   : > { %s66_s21 = ssub.s32 %s1117_s18, %s1358_s20  ;;  %195 = sbr.rel (%p945_p5) target bundleno = 32 (0x20), region = 20 }
   0x8   : > { %p68_p4 = scmp.eq.s32.totalorder %s66_s21, 0 }
   0xa   : > { %s1186_s23 = scalar_select %p68_p4, %s1109_s16, %s70_s22  }
   0xc   : > { %198 = sbr.rel (!%p79_p3) target bundleno = 32 (0x20), region = 24  ;;  %s200_s24 = sand.u32 (%p79_p3), 1, %s1109_s16  }
   0xd   : > { %s991_s25 = sshll.u32 (%p79_p3), %s1117_s18, 3  ;;  %s946_s26 = sshll.u32 (%p79_p3), %s200_s24, 8 }
   0xe   : > { %s1194_s29 = scalar_lea.vmem (%p79_p3), %s1349_s1, %s991_s25  ;;  %s1199_s30 = scalar_lea.vmem (%p79_p3), [#allocation3], %s946_s26 }
   0xf   : > { %v299_v0 = vld [vmem:[%s1194_s29] sm:$0xff] (%p79_p3)  ;;  %v301_v1 = vld [vmem:[%s1194_s29 + $0x10] sm:$0xff] (%p79_p3) }
  0x10   : > { %v303_v2 = vld [vmem:[%s1194_s29 + $0x20] sm:$0xff] (%p79_p3)  ;;  %300 = vst [vmem:[%s1199_s30] sm:$0xff] (%p79_p3), %v299_v0  ;;  %302 = vst [vmem:[%s1199_s30 + $0x8] sm:$0xff] (%p79_p3), %v301_v1  ;;  %v305_v3 = vld [vmem:[%s1194_s29 + $0x30] sm:$0xff] (%p79_p3) }
  0x11   : > { %304 = vst [vmem:[%s1199_s30 + $0x10] sm:$0xff] %v303_v2  ;;  %v307_v4 = vld [vmem:[%s1194_s29 + $0x40] sm:$0xff]  ;;  %v309_v5 = vld [vmem:[%s1194_s29 + $0x50] sm:$0xff]  ;;  %306 = vst [vmem:[%s1199_s30 + $0x18] sm:$0xff] %v305_v3 }
  0x12   : > { %308 = vst [vmem:[%s1199_s30 + $0x20] sm:$0xff] %v307_v4  ;;  %310 = vst [vmem:[%s1199_s30 + $0x28] sm:$0xff] %v309_v5  ;;  %v311_v6 = vld [vmem:[%s1194_s29 + $0x60] sm:$0xff]  ;;  %v313_v7 = vld [vmem:[%s1194_s29 + $0x70] sm:$0xff] }
  0x13   : > { %v315_v8 = vld [vmem:[%s1194_s29 + $0x80] sm:$0xff]  ;;  %312 = vst [vmem:[%s1199_s30 + $0x30] sm:$0xff] %v311_v6  ;;  %314 = vst [vmem:[%s1199_s30 + $0x38] sm:$0xff] %v313_v7  ;;  %v317_v9 = vld [vmem:[%s1194_s29 + $0x90] sm:$0xff] }
  0x14   : > { %316 = vst [vmem:[%s1199_s30 + $0x40] sm:$0xff] %v315_v8  ;;  %v319_v10 = vld [vmem:[%s1194_s29 + $0xa0] sm:$0xff]  ;;  %v321_v11 = vld [vmem:[%s1194_s29 + $0xb0] sm:$0xff]  ;;  %318 = vst [vmem:[%s1199_s30 + $0x48] sm:$0xff] %v317_v9 }
  0x15   : > { %320 = vst [vmem:[%s1199_s30 + $0x50] sm:$0xff] %v319_v10  ;;  %322 = vst [vmem:[%s1199_s30 + $0x58] sm:$0xff] %v321_v11  ;;  %v323_v12 = vld [vmem:[%s1194_s29 + $0xc0] sm:$0xff]  ;;  %v325_v13 = vld [vmem:[%s1194_s29 + $0xd0] sm:$0xff] }
  0x16   : > { %v327_v14 = vld [vmem:[%s1194_s29 + $0xe0] sm:$0xff]  ;;  %324 = vst [vmem:[%s1199_s30 + $0x60] sm:$0xff] %v323_v12  ;;  %326 = vst [vmem:[%s1199_s30 + $0x68] sm:$0xff] %v325_v13  ;;  %v329_v15 = vld [vmem:[%s1194_s29 + $0xf0] sm:$0xff] }
  0x17   : > { %328 = vst [vmem:[%s1199_s30 + $0x70] sm:$0xff] %v327_v14  ;;  %v331_v16 = vld [vmem:[%s1194_s29 + $0x100] sm:$0xff]  ;;  %v333_v17 = vld [vmem:[%s1194_s29 + $0x110] sm:$0xff]  ;;  %330 = vst [vmem:[%s1199_s30 + $0x78] sm:$0xff] %v329_v15 }
  0x18   : > { %332 = vst [vmem:[%s1199_s30 + $0x80] sm:$0xff] %v331_v16  ;;  %334 = vst [vmem:[%s1199_s30 + $0x88] sm:$0xff] %v333_v17  ;;  %v335_v18 = vld [vmem:[%s1194_s29 + $0x120] sm:$0xff]  ;;  %v337_v19 = vld [vmem:[%s1194_s29 + $0x130] sm:$0xff] }
  0x19   : > { %v339_v20 = vld [vmem:[%s1194_s29 + $0x140] sm:$0xff]  ;;  %336 = vst [vmem:[%s1199_s30 + $0x90] sm:$0xff] %v335_v18  ;;  %338 = vst [vmem:[%s1199_s30 + $0x98] sm:$0xff] %v337_v19  ;;  %v341_v21 = vld [vmem:[%s1194_s29 + $0x150] sm:$0xff] }
  0x1a   : > { %340 = vst [vmem:[%s1199_s30 + $0xa0] sm:$0xff] %v339_v20  ;;  %v343_v22 = vld [vmem:[%s1194_s29 + $0x160] sm:$0xff]  ;;  %v345_v23 = vld [vmem:[%s1194_s29 + $0x170] sm:$0xff]  ;;  %342 = vst [vmem:[%s1199_s30 + $0xa8] sm:$0xff] %v341_v21 }
  0x1b   : > { %344 = vst [vmem:[%s1199_s30 + $0xb0] sm:$0xff] %v343_v22  ;;  %346 = vst [vmem:[%s1199_s30 + $0xb8] sm:$0xff] %v345_v23  ;;  %v347_v24 = vld [vmem:[%s1194_s29 + $0x180] sm:$0xff]  ;;  %v349_v25 = vld [vmem:[%s1194_s29 + $0x190] sm:$0xff] }
  0x1c   : > { %v351_v26 = vld [vmem:[%s1194_s29 + $0x1a0] sm:$0xff]  ;;  %348 = vst [vmem:[%s1199_s30 + $0xc0] sm:$0xff] %v347_v24  ;;  %350 = vst [vmem:[%s1199_s30 + $0xc8] sm:$0xff] %v349_v25  ;;  %v353_v27 = vld [vmem:[%s1194_s29 + $0x1b0] sm:$0xff] }
  0x1d   : > { %352 = vst [vmem:[%s1199_s30 + $0xd0] sm:$0xff] %v351_v26  ;;  %v355_v28 = vld [vmem:[%s1194_s29 + $0x1c0] sm:$0xff]  ;;  %v357_v29 = vld [vmem:[%s1194_s29 + $0x1d0] sm:$0xff]  ;;  %354 = vst [vmem:[%s1199_s30 + $0xd8] sm:$0xff] %v353_v27 }
  0x1e   : > { %356 = vst [vmem:[%s1199_s30 + $0xe0] sm:$0xff] %v355_v28  ;;  %358 = vst [vmem:[%s1199_s30 + $0xe8] sm:$0xff] %v357_v29  ;;  %v359_v30 = vld [vmem:[%s1194_s29 + $0x1e0] sm:$0xff]  ;;  %v361_v31 = vld [vmem:[%s1194_s29 + $0x1f0] sm:$0xff] }
  0x1f   : > { %360 = vst [vmem:[%s1199_s30 + $0xf0] sm:$0xff] %v359_v30  ;;  %362 = vst [vmem:[%s1199_s30 + $0xf8] sm:$0xff] %v361_v31 }
  0x20 PF: > { %p949_p6 = scmp.ge.s32.totalorder %s1121_s19, 1  ;;  %p383_p7 = scmp.lt.s32.totalorder %s1121_s19, 3 }
  0x22   : > { %p384_p8 = pnand %p949_p6, %p383_p7 }
  0x23   : > { %s390_s5 = sand.u32 (!%p384_p8), 1, %s1105_s15   ;;  %s951_s10 = sshll.u32 (!%p384_p8), %s1113_s17, 1 }
  0x24   : > { %387 = sbr.rel (%p384_p8) target bundleno = 329 (0x149), region = 70  ;;  %s950_s8 = sshll.u32 (!%p384_p8), %s390_s5, 8 }
  0x25   : > { %s1272_s9 = scalar_lea.vmem (!%p384_p8), [#allocation3], %s950_s8  ;;  %p446_p9 = scmp.lt.s32.totalorder (!%p384_p8), %s951_s10, 3 }
  0x29   : > { %v1268_v32 = vld.sshfl [vmem:[%s1348_s0] sm:$0x11 pattern:$0x75316420]  ;;  %v515_v33 = vlaneseq  ;;  %v1123_v34 = vmov 1966171168  }
  0x2a   : > { %v513_v35 = vunpack.c.l.s4 %v1123_v34  ;;  %v1035_v37 = vld [vmem:[%s1272_s9 + $0x74] ss:$8 sps:$4 sm:$0xff]   ;;  %v1037_v38 = vld [vmem:[%s1272_s9 + $0x70] ss:$8 sps:$4 sm:$0xff]   ;;  %v511_v39 = vcombine.high %v1268_v32, %v1268_v32  ;;  %v1038_v41 = vld [vmem:[%s1272_s9 + $0x64] ss:$8 sps:$4 sm:$0xff]  }
  0x2b   : > { %v1270_v36 = vshrl.u32 %v515_v33, 7  ;;  %688 = vmatprep.subr.bf16.mxu0 %v1035_v37  ;;  %v1040_v42 = vld [vmem:[%s1272_s9 + $0x60] ss:$8 sps:$4 sm:$0xff]   ;;  %v1041_v44 = vld [vmem:[%s1272_s9 + $0x54] ss:$8 sps:$4 sm:$0xff]   ;;  %v1124_v10 = vmov 0.0  }
  0x2c   : > { %v514_v40 = vunpack.c.0.s8 %v513_v35  ;;  %689 = vmatpush1.bf16.msra.mxu0 %v1037_v38  ;;  %v1043_v46 = vld [vmem:[%s1272_s9 + $0x50] ss:$8 sps:$4 sm:$0xff]   ;;  %v1044_v47 = vld [vmem:[%s1272_s9 + $0x44] ss:$8 sps:$4 sm:$0xff]   ;;  %v1046_v48 = vld [vmem:[%s1272_s9 + $0x40] ss:$8 sps:$4 sm:$0xff]  }
  0x2d   : > { %690 = vmatprep.subr.bf16.mxu0 %v1038_v41  ;;  %v1047_v49 = vld [vmem:[%s1272_s9 + $0x34] ss:$8 sps:$4 sm:$0xff]   ;;  %v1049_v50 = vld [vmem:[%s1272_s9 + $0x30] ss:$8 sps:$4 sm:$0xff]   ;;  %v1050_v51 = vld [vmem:[%s1272_s9 + $0x24] ss:$8 sps:$4 sm:$0xff]  }
  0x2e   : > { %v1281_v43 = vsub.s32 %v514_v40, %v1270_v36  ;;  %v1052_v52 = vld [vmem:[%s1272_s9 + $0x20] ss:$8 sps:$4 sm:$0xff]   ;;  %v1053_v53 = vld [vmem:[%s1272_s9 + $0x14] ss:$8 sps:$4 sm:$0xff]   ;;  %v1055_v54 = vld [vmem:[%s1272_s9 + $0x10] ss:$8 sps:$4 sm:$0xff]  }
  0x2f   : > { %v1056_v55 = vld [vmem:[%s1272_s9 + $0x4] ss:$8 sps:$4 sm:$0xff]   ;;  %v1058_v56 = vld [vmem:[%s1272_s9] ss:$8 sps:$4 sm:$0xff]   ;;  %v1059_v57 = vld [vmem:[%s1272_s9 + $0xf4] ss:$8 sps:$4 sm:$0xff]  }
  0x30   : > { %v525_v45 = vrot.slane %v511_v39, %v1281_v43  ;;  %691 = vmatpush1.bf16.msra.mxu0 %v1040_v42  ;;  %v1061_v58 = vld [vmem:[%s1272_s9 + $0xf0] ss:$8 sps:$4 sm:$0xff]   ;;  %v1062_v59 = vld [vmem:[%s1272_s9 + $0xe4] ss:$8 sps:$4 sm:$0xff]   ;;  %v1064_v60 = vld [vmem:[%s1272_s9 + $0xe0] ss:$8 sps:$4 sm:$0xff]   ;;  %v518_v9 = vrot.slane %v1268_v32, %v1281_v43 }
  0x31   : > { %692 = vmatprep.subr.bf16.mxu0 %v1041_v44  ;;  %v1065_v61 = vld [vmem:[%s1272_s9 + $0xd4] ss:$8 sps:$4 sm:$0xff]   ;;  %v1067_v62 = vld [vmem:[%s1272_s9 + $0xd0] ss:$8 sps:$4 sm:$0xff]   ;;  %v1068_v63 = vld [vmem:[%s1272_s9 + $0xc4] ss:$8 sps:$4 sm:$0xff]  }
  0x32   : > { %720 = vmatprep.mubr.bf16.mxu0 %v525_v45  ;;  %v1070_v0 = vld [vmem:[%s1272_s9 + $0xc0] ss:$8 sps:$4 sm:$0xff]   ;;  %v1071_v1 = vld [vmem:[%s1272_s9 + $0xb4] ss:$8 sps:$4 sm:$0xff]   ;;  %v1073_v2 = vld [vmem:[%s1272_s9 + $0xb0] ss:$8 sps:$4 sm:$0xff]  }
  0x33   : > { %v1074_v3 = vld [vmem:[%s1272_s9 + $0xa4] ss:$8 sps:$4 sm:$0xff]   ;;  %v1076_v4 = vld [vmem:[%s1272_s9 + $0xa0] ss:$8 sps:$4 sm:$0xff]   ;;  %v1077_v5 = vld [vmem:[%s1272_s9 + $0x94] ss:$8 sps:$4 sm:$0xff]  }
  0x34   : > { %693 = vmatpush1.bf16.msra.mxu0 %v1043_v46  ;;  %v1079_v6 = vld [vmem:[%s1272_s9 + $0x90] ss:$8 sps:$4 sm:$0xff]   ;;  %v1080_v7 = vld [vmem:[%s1272_s9 + $0x84] ss:$8 sps:$4 sm:$0xff]   ;;  %v1082_v8 = vld [vmem:[%s1272_s9 + $0x80] ss:$8 sps:$4 sm:$0xff]  }
  0x35   : > { %694 = vmatprep.subr.bf16.mxu0 %v1044_v47  ;;  %468 = vst [vmem:[#allocation2] sm:$0xf] %v1124_v10  ;;  %v1125_v11 = vmov 1983009808   ;;  %s1360_s10 = smov (!%p446_p9, %s951_s10), 3  ;;  %v750_v15 = vsub.s32 0, %v1270_v36 }
  0x36   : > { %v733_v12 = vunpack.c.l.s4 %v1125_v11  ;;  %s448_s13 = scalar_lea.vmem %s1350_s2, %s1360_s10  ;;  %v754_v16 = vsub.s32 1, %v1270_v36  ;;  %s453_s17 = scalar_lea.vmem %s1351_s3, %s1360_s10 }
  0x37   : > { %v746_v19 = vld [vmem:[%s448_s13] sm:$0x3]  ;;  %s462_s24 = scalar_lea.vmem %s1352_s4, %s1360_s10 }
  0x38   : > { %695 = vmatpush1.bf16.msra.mxu0 %v1046_v48  ;;  %v734_v13 = vunpack.c.0.s8 %v733_v12  ;;  %v766_v22 = vld [vmem:[%s453_s17] sm:$0x3]  ;;  %v751_v25 = vrot.slane %v746_v19, %v750_v15  ;;  %v755_v26 = vrot.slane %v746_v19, %v754_v16 }
  0x39   : > { %696 = vmatprep.subr.bf16.mxu0 %v1047_v49  ;;  %v771_v29 = vrot.slane %v766_v22, %v750_v15  ;;  %v775_v30 = vrot.slane %v766_v22, %v754_v16 }
  0x3a   : > { %v737_v17 = vsub.s32 %v734_v13, %v1270_v36  ;;  %v756_v31 = vcombine.low %v751_v25, %v755_v26 }
  0x3b   : > { %v776_v32 = vcombine.low %v771_v29, %v775_v30 }
  0x3c   : > { %697 = vmatpush1.bf16.msra.mxu0 %v1049_v50  ;;  %v469_v21 = vld [vmem:[#allocation2] sm:$0xf]  ;;  %v763_v33 = vrot.slane %v756_v31, %v737_v17 }
  0x3d   : > { %698 = vmatprep.subr.bf16.mxu0 %v1050_v51  ;;  %v783_v34 = vrot.slane %v776_v32, %v737_v17 }
  0x40   : > { %699 = vmatpush1.bf16.msra.mxu0 %v1052_v52 }
  0x41   : > { %700 = vmatprep.subr.bf16.mxu0 %v1053_v53 }
  0x44   : > { %701 = vmatpush1.bf16.msra.mxu0 %v1055_v54 }
  0x45   : > { %702 = vmatprep.subr.bf16.mxu0 %v1056_v55 }
  0x48   : > { %703 = vmatpush1.bf16.msra.mxu0 %v1058_v56 }
  0x49   : > { %704 = vmatprep.subr.bf16.mxu0 %v1059_v57 }
  0x4c   : > { %705 = vmatpush2.bf16.msra.mxu0 %v1061_v58 }
  0x4d   : > { %706 = vmatprep.subr.bf16.mxu0 %v1062_v59 }
  0x50   : > { %707 = vmatpush2.bf16.msra.mxu0 %v1064_v60 }
  0x51   : > { %708 = vmatprep.subr.bf16.mxu0 %v1065_v61 }
  0x54   : > { %709 = vmatpush2.bf16.msra.mxu0 %v1067_v62 }
  0x55   : > { %710 = vmatprep.subr.bf16.mxu0 %v1068_v63 }
  0x58   : > { %711 = vmatpush2.bf16.msra.mxu0 %v1070_v0 }
  0x59   : > { %712 = vmatprep.subr.bf16.mxu0 %v1071_v1 }
  0x5c   : > { %713 = vmatpush2.bf16.msra.mxu0 %v1073_v2 }
  0x5d   : > { %714 = vmatprep.subr.bf16.mxu0 %v1074_v3 }
  0x60   : > { %715 = vmatpush2.bf16.msra.mxu0 %v1076_v4 }
  0x61   : > { %716 = vmatprep.subr.bf16.mxu0 %v1077_v5 }
  0x64   : > { %717 = vmatpush2.bf16.msra.mxu0 %v1079_v6 }
  0x65   : > { %718 = vmatprep.subr.bf16.mxu0 %v1080_v7 }
  0x68   : > { %719 = vmatpush2.bf16.msra.mxu0 %v1082_v8 }
  0x6b   : > { %721 = vmatmul.mubr.bf16.vlgmr.msra.gmra.mxu0 %v518_v9 }
 0x12b   : > { %v722_v14 = vpop.f32.mrf.mxu0 }
 0x12d   : > { %v724_v18 = vpop.f32.mrf.mxu0 }
 0x12e   : > { %v731_v20 = vcombine.low %v722_v14, %v724_v18 }
 0x12f   : > { %v726_v23 = vpop.f32.mrf.mxu0 }
 0x130   : > { %v738_v24 = vrot.slane %v731_v20, %v737_v17 }
 0x131   : > { %v727_v27 = vpop.f32.mrf.mxu0 }
 0x132   : > { %v740_v28 = vadd.f32 %v738_v24, %v469_v21 }
 0x134   : > { %741 = vst [vmem:[#allocation2] sm:$0xf] %v740_v28 }
 0x13b   : > { %v745_v35 = vld [vmem:[#allocation2] sm:$0xf] }
 0x13c   : > { %v765_v36 = vmul.f32 %v763_v33, %v745_v35 }
 0x13e   : > { %v785_v37 = vadd.f32 %v783_v34, %v765_v36 }
 0x140   : > { %v793_v38 = vrot.slane %v785_v37, %v737_v17 }
 0x142   : > { %v794_v39 = vcombine.high %v793_v38, %v793_v38 }
 0x144   : > { %v987_v40 = vpack.c.bf16 %v794_v39, %v793_v38 }
 0x146   : > { %v808_v41 = vrot.slane %v987_v40, %v1281_v43 }
 0x148   : > { %988 = vst.sshfl [vmem:[%s462_s24] sm:$0x5 pattern:$0x73625140] %v808_v41 }
 0x149 PF: > { %s14_s19 = sadd.s32 1, %s1121_s19   ;;  %s1353_s15 = smov %s1109_s16 }
 0x14a   : > { %p11_p10 = scmp.ge.s32.totalorder %s14_s19, 4   ;;  %s1354_s16 = smov %s1186_s23 }
 0x14b   : > { %s1355_s17 = smov %s1117_s18  ;;  %s1356_s18 = smov %s1358_s20 }
 0x14c   :  { %13 = sbr.rel (!%p11_p10) target bundleno = 3 (0x3), region = 126 }

// kernel: resnet18_forward.40
= control target key start
LH: loop header
LB: loop body
LE: loop exit
PB: predicated region body
PF: predicated region fallthrough
CT: control target
= control target key end

     0   :  { %s1433_s15 = smov 0   ;;  %s1435_s16 = smov 0   ;;  %s1722_s0 = inlined_call_operand.vmem [shape: bf16[2,2304], index: 0, kind: input, shape index: {}]   ;;  %s1723_s1 = inlined_call_operand.vmem [shape: bf16[2304,512], index: 1, kind: input, shape index: {}]   ;;  %s1724_s2 = inlined_call_operand.vmem [shape: f32[1,512], index: 2, kind: input, shape index: {}]   ;;  %s1725_s3 = inlined_call_operand.vmem [shape: f32[1,512], index: 3, kind: input, shape index: {}]   ;;  %s1726_s4 = inlined_call_operand.vmem [shape: bf16[2,512], index: 4, kind: output, shape index: {}]  }
   0x1   :  { %s1437_s17 = smov 0   ;;  %s1439_s18 = smov 0  }
   0x2   :  { %s1441_s19 = smov 0   ;;  %s1443_s20 = smov 0  }
   0x3   :  { %s1445_s21 = smov 0  }
   0x4 LB: > { %s26_s22 = sadd.s32 1, %s1394_s19  ;;  %s29_s23 = sadd.s32 1, %s1398_s20  ;;  %s1402_s21 = sphi %s1445_s21, %s14_s21   ;;  %s1398_s20 = sphi %s1443_s20, %s1732_s20   ;;  %s1394_s19 = sphi %s1441_s19, %s1731_s19   ;;  %s1390_s18 = sphi %s1439_s18, %s1730_s18   ;;  %s1386_s17 = sphi %s1437_s17, %s1729_s17   ;;  %s1382_s16 = sphi %s1435_s16, %s1728_s16   ;;  %s1378_s15 = sphi %s1433_s15, %s1727_s15  }
   0x5   : > { %p27_p0 = scmp.ge.s32.totalorder %s26_s22, 6  ;;  %p77_p1 = scmp.ne.s32.totalorder %s1382_s16, %s1378_s15 }
   0x6   : > { %p78_p2 = scmp.eq.s32.totalorder %s1402_s21, 0  ;;  %s70_s27 = sadd.s32 1, %s1382_s16 }
   0x7   : > { %s1734_s22 = smov (%p27_p0, %s26_s22), 0  ;;  %s1736_s23 = smov (!%p27_p0, %s29_s23), %s1398_s20 }
   0x8   : > { %p79_p3 = por %p78_p2, %p77_p1  ;;  %p31_p4 = scmp.ge.s32.totalorder %s1736_s23, 2 }
   0x9   : > { %s65_s24 = ssub.s32 %s1394_s19, %s1734_s22  ;;  %p1150_p6 = scmp.ge.s32.totalorder %s1402_s21, 12 }
   0xa   : > { %s1738_s23 = smov (%p31_p4, %s1736_s23), 0 }
   0xb   : > { %s66_s25 = ssub.s32 %s1398_s20, %s1738_s23  ;;  %183 = sbr.rel (%p1150_p6) target bundleno = 48 (0x30), region = 16 }
   0xc   : > { %s67_s26 = sor.u32 %s66_s25, %s65_s24 }
   0xd   : > { %p68_p5 = scmp.eq.s32.totalorder %s67_s26, 0 }
   0xf   : > { %s1484_s28 = scalar_select %p68_p5, %s1382_s16, %s70_s27  }
  0x10   : > { %198 = sbr.rel (!%p79_p3) target bundleno = 48 (0x30), region = 24  ;;  %s200_s29 = sand.u32 (%p79_p3), 1, %s1382_s16  }
  0x11   : > { %s1214_s30 = smul.u32 (%p79_p3), 384, %s200_s29  ;;  %s1151_s5 = sshll.u32 (%p79_p3), %s1398_s20, 1 }
  0x12   : > { %s1213_s6 = smul.u32 (%p79_p3), 192, %s1394_s19 }
  0x13   : > { %s1498_s12 = scalar_lea.vmem (%p79_p3), [#allocation3], %s1214_s30 }
  0x14   : > { %s206_s7 = sadd.s32 (%p79_p3), %s1213_s6, %s1151_s5 }
  0x15   : > { %s1153_s8 = sshll.u32 %s206_s7, 2 }
  0x16   : > { %s1493_s11 = scalar_lea.vmem %s1723_s1, %s1153_s8 }
  0x17   : > { %v331_v0 = vld [vmem:[%s1493_s11] sm:$0xff]  ;;  %v333_v1 = vld [vmem:[%s1493_s11 + $0x10] sm:$0xff] }
  0x18   : > { %v335_v2 = vld [vmem:[%s1493_s11 + $0x20] sm:$0xff]  ;;  %332 = vst [vmem:[%s1498_s12] sm:$0xff] %v331_v0  ;;  %334 = vst [vmem:[%s1498_s12 + $0x8] sm:$0xff] %v333_v1  ;;  %v337_v3 = vld [vmem:[%s1493_s11 + $0x30] sm:$0xff] }
  0x19   : > { %336 = vst [vmem:[%s1498_s12 + $0x10] sm:$0xff] %v335_v2  ;;  %v339_v4 = vld [vmem:[%s1493_s11 + $0x40] sm:$0xff]  ;;  %v341_v5 = vld [vmem:[%s1493_s11 + $0x50] sm:$0xff]  ;;  %338 = vst [vmem:[%s1498_s12 + $0x18] sm:$0xff] %v337_v3 }
  0x1a   : > { %340 = vst [vmem:[%s1498_s12 + $0x20] sm:$0xff] %v339_v4  ;;  %342 = vst [vmem:[%s1498_s12 + $0x28] sm:$0xff] %v341_v5  ;;  %v343_v6 = vld [vmem:[%s1493_s11 + $0x60] sm:$0xff]  ;;  %v345_v7 = vld [vmem:[%s1493_s11 + $0x70] sm:$0xff] }
  0x1b   : > { %v347_v8 = vld [vmem:[%s1493_s11 + $0x80] sm:$0xff]  ;;  %344 = vst [vmem:[%s1498_s12 + $0x30] sm:$0xff] %v343_v6  ;;  %346 = vst [vmem:[%s1498_s12 + $0x38] sm:$0xff] %v345_v7  ;;  %v349_v9 = vld [vmem:[%s1493_s11 + $0x90] sm:$0xff] }
  0x1c   : > { %348 = vst [vmem:[%s1498_s12 + $0x40] sm:$0xff] %v347_v8  ;;  %v351_v10 = vld [vmem:[%s1493_s11 + $0xa0] sm:$0xff]  ;;  %v353_v11 = vld [vmem:[%s1493_s11 + $0xb0] sm:$0xff]  ;;  %350 = vst [vmem:[%s1498_s12 + $0x48] sm:$0xff] %v349_v9 }
  0x1d   : > { %352 = vst [vmem:[%s1498_s12 + $0x50] sm:$0xff] %v351_v10  ;;  %354 = vst [vmem:[%s1498_s12 + $0x58] sm:$0xff] %v353_v11  ;;  %v355_v12 = vld [vmem:[%s1493_s11 + $0xc0] sm:$0xff]  ;;  %v357_v13 = vld [vmem:[%s1493_s11 + $0xd0] sm:$0xff] }
  0x1e   : > { %v359_v14 = vld [vmem:[%s1493_s11 + $0xe0] sm:$0xff]  ;;  %356 = vst [vmem:[%s1498_s12 + $0x60] sm:$0xff] %v355_v12  ;;  %358 = vst [vmem:[%s1498_s12 + $0x68] sm:$0xff] %v357_v13  ;;  %v361_v15 = vld [vmem:[%s1493_s11 + $0xf0] sm:$0xff] }
  0x1f   : > { %360 = vst [vmem:[%s1498_s12 + $0x70] sm:$0xff] %v359_v14  ;;  %v363_v16 = vld [vmem:[%s1493_s11 + $0x100] sm:$0xff]  ;;  %v365_v17 = vld [vmem:[%s1493_s11 + $0x110] sm:$0xff]  ;;  %362 = vst [vmem:[%s1498_s12 + $0x78] sm:$0xff] %v361_v15 }
  0x20   : > { %364 = vst [vmem:[%s1498_s12 + $0x80] sm:$0xff] %v363_v16  ;;  %366 = vst [vmem:[%s1498_s12 + $0x88] sm:$0xff] %v365_v17  ;;  %v367_v18 = vld [vmem:[%s1493_s11 + $0x120] sm:$0xff]  ;;  %v369_v19 = vld [vmem:[%s1493_s11 + $0x130] sm:$0xff] }
  0x21   : > { %v371_v20 = vld [vmem:[%s1493_s11 + $0x140] sm:$0xff]  ;;  %368 = vst [vmem:[%s1498_s12 + $0x90] sm:$0xff] %v367_v18  ;;  %370 = vst [vmem:[%s1498_s12 + $0x98] sm:$0xff] %v369_v19  ;;  %v373_v21 = vld [vmem:[%s1493_s11 + $0x150] sm:$0xff] }
  0x22   : > { %372 = vst [vmem:[%s1498_s12 + $0xa0] sm:$0xff] %v371_v20  ;;  %v375_v22 = vld [vmem:[%s1493_s11 + $0x160] sm:$0xff]  ;;  %v377_v23 = vld [vmem:[%s1493_s11 + $0x170] sm:$0xff]  ;;  %374 = vst [vmem:[%s1498_s12 + $0xa8] sm:$0xff] %v373_v21 }
  0x23   : > { %376 = vst [vmem:[%s1498_s12 + $0xb0] sm:$0xff] %v375_v22  ;;  %378 = vst [vmem:[%s1498_s12 + $0xb8] sm:$0xff] %v377_v23  ;;  %v379_v24 = vld [vmem:[%s1493_s11 + $0x180] sm:$0xff]  ;;  %v381_v25 = vld [vmem:[%s1493_s11 + $0x190] sm:$0xff] }
  0x24   : > { %v383_v26 = vld [vmem:[%s1493_s11 + $0x1a0] sm:$0xff]  ;;  %380 = vst [vmem:[%s1498_s12 + $0xc0] sm:$0xff] %v379_v24  ;;  %382 = vst [vmem:[%s1498_s12 + $0xc8] sm:$0xff] %v381_v25  ;;  %v385_v27 = vld [vmem:[%s1493_s11 + $0x1b0] sm:$0xff] }
  0x25   : > { %384 = vst [vmem:[%s1498_s12 + $0xd0] sm:$0xff] %v383_v26  ;;  %v387_v28 = vld [vmem:[%s1493_s11 + $0x1c0] sm:$0xff]  ;;  %v389_v29 = vld [vmem:[%s1493_s11 + $0x1d0] sm:$0xff]  ;;  %386 = vst [vmem:[%s1498_s12 + $0xd8] sm:$0xff] %v385_v27 }
  0x26   : > { %388 = vst [vmem:[%s1498_s12 + $0xe0] sm:$0xff] %v387_v28  ;;  %390 = vst [vmem:[%s1498_s12 + $0xe8] sm:$0xff] %v389_v29  ;;  %v391_v30 = vld [vmem:[%s1493_s11 + $0x1e0] sm:$0xff]  ;;  %v393_v31 = vld [vmem:[%s1493_s11 + $0x1f0] sm:$0xff] }
  0x27   : > { %v395_v32 = vld [vmem:[%s1493_s11 + $0x200] sm:$0xff]  ;;  %392 = vst [vmem:[%s1498_s12 + $0xf0] sm:$0xff] %v391_v30  ;;  %394 = vst [vmem:[%s1498_s12 + $0xf8] sm:$0xff] %v393_v31  ;;  %v397_v33 = vld [vmem:[%s1493_s11 + $0x210] sm:$0xff] }
  0x28   : > { %396 = vst [vmem:[%s1498_s12 + $0x100] sm:$0xff] %v395_v32  ;;  %v399_v34 = vld [vmem:[%s1493_s11 + $0x220] sm:$0xff]  ;;  %v401_v35 = vld [vmem:[%s1493_s11 + $0x230] sm:$0xff]  ;;  %398 = vst [vmem:[%s1498_s12 + $0x108] sm:$0xff] %v397_v33 }
  0x29   : > { %400 = vst [vmem:[%s1498_s12 + $0x110] sm:$0xff] %v399_v34  ;;  %402 = vst [vmem:[%s1498_s12 + $0x118] sm:$0xff] %v401_v35  ;;  %v403_v36 = vld [vmem:[%s1493_s11 + $0x240] sm:$0xff]  ;;  %v405_v37 = vld [vmem:[%s1493_s11 + $0x250] sm:$0xff] }
  0x2a   : > { %v407_v38 = vld [vmem:[%s1493_s11 + $0x260] sm:$0xff]  ;;  %404 = vst [vmem:[%s1498_s12 + $0x120] sm:$0xff] %v403_v36  ;;  %406 = vst [vmem:[%s1498_s12 + $0x128] sm:$0xff] %v405_v37  ;;  %v409_v39 = vld [vmem:[%s1493_s11 + $0x270] sm:$0xff] }
  0x2b   : > { %408 = vst [vmem:[%s1498_s12 + $0x130] sm:$0xff] %v407_v38  ;;  %v411_v40 = vld [vmem:[%s1493_s11 + $0x280] sm:$0xff]  ;;  %v413_v41 = vld [vmem:[%s1493_s11 + $0x290] sm:$0xff]  ;;  %410 = vst [vmem:[%s1498_s12 + $0x138] sm:$0xff] %v409_v39 }
  0x2c   : > { %412 = vst [vmem:[%s1498_s12 + $0x140] sm:$0xff] %v411_v40  ;;  %414 = vst [vmem:[%s1498_s12 + $0x148] sm:$0xff] %v413_v41  ;;  %v415_v42 = vld [vmem:[%s1493_s11 + $0x2a0] sm:$0xff]  ;;  %v417_v43 = vld [vmem:[%s1493_s11 + $0x2b0] sm:$0xff] }
  0x2d   : > { %v419_v44 = vld [vmem:[%s1493_s11 + $0x2c0] sm:$0xff]  ;;  %416 = vst [vmem:[%s1498_s12 + $0x150] sm:$0xff] %v415_v42  ;;  %418 = vst [vmem:[%s1498_s12 + $0x158] sm:$0xff] %v417_v43  ;;  %v421_v45 = vld [vmem:[%s1493_s11 + $0x2d0] sm:$0xff] }
  0x2e   : > { %420 = vst [vmem:[%s1498_s12 + $0x160] sm:$0xff] %v419_v44  ;;  %v423_v46 = vld [vmem:[%s1493_s11 + $0x2e0] sm:$0xff]  ;;  %v425_v47 = vld [vmem:[%s1493_s11 + $0x2f0] sm:$0xff]  ;;  %422 = vst [vmem:[%s1498_s12 + $0x168] sm:$0xff] %v421_v45 }
  0x2f   : > { %424 = vst [vmem:[%s1498_s12 + $0x170] sm:$0xff] %v423_v46  ;;  %426 = vst [vmem:[%s1498_s12 + $0x178] sm:$0xff] %v425_v47 }
  0x30 PF: > { %p1154_p7 = scmp.ge.s32.totalorder %s1402_s21, 1  ;;  %p447_p8 = scmp.lt.s32.totalorder %s1402_s21, 13 }
  0x32   : > { %p448_p9 = pnand %p1154_p7, %p447_p8 }
  0x33   : > { %s454_s13 = sand.u32 (!%p448_p9), 1, %s1378_s15   ;;  %s498_s14 = smul.u32 (!%p448_p9), 3, %s1386_s17 }
  0x34   : > { %451 = sbr.rel (%p448_p9) target bundleno = 359 (0x167), region = 70  ;;  %s1155_s25 = sshll.u32 (!%p448_p9), %s1390_s18, 1 }
  0x35   : > { %s1215_s24 = smul.u32 (!%p448_p9), 384, %s454_s13  ;;  %p501_p10 = scmp.lt.s32.totalorder (!%p448_p9), %s498_s14, 17 }
  0x36   : > { %p510_p11 = scmp.lt.s32.totalorder (!%p448_p9), %s1155_s25, 3  ;;  %p1158_p12 = scmp.ne.s32.totalorder (!%p448_p9), %s1386_s17, 0 }
  0x37   : > { %s1618_s11 = scalar_lea.vmem (!%p448_p9), [#allocation3], %s1215_s24 }
  0x39   : > { %s1740_s14 = smov (!%p501_p10, %s498_s14), 17  ;;  %s1742_s25 = smov (!%p510_p11, %s1155_s25), 3 }
  0x3a   : > { %s505_s29 = scalar_lea.vmem %s1722_s0, %s1740_s14  ;;  %s512_s15 = scalar_lea.vmem %s1724_s2, %s1742_s25 }
  0x3b   : > { %s517_s7 = scalar_lea.vmem %s1725_s3, %s1742_s25  ;;  %s526_s10 = scalar_lea.vmem %s1726_s4, %s1742_s25 }
  0x3c   : > { %532 = sbr.rel (%p1158_p12) target bundleno = 67 (0x43), region = 78 }
  0x41   : > { %v1404_v48 = vmov 0.0  }
  0x42   : > { %533 = vst [vmem:[#allocation2] sm:$0xf] %v1404_v48 }
  0x43 PF: > { %v1276_v49 = vld [vmem:[%s1618_s11 + $0x74] ss:$8 sps:$4 sm:$0xff]   ;;  %v1278_v50 = vld [vmem:[%s1618_s11 + $0x70] ss:$8 sps:$4 sm:$0xff]   ;;  %v1405_v51 = vmov 0   ;;  %v596_v12 = vlaneseq  ;;  %p1208_p13 = scmp.ne.s32.totalorder %s1386_s17, 5 }
  0x44   : > { %924 = vmatprep.mubr.bf16.mxu1 %v1405_v51  ;;  %851 = vmatprep.subr.bf16.mxu0 %v1276_v49  ;;  %v1279_v52 = vld [vmem:[%s1618_s11 + $0x64] ss:$8 sps:$4 sm:$0xff]   ;;  %v1281_v53 = vld [vmem:[%s1618_s11 + $0x60] ss:$8 sps:$4 sm:$0xff]   ;;  %v1282_v54 = vld [vmem:[%s1618_s11 + $0x54] ss:$8 sps:$4 sm:$0xff]  }
  0x45   : > { %852 = vmatpush1.bf16.msra.mxu0 %v1278_v50  ;;  %v1284_v55 = vld [vmem:[%s1618_s11 + $0x50] ss:$8 sps:$4 sm:$0xff]   ;;  %v1285_v56 = vld [vmem:[%s1618_s11 + $0x44] ss:$8 sps:$4 sm:$0xff]   ;;  %v1297_v57 = vld [vmem:[%s1618_s11 + $0x174] ss:$8 sps:$4 sm:$0xff]  }
  0x46   : > { %853 = vmatprep.subr.bf16.mxu0 %v1279_v52  ;;  %v1299_v58 = vld [vmem:[%s1618_s11 + $0x170] ss:$8 sps:$4 sm:$0xff]   ;;  %v1287_v59 = vld [vmem:[%s1618_s11 + $0x40] ss:$8 sps:$4 sm:$0xff]   ;;  %v1288_v60 = vld [vmem:[%s1618_s11 + $0x34] ss:$8 sps:$4 sm:$0xff]   ;;  %892 = vmatprep.subr.bf16.mxu1 %v1297_v57 }
  0x47   : > { %v1303_v61 = vld [vmem:[%s1618_s11 + $0x164] ss:$8 sps:$4 sm:$0xff]   ;;  %893 = vmatpush1.bf16.msra.mxu1 %v1299_v58  ;;  %v1305_v62 = vld [vmem:[%s1618_s11 + $0x160] ss:$8 sps:$4 sm:$0xff]   ;;  %v1290_v63 = vld [vmem:[%s1618_s11 + $0x30] ss:$8 sps:$4 sm:$0xff]  }
  0x48   : > { %894 = vmatprep.subr.bf16.mxu1 %v1303_v61  ;;  %v1309_v0 = vld [vmem:[%s1618_s11 + $0x154] ss:$8 sps:$4 sm:$0xff]   ;;  %v1291_v1 = vld [vmem:[%s1618_s11 + $0x24] ss:$8 sps:$4 sm:$0xff]   ;;  %v1311_v2 = vld [vmem:[%s1618_s11 + $0x150] ss:$8 sps:$4 sm:$0xff]  }
  0x49   : > { %854 = vmatpush1.bf16.msra.mxu0 %v1281_v53  ;;  %v1315_v3 = vld [vmem:[%s1618_s11 + $0x144] ss:$8 sps:$4 sm:$0xff]   ;;  %v1293_v4 = vld [vmem:[%s1618_s11 + $0x20] ss:$8 sps:$4 sm:$0xff]   ;;  %v1294_v5 = vld [vmem:[%s1618_s11 + $0x14] ss:$8 sps:$4 sm:$0xff]  }
  0x4a   : > { %855 = vmatprep.subr.bf16.mxu0 %v1282_v54  ;;  %v1317_v6 = vld [vmem:[%s1618_s11 + $0x140] ss:$8 sps:$4 sm:$0xff]   ;;  %v1321_v7 = vld [vmem:[%s1618_s11 + $0x134] ss:$8 sps:$4 sm:$0xff]   ;;  %v1296_v8 = vld [vmem:[%s1618_s11 + $0x10] ss:$8 sps:$4 sm:$0xff]  }
  0x4b   : > { %895 = vmatpush1.bf16.msra.mxu1 %v1305_v62  ;;  %v1300_v9 = vld [vmem:[%s1618_s11 + $0x4] ss:$8 sps:$4 sm:$0xff]   ;;  %v1406_v10 = vmov 1966171168   ;;  %v1323_v13 = vld [vmem:[%s1618_s11 + $0x130] ss:$8 sps:$4 sm:$0xff]  }
  0x4c   : > { %896 = vmatprep.subr.bf16.mxu1 %v1309_v0  ;;  %v594_v11 = vunpack.c.l.s4 %v1406_v10  ;;  %v1327_v14 = vld [vmem:[%s1618_s11 + $0x124] ss:$8 sps:$4 sm:$0xff]   ;;  %v1302_v15 = vld [vmem:[%s1618_s11] ss:$8 sps:$4 sm:$0xff]   ;;  %v1306_v16 = vld [vmem:[%s1618_s11 + $0xf4] ss:$8 sps:$4 sm:$0xff]  }
  0x4d   : > { %856 = vmatpush1.bf16.msra.mxu0 %v1284_v55  ;;  %v1649_v18 = vshrl.u32 %v596_v12, 7  ;;  %v1329_v19 = vld [vmem:[%s1618_s11 + $0x120] ss:$8 sps:$4 sm:$0xff]   ;;  %v1308_v20 = vld [vmem:[%s1618_s11 + $0xf0] ss:$8 sps:$4 sm:$0xff]  }
  0x4e   : > { %857 = vmatprep.subr.bf16.mxu0 %v1285_v56  ;;  %v595_v17 = vunpack.c.0.s8 %v594_v11  ;;  %v1333_v21 = vld [vmem:[%s1618_s11 + $0x114] ss:$8 sps:$4 sm:$0xff]   ;;  %v1312_v23 = vld [vmem:[%s1618_s11 + $0xe4] ss:$8 sps:$4 sm:$0xff]   ;;  %v1335_v26 = vld [vmem:[%s1618_s11 + $0x110] ss:$8 sps:$4 sm:$0xff]  }
  0x4f   : > { %897 = vmatpush1.bf16.msra.mxu1 %v1311_v2  ;;  %v1159_v22 = vld.sshfl [vmem:[%s505_s29] sm:$0x13 pattern:$0x75316420]  ;;  %v1339_v27 = vld [vmem:[%s1618_s11 + $0x104] ss:$8 sps:$4 sm:$0xff]  }
  0x50   : > { %898 = vmatprep.subr.bf16.mxu1 %v1315_v3  ;;  %v1661_v24 = vsub.s32 %v595_v17, %v1649_v18  ;;  %v592_v25 = vcombine.high %v1159_v22, %v1159_v22  ;;  %v1314_v29 = vld [vmem:[%s1618_s11 + $0xe0] ss:$8 sps:$4 sm:$0xff]   ;;  %v1318_v30 = vld [vmem:[%s1618_s11 + $0xd4] ss:$8 sps:$4 sm:$0xff]   ;;  %v1320_v33 = vld [vmem:[%s1618_s11 + $0xd0] ss:$8 sps:$4 sm:$0xff]  }
  0x51   : > { %858 = vmatpush1.bf16.msra.mxu0 %v1287_v59  ;;  %v1341_v32 = vld [vmem:[%s1618_s11 + $0x100] ss:$8 sps:$4 sm:$0xff]   ;;  %v1324_v34 = vld [vmem:[%s1618_s11 + $0xc4] ss:$8 sps:$4 sm:$0xff]   ;;  %v1330_v37 = vld [vmem:[%s1618_s11 + $0xb4] ss:$8 sps:$4 sm:$0xff]  }
  0x52   : > { %859 = vmatprep.subr.bf16.mxu0 %v1288_v60  ;;  %v606_v28 = vrot.slane %v592_v25, %v1661_v24  ;;  %v599_v31 = vrot.slane %v1159_v22, %v1661_v24  ;;  %v1326_v36 = vld [vmem:[%s1618_s11 + $0xc0] ss:$8 sps:$4 sm:$0xff]   ;;  %v1332_v38 = vld [vmem:[%s1618_s11 + $0xb0] ss:$8 sps:$4 sm:$0xff]   ;;  %v1336_v39 = vld [vmem:[%s1618_s11 + $0xa4] ss:$8 sps:$4 sm:$0xff]  }
  0x53   : > { %899 = vmatpush1.bf16.msra.mxu1 %v1317_v6  ;;  %v1338_v40 = vld [vmem:[%s1618_s11 + $0xa0] ss:$8 sps:$4 sm:$0xff]   ;;  %v1342_v41 = vld [vmem:[%s1618_s11 + $0x94] ss:$8 sps:$4 sm:$0xff]   ;;  %v1344_v42 = vld [vmem:[%s1618_s11 + $0x90] ss:$8 sps:$4 sm:$0xff]  }
  0x54   : > { %900 = vmatprep.subr.bf16.mxu1 %v1321_v7  ;;  %883 = vmatprep.mubr.bf16.mxu0 %v606_v28  ;;  %v607_v35 = vcombine.high %v599_v31, %v599_v31  ;;  %v1345_v43 = vld [vmem:[%s1618_s11 + $0x84] ss:$8 sps:$4 sm:$0xff]   ;;  %v1347_v44 = vld [vmem:[%s1618_s11 + $0x80] ss:$8 sps:$4 sm:$0xff]   ;;  %v1407_v49 = vmov 1983009808  }
  0x55   : > { %860 = vmatpush1.bf16.msra.mxu0 %v1290_v63  ;;  %v937_v50 = vunpack.c.l.s4 %v1407_v49  ;;  %v534_v59 = vld [vmem:[#allocation2] sm:$0xf] }
  0x56   : > { %861 = vmatprep.subr.bf16.mxu0 %v1291_v1 }
  0x57   : > { %901 = vmatpush1.bf16.msra.mxu1 %v1323_v13  ;;  %v938_v51 = vunpack.c.0.s8 %v937_v50 }
  0x58   : > { %902 = vmatprep.subr.bf16.mxu1 %v1327_v14 }
  0x59   : > { %862 = vmatpush1.bf16.msra.mxu0 %v1293_v4  ;;  %v941_v56 = vsub.s32 %v938_v51, %v1649_v18 }
  0x5a   : > { %863 = vmatprep.subr.bf16.mxu0 %v1294_v5 }
  0x5b   : > { %903 = vmatpush1.bf16.msra.mxu1 %v1329_v19 }
  0x5c   : > { %904 = vmatprep.subr.bf16.mxu1 %v1333_v21 }
  0x5d   : > { %864 = vmatpush1.bf16.msra.mxu0 %v1296_v8 }
  0x5e   : > { %865 = vmatprep.subr.bf16.mxu0 %v1300_v9 }
  0x5f   : > { %905 = vmatpush1.bf16.msra.mxu1 %v1335_v26 }
  0x60   : > { %906 = vmatprep.subr.bf16.mxu1 %v1339_v27 }
  0x61   : > { %866 = vmatpush1.bf16.msra.mxu0 %v1302_v15 }
  0x62   : > { %867 = vmatprep.subr.bf16.mxu0 %v1306_v16 }
  0x63   : > { %907 = vmatpush1.bf16.msra.mxu1 %v1341_v32 }
  0x65   : > { %868 = vmatpush2.bf16.msra.mxu0 %v1308_v20 }
  0x66   : > { %869 = vmatprep.subr.bf16.mxu0 %v1312_v23  ;;  %925 = vmatmul.mubr.bf16.vlgmr.msra.gmra.mxu1 %v607_v35 }
  0x69   : > { %870 = vmatpush2.bf16.msra.mxu0 %v1314_v29 }
  0x6a   : > { %871 = vmatprep.subr.bf16.mxu0 %v1318_v30 }
  0x6d   : > { %872 = vmatpush2.bf16.msra.mxu0 %v1320_v33 }
  0x6e   : > { %873 = vmatprep.subr.bf16.mxu0 %v1324_v34 }
  0x71   : > { %874 = vmatpush2.bf16.msra.mxu0 %v1326_v36 }
  0x72   : > { %875 = vmatprep.subr.bf16.mxu0 %v1330_v37 }
  0x75   : > { %876 = vmatpush2.bf16.msra.mxu0 %v1332_v38 }
  0x76   : > { %877 = vmatprep.subr.bf16.mxu0 %v1336_v39 }
  0x79   : > { %878 = vmatpush2.bf16.msra.mxu0 %v1338_v40 }
  0x7a   : > { %879 = vmatprep.subr.bf16.mxu0 %v1342_v41 }
  0x7d   : > { %880 = vmatpush2.bf16.msra.mxu0 %v1344_v42 }
  0x7e   : > { %881 = vmatprep.subr.bf16.mxu0 %v1345_v43 }
  0x81   : > { %882 = vmatpush2.bf16.msra.mxu0 %v1347_v44 }
  0x84   : > { %884 = vmatmul.mubr.bf16.vlgmr.msra.gmra.mxu0 %v599_v31 }
 0x126   : > { %v926_v45 = vpop.f32.mrf.mxu1 }
 0x128   : > { %v928_v46 = vpop.f32.mrf.mxu1 }
 0x12a   : > { %v930_v47 = vpop.f32.mrf.mxu1 }
 0x12c   : > { %v931_v48 = vpop.f32.mrf.mxu1 }
 0x144   : > { %v885_v52 = vpop.f32.mrf.mxu0 }
 0x145   : > { %v927_v54 = vadd.f32 %v926_v45, %v885_v52 }
 0x146   : > { %v887_v53 = vpop.f32.mrf.mxu0 }
 0x147   : > { %v929_v55 = vadd.f32 %v928_v46, %v887_v53 }
 0x148   : > { %v889_v57 = vpop.f32.mrf.mxu0 }
 0x149   : > { %v935_v58 = vcombine.low %v927_v54, %v929_v55 }
 0x14a   : > { %v890_v60 = vpop.f32.mrf.mxu0 }
 0x14b   : > { %v942_v61 = vrot.slane %v935_v58, %v941_v56  ;;  %949 = sbr.rel (%p1208_p13) target bundleno = 359 (0x167), region = 82 }
 0x14d   : > { %v944_v62 = vadd.f32 %v942_v61, %v534_v59 }
 0x14f   : > { %945 = vst [vmem:[#allocation2] sm:$0xf] %v944_v62 }
 0x150   : > { %v951_v63 = vld [vmem:[%s512_s15] sm:$0x3]  ;;  %v955_v0 = vsub.s32 0, %v1649_v18  ;;  %v959_v1 = vsub.s32 1, %v1649_v18 }
 0x151   : > { %v971_v2 = vld [vmem:[%s517_s7] sm:$0x3] }
 0x152   : > { %v956_v3 = vrot.slane %v951_v63, %v955_v0  ;;  %v960_v4 = vrot.slane %v951_v63, %v959_v1  ;;  %v976_v5 = vrot.slane %v971_v2, %v955_v0  ;;  %v980_v6 = vrot.slane %v971_v2, %v959_v1 }
 0x154   : > { %v961_v7 = vcombine.low %v956_v3, %v960_v4  ;;  %v981_v8 = vcombine.low %v976_v5, %v980_v6 }
 0x156   : > { %v950_v9 = vld [vmem:[#allocation2] sm:$0xf]  ;;  %v968_v10 = vrot.slane %v961_v7, %v941_v56  ;;  %v988_v11 = vrot.slane %v981_v8, %v941_v56 }
 0x158   : > { %v970_v12 = vmul.f32 %v968_v10, %v950_v9 }
 0x15a   : > { %v990_v13 = vadd.f32 %v988_v11, %v970_v12 }
 0x15c   : > { %v991_v14 = vmax.f32 %v990_v13, 0.0 }
 0x15e   : > { %v999_v15 = vrot.slane %v991_v14, %v941_v56 }
 0x160   : > { %v1000_v16 = vcombine.high %v999_v15, %v999_v15 }
 0x162   : > { %v1209_v17 = vpack.c.bf16 %v1000_v16, %v999_v15 }
 0x164   : > { %v1014_v18 = vrot.slane %v1209_v17, %v1661_v24 }
 0x166   : > { %1210 = vst.sshfl [vmem:[%s526_s10] sm:$0x5 pattern:$0x73625140] %v1014_v18 }
 0x167 PF: > { %s14_s21 = sadd.s32 1, %s1402_s21   ;;  %s1727_s15 = smov %s1382_s16 }
 0x168   : > { %p11_p0 = scmp.ge.s32.totalorder %s14_s21, 14   ;;  %s1728_s16 = smov %s1484_s28 }
 0x169   : > { %s1729_s17 = smov %s1394_s19  ;;  %s1730_s18 = smov %s1398_s20 }
 0x16a   : > { %s1731_s19 = smov %s1734_s22  ;;  %s1732_s20 = smov %s1738_s23 }
 0x16b   :  { %13 = sbr.rel (!%p11_p0) target bundleno = 4 (0x4), region = 126 }

// kernel: resnet18_forward.41
= control target key start
LH: loop header
LB: loop body
LE: loop exit
PB: predicated region body
PF: predicated region fallthrough
CT: control target
= control target key end

     0   :  { %s1718_s18 = smov 0   ;;  %s1720_s19 = smov 0   ;;  %s2064_s0 = inlined_call_operand.vmem [shape: bf16[2,4608], index: 0, kind: input, shape index: {}]   ;;  %s2065_s1 = inlined_call_operand.vmem [shape: bf16[4608,512], index: 1, kind: input, shape index: {}]   ;;  %s2066_s2 = inlined_call_operand.vmem [shape: f32[1,512], index: 2, kind: input, shape index: {}]   ;;  %s2067_s3 = inlined_call_operand.vmem [shape: f32[1,512], index: 3, kind: input, shape index: {}]   ;;  %s2068_s4 = inlined_call_operand.vmem [shape: bf16[2,512], index: 4, kind: input, shape index: {}]   ;;  %s2069_s5 = inlined_call_operand.vmem [shape: bf16[2,512], index: 5, kind: output, shape index: {}]  }
   0x1   :  { %s1722_s20 = smov 0   ;;  %s1724_s21 = smov 0  }
   0x2   :  { %s1726_s22 = smov 0   ;;  %s1728_s23 = smov 0  }
   0x3   :  { %s1730_s24 = smov 0  }
   0x4 LB: > { %s27_s25 = sadd.s32 1, %s1675_s22  ;;  %s30_s26 = sadd.s32 1, %s1679_s23  ;;  %s1683_s24 = sphi %s1730_s24, %s15_s24   ;;  %s1679_s23 = sphi %s1728_s23, %s2075_s23   ;;  %s1675_s22 = sphi %s1726_s22, %s2074_s22   ;;  %s1671_s21 = sphi %s1724_s21, %s2073_s21   ;;  %s1667_s20 = sphi %s1722_s20, %s2072_s20   ;;  %s1663_s19 = sphi %s1720_s19, %s2071_s19   ;;  %s1659_s18 = sphi %s1718_s18, %s2070_s18  }
   0x5   : > { %p28_p0 = scmp.ge.s32.totalorder %s27_s25, 9  ;;  %p78_p1 = scmp.ne.s32.totalorder %s1663_s19, %s1659_s18 }
   0x6   : > { %p79_p2 = scmp.eq.s32.totalorder %s1683_s24, 0  ;;  %s71_s30 = sadd.s32 1, %s1663_s19 }
   0x7   : > { %s2077_s25 = smov (%p28_p0, %s27_s25), 0  ;;  %s2079_s26 = smov (!%p28_p0, %s30_s26), %s1679_s23 }
   0x8   : > { %p80_p3 = por %p79_p2, %p78_p1  ;;  %p32_p4 = scmp.ge.s32.totalorder %s2079_s26, 2 }
   0x9   : > { %s66_s27 = ssub.s32 %s1675_s22, %s2077_s25  ;;  %p1389_p6 = scmp.ge.s32.totalorder %s1683_s24, 18 }
   0xa   : > { %s2081_s26 = smov (%p32_p4, %s2079_s26), 0 }
   0xb   : > { %s67_s28 = ssub.s32 %s1679_s23, %s2081_s26  ;;  %212 = sbr.rel (%p1389_p6) target bundleno = 55 (0x37), region = 16 }
   0xc   : > { %s68_s29 = sor.u32 %s67_s28, %s66_s27 }
   0xd   : > { %p69_p5 = scmp.eq.s32.totalorder %s68_s29, 0 }
   0xf   : > { %s1769_s6 = scalar_select %p69_p5, %s1663_s19, %s71_s30  }
  0x10   : > { %227 = sbr.rel (!%p80_p3) target bundleno = 55 (0x37), region = 24  ;;  %s229_s7 = sand.u32 (%p80_p3), 1, %s1663_s19  }
  0x11   : > { %s1392_s8 = sshll.u32 (%p80_p3), %s1679_s23, 1  ;;  %s1390_s9 = sshll.u32 (%p80_p3), %s229_s7, 9 }
  0x12   : > { %s1473_s10 = sshll.u32 (%p80_p3), %s1675_s22, 8  ;;  %s1783_s16 = scalar_lea.vmem (%p80_p3), [#allocation3], %s1390_s9 }
  0x13   : > { %s235_s11 = sadd.s32 (%p80_p3), %s1473_s10, %s1392_s8 }
  0x14   : > { %s1394_s12 = sshll.u32 (%p80_p3), %s235_s11, 2 }
  0x15   : > { %s1778_s15 = scalar_lea.vmem %s2065_s1, %s1394_s12 }
  0x16   : > { %v392_v0 = vld [vmem:[%s1778_s15] sm:$0xff]  ;;  %v394_v1 = vld [vmem:[%s1778_s15 + $0x10] sm:$0xff] }
  0x17   : > { %v396_v2 = vld [vmem:[%s1778_s15 + $0x20] sm:$0xff]  ;;  %393 = vst [vmem:[%s1783_s16] sm:$0xff] %v392_v0  ;;  %395 = vst [vmem:[%s1783_s16 + $0x8] sm:$0xff] %v394_v1  ;;  %v398_v3 = vld [vmem:[%s1778_s15 + $0x30] sm:$0xff] }
  0x18   : > { %397 = vst [vmem:[%s1783_s16 + $0x10] sm:$0xff] %v396_v2  ;;  %v400_v4 = vld [vmem:[%s1778_s15 + $0x40] sm:$0xff]  ;;  %v402_v5 = vld [vmem:[%s1778_s15 + $0x50] sm:$0xff]  ;;  %399 = vst [vmem:[%s1783_s16 + $0x18] sm:$0xff] %v398_v3 }
  0x19   : > { %401 = vst [vmem:[%s1783_s16 + $0x20] sm:$0xff] %v400_v4  ;;  %403 = vst [vmem:[%s1783_s16 + $0x28] sm:$0xff] %v402_v5  ;;  %v404_v6 = vld [vmem:[%s1778_s15 + $0x60] sm:$0xff]  ;;  %v406_v7 = vld [vmem:[%s1778_s15 + $0x70] sm:$0xff] }
  0x1a   : > { %v408_v8 = vld [vmem:[%s1778_s15 + $0x80] sm:$0xff]  ;;  %405 = vst [vmem:[%s1783_s16 + $0x30] sm:$0xff] %v404_v6  ;;  %407 = vst [vmem:[%s1783_s16 + $0x38] sm:$0xff] %v406_v7  ;;  %v410_v9 = vld [vmem:[%s1778_s15 + $0x90] sm:$0xff] }
  0x1b   : > { %409 = vst [vmem:[%s1783_s16 + $0x40] sm:$0xff] %v408_v8  ;;  %v412_v10 = vld [vmem:[%s1778_s15 + $0xa0] sm:$0xff]  ;;  %v414_v11 = vld [vmem:[%s1778_s15 + $0xb0] sm:$0xff]  ;;  %411 = vst [vmem:[%s1783_s16 + $0x48] sm:$0xff] %v410_v9 }
  0x1c   : > { %413 = vst [vmem:[%s1783_s16 + $0x50] sm:$0xff] %v412_v10  ;;  %415 = vst [vmem:[%s1783_s16 + $0x58] sm:$0xff] %v414_v11  ;;  %v416_v12 = vld [vmem:[%s1778_s15 + $0xc0] sm:$0xff]  ;;  %v418_v13 = vld [vmem:[%s1778_s15 + $0xd0] sm:$0xff] }
  0x1d   : > { %v420_v14 = vld [vmem:[%s1778_s15 + $0xe0] sm:$0xff]  ;;  %417 = vst [vmem:[%s1783_s16 + $0x60] sm:$0xff] %v416_v12  ;;  %419 = vst [vmem:[%s1783_s16 + $0x68] sm:$0xff] %v418_v13  ;;  %v422_v15 = vld [vmem:[%s1778_s15 + $0xf0] sm:$0xff] }
  0x1e   : > { %421 = vst [vmem:[%s1783_s16 + $0x70] sm:$0xff] %v420_v14  ;;  %v424_v16 = vld [vmem:[%s1778_s15 + $0x100] sm:$0xff]  ;;  %v426_v17 = vld [vmem:[%s1778_s15 + $0x110] sm:$0xff]  ;;  %423 = vst [vmem:[%s1783_s16 + $0x78] sm:$0xff] %v422_v15 }
  0x1f   : > { %425 = vst [vmem:[%s1783_s16 + $0x80] sm:$0xff] %v424_v16  ;;  %427 = vst [vmem:[%s1783_s16 + $0x88] sm:$0xff] %v426_v17  ;;  %v428_v18 = vld [vmem:[%s1778_s15 + $0x120] sm:$0xff]  ;;  %v430_v19 = vld [vmem:[%s1778_s15 + $0x130] sm:$0xff] }
  0x20   : > { %v432_v20 = vld [vmem:[%s1778_s15 + $0x140] sm:$0xff]  ;;  %429 = vst [vmem:[%s1783_s16 + $0x90] sm:$0xff] %v428_v18  ;;  %431 = vst [vmem:[%s1783_s16 + $0x98] sm:$0xff] %v430_v19  ;;  %v434_v21 = vld [vmem:[%s1778_s15 + $0x150] sm:$0xff] }
  0x21   : > { %433 = vst [vmem:[%s1783_s16 + $0xa0] sm:$0xff] %v432_v20  ;;  %v436_v22 = vld [vmem:[%s1778_s15 + $0x160] sm:$0xff]  ;;  %v438_v23 = vld [vmem:[%s1778_s15 + $0x170] sm:$0xff]  ;;  %435 = vst [vmem:[%s1783_s16 + $0xa8] sm:$0xff] %v434_v21 }
  0x22   : > { %437 = vst [vmem:[%s1783_s16 + $0xb0] sm:$0xff] %v436_v22  ;;  %439 = vst [vmem:[%s1783_s16 + $0xb8] sm:$0xff] %v438_v23  ;;  %v440_v24 = vld [vmem:[%s1778_s15 + $0x180] sm:$0xff]  ;;  %v442_v25 = vld [vmem:[%s1778_s15 + $0x190] sm:$0xff] }
  0x23   : > { %v444_v26 = vld [vmem:[%s1778_s15 + $0x1a0] sm:$0xff]  ;;  %441 = vst [vmem:[%s1783_s16 + $0xc0] sm:$0xff] %v440_v24  ;;  %443 = vst [vmem:[%s1783_s16 + $0xc8] sm:$0xff] %v442_v25  ;;  %v446_v27 = vld [vmem:[%s1778_s15 + $0x1b0] sm:$0xff] }
  0x24   : > { %445 = vst [vmem:[%s1783_s16 + $0xd0] sm:$0xff] %v444_v26  ;;  %v448_v28 = vld [vmem:[%s1778_s15 + $0x1c0] sm:$0xff]  ;;  %v450_v29 = vld [vmem:[%s1778_s15 + $0x1d0] sm:$0xff]  ;;  %447 = vst [vmem:[%s1783_s16 + $0xd8] sm:$0xff] %v446_v27 }
  0x25   : > { %449 = vst [vmem:[%s1783_s16 + $0xe0] sm:$0xff] %v448_v28  ;;  %451 = vst [vmem:[%s1783_s16 + $0xe8] sm:$0xff] %v450_v29  ;;  %v452_v30 = vld [vmem:[%s1778_s15 + $0x1e0] sm:$0xff]  ;;  %v454_v31 = vld [vmem:[%s1778_s15 + $0x1f0] sm:$0xff] }
  0x26   : > { %v456_v32 = vld [vmem:[%s1778_s15 + $0x200] sm:$0xff]  ;;  %453 = vst [vmem:[%s1783_s16 + $0xf0] sm:$0xff] %v452_v30  ;;  %455 = vst [vmem:[%s1783_s16 + $0xf8] sm:$0xff] %v454_v31  ;;  %v458_v33 = vld [vmem:[%s1778_s15 + $0x210] sm:$0xff] }
  0x27   : > { %457 = vst [vmem:[%s1783_s16 + $0x100] sm:$0xff] %v456_v32  ;;  %v460_v34 = vld [vmem:[%s1778_s15 + $0x220] sm:$0xff]  ;;  %v462_v35 = vld [vmem:[%s1778_s15 + $0x230] sm:$0xff]  ;;  %459 = vst [vmem:[%s1783_s16 + $0x108] sm:$0xff] %v458_v33 }
  0x28   : > { %461 = vst [vmem:[%s1783_s16 + $0x110] sm:$0xff] %v460_v34  ;;  %463 = vst [vmem:[%s1783_s16 + $0x118] sm:$0xff] %v462_v35  ;;  %v464_v36 = vld [vmem:[%s1778_s15 + $0x240] sm:$0xff]  ;;  %v466_v37 = vld [vmem:[%s1778_s15 + $0x250] sm:$0xff] }
  0x29   : > { %v468_v38 = vld [vmem:[%s1778_s15 + $0x260] sm:$0xff]  ;;  %465 = vst [vmem:[%s1783_s16 + $0x120] sm:$0xff] %v464_v36  ;;  %467 = vst [vmem:[%s1783_s16 + $0x128] sm:$0xff] %v466_v37  ;;  %v470_v39 = vld [vmem:[%s1778_s15 + $0x270] sm:$0xff] }
  0x2a   : > { %469 = vst [vmem:[%s1783_s16 + $0x130] sm:$0xff] %v468_v38  ;;  %v472_v40 = vld [vmem:[%s1778_s15 + $0x280] sm:$0xff]  ;;  %v474_v41 = vld [vmem:[%s1778_s15 + $0x290] sm:$0xff]  ;;  %471 = vst [vmem:[%s1783_s16 + $0x138] sm:$0xff] %v470_v39 }
  0x2b   : > { %473 = vst [vmem:[%s1783_s16 + $0x140] sm:$0xff] %v472_v40  ;;  %475 = vst [vmem:[%s1783_s16 + $0x148] sm:$0xff] %v474_v41  ;;  %v476_v42 = vld [vmem:[%s1778_s15 + $0x2a0] sm:$0xff]  ;;  %v478_v43 = vld [vmem:[%s1778_s15 + $0x2b0] sm:$0xff] }
  0x2c   : > { %v480_v44 = vld [vmem:[%s1778_s15 + $0x2c0] sm:$0xff]  ;;  %477 = vst [vmem:[%s1783_s16 + $0x150] sm:$0xff] %v476_v42  ;;  %479 = vst [vmem:[%s1783_s16 + $0x158] sm:$0xff] %v478_v43  ;;  %v482_v45 = vld [vmem:[%s1778_s15 + $0x2d0] sm:$0xff] }
  0x2d   : > { %481 = vst [vmem:[%s1783_s16 + $0x160] sm:$0xff] %v480_v44  ;;  %v484_v46 = vld [vmem:[%s1778_s15 + $0x2e0] sm:$0xff]  ;;  %v486_v47 = vld [vmem:[%s1778_s15 + $0x2f0] sm:$0xff]  ;;  %483 = vst [vmem:[%s1783_s16 + $0x168] sm:$0xff] %v482_v45 }
  0x2e   : > { %485 = vst [vmem:[%s1783_s16 + $0x170] sm:$0xff] %v484_v46  ;;  %487 = vst [vmem:[%s1783_s16 + $0x178] sm:$0xff] %v486_v47  ;;  %v488_v48 = vld [vmem:[%s1778_s15 + $0x300] sm:$0xff]  ;;  %v490_v49 = vld [vmem:[%s1778_s15 + $0x310] sm:$0xff] }
  0x2f   : > { %v492_v50 = vld [vmem:[%s1778_s15 + $0x320] sm:$0xff]  ;;  %489 = vst [vmem:[%s1783_s16 + $0x180] sm:$0xff] %v488_v48  ;;  %491 = vst [vmem:[%s1783_s16 + $0x188] sm:$0xff] %v490_v49  ;;  %v494_v51 = vld [vmem:[%s1778_s15 + $0x330] sm:$0xff] }
  0x30   : > { %493 = vst [vmem:[%s1783_s16 + $0x190] sm:$0xff] %v492_v50  ;;  %v496_v52 = vld [vmem:[%s1778_s15 + $0x340] sm:$0xff]  ;;  %v498_v53 = vld [vmem:[%s1778_s15 + $0x350] sm:$0xff]  ;;  %495 = vst [vmem:[%s1783_s16 + $0x198] sm:$0xff] %v494_v51 }
  0x31   : > { %497 = vst [vmem:[%s1783_s16 + $0x1a0] sm:$0xff] %v496_v52  ;;  %499 = vst [vmem:[%s1783_s16 + $0x1a8] sm:$0xff] %v498_v53  ;;  %v500_v54 = vld [vmem:[%s1778_s15 + $0x360] sm:$0xff]  ;;  %v502_v55 = vld [vmem:[%s1778_s15 + $0x370] sm:$0xff] }
  0x32   : > { %v504_v56 = vld [vmem:[%s1778_s15 + $0x380] sm:$0xff]  ;;  %501 = vst [vmem:[%s1783_s16 + $0x1b0] sm:$0xff] %v500_v54  ;;  %503 = vst [vmem:[%s1783_s16 + $0x1b8] sm:$0xff] %v502_v55  ;;  %v506_v57 = vld [vmem:[%s1778_s15 + $0x390] sm:$0xff] }
  0x33   : > { %505 = vst [vmem:[%s1783_s16 + $0x1c0] sm:$0xff] %v504_v56  ;;  %v508_v58 = vld [vmem:[%s1778_s15 + $0x3a0] sm:$0xff]  ;;  %v510_v59 = vld [vmem:[%s1778_s15 + $0x3b0] sm:$0xff]  ;;  %507 = vst [vmem:[%s1783_s16 + $0x1c8] sm:$0xff] %v506_v57 }
  0x34   : > { %509 = vst [vmem:[%s1783_s16 + $0x1d0] sm:$0xff] %v508_v58  ;;  %511 = vst [vmem:[%s1783_s16 + $0x1d8] sm:$0xff] %v510_v59  ;;  %v512_v60 = vld [vmem:[%s1778_s15 + $0x3c0] sm:$0xff]  ;;  %v514_v61 = vld [vmem:[%s1778_s15 + $0x3d0] sm:$0xff] }
  0x35   : > { %v516_v62 = vld [vmem:[%s1778_s15 + $0x3e0] sm:$0xff]  ;;  %513 = vst [vmem:[%s1783_s16 + $0x1e0] sm:$0xff] %v512_v60  ;;  %515 = vst [vmem:[%s1783_s16 + $0x1e8] sm:$0xff] %v514_v61  ;;  %v518_v63 = vld [vmem:[%s1778_s15 + $0x3f0] sm:$0xff] }
  0x36   : > { %517 = vst [vmem:[%s1783_s16 + $0x1f0] sm:$0xff] %v516_v62  ;;  %519 = vst [vmem:[%s1783_s16 + $0x1f8] sm:$0xff] %v518_v63 }
  0x37 PF: > { %p1395_p7 = scmp.ge.s32.totalorder %s1683_s24, 1  ;;  %p552_p8 = scmp.lt.s32.totalorder %s1683_s24, 19 }
  0x39   : > { %p553_p9 = pnand %p1395_p7, %p552_p8 }
  0x3a   : > { %s559_s17 = sand.u32 (!%p553_p9), 1, %s1659_s18   ;;  %s1397_s27 = sshll.u32 (!%p553_p9), %s1667_s20, 2 }
  0x3b   : > { %556 = sbr.rel (%p553_p9) target bundleno = 369 (0x171), region = 74  ;;  %s1396_s28 = sshll.u32 (!%p553_p9), %s559_s17, 9 }
  0x3c   : > { %p616_p10 = scmp.lt.s32.totalorder (!%p553_p9), %s1397_s27, 35  ;;  %s1398_s29 = sshll.u32 (!%p553_p9), %s1671_s21, 1 }
  0x3d   : > { %p625_p11 = scmp.lt.s32.totalorder (!%p553_p9), %s1398_s29, 3  ;;  %s1939_s7 = scalar_lea.vmem (!%p553_p9), [#allocation3], %s1396_s28 }
  0x3e   : > { %p1402_p12 = scmp.ne.s32.totalorder (!%p553_p9), %s1667_s20, 0 }
  0x40   : > { %s2083_s27 = smov (!%p616_p10, %s1397_s27), 35  ;;  %s2085_s29 = smov (!%p625_p11, %s1398_s29), 3 }
  0x41   : > { %s620_s8 = scalar_lea.vmem %s2064_s0, %s2083_s27  ;;  %s627_s18 = scalar_lea.vmem %s2066_s2, %s2085_s29 }
  0x42   : > { %s632_s12 = scalar_lea.vmem %s2067_s3, %s2085_s29  ;;  %s641_s15 = scalar_lea.vmem %s2068_s4, %s2085_s29 }
  0x43   : > { %s650_s30 = scalar_lea.vmem %s2069_s5, %s2085_s29  ;;  %655 = sbr.rel (%p1402_p12) target bundleno = 74 (0x4a), region = 82 }
  0x48   : > { %v1685_v0 = vmov 0.0  }
  0x49   : > { %656 = vst [vmem:[#allocation2] sm:$0xf] %v1685_v0 }
  0x4a PF: > { %v1533_v1 = vld [vmem:[%s1939_s7 + $0x74] ss:$8 sps:$4 sm:$0xff]   ;;  %v1537_v3 = vld [vmem:[%s1939_s7 + $0x70] ss:$8 sps:$4 sm:$0xff]   ;;  %v1539_v5 = vld [vmem:[%s1939_s7 + $0x64] ss:$8 sps:$4 sm:$0xff]   ;;  %v735_v41 = vlaneseq }
  0x4b   : > { %v1535_v2 = vld [vmem:[%s1939_s7 + $0x174] ss:$8 sps:$4 sm:$0xff]   ;;  %1072 = vmatprep.subr.bf16.mxu0 %v1533_v1  ;;  %v1538_v4 = vld [vmem:[%s1939_s7 + $0x170] ss:$8 sps:$4 sm:$0xff]   ;;  %v1541_v6 = vld [vmem:[%s1939_s7 + $0x164] ss:$8 sps:$4 sm:$0xff]  }
  0x4c   : > { %1113 = vmatprep.subr.bf16.mxu1 %v1535_v2  ;;  %1073 = vmatpush1.bf16.msra.mxu0 %v1537_v3  ;;  %v1543_v7 = vld [vmem:[%s1939_s7 + $0x60] ss:$8 sps:$4 sm:$0xff]   ;;  %v1545_v9 = vld [vmem:[%s1939_s7 + $0x54] ss:$8 sps:$4 sm:$0xff]   ;;  %v1549_v11 = vld [vmem:[%s1939_s7 + $0x50] ss:$8 sps:$4 sm:$0xff]  }
  0x4d   : > { %1114 = vmatpush1.bf16.msra.mxu1 %v1538_v4  ;;  %1074 = vmatprep.subr.bf16.mxu0 %v1539_v5  ;;  %v1544_v8 = vld [vmem:[%s1939_s7 + $0x160] ss:$8 sps:$4 sm:$0xff]   ;;  %v1547_v10 = vld [vmem:[%s1939_s7 + $0x154] ss:$8 sps:$4 sm:$0xff]   ;;  %v1550_v12 = vld [vmem:[%s1939_s7 + $0x150] ss:$8 sps:$4 sm:$0xff]  }
  0x4e   : > { %1115 = vmatprep.subr.bf16.mxu1 %v1541_v6  ;;  %v1551_v13 = vld [vmem:[%s1939_s7 + $0x44] ss:$8 sps:$4 sm:$0xff]   ;;  %v1555_v15 = vld [vmem:[%s1939_s7 + $0x40] ss:$8 sps:$4 sm:$0xff]   ;;  %v1557_v17 = vld [vmem:[%s1939_s7 + $0x34] ss:$8 sps:$4 sm:$0xff]  }
  0x4f   : > { %v1553_v14 = vld [vmem:[%s1939_s7 + $0x144] ss:$8 sps:$4 sm:$0xff]   ;;  %v1556_v16 = vld [vmem:[%s1939_s7 + $0x140] ss:$8 sps:$4 sm:$0xff]   ;;  %v1559_v18 = vld [vmem:[%s1939_s7 + $0x134] ss:$8 sps:$4 sm:$0xff]  }
  0x50   : > { %1075 = vmatpush1.bf16.msra.mxu0 %v1543_v7  ;;  %v1561_v19 = vld [vmem:[%s1939_s7 + $0x30] ss:$8 sps:$4 sm:$0xff]   ;;  %v1563_v21 = vld [vmem:[%s1939_s7 + $0x24] ss:$8 sps:$4 sm:$0xff]   ;;  %v1567_v23 = vld [vmem:[%s1939_s7 + $0x20] ss:$8 sps:$4 sm:$0xff]  }
  0x51   : > { %1116 = vmatpush1.bf16.msra.mxu1 %v1544_v8  ;;  %1076 = vmatprep.subr.bf16.mxu0 %v1545_v9  ;;  %v1562_v20 = vld [vmem:[%s1939_s7 + $0x130] ss:$8 sps:$4 sm:$0xff]   ;;  %v1565_v22 = vld [vmem:[%s1939_s7 + $0x124] ss:$8 sps:$4 sm:$0xff]   ;;  %v1568_v24 = vld [vmem:[%s1939_s7 + $0x120] ss:$8 sps:$4 sm:$0xff]  }
  0x52   : > { %1117 = vmatprep.subr.bf16.mxu1 %v1547_v10  ;;  %v1569_v25 = vld [vmem:[%s1939_s7 + $0x14] ss:$8 sps:$4 sm:$0xff]   ;;  %v1573_v27 = vld [vmem:[%s1939_s7 + $0x10] ss:$8 sps:$4 sm:$0xff]   ;;  %v1575_v29 = vld [vmem:[%s1939_s7 + $0x4] ss:$8 sps:$4 sm:$0xff]  }
  0x53   : > { %v1571_v26 = vld [vmem:[%s1939_s7 + $0x114] ss:$8 sps:$4 sm:$0xff]   ;;  %v1574_v28 = vld [vmem:[%s1939_s7 + $0x110] ss:$8 sps:$4 sm:$0xff]   ;;  %v1577_v30 = vld [vmem:[%s1939_s7 + $0x104] ss:$8 sps:$4 sm:$0xff]  }
  0x54   : > { %1077 = vmatpush1.bf16.msra.mxu0 %v1549_v11  ;;  %v1579_v31 = vld [vmem:[%s1939_s7] ss:$8 sps:$4 sm:$0xff]   ;;  %v1581_v33 = vld [vmem:[%s1939_s7 + $0xf4] ss:$8 sps:$4 sm:$0xff]   ;;  %v1585_v35 = vld [vmem:[%s1939_s7 + $0xf0] ss:$8 sps:$4 sm:$0xff]  }
  0x55   : > { %1118 = vmatpush1.bf16.msra.mxu1 %v1550_v12  ;;  %1078 = vmatprep.subr.bf16.mxu0 %v1551_v13  ;;  %v1580_v32 = vld [vmem:[%s1939_s7 + $0x100] ss:$8 sps:$4 sm:$0xff]   ;;  %v1583_v34 = vld [vmem:[%s1939_s7 + $0x1f4] ss:$8 sps:$4 sm:$0xff]   ;;  %v1586_v36 = vld [vmem:[%s1939_s7 + $0x1f0] ss:$8 sps:$4 sm:$0xff]  }
  0x56   : > { %1119 = vmatprep.subr.bf16.mxu1 %v1553_v14  ;;  %v1587_v37 = vld [vmem:[%s1939_s7 + $0xe4] ss:$8 sps:$4 sm:$0xff]   ;;  %v1686_v39 = vmov 1966171168   ;;  %v1591_v42 = vld [vmem:[%s1939_s7 + $0xe0] ss:$8 sps:$4 sm:$0xff]  }
  0x57   : > { %v1589_v38 = vld [vmem:[%s1939_s7 + $0x1e4] ss:$8 sps:$4 sm:$0xff]   ;;  %v733_v40 = vunpack.c.l.s4 %v1686_v39  ;;  %v1592_v43 = vld [vmem:[%s1939_s7 + $0x1e0] ss:$8 sps:$4 sm:$0xff]   ;;  %v1593_v44 = vld [vmem:[%s1939_s7 + $0xd4] ss:$8 sps:$4 sm:$0xff]  }
  0x58   : > { %1079 = vmatpush1.bf16.msra.mxu0 %v1555_v15  ;;  %v1595_v45 = vld [vmem:[%s1939_s7 + $0x1d4] ss:$8 sps:$4 sm:$0xff]   ;;  %v1984_v47 = vshrl.u32 %v735_v41, 7  ;;  %v1597_v48 = vld [vmem:[%s1939_s7 + $0xd0] ss:$8 sps:$4 sm:$0xff]   ;;  %p1468_p13 = scmp.ne.s32.totalorder %s1667_s20, 8 }
  0x59   : > { %1120 = vmatpush1.bf16.msra.mxu1 %v1556_v16  ;;  %1080 = vmatprep.subr.bf16.mxu0 %v1557_v17  ;;  %v734_v46 = vunpack.c.0.s8 %v733_v40  ;;  %v1598_v49 = vld [vmem:[%s1939_s7 + $0x1d0] ss:$8 sps:$4 sm:$0xff]   ;;  %v1599_v50 = vld [vmem:[%s1939_s7 + $0xc4] ss:$8 sps:$4 sm:$0xff]   ;;  %v1603_v54 = vld [vmem:[%s1939_s7 + $0xc0] ss:$8 sps:$4 sm:$0xff]  }
  0x5a   : > { %1121 = vmatprep.subr.bf16.mxu1 %v1559_v18  ;;  %v1601_v51 = vld [vmem:[%s1939_s7 + $0x1c4] ss:$8 sps:$4 sm:$0xff]   ;;  %v1403_v53 = vld.sshfl [vmem:[%s620_s8] sm:$0x33 pattern:$0x75316420] }
  0x5b   : > { %v1991_v52 = vsub.s32 %v734_v46, %v1984_v47  ;;  %v1604_v55 = vld [vmem:[%s1939_s7 + $0x1c0] ss:$8 sps:$4 sm:$0xff]   ;;  %v731_v56 = vcombine.high %v1403_v53, %v1403_v53  ;;  %v1605_v57 = vld [vmem:[%s1939_s7 + $0xb4] ss:$8 sps:$4 sm:$0xff]   ;;  %v1609_v60 = vld [vmem:[%s1939_s7 + $0xb0] ss:$8 sps:$4 sm:$0xff]  }
  0x5c   : > { %1081 = vmatpush1.bf16.msra.mxu0 %v1561_v19  ;;  %v1607_v58 = vld [vmem:[%s1939_s7 + $0x1b4] ss:$8 sps:$4 sm:$0xff]   ;;  %v1610_v61 = vld [vmem:[%s1939_s7 + $0x1b0] ss:$8 sps:$4 sm:$0xff]   ;;  %v1611_v63 = vld [vmem:[%s1939_s7 + $0xa4] ss:$8 sps:$4 sm:$0xff]  }
  0x5d   : > { %1122 = vmatpush1.bf16.msra.mxu1 %v1562_v20  ;;  %1082 = vmatprep.subr.bf16.mxu0 %v1563_v21  ;;  %v745_v59 = vrot.slane %v731_v56, %v1991_v52  ;;  %v1613_v0 = vld [vmem:[%s1939_s7 + $0x1a4] ss:$8 sps:$4 sm:$0xff]   ;;  %v1615_v1 = vld [vmem:[%s1939_s7 + $0xa0] ss:$8 sps:$4 sm:$0xff]   ;;  %v1617_v3 = vld [vmem:[%s1939_s7 + $0x94] ss:$8 sps:$4 sm:$0xff]   ;;  %v738_v9 = vrot.slane %v1403_v53, %v1991_v52 }
  0x5e   : > { %1123 = vmatprep.subr.bf16.mxu1 %v1565_v22  ;;  %v1616_v2 = vld [vmem:[%s1939_s7 + $0x1a0] ss:$8 sps:$4 sm:$0xff]   ;;  %v1619_v4 = vld [vmem:[%s1939_s7 + $0x194] ss:$8 sps:$4 sm:$0xff]   ;;  %v1621_v5 = vld [vmem:[%s1939_s7 + $0x90] ss:$8 sps:$4 sm:$0xff]  }
  0x5f   : > { %v747_v62 = vcombine.high %v745_v59, %v745_v59  ;;  %1104 = vmatprep.mubr.bf16.mxu0 %v745_v59  ;;  %v1622_v6 = vld [vmem:[%s1939_s7 + $0x190] ss:$8 sps:$4 sm:$0xff]   ;;  %v1623_v7 = vld [vmem:[%s1939_s7 + $0x84] ss:$8 sps:$4 sm:$0xff]   ;;  %v1627_v10 = vld [vmem:[%s1939_s7 + $0x80] ss:$8 sps:$4 sm:$0xff]   ;;  %v746_v12 = vcombine.high %v738_v9, %v738_v9 }
  0x60   : > { %1083 = vmatpush1.bf16.msra.mxu0 %v1567_v23  ;;  %v1625_v8 = vld [vmem:[%s1939_s7 + $0x184] ss:$8 sps:$4 sm:$0xff]   ;;  %v1628_v11 = vld [vmem:[%s1939_s7 + $0x180] ss:$8 sps:$4 sm:$0xff]   ;;  %v1687_v13 = vmov 1983009808  }
  0x61   : > { %1124 = vmatpush1.bf16.msra.mxu1 %v1568_v24  ;;  %1084 = vmatprep.subr.bf16.mxu0 %v1569_v25  ;;  %v1158_v14 = vunpack.c.l.s4 %v1687_v13 }
  0x62   : > { %1125 = vmatprep.subr.bf16.mxu1 %v1571_v26  ;;  %1145 = vmatprep.mubr.bf16.mxu1 %v747_v62  ;;  %v657_v26 = vld [vmem:[#allocation2] sm:$0xf] }
  0x63   : > { %v1159_v15 = vunpack.c.0.s8 %v1158_v14 }
  0x64   : > { %1085 = vmatpush1.bf16.msra.mxu0 %v1573_v27 }
  0x65   : > { %1126 = vmatpush1.bf16.msra.mxu1 %v1574_v28  ;;  %1086 = vmatprep.subr.bf16.mxu0 %v1575_v29  ;;  %v1162_v22 = vsub.s32 %v1159_v15, %v1984_v47 }
  0x66   : > { %1127 = vmatprep.subr.bf16.mxu1 %v1577_v30 }
  0x68   : > { %1087 = vmatpush1.bf16.msra.mxu0 %v1579_v31 }
  0x69   : > { %1128 = vmatpush1.bf16.msra.mxu1 %v1580_v32  ;;  %1088 = vmatprep.subr.bf16.mxu0 %v1581_v33 }
  0x6a   : > { %1129 = vmatprep.subr.bf16.mxu1 %v1583_v34 }
  0x6c   : > { %1089 = vmatpush2.bf16.msra.mxu0 %v1585_v35 }
  0x6d   : > { %1130 = vmatpush2.bf16.msra.mxu1 %v1586_v36  ;;  %1090 = vmatprep.subr.bf16.mxu0 %v1587_v37 }
  0x6e   : > { %1131 = vmatprep.subr.bf16.mxu1 %v1589_v38 }
  0x70   : > { %1091 = vmatpush2.bf16.msra.mxu0 %v1591_v42 }
  0x71   : > { %1132 = vmatpush2.bf16.msra.mxu1 %v1592_v43  ;;  %1092 = vmatprep.subr.bf16.mxu0 %v1593_v44 }
  0x72   : > { %1133 = vmatprep.subr.bf16.mxu1 %v1595_v45 }
  0x74   : > { %1093 = vmatpush2.bf16.msra.mxu0 %v1597_v48 }
  0x75   : > { %1134 = vmatpush2.bf16.msra.mxu1 %v1598_v49  ;;  %1094 = vmatprep.subr.bf16.mxu0 %v1599_v50 }
  0x76   : > { %1135 = vmatprep.subr.bf16.mxu1 %v1601_v51 }
  0x78   : > { %1095 = vmatpush2.bf16.msra.mxu0 %v1603_v54 }
  0x79   : > { %1136 = vmatpush2.bf16.msra.mxu1 %v1604_v55  ;;  %1096 = vmatprep.subr.bf16.mxu0 %v1605_v57 }
  0x7a   : > { %1137 = vmatprep.subr.bf16.mxu1 %v1607_v58 }
  0x7c   : > { %1097 = vmatpush2.bf16.msra.mxu0 %v1609_v60 }
  0x7d   : > { %1138 = vmatpush2.bf16.msra.mxu1 %v1610_v61  ;;  %1098 = vmatprep.subr.bf16.mxu0 %v1611_v63 }
  0x7e   : > { %1139 = vmatprep.subr.bf16.mxu1 %v1613_v0 }
  0x80   : > { %1099 = vmatpush2.bf16.msra.mxu0 %v1615_v1 }
  0x81   : > { %1140 = vmatpush2.bf16.msra.mxu1 %v1616_v2  ;;  %1100 = vmatprep.subr.bf16.mxu0 %v1617_v3 }
  0x82   : > { %1141 = vmatprep.subr.bf16.mxu1 %v1619_v4 }
  0x84   : > { %1101 = vmatpush2.bf16.msra.mxu0 %v1621_v5 }
  0x85   : > { %1142 = vmatpush2.bf16.msra.mxu1 %v1622_v6  ;;  %1102 = vmatprep.subr.bf16.mxu0 %v1623_v7 }
  0x86   : > { %1143 = vmatprep.subr.bf16.mxu1 %v1625_v8 }
  0x88   : > { %1103 = vmatpush2.bf16.msra.mxu0 %v1627_v10 }
  0x89   : > { %1144 = vmatpush2.bf16.msra.mxu1 %v1628_v11 }
  0x8b   : > { %1105 = vmatmul.mubr.bf16.vlgmr.msra.gmra.mxu0 %v738_v9 }
  0x8c   : > { %1146 = vmatmul.mubr.bf16.vlgmr.msra.gmra.mxu1 %v746_v12 }
 0x14b   : > { %v1106_v16 = vpop.f32.mrf.mxu0 }
 0x14c   : > { %v1147_v17 = vpop.f32.mrf.mxu1 }
 0x14d   : > { %v1108_v18 = vpop.f32.mrf.mxu0  ;;  %v1148_v20 = vadd.f32 %v1147_v17, %v1106_v16 }
 0x14e   : > { %v1149_v19 = vpop.f32.mrf.mxu1 }
 0x14f   : > { %v1150_v21 = vadd.f32 %v1149_v19, %v1108_v18  ;;  %v1110_v23 = vpop.f32.mrf.mxu0 }
 0x150   : > { %v1151_v24 = vpop.f32.mrf.mxu1 }
 0x151   : > { %v1156_v25 = vcombine.low %v1148_v20, %v1150_v21  ;;  %v1111_v27 = vpop.f32.mrf.mxu0 }
 0x152   : > { %v1152_v28 = vpop.f32.mrf.mxu1 }
 0x153   : > { %v1163_v29 = vrot.slane %v1156_v25, %v1162_v22  ;;  %1170 = sbr.rel (%p1468_p13) target bundleno = 369 (0x171), region = 86 }
 0x155   : > { %v1165_v30 = vadd.f32 %v1163_v29, %v657_v26 }
 0x157   : > { %1166 = vst [vmem:[#allocation2] sm:$0xf] %v1165_v30 }
 0x158   : > { %v1172_v31 = vld [vmem:[%s627_s18] sm:$0x3]  ;;  %v1176_v32 = vsub.s32 0, %v1984_v47  ;;  %v1180_v33 = vsub.s32 1, %v1984_v47 }
 0x159   : > { %v1192_v34 = vld [vmem:[%s632_s12] sm:$0x3] }
 0x15a   : > { %v1177_v35 = vrot.slane %v1172_v31, %v1176_v32  ;;  %v1181_v36 = vrot.slane %v1172_v31, %v1180_v33  ;;  %v1197_v37 = vrot.slane %v1192_v34, %v1176_v32  ;;  %v1201_v38 = vrot.slane %v1192_v34, %v1180_v33  ;;  %v1212_v42 = vld [vmem:[%s641_s15] sm:$0x3] }
 0x15b   : > { %v1213_v46 = vunpack.c.l.bf16 %v1212_v42 }
 0x15c   : > { %v1182_v39 = vcombine.low %v1177_v35, %v1181_v36  ;;  %v1202_v40 = vcombine.low %v1197_v37, %v1201_v38 }
 0x15e   : > { %v1171_v41 = vld [vmem:[#allocation2] sm:$0xf]  ;;  %v1189_v43 = vrot.slane %v1182_v39, %v1162_v22  ;;  %v1209_v44 = vrot.slane %v1202_v40, %v1162_v22 }
 0x160   : > { %v1191_v45 = vmul.f32 %v1189_v43, %v1171_v41 }
 0x162   : > { %v1211_v47 = vadd.f32 %v1209_v44, %v1191_v45 }
 0x164   : > { %v1214_v48 = vadd.f32 %v1213_v46, %v1211_v47 }
 0x166   : > { %v1215_v49 = vmax.f32 %v1214_v48, 0.0 }
 0x168   : > { %v1223_v50 = vrot.slane %v1215_v49, %v1162_v22 }
 0x16a   : > { %v1224_v51 = vcombine.high %v1223_v50, %v1223_v50 }
 0x16c   : > { %v1469_v53 = vpack.c.bf16 %v1224_v51, %v1223_v50 }
 0x16e   : > { %v1238_v54 = vrot.slane %v1469_v53, %v1991_v52 }
 0x170   : > { %1470 = vst.sshfl [vmem:[%s650_s30] sm:$0x5 pattern:$0x73625140] %v1238_v54 }
 0x171 PF: > { %s15_s24 = sadd.s32 1, %s1683_s24   ;;  %s2070_s18 = smov %s1663_s19 }
 0x172   : > { %p12_p0 = scmp.ge.s32.totalorder %s15_s24, 20   ;;  %s2071_s19 = smov %s1769_s6 }
 0x173   : > { %s2072_s20 = smov %s1675_s22  ;;  %s2073_s21 = smov %s1679_s23 }
 0x174   : > { %s2074_s22 = smov %s2077_s25  ;;  %s2075_s23 = smov %s2081_s26 }
 0x175   :  { %14 = sbr.rel (!%p12_p0) target bundleno = 4 (0x4), region = 133 }

// kernel: resnet18_forward.42
= control target key start
LH: loop header
LB: loop body
LE: loop exit
PB: predicated region body
PF: predicated region fallthrough
CT: control target
= control target key end

     0   :  { %s1634_s15 = smov 0   ;;  %s1636_s16 = smov 0   ;;  %s1971_s0 = inlined_call_operand.vmem [shape: bf16[2,4608], index: 0, kind: input, shape index: {}]   ;;  %s1972_s1 = inlined_call_operand.vmem [shape: bf16[4608,512], index: 1, kind: input, shape index: {}]   ;;  %s1973_s2 = inlined_call_operand.vmem [shape: f32[1,512], index: 2, kind: input, shape index: {}]   ;;  %s1974_s3 = inlined_call_operand.vmem [shape: f32[1,512], index: 3, kind: input, shape index: {}]   ;;  %s1975_s4 = inlined_call_operand.vmem [shape: bf16[2,512], index: 4, kind: output, shape index: {}]  }
   0x1   :  { %s1638_s17 = smov 0   ;;  %s1640_s18 = smov 0  }
   0x2   :  { %s1642_s19 = smov 0   ;;  %s1644_s20 = smov 0  }
   0x3   :  { %s1646_s21 = smov 0  }
   0x4 LB: > { %s26_s22 = sadd.s32 1, %s1596_s19  ;;  %s29_s23 = sadd.s32 1, %s1600_s20  ;;  %s1604_s21 = sphi %s1646_s21, %s14_s21   ;;  %s1600_s20 = sphi %s1644_s20, %s1981_s20   ;;  %s1596_s19 = sphi %s1642_s19, %s1980_s19   ;;  %s1592_s18 = sphi %s1640_s18, %s1979_s18   ;;  %s1588_s17 = sphi %s1638_s17, %s1978_s17   ;;  %s1584_s16 = sphi %s1636_s16, %s1977_s16   ;;  %s1580_s15 = sphi %s1634_s15, %s1976_s15  }
   0x5   : > { %p27_p0 = scmp.ge.s32.totalorder %s26_s22, 9  ;;  %p77_p1 = scmp.ne.s32.totalorder %s1584_s16, %s1580_s15 }
   0x6   : > { %p78_p2 = scmp.eq.s32.totalorder %s1604_s21, 0  ;;  %s70_s27 = sadd.s32 1, %s1584_s16 }
   0x7   : > { %s1983_s22 = smov (%p27_p0, %s26_s22), 0  ;;  %s1985_s23 = smov (!%p27_p0, %s29_s23), %s1600_s20 }
   0x8   : > { %p79_p3 = por %p78_p2, %p77_p1  ;;  %p31_p4 = scmp.ge.s32.totalorder %s1985_s23, 2 }
   0x9   : > { %s65_s24 = ssub.s32 %s1596_s19, %s1983_s22  ;;  %p1311_p6 = scmp.ge.s32.totalorder %s1604_s21, 18 }
   0xa   : > { %s1987_s23 = smov (%p31_p4, %s1985_s23), 0 }
   0xb   : > { %s66_s25 = ssub.s32 %s1600_s20, %s1987_s23  ;;  %183 = sbr.rel (%p1311_p6) target bundleno = 55 (0x37), region = 16 }
   0xc   : > { %s67_s26 = sor.u32 %s66_s25, %s65_s24 }
   0xd   : > { %p68_p5 = scmp.eq.s32.totalorder %s67_s26, 0 }
   0xf   : > { %s1685_s28 = scalar_select %p68_p5, %s1584_s16, %s70_s27  }
  0x10   : > { %198 = sbr.rel (!%p79_p3) target bundleno = 55 (0x37), region = 24  ;;  %s200_s29 = sand.u32 (%p79_p3), 1, %s1584_s16  }
  0x11   : > { %s1314_s30 = sshll.u32 (%p79_p3), %s1600_s20, 1  ;;  %s1312_s5 = sshll.u32 (%p79_p3), %s200_s29, 9 }
  0x12   : > { %s1394_s6 = sshll.u32 (%p79_p3), %s1596_s19, 8  ;;  %s1699_s12 = scalar_lea.vmem (%p79_p3), [#allocation3], %s1312_s5 }
  0x13   : > { %s206_s7 = sadd.s32 (%p79_p3), %s1394_s6, %s1314_s30 }
  0x14   : > { %s1316_s8 = sshll.u32 (%p79_p3), %s206_s7, 2 }
  0x15   : > { %s1694_s11 = scalar_lea.vmem %s1972_s1, %s1316_s8 }
  0x16   : > { %v363_v0 = vld [vmem:[%s1694_s11] sm:$0xff]  ;;  %v365_v1 = vld [vmem:[%s1694_s11 + $0x10] sm:$0xff] }
  0x17   : > { %v367_v2 = vld [vmem:[%s1694_s11 + $0x20] sm:$0xff]  ;;  %364 = vst [vmem:[%s1699_s12] sm:$0xff] %v363_v0  ;;  %366 = vst [vmem:[%s1699_s12 + $0x8] sm:$0xff] %v365_v1  ;;  %v369_v3 = vld [vmem:[%s1694_s11 + $0x30] sm:$0xff] }
  0x18   : > { %368 = vst [vmem:[%s1699_s12 + $0x10] sm:$0xff] %v367_v2  ;;  %v371_v4 = vld [vmem:[%s1694_s11 + $0x40] sm:$0xff]  ;;  %v373_v5 = vld [vmem:[%s1694_s11 + $0x50] sm:$0xff]  ;;  %370 = vst [vmem:[%s1699_s12 + $0x18] sm:$0xff] %v369_v3 }
  0x19   : > { %372 = vst [vmem:[%s1699_s12 + $0x20] sm:$0xff] %v371_v4  ;;  %374 = vst [vmem:[%s1699_s12 + $0x28] sm:$0xff] %v373_v5  ;;  %v375_v6 = vld [vmem:[%s1694_s11 + $0x60] sm:$0xff]  ;;  %v377_v7 = vld [vmem:[%s1694_s11 + $0x70] sm:$0xff] }
  0x1a   : > { %v379_v8 = vld [vmem:[%s1694_s11 + $0x80] sm:$0xff]  ;;  %376 = vst [vmem:[%s1699_s12 + $0x30] sm:$0xff] %v375_v6  ;;  %378 = vst [vmem:[%s1699_s12 + $0x38] sm:$0xff] %v377_v7  ;;  %v381_v9 = vld [vmem:[%s1694_s11 + $0x90] sm:$0xff] }
  0x1b   : > { %380 = vst [vmem:[%s1699_s12 + $0x40] sm:$0xff] %v379_v8  ;;  %v383_v10 = vld [vmem:[%s1694_s11 + $0xa0] sm:$0xff]  ;;  %v385_v11 = vld [vmem:[%s1694_s11 + $0xb0] sm:$0xff]  ;;  %382 = vst [vmem:[%s1699_s12 + $0x48] sm:$0xff] %v381_v9 }
  0x1c   : > { %384 = vst [vmem:[%s1699_s12 + $0x50] sm:$0xff] %v383_v10  ;;  %386 = vst [vmem:[%s1699_s12 + $0x58] sm:$0xff] %v385_v11  ;;  %v387_v12 = vld [vmem:[%s1694_s11 + $0xc0] sm:$0xff]  ;;  %v389_v13 = vld [vmem:[%s1694_s11 + $0xd0] sm:$0xff] }
  0x1d   : > { %v391_v14 = vld [vmem:[%s1694_s11 + $0xe0] sm:$0xff]  ;;  %388 = vst [vmem:[%s1699_s12 + $0x60] sm:$0xff] %v387_v12  ;;  %390 = vst [vmem:[%s1699_s12 + $0x68] sm:$0xff] %v389_v13  ;;  %v393_v15 = vld [vmem:[%s1694_s11 + $0xf0] sm:$0xff] }
  0x1e   : > { %392 = vst [vmem:[%s1699_s12 + $0x70] sm:$0xff] %v391_v14  ;;  %v395_v16 = vld [vmem:[%s1694_s11 + $0x100] sm:$0xff]  ;;  %v397_v17 = vld [vmem:[%s1694_s11 + $0x110] sm:$0xff]  ;;  %394 = vst [vmem:[%s1699_s12 + $0x78] sm:$0xff] %v393_v15 }
  0x1f   : > { %396 = vst [vmem:[%s1699_s12 + $0x80] sm:$0xff] %v395_v16  ;;  %398 = vst [vmem:[%s1699_s12 + $0x88] sm:$0xff] %v397_v17  ;;  %v399_v18 = vld [vmem:[%s1694_s11 + $0x120] sm:$0xff]  ;;  %v401_v19 = vld [vmem:[%s1694_s11 + $0x130] sm:$0xff] }
  0x20   : > { %v403_v20 = vld [vmem:[%s1694_s11 + $0x140] sm:$0xff]  ;;  %400 = vst [vmem:[%s1699_s12 + $0x90] sm:$0xff] %v399_v18  ;;  %402 = vst [vmem:[%s1699_s12 + $0x98] sm:$0xff] %v401_v19  ;;  %v405_v21 = vld [vmem:[%s1694_s11 + $0x150] sm:$0xff] }
  0x21   : > { %404 = vst [vmem:[%s1699_s12 + $0xa0] sm:$0xff] %v403_v20  ;;  %v407_v22 = vld [vmem:[%s1694_s11 + $0x160] sm:$0xff]  ;;  %v409_v23 = vld [vmem:[%s1694_s11 + $0x170] sm:$0xff]  ;;  %406 = vst [vmem:[%s1699_s12 + $0xa8] sm:$0xff] %v405_v21 }
  0x22   : > { %408 = vst [vmem:[%s1699_s12 + $0xb0] sm:$0xff] %v407_v22  ;;  %410 = vst [vmem:[%s1699_s12 + $0xb8] sm:$0xff] %v409_v23  ;;  %v411_v24 = vld [vmem:[%s1694_s11 + $0x180] sm:$0xff]  ;;  %v413_v25 = vld [vmem:[%s1694_s11 + $0x190] sm:$0xff] }
  0x23   : > { %v415_v26 = vld [vmem:[%s1694_s11 + $0x1a0] sm:$0xff]  ;;  %412 = vst [vmem:[%s1699_s12 + $0xc0] sm:$0xff] %v411_v24  ;;  %414 = vst [vmem:[%s1699_s12 + $0xc8] sm:$0xff] %v413_v25  ;;  %v417_v27 = vld [vmem:[%s1694_s11 + $0x1b0] sm:$0xff] }
  0x24   : > { %416 = vst [vmem:[%s1699_s12 + $0xd0] sm:$0xff] %v415_v26  ;;  %v419_v28 = vld [vmem:[%s1694_s11 + $0x1c0] sm:$0xff]  ;;  %v421_v29 = vld [vmem:[%s1694_s11 + $0x1d0] sm:$0xff]  ;;  %418 = vst [vmem:[%s1699_s12 + $0xd8] sm:$0xff] %v417_v27 }
  0x25   : > { %420 = vst [vmem:[%s1699_s12 + $0xe0] sm:$0xff] %v419_v28  ;;  %422 = vst [vmem:[%s1699_s12 + $0xe8] sm:$0xff] %v421_v29  ;;  %v423_v30 = vld [vmem:[%s1694_s11 + $0x1e0] sm:$0xff]  ;;  %v425_v31 = vld [vmem:[%s1694_s11 + $0x1f0] sm:$0xff] }
  0x26   : > { %v427_v32 = vld [vmem:[%s1694_s11 + $0x200] sm:$0xff]  ;;  %424 = vst [vmem:[%s1699_s12 + $0xf0] sm:$0xff] %v423_v30  ;;  %426 = vst [vmem:[%s1699_s12 + $0xf8] sm:$0xff] %v425_v31  ;;  %v429_v33 = vld [vmem:[%s1694_s11 + $0x210] sm:$0xff] }
  0x27   : > { %428 = vst [vmem:[%s1699_s12 + $0x100] sm:$0xff] %v427_v32  ;;  %v431_v34 = vld [vmem:[%s1694_s11 + $0x220] sm:$0xff]  ;;  %v433_v35 = vld [vmem:[%s1694_s11 + $0x230] sm:$0xff]  ;;  %430 = vst [vmem:[%s1699_s12 + $0x108] sm:$0xff] %v429_v33 }
  0x28   : > { %432 = vst [vmem:[%s1699_s12 + $0x110] sm:$0xff] %v431_v34  ;;  %434 = vst [vmem:[%s1699_s12 + $0x118] sm:$0xff] %v433_v35  ;;  %v435_v36 = vld [vmem:[%s1694_s11 + $0x240] sm:$0xff]  ;;  %v437_v37 = vld [vmem:[%s1694_s11 + $0x250] sm:$0xff] }
  0x29   : > { %v439_v38 = vld [vmem:[%s1694_s11 + $0x260] sm:$0xff]  ;;  %436 = vst [vmem:[%s1699_s12 + $0x120] sm:$0xff] %v435_v36  ;;  %438 = vst [vmem:[%s1699_s12 + $0x128] sm:$0xff] %v437_v37  ;;  %v441_v39 = vld [vmem:[%s1694_s11 + $0x270] sm:$0xff] }
  0x2a   : > { %440 = vst [vmem:[%s1699_s12 + $0x130] sm:$0xff] %v439_v38  ;;  %v443_v40 = vld [vmem:[%s1694_s11 + $0x280] sm:$0xff]  ;;  %v445_v41 = vld [vmem:[%s1694_s11 + $0x290] sm:$0xff]  ;;  %442 = vst [vmem:[%s1699_s12 + $0x138] sm:$0xff] %v441_v39 }
  0x2b   : > { %444 = vst [vmem:[%s1699_s12 + $0x140] sm:$0xff] %v443_v40  ;;  %446 = vst [vmem:[%s1699_s12 + $0x148] sm:$0xff] %v445_v41  ;;  %v447_v42 = vld [vmem:[%s1694_s11 + $0x2a0] sm:$0xff]  ;;  %v449_v43 = vld [vmem:[%s1694_s11 + $0x2b0] sm:$0xff] }
  0x2c   : > { %v451_v44 = vld [vmem:[%s1694_s11 + $0x2c0] sm:$0xff]  ;;  %448 = vst [vmem:[%s1699_s12 + $0x150] sm:$0xff] %v447_v42  ;;  %450 = vst [vmem:[%s1699_s12 + $0x158] sm:$0xff] %v449_v43  ;;  %v453_v45 = vld [vmem:[%s1694_s11 + $0x2d0] sm:$0xff] }
  0x2d   : > { %452 = vst [vmem:[%s1699_s12 + $0x160] sm:$0xff] %v451_v44  ;;  %v455_v46 = vld [vmem:[%s1694_s11 + $0x2e0] sm:$0xff]  ;;  %v457_v47 = vld [vmem:[%s1694_s11 + $0x2f0] sm:$0xff]  ;;  %454 = vst [vmem:[%s1699_s12 + $0x168] sm:$0xff] %v453_v45 }
  0x2e   : > { %456 = vst [vmem:[%s1699_s12 + $0x170] sm:$0xff] %v455_v46  ;;  %458 = vst [vmem:[%s1699_s12 + $0x178] sm:$0xff] %v457_v47  ;;  %v459_v48 = vld [vmem:[%s1694_s11 + $0x300] sm:$0xff]  ;;  %v461_v49 = vld [vmem:[%s1694_s11 + $0x310] sm:$0xff] }
  0x2f   : > { %v463_v50 = vld [vmem:[%s1694_s11 + $0x320] sm:$0xff]  ;;  %460 = vst [vmem:[%s1699_s12 + $0x180] sm:$0xff] %v459_v48  ;;  %462 = vst [vmem:[%s1699_s12 + $0x188] sm:$0xff] %v461_v49  ;;  %v465_v51 = vld [vmem:[%s1694_s11 + $0x330] sm:$0xff] }
  0x30   : > { %464 = vst [vmem:[%s1699_s12 + $0x190] sm:$0xff] %v463_v50  ;;  %v467_v52 = vld [vmem:[%s1694_s11 + $0x340] sm:$0xff]  ;;  %v469_v53 = vld [vmem:[%s1694_s11 + $0x350] sm:$0xff]  ;;  %466 = vst [vmem:[%s1699_s12 + $0x198] sm:$0xff] %v465_v51 }
  0x31   : > { %468 = vst [vmem:[%s1699_s12 + $0x1a0] sm:$0xff] %v467_v52  ;;  %470 = vst [vmem:[%s1699_s12 + $0x1a8] sm:$0xff] %v469_v53  ;;  %v471_v54 = vld [vmem:[%s1694_s11 + $0x360] sm:$0xff]  ;;  %v473_v55 = vld [vmem:[%s1694_s11 + $0x370] sm:$0xff] }
  0x32   : > { %v475_v56 = vld [vmem:[%s1694_s11 + $0x380] sm:$0xff]  ;;  %472 = vst [vmem:[%s1699_s12 + $0x1b0] sm:$0xff] %v471_v54  ;;  %474 = vst [vmem:[%s1699_s12 + $0x1b8] sm:$0xff] %v473_v55  ;;  %v477_v57 = vld [vmem:[%s1694_s11 + $0x390] sm:$0xff] }
  0x33   : > { %476 = vst [vmem:[%s1699_s12 + $0x1c0] sm:$0xff] %v475_v56  ;;  %v479_v58 = vld [vmem:[%s1694_s11 + $0x3a0] sm:$0xff]  ;;  %v481_v59 = vld [vmem:[%s1694_s11 + $0x3b0] sm:$0xff]  ;;  %478 = vst [vmem:[%s1699_s12 + $0x1c8] sm:$0xff] %v477_v57 }
  0x34   : > { %480 = vst [vmem:[%s1699_s12 + $0x1d0] sm:$0xff] %v479_v58  ;;  %482 = vst [vmem:[%s1699_s12 + $0x1d8] sm:$0xff] %v481_v59  ;;  %v483_v60 = vld [vmem:[%s1694_s11 + $0x3c0] sm:$0xff]  ;;  %v485_v61 = vld [vmem:[%s1694_s11 + $0x3d0] sm:$0xff] }
  0x35   : > { %v487_v62 = vld [vmem:[%s1694_s11 + $0x3e0] sm:$0xff]  ;;  %484 = vst [vmem:[%s1699_s12 + $0x1e0] sm:$0xff] %v483_v60  ;;  %486 = vst [vmem:[%s1699_s12 + $0x1e8] sm:$0xff] %v485_v61  ;;  %v489_v63 = vld [vmem:[%s1694_s11 + $0x3f0] sm:$0xff] }
  0x36   : > { %488 = vst [vmem:[%s1699_s12 + $0x1f0] sm:$0xff] %v487_v62  ;;  %490 = vst [vmem:[%s1699_s12 + $0x1f8] sm:$0xff] %v489_v63 }
  0x37 PF: > { %p1317_p7 = scmp.ge.s32.totalorder %s1604_s21, 1  ;;  %p511_p8 = scmp.lt.s32.totalorder %s1604_s21, 19 }
  0x39   : > { %p512_p9 = pnand %p1317_p7, %p511_p8 }
  0x3a   : > { %s518_s13 = sand.u32 (!%p512_p9), 1, %s1580_s15   ;;  %s1319_s14 = sshll.u32 (!%p512_p9), %s1588_s17, 2 }
  0x3b   : > { %515 = sbr.rel (%p512_p9) target bundleno = 367 (0x16f), region = 70  ;;  %s1318_s24 = sshll.u32 (!%p512_p9), %s518_s13, 9 }
  0x3c   : > { %p565_p10 = scmp.lt.s32.totalorder (!%p512_p9), %s1319_s14, 35  ;;  %s1320_s25 = sshll.u32 (!%p512_p9), %s1592_s18, 1 }
  0x3d   : > { %p574_p11 = scmp.lt.s32.totalorder (!%p512_p9), %s1320_s25, 3  ;;  %s1851_s11 = scalar_lea.vmem (!%p512_p9), [#allocation3], %s1318_s24 }
  0x3e   : > { %p1323_p12 = scmp.ne.s32.totalorder (!%p512_p9), %s1588_s17, 0 }
  0x40   : > { %s1989_s14 = smov (!%p565_p10, %s1319_s14), 35  ;;  %s1991_s25 = smov (!%p574_p11, %s1320_s25), 3 }
  0x41   : > { %s569_s29 = scalar_lea.vmem %s1971_s0, %s1989_s14  ;;  %s576_s15 = scalar_lea.vmem %s1973_s2, %s1991_s25 }
  0x42   : > { %s581_s18 = scalar_lea.vmem %s1974_s3, %s1991_s25  ;;  %s590_s10 = scalar_lea.vmem %s1975_s4, %s1991_s25 }
  0x43   : > { %595 = sbr.rel (%p1323_p12) target bundleno = 74 (0x4a), region = 78 }
  0x48   : > { %v1606_v0 = vmov 0.0  }
  0x49   : > { %596 = vst [vmem:[#allocation2] sm:$0xf] %v1606_v0 }
  0x4a PF: > { %v1454_v1 = vld [vmem:[%s1851_s11 + $0x74] ss:$8 sps:$4 sm:$0xff]   ;;  %v1458_v3 = vld [vmem:[%s1851_s11 + $0x70] ss:$8 sps:$4 sm:$0xff]   ;;  %v1460_v5 = vld [vmem:[%s1851_s11 + $0x64] ss:$8 sps:$4 sm:$0xff]   ;;  %v675_v41 = vlaneseq }
  0x4b   : > { %v1456_v2 = vld [vmem:[%s1851_s11 + $0x174] ss:$8 sps:$4 sm:$0xff]   ;;  %1012 = vmatprep.subr.bf16.mxu0 %v1454_v1  ;;  %v1459_v4 = vld [vmem:[%s1851_s11 + $0x170] ss:$8 sps:$4 sm:$0xff]   ;;  %v1462_v6 = vld [vmem:[%s1851_s11 + $0x164] ss:$8 sps:$4 sm:$0xff]  }
  0x4c   : > { %1053 = vmatprep.subr.bf16.mxu1 %v1456_v2  ;;  %1013 = vmatpush1.bf16.msra.mxu0 %v1458_v3  ;;  %v1464_v7 = vld [vmem:[%s1851_s11 + $0x60] ss:$8 sps:$4 sm:$0xff]   ;;  %v1466_v9 = vld [vmem:[%s1851_s11 + $0x54] ss:$8 sps:$4 sm:$0xff]   ;;  %v1470_v11 = vld [vmem:[%s1851_s11 + $0x50] ss:$8 sps:$4 sm:$0xff]  }
  0x4d   : > { %1054 = vmatpush1.bf16.msra.mxu1 %v1459_v4  ;;  %1014 = vmatprep.subr.bf16.mxu0 %v1460_v5  ;;  %v1465_v8 = vld [vmem:[%s1851_s11 + $0x160] ss:$8 sps:$4 sm:$0xff]   ;;  %v1468_v10 = vld [vmem:[%s1851_s11 + $0x154] ss:$8 sps:$4 sm:$0xff]   ;;  %v1471_v12 = vld [vmem:[%s1851_s11 + $0x150] ss:$8 sps:$4 sm:$0xff]  }
  0x4e   : > { %1055 = vmatprep.subr.bf16.mxu1 %v1462_v6  ;;  %v1472_v13 = vld [vmem:[%s1851_s11 + $0x44] ss:$8 sps:$4 sm:$0xff]   ;;  %v1476_v15 = vld [vmem:[%s1851_s11 + $0x40] ss:$8 sps:$4 sm:$0xff]   ;;  %v1478_v17 = vld [vmem:[%s1851_s11 + $0x34] ss:$8 sps:$4 sm:$0xff]  }
  0x4f   : > { %v1474_v14 = vld [vmem:[%s1851_s11 + $0x144] ss:$8 sps:$4 sm:$0xff]   ;;  %v1477_v16 = vld [vmem:[%s1851_s11 + $0x140] ss:$8 sps:$4 sm:$0xff]   ;;  %v1480_v18 = vld [vmem:[%s1851_s11 + $0x134] ss:$8 sps:$4 sm:$0xff]  }
  0x50   : > { %1015 = vmatpush1.bf16.msra.mxu0 %v1464_v7  ;;  %v1482_v19 = vld [vmem:[%s1851_s11 + $0x30] ss:$8 sps:$4 sm:$0xff]   ;;  %v1484_v21 = vld [vmem:[%s1851_s11 + $0x24] ss:$8 sps:$4 sm:$0xff]   ;;  %v1488_v23 = vld [vmem:[%s1851_s11 + $0x20] ss:$8 sps:$4 sm:$0xff]  }
  0x51   : > { %1056 = vmatpush1.bf16.msra.mxu1 %v1465_v8  ;;  %1016 = vmatprep.subr.bf16.mxu0 %v1466_v9  ;;  %v1483_v20 = vld [vmem:[%s1851_s11 + $0x130] ss:$8 sps:$4 sm:$0xff]   ;;  %v1486_v22 = vld [vmem:[%s1851_s11 + $0x124] ss:$8 sps:$4 sm:$0xff]   ;;  %v1489_v24 = vld [vmem:[%s1851_s11 + $0x120] ss:$8 sps:$4 sm:$0xff]  }
  0x52   : > { %1057 = vmatprep.subr.bf16.mxu1 %v1468_v10  ;;  %v1490_v25 = vld [vmem:[%s1851_s11 + $0x14] ss:$8 sps:$4 sm:$0xff]   ;;  %v1494_v27 = vld [vmem:[%s1851_s11 + $0x10] ss:$8 sps:$4 sm:$0xff]   ;;  %v1496_v29 = vld [vmem:[%s1851_s11 + $0x4] ss:$8 sps:$4 sm:$0xff]  }
  0x53   : > { %v1492_v26 = vld [vmem:[%s1851_s11 + $0x114] ss:$8 sps:$4 sm:$0xff]   ;;  %v1495_v28 = vld [vmem:[%s1851_s11 + $0x110] ss:$8 sps:$4 sm:$0xff]   ;;  %v1498_v30 = vld [vmem:[%s1851_s11 + $0x104] ss:$8 sps:$4 sm:$0xff]  }
  0x54   : > { %1017 = vmatpush1.bf16.msra.mxu0 %v1470_v11  ;;  %v1500_v31 = vld [vmem:[%s1851_s11] ss:$8 sps:$4 sm:$0xff]   ;;  %v1502_v33 = vld [vmem:[%s1851_s11 + $0xf4] ss:$8 sps:$4 sm:$0xff]   ;;  %v1506_v35 = vld [vmem:[%s1851_s11 + $0xf0] ss:$8 sps:$4 sm:$0xff]  }
  0x55   : > { %1058 = vmatpush1.bf16.msra.mxu1 %v1471_v12  ;;  %1018 = vmatprep.subr.bf16.mxu0 %v1472_v13  ;;  %v1501_v32 = vld [vmem:[%s1851_s11 + $0x100] ss:$8 sps:$4 sm:$0xff]   ;;  %v1504_v34 = vld [vmem:[%s1851_s11 + $0x1f4] ss:$8 sps:$4 sm:$0xff]   ;;  %v1507_v36 = vld [vmem:[%s1851_s11 + $0x1f0] ss:$8 sps:$4 sm:$0xff]  }
  0x56   : > { %1059 = vmatprep.subr.bf16.mxu1 %v1474_v14  ;;  %v1508_v37 = vld [vmem:[%s1851_s11 + $0xe4] ss:$8 sps:$4 sm:$0xff]   ;;  %v1607_v39 = vmov 1966171168   ;;  %v1512_v42 = vld [vmem:[%s1851_s11 + $0xe0] ss:$8 sps:$4 sm:$0xff]  }
  0x57   : > { %v1510_v38 = vld [vmem:[%s1851_s11 + $0x1e4] ss:$8 sps:$4 sm:$0xff]   ;;  %v673_v40 = vunpack.c.l.s4 %v1607_v39  ;;  %v1513_v43 = vld [vmem:[%s1851_s11 + $0x1e0] ss:$8 sps:$4 sm:$0xff]   ;;  %v1514_v44 = vld [vmem:[%s1851_s11 + $0xd4] ss:$8 sps:$4 sm:$0xff]  }
  0x58   : > { %1019 = vmatpush1.bf16.msra.mxu0 %v1476_v15  ;;  %v1516_v45 = vld [vmem:[%s1851_s11 + $0x1d4] ss:$8 sps:$4 sm:$0xff]   ;;  %v1896_v47 = vshrl.u32 %v675_v41, 7  ;;  %v1518_v48 = vld [vmem:[%s1851_s11 + $0xd0] ss:$8 sps:$4 sm:$0xff]   ;;  %p1389_p13 = scmp.ne.s32.totalorder %s1588_s17, 8 }
  0x59   : > { %1060 = vmatpush1.bf16.msra.mxu1 %v1477_v16  ;;  %1020 = vmatprep.subr.bf16.mxu0 %v1478_v17  ;;  %v674_v46 = vunpack.c.0.s8 %v673_v40  ;;  %v1519_v49 = vld [vmem:[%s1851_s11 + $0x1d0] ss:$8 sps:$4 sm:$0xff]   ;;  %v1520_v50 = vld [vmem:[%s1851_s11 + $0xc4] ss:$8 sps:$4 sm:$0xff]   ;;  %v1524_v54 = vld [vmem:[%s1851_s11 + $0xc0] ss:$8 sps:$4 sm:$0xff]  }
  0x5a   : > { %1061 = vmatprep.subr.bf16.mxu1 %v1480_v18  ;;  %v1522_v51 = vld [vmem:[%s1851_s11 + $0x1c4] ss:$8 sps:$4 sm:$0xff]   ;;  %v1324_v53 = vld.sshfl [vmem:[%s569_s29] sm:$0x33 pattern:$0x75316420] }
  0x5b   : > { %v1903_v52 = vsub.s32 %v674_v46, %v1896_v47  ;;  %v1525_v55 = vld [vmem:[%s1851_s11 + $0x1c0] ss:$8 sps:$4 sm:$0xff]   ;;  %v671_v56 = vcombine.high %v1324_v53, %v1324_v53  ;;  %v1526_v57 = vld [vmem:[%s1851_s11 + $0xb4] ss:$8 sps:$4 sm:$0xff]   ;;  %v1530_v60 = vld [vmem:[%s1851_s11 + $0xb0] ss:$8 sps:$4 sm:$0xff]  }
  0x5c   : > { %1021 = vmatpush1.bf16.msra.mxu0 %v1482_v19  ;;  %v1528_v58 = vld [vmem:[%s1851_s11 + $0x1b4] ss:$8 sps:$4 sm:$0xff]   ;;  %v1531_v61 = vld [vmem:[%s1851_s11 + $0x1b0] ss:$8 sps:$4 sm:$0xff]   ;;  %v1532_v63 = vld [vmem:[%s1851_s11 + $0xa4] ss:$8 sps:$4 sm:$0xff]  }
  0x5d   : > { %1062 = vmatpush1.bf16.msra.mxu1 %v1483_v20  ;;  %1022 = vmatprep.subr.bf16.mxu0 %v1484_v21  ;;  %v685_v59 = vrot.slane %v671_v56, %v1903_v52  ;;  %v1534_v0 = vld [vmem:[%s1851_s11 + $0x1a4] ss:$8 sps:$4 sm:$0xff]   ;;  %v1536_v1 = vld [vmem:[%s1851_s11 + $0xa0] ss:$8 sps:$4 sm:$0xff]   ;;  %v1538_v3 = vld [vmem:[%s1851_s11 + $0x94] ss:$8 sps:$4 sm:$0xff]   ;;  %v678_v9 = vrot.slane %v1324_v53, %v1903_v52 }
  0x5e   : > { %1063 = vmatprep.subr.bf16.mxu1 %v1486_v22  ;;  %v1537_v2 = vld [vmem:[%s1851_s11 + $0x1a0] ss:$8 sps:$4 sm:$0xff]   ;;  %v1540_v4 = vld [vmem:[%s1851_s11 + $0x194] ss:$8 sps:$4 sm:$0xff]   ;;  %v1542_v5 = vld [vmem:[%s1851_s11 + $0x90] ss:$8 sps:$4 sm:$0xff]  }
  0x5f   : > { %v687_v62 = vcombine.high %v685_v59, %v685_v59  ;;  %1044 = vmatprep.mubr.bf16.mxu0 %v685_v59  ;;  %v1543_v6 = vld [vmem:[%s1851_s11 + $0x190] ss:$8 sps:$4 sm:$0xff]   ;;  %v1544_v7 = vld [vmem:[%s1851_s11 + $0x84] ss:$8 sps:$4 sm:$0xff]   ;;  %v1548_v10 = vld [vmem:[%s1851_s11 + $0x80] ss:$8 sps:$4 sm:$0xff]   ;;  %v686_v12 = vcombine.high %v678_v9, %v678_v9 }
  0x60   : > { %1023 = vmatpush1.bf16.msra.mxu0 %v1488_v23  ;;  %v1546_v8 = vld [vmem:[%s1851_s11 + $0x184] ss:$8 sps:$4 sm:$0xff]   ;;  %v1549_v11 = vld [vmem:[%s1851_s11 + $0x180] ss:$8 sps:$4 sm:$0xff]   ;;  %v1608_v13 = vmov 1983009808  }
  0x61   : > { %1064 = vmatpush1.bf16.msra.mxu1 %v1489_v24  ;;  %1024 = vmatprep.subr.bf16.mxu0 %v1490_v25  ;;  %v1098_v14 = vunpack.c.l.s4 %v1608_v13 }
  0x62   : > { %1065 = vmatprep.subr.bf16.mxu1 %v1492_v26  ;;  %1085 = vmatprep.mubr.bf16.mxu1 %v687_v62  ;;  %v597_v26 = vld [vmem:[#allocation2] sm:$0xf] }
  0x63   : > { %v1099_v15 = vunpack.c.0.s8 %v1098_v14 }
  0x64   : > { %1025 = vmatpush1.bf16.msra.mxu0 %v1494_v27 }
  0x65   : > { %1066 = vmatpush1.bf16.msra.mxu1 %v1495_v28  ;;  %1026 = vmatprep.subr.bf16.mxu0 %v1496_v29  ;;  %v1102_v22 = vsub.s32 %v1099_v15, %v1896_v47 }
  0x66   : > { %1067 = vmatprep.subr.bf16.mxu1 %v1498_v30 }
  0x68   : > { %1027 = vmatpush1.bf16.msra.mxu0 %v1500_v31 }
  0x69   : > { %1068 = vmatpush1.bf16.msra.mxu1 %v1501_v32  ;;  %1028 = vmatprep.subr.bf16.mxu0 %v1502_v33 }
  0x6a   : > { %1069 = vmatprep.subr.bf16.mxu1 %v1504_v34 }
  0x6c   : > { %1029 = vmatpush2.bf16.msra.mxu0 %v1506_v35 }
  0x6d   : > { %1070 = vmatpush2.bf16.msra.mxu1 %v1507_v36  ;;  %1030 = vmatprep.subr.bf16.mxu0 %v1508_v37 }
  0x6e   : > { %1071 = vmatprep.subr.bf16.mxu1 %v1510_v38 }
  0x70   : > { %1031 = vmatpush2.bf16.msra.mxu0 %v1512_v42 }
  0x71   : > { %1072 = vmatpush2.bf16.msra.mxu1 %v1513_v43  ;;  %1032 = vmatprep.subr.bf16.mxu0 %v1514_v44 }
  0x72   : > { %1073 = vmatprep.subr.bf16.mxu1 %v1516_v45 }
  0x74   : > { %1033 = vmatpush2.bf16.msra.mxu0 %v1518_v48 }
  0x75   : > { %1074 = vmatpush2.bf16.msra.mxu1 %v1519_v49  ;;  %1034 = vmatprep.subr.bf16.mxu0 %v1520_v50 }
  0x76   : > { %1075 = vmatprep.subr.bf16.mxu1 %v1522_v51 }
  0x78   : > { %1035 = vmatpush2.bf16.msra.mxu0 %v1524_v54 }
  0x79   : > { %1076 = vmatpush2.bf16.msra.mxu1 %v1525_v55  ;;  %1036 = vmatprep.subr.bf16.mxu0 %v1526_v57 }
  0x7a   : > { %1077 = vmatprep.subr.bf16.mxu1 %v1528_v58 }
  0x7c   : > { %1037 = vmatpush2.bf16.msra.mxu0 %v1530_v60 }
  0x7d   : > { %1078 = vmatpush2.bf16.msra.mxu1 %v1531_v61  ;;  %1038 = vmatprep.subr.bf16.mxu0 %v1532_v63 }
  0x7e   : > { %1079 = vmatprep.subr.bf16.mxu1 %v1534_v0 }
  0x80   : > { %1039 = vmatpush2.bf16.msra.mxu0 %v1536_v1 }
  0x81   : > { %1080 = vmatpush2.bf16.msra.mxu1 %v1537_v2  ;;  %1040 = vmatprep.subr.bf16.mxu0 %v1538_v3 }
  0x82   : > { %1081 = vmatprep.subr.bf16.mxu1 %v1540_v4 }
  0x84   : > { %1041 = vmatpush2.bf16.msra.mxu0 %v1542_v5 }
  0x85   : > { %1082 = vmatpush2.bf16.msra.mxu1 %v1543_v6  ;;  %1042 = vmatprep.subr.bf16.mxu0 %v1544_v7 }
  0x86   : > { %1083 = vmatprep.subr.bf16.mxu1 %v1546_v8 }
  0x88   : > { %1043 = vmatpush2.bf16.msra.mxu0 %v1548_v10 }
  0x89   : > { %1084 = vmatpush2.bf16.msra.mxu1 %v1549_v11 }
  0x8b   : > { %1045 = vmatmul.mubr.bf16.vlgmr.msra.gmra.mxu0 %v678_v9 }
  0x8c   : > { %1086 = vmatmul.mubr.bf16.vlgmr.msra.gmra.mxu1 %v686_v12 }
 0x14b   : > { %v1046_v16 = vpop.f32.mrf.mxu0 }
 0x14c   : > { %v1087_v17 = vpop.f32.mrf.mxu1 }
 0x14d   : > { %v1048_v18 = vpop.f32.mrf.mxu0  ;;  %v1088_v20 = vadd.f32 %v1087_v17, %v1046_v16 }
 0x14e   : > { %v1089_v19 = vpop.f32.mrf.mxu1 }
 0x14f   : > { %v1090_v21 = vadd.f32 %v1089_v19, %v1048_v18  ;;  %v1050_v23 = vpop.f32.mrf.mxu0 }
 0x150   : > { %v1091_v24 = vpop.f32.mrf.mxu1 }
 0x151   : > { %v1096_v25 = vcombine.low %v1088_v20, %v1090_v21  ;;  %v1051_v27 = vpop.f32.mrf.mxu0 }
 0x152   : > { %v1092_v28 = vpop.f32.mrf.mxu1 }
 0x153   : > { %v1103_v29 = vrot.slane %v1096_v25, %v1102_v22  ;;  %1110 = sbr.rel (%p1389_p13) target bundleno = 367 (0x16f), region = 82 }
 0x155   : > { %v1105_v30 = vadd.f32 %v1103_v29, %v597_v26 }
 0x157   : > { %1106 = vst [vmem:[#allocation2] sm:$0xf] %v1105_v30 }
 0x158   : > { %v1112_v31 = vld [vmem:[%s576_s15] sm:$0x3]  ;;  %v1116_v32 = vsub.s32 0, %v1896_v47  ;;  %v1120_v33 = vsub.s32 1, %v1896_v47 }
 0x159   : > { %v1132_v34 = vld [vmem:[%s581_s18] sm:$0x3] }
 0x15a   : > { %v1117_v35 = vrot.slane %v1112_v31, %v1116_v32  ;;  %v1121_v36 = vrot.slane %v1112_v31, %v1120_v33  ;;  %v1137_v37 = vrot.slane %v1132_v34, %v1116_v32  ;;  %v1141_v38 = vrot.slane %v1132_v34, %v1120_v33 }
 0x15c   : > { %v1122_v39 = vcombine.low %v1117_v35, %v1121_v36  ;;  %v1142_v40 = vcombine.low %v1137_v37, %v1141_v38 }
 0x15e   : > { %v1111_v41 = vld [vmem:[#allocation2] sm:$0xf]  ;;  %v1129_v42 = vrot.slane %v1122_v39, %v1102_v22  ;;  %v1149_v43 = vrot.slane %v1142_v40, %v1102_v22 }
 0x160   : > { %v1131_v44 = vmul.f32 %v1129_v42, %v1111_v41 }
 0x162   : > { %v1151_v45 = vadd.f32 %v1149_v43, %v1131_v44 }
 0x164   : > { %v1152_v46 = vmax.f32 %v1151_v45, 0.0 }
 0x166   : > { %v1160_v48 = vrot.slane %v1152_v46, %v1102_v22 }
 0x168   : > { %v1161_v47 = vcombine.high %v1160_v48, %v1160_v48 }
 0x16a   : > { %v1390_v49 = vpack.c.bf16 %v1161_v47, %v1160_v48 }
 0x16c   : > { %v1175_v50 = vrot.slane %v1390_v49, %v1903_v52 }
 0x16e   : > { %1391 = vst.sshfl [vmem:[%s590_s10] sm:$0x5 pattern:$0x73625140] %v1175_v50 }
 0x16f PF: > { %s14_s21 = sadd.s32 1, %s1604_s21   ;;  %s1976_s15 = smov %s1584_s16 }
 0x170   : > { %p11_p0 = scmp.ge.s32.totalorder %s14_s21, 20   ;;  %s1977_s16 = smov %s1685_s28 }
 0x171   : > { %s1978_s17 = smov %s1596_s19  ;;  %s1979_s18 = smov %s1600_s20 }
 0x172   : > { %s1980_s19 = smov %s1983_s22  ;;  %s1981_s20 = smov %s1987_s23 }
 0x173   :  { %13 = sbr.rel (!%p11_p0) target bundleno = 4 (0x4), region = 126 }

// kernel: resnet18_forward.44
= control target key start
LH: loop header
LB: loop body
LE: loop exit
PB: predicated region body
PF: predicated region fallthrough
CT: control target
= control target key end

     0   :  { %vm21_vm0 = vcmask 1041409   ;;  %vm23_vm1 = vcmask 1043459   ;;  %vm25_vm2 = vcmask 1045509   ;;  %vm27_vm3 = vcmask 1047559   ;;  %s55_s0 = inlined_call_operand.vmem [shape: bf16[2,1,512], index: 0, kind: input, shape index: {}]   ;;  %s56_s1 = inlined_call_operand.vmem [shape: f32[2,512], index: 1, kind: output, shape index: {}]  }
   0x1   :  { %v36_v0 = vld [vmem:[%s55_s0] sm:$0xff]  }
   0x2   :  { %v37_v1 = vunpack.c.l.bf16 %v36_v0  ;;  %v38_v2 = vunpack.c.h.bf16 %v36_v0 }
   0x4   :  { %v20_v3 = vrot.slane %v38_v2, 7 }
   0x6   :  { %v22_v4 = vsel %vm21_vm0, %v20_v3, %v37_v1 }
   0x7   :  { %v24_v5 = vsel %vm23_vm1, %v20_v3, %v22_v4 }
   0x8   :  { %v26_v6 = vsel %vm25_vm2, %v20_v3, %v24_v5 }
   0x9   :  { %v28_v7 = vsel %vm27_vm3, %v20_v3, %v26_v6 }
   0xa   :  { %30 = vst [vmem:[%s56_s1] sm:$0xff] %v28_v7 }

// kernel: resnet18_forward.45
= control target key start
LH: loop header
LB: loop body
LE: loop exit
PB: predicated region body
PF: predicated region fallthrough
CT: control target
= control target key end

     0   :  { %v2430_v35 = vmov 1966171168   ;;  %v302_v37 = vlaneseq  ;;  %s3332_s0 = inlined_call_operand.vmem [shape: bf16[2,512], index: 0, kind: input, shape index: {}]   ;;  %s3333_s1 = inlined_call_operand.vmem [shape: bf16[512,1000], index: 1, kind: input, shape index: {}]   ;;  %s3334_s2 = inlined_call_operand.vmem [shape: f32[1,1000], index: 2, kind: input, shape index: {}]   ;;  %s3335_s3 = inlined_call_operand.vmem [shape: f32[1,1000], index: 3, kind: input, shape index: {}]   ;;  %s3336_s4 = inlined_call_operand.hbm [shape: f32[2,1000], index: 4, kind: output, shape index: {}]  }
   0x1   :  { %v90_v0 = vld [vmem:[%s3333_s1 + $0x1c0] sm:$0xff]  ;;  %v300_v36 = vunpack.c.l.s4 %v2430_v35 }
   0x2   :  { %v94_v1 = vld [vmem:[%s3333_s1 + $0x1e0] sm:$0xff]  ;;  %v2531_v47 = vshrl.u32 %v302_v37, 7 }
   0x3   :  { %v218_v2 = vld [vmem:[%s3333_s1 + $0x5c0] sm:$0xff]  ;;  %v2205_v3 = vcombine.high %v90_v0, %v94_v1  ;;  %v2204_v5 = vcombine.low %v90_v0, %v94_v1  ;;  %v301_v46 = vunpack.c.0.s8 %v300_v36 }
   0x4   :  { %v222_v4 = vld [vmem:[%s3333_s1 + $0x5e0] sm:$0xff] }
   0x5   :  { %v82_v6 = vld [vmem:[%s3333_s1 + $0x180] sm:$0xff]  ;;  %v2333_v8 = vcombine.high %v218_v2, %v222_v4  ;;  %v2332_v9 = vcombine.low %v218_v2, %v222_v4  ;;  %1599 = vmatprep.subr.bf16.mxu0 %v2205_v3  ;;  %v2546_v56 = vsub.s32 %v301_v46, %v2531_v47 }
   0x6   :  { %v86_v7 = vld [vmem:[%s3333_s1 + $0x1a0] sm:$0xff]  ;;  %1600 = vmatpush1.bf16.msra.mxu0 %v2204_v5 }
   0x7   :  { %v2197_v10 = vcombine.high %v82_v6, %v86_v7  ;;  %v210_v11 = vld [vmem:[%s3333_s1 + $0x580] sm:$0xff]  ;;  %1640 = vmatprep.subr.bf16.mxu1 %v2333_v8  ;;  %v2196_v18 = vcombine.low %v82_v6, %v86_v7 }
   0x8   :  { %v214_v12 = vld [vmem:[%s3333_s1 + $0x5a0] sm:$0xff]  ;;  %1641 = vmatpush1.bf16.msra.mxu1 %v2332_v9 }
   0x9   :  { %v74_v13 = vld [vmem:[%s3333_s1 + $0x140] sm:$0xff]  ;;  %v2325_v14 = vcombine.high %v210_v11, %v214_v12  ;;  %1601 = vmatprep.subr.bf16.mxu0 %v2197_v10  ;;  %v2324_v19 = vcombine.low %v210_v11, %v214_v12 }
   0xa   :  { %v78_v15 = vld [vmem:[%s3333_s1 + $0x160] sm:$0xff]  ;;  %1602 = vmatpush1.bf16.msra.mxu0 %v2196_v18 }
   0xb   :  { %v202_v16 = vld [vmem:[%s3333_s1 + $0x540] sm:$0xff]  ;;  %v2189_v20 = vcombine.high %v74_v13, %v78_v15  ;;  %1642 = vmatprep.subr.bf16.mxu1 %v2325_v14  ;;  %v2188_v26 = vcombine.low %v74_v13, %v78_v15 }
   0xc   :  { %v206_v17 = vld [vmem:[%s3333_s1 + $0x560] sm:$0xff]  ;;  %1643 = vmatpush1.bf16.msra.mxu1 %v2324_v19 }
   0xd   :  { %v2317_v21 = vcombine.high %v202_v16, %v206_v17  ;;  %v66_v22 = vld [vmem:[%s3333_s1 + $0x100] sm:$0xff]  ;;  %1603 = vmatprep.subr.bf16.mxu0 %v2189_v20  ;;  %v2316_v27 = vcombine.low %v202_v16, %v206_v17 }
   0xe   :  { %v70_v23 = vld [vmem:[%s3333_s1 + $0x120] sm:$0xff]  ;;  %1604 = vmatpush1.bf16.msra.mxu0 %v2188_v26 }
   0xf   :  { %v194_v24 = vld [vmem:[%s3333_s1 + $0x500] sm:$0xff]  ;;  %v2181_v28 = vcombine.high %v66_v22, %v70_v23  ;;  %1644 = vmatprep.subr.bf16.mxu1 %v2317_v21  ;;  %v2180_v34 = vcombine.low %v66_v22, %v70_v23 }
  0x10   :  { %v198_v25 = vld [vmem:[%s3333_s1 + $0x520] sm:$0xff]  ;;  %1645 = vmatpush1.bf16.msra.mxu1 %v2316_v27 }
  0x11   :  { %v2309_v29 = vcombine.high %v194_v24, %v198_v25  ;;  %v58_v30 = vld [vmem:[%s3333_s1 + $0xc0] sm:$0xff]  ;;  %1605 = vmatprep.subr.bf16.mxu0 %v2181_v28  ;;  %v2308_v38 = vcombine.low %v194_v24, %v198_v25 }
  0x12   :  { %v62_v31 = vld [vmem:[%s3333_s1 + $0xe0] sm:$0xff]  ;;  %1606 = vmatpush1.bf16.msra.mxu0 %v2180_v34 }
  0x13   :  { %v186_v32 = vld [vmem:[%s3333_s1 + $0x4c0] sm:$0xff]  ;;  %v2173_v39 = vcombine.high %v58_v30, %v62_v31  ;;  %1646 = vmatprep.subr.bf16.mxu1 %v2309_v29  ;;  %v2172_v45 = vcombine.low %v58_v30, %v62_v31 }
  0x14   :  { %v190_v33 = vld [vmem:[%s3333_s1 + $0x4e0] sm:$0xff]  ;;  %1647 = vmatpush1.bf16.msra.mxu1 %v2308_v38 }
  0x15   :  { %v2301_v40 = vcombine.high %v186_v32, %v190_v33  ;;  %v50_v41 = vld [vmem:[%s3333_s1 + $0x80] sm:$0xff]  ;;  %1607 = vmatprep.subr.bf16.mxu0 %v2173_v39  ;;  %v2300_v48 = vcombine.low %v186_v32, %v190_v33 }
  0x16   :  { %v54_v42 = vld [vmem:[%s3333_s1 + $0xa0] sm:$0xff]  ;;  %1608 = vmatpush1.bf16.msra.mxu0 %v2172_v45 }
  0x17   :  { %v178_v43 = vld [vmem:[%s3333_s1 + $0x480] sm:$0xff]  ;;  %v2165_v49 = vcombine.high %v50_v41, %v54_v42  ;;  %1648 = vmatprep.subr.bf16.mxu1 %v2301_v40  ;;  %v2164_v55 = vcombine.low %v50_v41, %v54_v42 }
  0x18   :  { %v182_v44 = vld [vmem:[%s3333_s1 + $0x4a0] sm:$0xff]  ;;  %1649 = vmatpush1.bf16.msra.mxu1 %v2300_v48 }
  0x19   :  { %v2293_v50 = vcombine.high %v178_v43, %v182_v44  ;;  %v42_v51 = vld [vmem:[%s3333_s1 + $0x40] sm:$0xff]  ;;  %1609 = vmatprep.subr.bf16.mxu0 %v2165_v49  ;;  %v2292_v57 = vcombine.low %v178_v43, %v182_v44 }
  0x1a   :  { %v46_v52 = vld [vmem:[%s3333_s1 + $0x60] sm:$0xff]  ;;  %1610 = vmatpush1.bf16.msra.mxu0 %v2164_v55 }
  0x1b   :  { %v170_v53 = vld [vmem:[%s3333_s1 + $0x440] sm:$0xff]  ;;  %v2157_v58 = vcombine.high %v42_v51, %v46_v52  ;;  %1650 = vmatprep.subr.bf16.mxu1 %v2293_v50  ;;  %v2156_v2 = vcombine.low %v42_v51, %v46_v52 }
  0x1c   :  { %v174_v54 = vld [vmem:[%s3333_s1 + $0x460] sm:$0xff]  ;;  %1651 = vmatpush1.bf16.msra.mxu1 %v2292_v57 }
  0x1d   :  { %v2551_v59 = vld.sshfl [vmem:[%s3332_s0] sm:$0x33 pattern:$0x75316420]  ;;  %v2285_v60 = vcombine.high %v170_v53, %v174_v54  ;;  %1611 = vmatprep.subr.bf16.mxu0 %v2157_v58  ;;  %v2284_v4 = vcombine.low %v170_v53, %v174_v54 }
  0x1e   :  { %v34_v61 = vld [vmem:[%s3333_s1] sm:$0xff]  ;;  %v298_v63 = vcombine.high %v2551_v59, %v2551_v59  ;;  %1612 = vmatpush1.bf16.msra.mxu0 %v2156_v2 }
  0x1f   :  { %v38_v62 = vld [vmem:[%s3333_s1 + $0x20] sm:$0xff]  ;;  %1652 = vmatprep.subr.bf16.mxu1 %v2285_v60 }
  0x20   :  { %v162_v0 = vld [vmem:[%s3333_s1 + $0x400] sm:$0xff]  ;;  %v2568_v3 = vrot.slane %v298_v63, %v2546_v56  ;;  %v2149_v5 = vcombine.high %v34_v61, %v38_v62  ;;  %v2148_v12 = vcombine.low %v34_v61, %v38_v62  ;;  %1653 = vmatpush1.bf16.msra.mxu1 %v2284_v4 }
  0x21   :  { %v166_v1 = vld [vmem:[%s3333_s1 + $0x420] sm:$0xff] }
  0x22   :  { %v2277_v6 = vcombine.high %v162_v0, %v166_v1  ;;  %v154_v7 = vld [vmem:[%s3333_s1 + $0x3c0] sm:$0xff]  ;;  %1631 = vmatprep.mubr.bf16.mxu0 %v2568_v3  ;;  %v2579_v9 = vcombine.high %v2568_v3, %v2568_v3  ;;  %1613 = vmatprep.subr.bf16.mxu0 %v2149_v5  ;;  %v2276_v13 = vcombine.low %v162_v0, %v166_v1 }
  0x23   :  { %v158_v8 = vld [vmem:[%s3333_s1 + $0x3e0] sm:$0xff]  ;;  %1614 = vmatpush1.bf16.msra.mxu0 %v2148_v12 }
  0x24   :  { %v282_v10 = vld [vmem:[%s3333_s1 + $0x7c0] sm:$0xff]  ;;  %1672 = vmatprep.mubr.bf16.mxu1 %v2579_v9  ;;  %v2269_v14 = vcombine.high %v154_v7, %v158_v8  ;;  %1654 = vmatprep.subr.bf16.mxu1 %v2277_v6  ;;  %v2268_v20 = vcombine.low %v154_v7, %v158_v8 }
  0x25   :  { %v286_v11 = vld [vmem:[%s3333_s1 + $0x7e0] sm:$0xff]  ;;  %1655 = vmatpush1.bf16.msra.mxu1 %v2276_v13  ;;  %v91_v13 = vld [vmem:[%s3333_s1 + $0x1c8] sm:$0xff] }
  0x26   :  { %v2397_v15 = vcombine.high %v282_v10, %v286_v11  ;;  %v146_v16 = vld [vmem:[%s3333_s1 + $0x380] sm:$0xff]  ;;  %1615 = vmatprep.subr.bf16.mxu0 %v2269_v14  ;;  %v2396_v21 = vcombine.low %v282_v10, %v286_v11  ;;  %v95_v14 = vld [vmem:[%s3333_s1 + $0x1e8] sm:$0xff] }
  0x27   :  { %v150_v17 = vld [vmem:[%s3333_s1 + $0x3a0] sm:$0xff]  ;;  %1616 = vmatpush2.bf16.msra.mxu0 %v2268_v20  ;;  %v2207_v20 = vcombine.high %v91_v13, %v95_v14 }
  0x28   :  { %v274_v18 = vld [vmem:[%s3333_s1 + $0x780] sm:$0xff]  ;;  %v2261_v22 = vcombine.high %v146_v16, %v150_v17  ;;  %1656 = vmatprep.subr.bf16.mxu1 %v2397_v15  ;;  %v2260_v28 = vcombine.low %v146_v16, %v150_v17  ;;  %v219_v15 = vld [vmem:[%s3333_s1 + $0x5c8] sm:$0xff] }
  0x29   :  { %v278_v19 = vld [vmem:[%s3333_s1 + $0x7a0] sm:$0xff]  ;;  %1657 = vmatpush2.bf16.msra.mxu1 %v2396_v21  ;;  %v223_v16 = vld [vmem:[%s3333_s1 + $0x5e8] sm:$0xff] }
  0x2a   :  { %v2389_v23 = vcombine.high %v274_v18, %v278_v19  ;;  %v138_v24 = vld [vmem:[%s3333_s1 + $0x340] sm:$0xff]  ;;  %1617 = vmatprep.subr.bf16.mxu0 %v2261_v22  ;;  %v2388_v29 = vcombine.low %v274_v18, %v278_v19  ;;  %v2686_v18 = vrot.slane %v2551_v59, %v2546_v56  ;;  %v2335_v21 = vcombine.high %v219_v15, %v223_v16  ;;  %v83_v22 = vld [vmem:[%s3333_s1 + $0x188] sm:$0xff] }
  0x2b   :  { %v142_v25 = vld [vmem:[%s3333_s1 + $0x360] sm:$0xff]  ;;  %1618 = vmatpush2.bf16.msra.mxu0 %v2260_v28  ;;  %v215_v56 = vld [vmem:[%s3333_s1 + $0x5a8] sm:$0xff] }
  0x2c   :  { %v266_v26 = vld [vmem:[%s3333_s1 + $0x740] sm:$0xff]  ;;  %v2253_v30 = vcombine.high %v138_v24, %v142_v25  ;;  %1658 = vmatprep.subr.bf16.mxu1 %v2389_v23  ;;  %v2252_v36 = vcombine.low %v138_v24, %v142_v25  ;;  %v87_v23 = vld [vmem:[%s3333_s1 + $0x1a8] sm:$0xff]  ;;  %v2702_v59 = vcombine.high %v2686_v18, %v2686_v18  ;;  %v2206_v25 = vcombine.low %v91_v13, %v95_v14 }
  0x2d   :  { %v270_v27 = vld [vmem:[%s3333_s1 + $0x760] sm:$0xff]  ;;  %1659 = vmatpush2.bf16.msra.mxu1 %v2388_v29  ;;  %v211_v24 = vld [vmem:[%s3333_s1 + $0x588] sm:$0xff] }
  0x2e   :  { %v2381_v31 = vcombine.high %v266_v26, %v270_v27  ;;  %v130_v32 = vld [vmem:[%s3333_s1 + $0x300] sm:$0xff]  ;;  %1619 = vmatprep.subr.bf16.mxu0 %v2253_v30  ;;  %v2380_v37 = vcombine.low %v266_v26, %v270_v27 }
  0x2f   :  { %v134_v33 = vld [vmem:[%s3333_s1 + $0x320] sm:$0xff]  ;;  %1620 = vmatpush2.bf16.msra.mxu0 %v2252_v36 }
  0x30   :  { %v258_v34 = vld [vmem:[%s3333_s1 + $0x700] sm:$0xff]  ;;  %v2245_v38 = vcombine.high %v130_v32, %v134_v33  ;;  %1660 = vmatprep.subr.bf16.mxu1 %v2381_v31  ;;  %v2244_v44 = vcombine.low %v130_v32, %v134_v33 }
  0x31   :  { %v262_v35 = vld [vmem:[%s3333_s1 + $0x720] sm:$0xff]  ;;  %1661 = vmatpush2.bf16.msra.mxu1 %v2380_v37 }
  0x32   :  { %v2373_v39 = vcombine.high %v258_v34, %v262_v35  ;;  %v122_v40 = vld [vmem:[%s3333_s1 + $0x2c0] sm:$0xff]  ;;  %1621 = vmatprep.subr.bf16.mxu0 %v2245_v38  ;;  %v2372_v45 = vcombine.low %v258_v34, %v262_v35 }
  0x33   :  { %v126_v41 = vld [vmem:[%s3333_s1 + $0x2e0] sm:$0xff]  ;;  %1622 = vmatpush2.bf16.msra.mxu0 %v2244_v44 }
  0x34   :  { %v250_v42 = vld [vmem:[%s3333_s1 + $0x6c0] sm:$0xff]  ;;  %v2237_v46 = vcombine.high %v122_v40, %v126_v41  ;;  %1662 = vmatprep.subr.bf16.mxu1 %v2373_v39  ;;  %v2236_v53 = vcombine.low %v122_v40, %v126_v41 }
  0x35   :  { %v254_v43 = vld [vmem:[%s3333_s1 + $0x6e0] sm:$0xff]  ;;  %1663 = vmatpush2.bf16.msra.mxu1 %v2372_v45 }
  0x36   :  { %v2365_v48 = vcombine.high %v250_v42, %v254_v43  ;;  %v114_v49 = vld [vmem:[%s3333_s1 + $0x280] sm:$0xff]  ;;  %1623 = vmatprep.subr.bf16.mxu0 %v2237_v46  ;;  %v2364_v54 = vcombine.low %v250_v42, %v254_v43 }
  0x37   :  { %v118_v50 = vld [vmem:[%s3333_s1 + $0x2a0] sm:$0xff]  ;;  %1624 = vmatpush2.bf16.msra.mxu0 %v2236_v53 }
  0x38   :  { %v242_v51 = vld [vmem:[%s3333_s1 + $0x680] sm:$0xff]  ;;  %v2229_v55 = vcombine.high %v114_v49, %v118_v50  ;;  %1664 = vmatprep.subr.bf16.mxu1 %v2365_v48  ;;  %v2228_v63 = vcombine.low %v114_v49, %v118_v50 }
  0x39   :  { %v246_v52 = vld [vmem:[%s3333_s1 + $0x6a0] sm:$0xff]  ;;  %1665 = vmatpush2.bf16.msra.mxu1 %v2364_v54 }
  0x3a   :  { %v2357_v57 = vcombine.high %v242_v51, %v246_v52  ;;  %v106_v58 = vld [vmem:[%s3333_s1 + $0x240] sm:$0xff]  ;;  %1625 = vmatprep.subr.bf16.mxu0 %v2229_v55  ;;  %v2356_v0 = vcombine.low %v242_v51, %v246_v52 }
  0x3b   :  { %v110_v60 = vld [vmem:[%s3333_s1 + $0x260] sm:$0xff]  ;;  %1626 = vmatpush2.bf16.msra.mxu0 %v2228_v63 }
  0x3c   :  { %v234_v61 = vld [vmem:[%s3333_s1 + $0x640] sm:$0xff]  ;;  %v2221_v1 = vcombine.high %v106_v58, %v110_v60  ;;  %1666 = vmatprep.subr.bf16.mxu1 %v2357_v57  ;;  %v2220_v8 = vcombine.low %v106_v58, %v110_v60 }
  0x3d   :  { %v238_v62 = vld [vmem:[%s3333_s1 + $0x660] sm:$0xff]  ;;  %1667 = vmatpush2.bf16.msra.mxu1 %v2356_v0 }
  0x3e   :  { %v2349_v2 = vcombine.high %v234_v61, %v238_v62  ;;  %v98_v4 = vld [vmem:[%s3333_s1 + $0x200] sm:$0xff]  ;;  %1627 = vmatprep.subr.bf16.mxu0 %v2221_v1  ;;  %v2348_v10 = vcombine.low %v234_v61, %v238_v62 }
  0x3f   :  { %v102_v5 = vld [vmem:[%s3333_s1 + $0x220] sm:$0xff]  ;;  %1628 = vmatpush2.bf16.msra.mxu0 %v2220_v8 }
  0x40   :  { %v226_v6 = vld [vmem:[%s3333_s1 + $0x600] sm:$0xff]  ;;  %v2213_v11 = vcombine.high %v98_v4, %v102_v5  ;;  %1668 = vmatprep.subr.bf16.mxu1 %v2349_v2  ;;  %v2212_v17 = vcombine.low %v98_v4, %v102_v5 }
  0x41   :  { %v230_v7 = vld [vmem:[%s3333_s1 + $0x620] sm:$0xff]  ;;  %1669 = vmatpush2.bf16.msra.mxu1 %v2348_v10 }
  0x42   :  { %v2341_v12 = vcombine.high %v226_v6, %v230_v7  ;;  %1629 = vmatprep.subr.bf16.mxu0 %v2213_v11  ;;  %v2340_v19 = vcombine.low %v226_v6, %v230_v7 }
  0x43   :  { %1630 = vmatpush2.bf16.msra.mxu0 %v2212_v17 }
  0x44   :  { %1670 = vmatprep.subr.bf16.mxu1 %v2341_v12 }
  0x45   :  { %9 = vsyncpa [#allocation4], 0  ;;  %1671 = vmatpush2.bf16.msra.mxu1 %v2340_v19  ;;  %1681 = vmatprep.subr.bf16.mxu0 %v2207_v20  ;;  %v2334_v26 = vcombine.low %v219_v15, %v223_v16  ;;  %v2199_v27 = vcombine.high %v83_v22, %v87_v23  ;;  %v2327_v28 = vcombine.high %v211_v24, %v215_v56  ;;  %v75_v29 = vld [vmem:[%s3333_s1 + $0x148] sm:$0xff]  ;;  %vm23_vm0 = vcmask 1041408  }
  0x46   :  { %1722 = vmatprep.subr.bf16.mxu1 %v2335_v21  ;;  %v79_v30 = vld [vmem:[%s3333_s1 + $0x168] sm:$0xff]  ;;  %1632 = vmatmul.mubr.bf16.vlgmr.msra.gmra.mxu0 %v2686_v18  ;;  %v2198_v33 = vcombine.low %v83_v22, %v87_v23  ;;  %v2326_v34 = vcombine.low %v211_v24, %v215_v56  ;;  %vm24_vm1 = vcmask 1043458   ;;  %vm26_vm3 = vcmask 1045508  }
  0x47   :  { %v203_v31 = vld [vmem:[%s3333_s1 + $0x548] sm:$0xff]  ;;  %1682 = vmatpush1.bf16.msra.mxu0 %v2206_v25  ;;  %v2191_v35 = vcombine.high %v75_v29, %v79_v30  ;;  %1713 = vmatprep.mubr.bf16.mxu0 %v2568_v3  ;;  %v2190_v41 = vcombine.low %v75_v29, %v79_v30  ;;  %vm25_vm2 = vmor %vm24_vm1, %vm23_vm0  ;;  %vm28_vm5 = vcmask 850950  }
  0x48   :  { %v207_v32 = vld [vmem:[%s3333_s1 + $0x568] sm:$0xff]  ;;  %1673 = vmatmul.mubr.bf16.vlgmr.msra.gmra.mxu1 %v2702_v59  ;;  %1683 = vmatprep.subr.bf16.mxu0 %v2199_v27  ;;  %vm27_vm4 = vmor %vm26_vm3, %vm25_vm2 }
  0x49   :  { %1723 = vmatpush1.bf16.msra.mxu1 %v2334_v26  ;;  %v2319_v36 = vcombine.high %v203_v31, %v207_v32  ;;  %v67_v37 = vld [vmem:[%s3333_s1 + $0x108] sm:$0xff]  ;;  %1754 = vmatprep.mubr.bf16.mxu1 %v2579_v9  ;;  %v2318_v42 = vcombine.low %v203_v31, %v207_v32  ;;  %vm3292_vm6 = vmor %vm28_vm5, %vm27_vm4 }
  0x4a   :  { %1724 = vmatprep.subr.bf16.mxu1 %v2327_v28  ;;  %v71_v38 = vld [vmem:[%s3333_s1 + $0x128] sm:$0xff] }
  0x4b   :  { %v195_v39 = vld [vmem:[%s3333_s1 + $0x508] sm:$0xff]  ;;  %1684 = vmatpush1.bf16.msra.mxu0 %v2198_v33  ;;  %v2183_v43 = vcombine.high %v67_v37, %v71_v38  ;;  %v2182_v50 = vcombine.low %v67_v37, %v71_v38 }
  0x4c   :  { %v199_v40 = vld [vmem:[%s3333_s1 + $0x528] sm:$0xff]  ;;  %1685 = vmatprep.subr.bf16.mxu0 %v2191_v35 }
  0x4d   :  { %1725 = vmatpush1.bf16.msra.mxu1 %v2326_v34  ;;  %v2311_v44 = vcombine.high %v195_v39, %v199_v40  ;;  %v59_v45 = vld [vmem:[%s3333_s1 + $0xc8] sm:$0xff]  ;;  %v2310_v51 = vcombine.low %v195_v39, %v199_v40 }
  0x4e   :  { %1726 = vmatprep.subr.bf16.mxu1 %v2319_v36  ;;  %v63_v46 = vld [vmem:[%s3333_s1 + $0xe8] sm:$0xff] }
  0x4f   :  { %v187_v48 = vld [vmem:[%s3333_s1 + $0x4c8] sm:$0xff]  ;;  %1686 = vmatpush1.bf16.msra.mxu0 %v2190_v41  ;;  %v2175_v52 = vcombine.high %v59_v45, %v63_v46  ;;  %v2174_v60 = vcombine.low %v59_v45, %v63_v46 }
  0x50   :  { %v191_v49 = vld [vmem:[%s3333_s1 + $0x4e8] sm:$0xff]  ;;  %1687 = vmatprep.subr.bf16.mxu0 %v2183_v43 }
  0x51   :  { %1727 = vmatpush1.bf16.msra.mxu1 %v2318_v42  ;;  %v2303_v53 = vcombine.high %v187_v48, %v191_v49  ;;  %v51_v54 = vld [vmem:[%s3333_s1 + $0x88] sm:$0xff]  ;;  %v2302_v61 = vcombine.low %v187_v48, %v191_v49 }
  0x52   :  { %1728 = vmatprep.subr.bf16.mxu1 %v2311_v44  ;;  %v55_v55 = vld [vmem:[%s3333_s1 + $0xa8] sm:$0xff] }
  0x53   :  { %v179_v57 = vld [vmem:[%s3333_s1 + $0x488] sm:$0xff]  ;;  %1688 = vmatpush1.bf16.msra.mxu0 %v2182_v50  ;;  %v2167_v62 = vcombine.high %v51_v54, %v55_v55  ;;  %v2166_v5 = vcombine.low %v51_v54, %v55_v55 }
  0x54   :  { %v183_v58 = vld [vmem:[%s3333_s1 + $0x4a8] sm:$0xff]  ;;  %1689 = vmatprep.subr.bf16.mxu0 %v2175_v52 }
  0x55   :  { %1729 = vmatpush1.bf16.msra.mxu1 %v2310_v51  ;;  %v2295_v63 = vcombine.high %v179_v57, %v183_v58  ;;  %v43_v0 = vld [vmem:[%s3333_s1 + $0x48] sm:$0xff]  ;;  %v2294_v6 = vcombine.low %v179_v57, %v183_v58 }
  0x56   :  { %1730 = vmatprep.subr.bf16.mxu1 %v2303_v53  ;;  %v47_v1 = vld [vmem:[%s3333_s1 + $0x68] sm:$0xff] }
  0x57   :  { %v171_v2 = vld [vmem:[%s3333_s1 + $0x448] sm:$0xff]  ;;  %1690 = vmatpush1.bf16.msra.mxu0 %v2174_v60  ;;  %v2159_v7 = vcombine.high %v43_v0, %v47_v1  ;;  %v2158_v14 = vcombine.low %v43_v0, %v47_v1 }
  0x58   :  { %v175_v4 = vld [vmem:[%s3333_s1 + $0x468] sm:$0xff]  ;;  %1691 = vmatprep.subr.bf16.mxu0 %v2167_v62 }
  0x59   :  { %1731 = vmatpush1.bf16.msra.mxu1 %v2302_v61  ;;  %v2287_v8 = vcombine.high %v171_v2, %v175_v4  ;;  %v35_v10 = vld [vmem:[%s3333_s1 + $0x8] sm:$0xff]  ;;  %v2286_v15 = vcombine.low %v171_v2, %v175_v4 }
  0x5a   :  { %1732 = vmatprep.subr.bf16.mxu1 %v2295_v63  ;;  %v39_v11 = vld [vmem:[%s3333_s1 + $0x28] sm:$0xff] }
  0x5b   :  { %v163_v12 = vld [vmem:[%s3333_s1 + $0x408] sm:$0xff]  ;;  %1692 = vmatpush1.bf16.msra.mxu0 %v2166_v5  ;;  %v2151_v16 = vcombine.high %v35_v10, %v39_v11  ;;  %v2150_v23 = vcombine.low %v35_v10, %v39_v11 }
  0x5c   :  { %v167_v13 = vld [vmem:[%s3333_s1 + $0x428] sm:$0xff]  ;;  %1693 = vmatprep.subr.bf16.mxu0 %v2159_v7 }
  0x5d   :  { %1733 = vmatpush1.bf16.msra.mxu1 %v2294_v6  ;;  %v2279_v17 = vcombine.high %v163_v12, %v167_v13  ;;  %v155_v19 = vld [vmem:[%s3333_s1 + $0x3c8] sm:$0xff]  ;;  %v2278_v24 = vcombine.low %v163_v12, %v167_v13 }
  0x5e   :  { %1734 = vmatprep.subr.bf16.mxu1 %v2287_v8  ;;  %v159_v20 = vld [vmem:[%s3333_s1 + $0x3e8] sm:$0xff] }
  0x5f   :  { %v283_v21 = vld [vmem:[%s3333_s1 + $0x7c8] sm:$0xff]  ;;  %1694 = vmatpush1.bf16.msra.mxu0 %v2158_v14  ;;  %v2271_v56 = vcombine.high %v155_v19, %v159_v20  ;;  %v2270_v30 = vcombine.low %v155_v19, %v159_v20 }
  0x60   :  { %v287_v22 = vld [vmem:[%s3333_s1 + $0x7e8] sm:$0xff]  ;;  %1695 = vmatprep.subr.bf16.mxu0 %v2151_v16 }
  0x61   :  { %1735 = vmatpush1.bf16.msra.mxu1 %v2286_v15  ;;  %v2399_v25 = vcombine.high %v283_v21, %v287_v22  ;;  %v147_v26 = vld [vmem:[%s3333_s1 + $0x388] sm:$0xff]  ;;  %v2398_v31 = vcombine.low %v283_v21, %v287_v22 }
  0x62   :  { %1736 = vmatprep.subr.bf16.mxu1 %v2279_v17  ;;  %v151_v27 = vld [vmem:[%s3333_s1 + $0x3a8] sm:$0xff] }
  0x63   :  { %v275_v28 = vld [vmem:[%s3333_s1 + $0x788] sm:$0xff]  ;;  %1696 = vmatpush1.bf16.msra.mxu0 %v2150_v23  ;;  %v2263_v32 = vcombine.high %v147_v26, %v151_v27  ;;  %v2262_v38 = vcombine.low %v147_v26, %v151_v27  ;;  %v224_v26 = vld [vmem:[%s3333_s1 + $0x5f0] sm:$0xff] }
  0x64   :  { %v279_v29 = vld [vmem:[%s3333_s1 + $0x7a8] sm:$0xff]  ;;  %1697 = vmatprep.subr.bf16.mxu0 %v2271_v56  ;;  %v96_v56 = vld [vmem:[%s3333_s1 + $0x1f0] sm:$0xff] }
  0x65   :  { %1737 = vmatpush1.bf16.msra.mxu1 %v2278_v24  ;;  %v2391_v33 = vcombine.high %v275_v28, %v279_v29  ;;  %v139_v34 = vld [vmem:[%s3333_s1 + $0x348] sm:$0xff]  ;;  %v2390_v39 = vcombine.low %v275_v28, %v279_v29  ;;  %v92_v24 = vld [vmem:[%s3333_s1 + $0x1d0] sm:$0xff] }
  0x66   :  { %1738 = vmatprep.subr.bf16.mxu1 %v2399_v25  ;;  %v143_v35 = vld [vmem:[%s3333_s1 + $0x368] sm:$0xff]  ;;  %v220_v25 = vld [vmem:[%s3333_s1 + $0x5d0] sm:$0xff]  ;;  %v2209_v29 = vcombine.high %v92_v24, %v96_v56 }
  0x67   :  { %v267_v36 = vld [vmem:[%s3333_s1 + $0x748] sm:$0xff]  ;;  %1698 = vmatpush2.bf16.msra.mxu0 %v2270_v30  ;;  %v2255_v40 = vcombine.high %v139_v34, %v143_v35  ;;  %v2254_v46 = vcombine.low %v139_v34, %v143_v35  ;;  %v2337_v30 = vcombine.high %v220_v25, %v224_v26  ;;  %v216_v34 = vld [vmem:[%s3333_s1 + $0x5b0] sm:$0xff]  ;;  %v2208_v35 = vcombine.low %v92_v24, %v96_v56 }
  0x68   :  { %v271_v37 = vld [vmem:[%s3333_s1 + $0x768] sm:$0xff]  ;;  %1699 = vmatprep.subr.bf16.mxu0 %v2263_v32  ;;  %v88_v32 = vld [vmem:[%s3333_s1 + $0x1b0] sm:$0xff] }
  0x69   :  { %1739 = vmatpush2.bf16.msra.mxu1 %v2398_v31  ;;  %v2383_v41 = vcombine.high %v267_v36, %v271_v37  ;;  %v131_v42 = vld [vmem:[%s3333_s1 + $0x308] sm:$0xff]  ;;  %v2382_v48 = vcombine.low %v267_v36, %v271_v37  ;;  %v84_v31 = vld [vmem:[%s3333_s1 + $0x190] sm:$0xff]  ;;  %v2336_v36 = vcombine.low %v220_v25, %v224_v26 }
  0x6a   :  { %1740 = vmatprep.subr.bf16.mxu1 %v2391_v33  ;;  %v135_v43 = vld [vmem:[%s3333_s1 + $0x328] sm:$0xff]  ;;  %v212_v33 = vld [vmem:[%s3333_s1 + $0x590] sm:$0xff]  ;;  %v2201_v37 = vcombine.high %v84_v31, %v88_v32 }
  0x6b   :  { %v259_v44 = vld [vmem:[%s3333_s1 + $0x708] sm:$0xff]  ;;  %1700 = vmatpush2.bf16.msra.mxu0 %v2262_v38  ;;  %v2247_v49 = vcombine.high %v131_v42, %v135_v43  ;;  %v2246_v55 = vcombine.low %v131_v42, %v135_v43  ;;  %v2329_v38 = vcombine.high %v212_v33, %v216_v34  ;;  %v208_v42 = vld [vmem:[%s3333_s1 + $0x570] sm:$0xff]  ;;  %v2200_v43 = vcombine.low %v84_v31, %v88_v32 }
  0x6c   :  { %v263_v45 = vld [vmem:[%s3333_s1 + $0x728] sm:$0xff]  ;;  %1701 = vmatprep.subr.bf16.mxu0 %v2255_v40  ;;  %v80_v40 = vld [vmem:[%s3333_s1 + $0x170] sm:$0xff] }
  0x6d   :  { %1741 = vmatpush2.bf16.msra.mxu1 %v2390_v39  ;;  %v2375_v50 = vcombine.high %v259_v44, %v263_v45  ;;  %v123_v51 = vld [vmem:[%s3333_s1 + $0x2c8] sm:$0xff]  ;;  %v2374_v57 = vcombine.low %v259_v44, %v263_v45  ;;  %v76_v39 = vld [vmem:[%s3333_s1 + $0x150] sm:$0xff]  ;;  %v2328_v44 = vcombine.low %v212_v33, %v216_v34 }
  0x6e   :  { %1742 = vmatprep.subr.bf16.mxu1 %v2383_v41  ;;  %v127_v52 = vld [vmem:[%s3333_s1 + $0x2e8] sm:$0xff]  ;;  %v204_v41 = vld [vmem:[%s3333_s1 + $0x550] sm:$0xff]  ;;  %v2193_v45 = vcombine.high %v76_v39, %v80_v40 }
  0x6f   :  { %v251_v53 = vld [vmem:[%s3333_s1 + $0x6c8] sm:$0xff]  ;;  %1702 = vmatpush2.bf16.msra.mxu0 %v2254_v46  ;;  %v2239_v58 = vcombine.high %v123_v51, %v127_v52  ;;  %v2238_v1 = vcombine.low %v123_v51, %v127_v52  ;;  %v2321_v46 = vcombine.high %v204_v41, %v208_v42  ;;  %v200_v51 = vld [vmem:[%s3333_s1 + $0x530] sm:$0xff]  ;;  %v2192_v52 = vcombine.low %v76_v39, %v80_v40 }
  0x70   :  { %v255_v54 = vld [vmem:[%s3333_s1 + $0x6e8] sm:$0xff]  ;;  %1703 = vmatprep.subr.bf16.mxu0 %v2247_v49  ;;  %v72_v49 = vld [vmem:[%s3333_s1 + $0x130] sm:$0xff] }
  0x71   :  { %1743 = vmatpush2.bf16.msra.mxu1 %v2382_v48  ;;  %v2367_v60 = vcombine.high %v251_v53, %v255_v54  ;;  %v115_v61 = vld [vmem:[%s3333_s1 + $0x288] sm:$0xff]  ;;  %v2366_v2 = vcombine.low %v251_v53, %v255_v54  ;;  %v68_v48 = vld [vmem:[%s3333_s1 + $0x110] sm:$0xff]  ;;  %v2320_v53 = vcombine.low %v204_v41, %v208_v42 }
  0x72   :  { %1744 = vmatprep.subr.bf16.mxu1 %v2375_v50  ;;  %v119_v62 = vld [vmem:[%s3333_s1 + $0x2a8] sm:$0xff]  ;;  %v196_v50 = vld [vmem:[%s3333_s1 + $0x510] sm:$0xff]  ;;  %v2185_v54 = vcombine.high %v68_v48, %v72_v49 }
  0x73   :  { %v243_v63 = vld [vmem:[%s3333_s1 + $0x688] sm:$0xff]  ;;  %1704 = vmatpush2.bf16.msra.mxu0 %v2246_v55  ;;  %v2231_v4 = vcombine.high %v115_v61, %v119_v62  ;;  %v2230_v11 = vcombine.low %v115_v61, %v119_v62  ;;  %v2313_v55 = vcombine.high %v196_v50, %v200_v51  ;;  %v192_v61 = vld [vmem:[%s3333_s1 + $0x4f0] sm:$0xff]  ;;  %v2184_v62 = vcombine.low %v68_v48, %v72_v49 }
  0x74   :  { %v247_v0 = vld [vmem:[%s3333_s1 + $0x6a8] sm:$0xff]  ;;  %1705 = vmatprep.subr.bf16.mxu0 %v2239_v58  ;;  %v64_v58 = vld [vmem:[%s3333_s1 + $0xf0] sm:$0xff] }
  0x75   :  { %1745 = vmatpush2.bf16.msra.mxu1 %v2374_v57  ;;  %v2359_v5 = vcombine.high %v243_v63, %v247_v0  ;;  %v107_v6 = vld [vmem:[%s3333_s1 + $0x248] sm:$0xff]  ;;  %v2358_v12 = vcombine.low %v243_v63, %v247_v0  ;;  %v60_v57 = vld [vmem:[%s3333_s1 + $0xd0] sm:$0xff]  ;;  %v2312_v63 = vcombine.low %v196_v50, %v200_v51 }
  0x76   :  { %1746 = vmatprep.subr.bf16.mxu1 %v2367_v60  ;;  %v111_v7 = vld [vmem:[%s3333_s1 + $0x268] sm:$0xff]  ;;  %v188_v60 = vld [vmem:[%s3333_s1 + $0x4d0] sm:$0xff]  ;;  %v2177_v0 = vcombine.high %v60_v57, %v64_v58 }
  0x77   :  { %v235_v8 = vld [vmem:[%s3333_s1 + $0x648] sm:$0xff]  ;;  %1706 = vmatpush2.bf16.msra.mxu0 %v2238_v1  ;;  %v2223_v13 = vcombine.high %v107_v6, %v111_v7  ;;  %v2222_v20 = vcombine.low %v107_v6, %v111_v7  ;;  %v2305_v1 = vcombine.high %v188_v60, %v192_v61  ;;  %v184_v6 = vld [vmem:[%s3333_s1 + $0x4b0] sm:$0xff]  ;;  %v2176_v7 = vcombine.low %v60_v57, %v64_v58 }
  0x78   :  { %v239_v10 = vld [vmem:[%s3333_s1 + $0x668] sm:$0xff]  ;;  %1707 = vmatprep.subr.bf16.mxu0 %v2231_v4  ;;  %v56_v4 = vld [vmem:[%s3333_s1 + $0xb0] sm:$0xff] }
  0x79   :  { %1747 = vmatpush2.bf16.msra.mxu1 %v2366_v2  ;;  %v2351_v14 = vcombine.high %v235_v8, %v239_v10  ;;  %v99_v15 = vld [vmem:[%s3333_s1 + $0x208] sm:$0xff]  ;;  %v2350_v21 = vcombine.low %v235_v8, %v239_v10  ;;  %v52_v2 = vld [vmem:[%s3333_s1 + $0x90] sm:$0xff]  ;;  %v2304_v8 = vcombine.low %v188_v60, %v192_v61 }
  0x7a   :  { %1748 = vmatprep.subr.bf16.mxu1 %v2359_v5  ;;  %v103_v16 = vld [vmem:[%s3333_s1 + $0x228] sm:$0xff]  ;;  %v180_v5 = vld [vmem:[%s3333_s1 + $0x490] sm:$0xff]  ;;  %v2169_v10 = vcombine.high %v52_v2, %v56_v4 }
  0x7b   :  { %v227_v17 = vld [vmem:[%s3333_s1 + $0x608] sm:$0xff]  ;;  %1708 = vmatpush2.bf16.msra.mxu0 %v2230_v11  ;;  %v2215_v22 = vcombine.high %v99_v15, %v103_v16  ;;  %v2214_v27 = vcombine.low %v99_v15, %v103_v16  ;;  %v2297_v11 = vcombine.high %v180_v5, %v184_v6  ;;  %v176_v15 = vld [vmem:[%s3333_s1 + $0x470] sm:$0xff]  ;;  %v2168_v16 = vcombine.low %v52_v2, %v56_v4 }
  0x7c   :  { %v231_v19 = vld [vmem:[%s3333_s1 + $0x628] sm:$0xff]  ;;  %1709 = vmatprep.subr.bf16.mxu0 %v2223_v13  ;;  %v48_v13 = vld [vmem:[%s3333_s1 + $0x70] sm:$0xff] }
  0x7d   :  { %1749 = vmatpush2.bf16.msra.mxu1 %v2358_v12  ;;  %v2343_v23 = vcombine.high %v227_v17, %v231_v19  ;;  %v2342_v28 = vcombine.low %v227_v17, %v231_v19  ;;  %v44_v12 = vld [vmem:[%s3333_s1 + $0x50] sm:$0xff]  ;;  %v2296_v17 = vcombine.low %v180_v5, %v184_v6 }
  0x7e   :  { %1750 = vmatprep.subr.bf16.mxu1 %v2351_v14  ;;  %v172_v14 = vld [vmem:[%s3333_s1 + $0x450] sm:$0xff]  ;;  %v2161_v19 = vcombine.high %v44_v12, %v48_v13  ;;  %v2160_v56 = vcombine.low %v44_v12, %v48_v13 }
  0x7f   :  { %1710 = vmatpush2.bf16.msra.mxu0 %v2222_v20  ;;  %v2289_v20 = vcombine.high %v172_v14, %v176_v15  ;;  %v168_v24 = vld [vmem:[%s3333_s1 + $0x430] sm:$0xff]  ;;  %v2288_v25 = vcombine.low %v172_v14, %v176_v15 }
  0x80   :  { %1711 = vmatprep.subr.bf16.mxu0 %v2215_v22  ;;  %v40_v22 = vld [vmem:[%s3333_s1 + $0x30] sm:$0xff] }
  0x81   :  { %1751 = vmatpush2.bf16.msra.mxu1 %v2350_v21  ;;  %v36_v21 = vld [vmem:[%s3333_s1 + $0x10] sm:$0xff] }
  0x82   :  { %1752 = vmatprep.subr.bf16.mxu1 %v2343_v23  ;;  %v164_v23 = vld [vmem:[%s3333_s1 + $0x410] sm:$0xff]  ;;  %v2153_v26 = vcombine.high %v36_v21, %v40_v22  ;;  %v2152_v32 = vcombine.low %v36_v21, %v40_v22 }
  0x83   :  { %1712 = vmatpush2.bf16.msra.mxu0 %v2214_v27  ;;  %v2281_v27 = vcombine.high %v164_v23, %v168_v24  ;;  %v288_v31 = vld [vmem:[%s3333_s1 + $0x7f0] sm:$0xff]  ;;  %v2280_v33 = vcombine.low %v164_v23, %v168_v24 }
  0x84   :  { %1763 = vmatprep.subr.bf16.mxu0 %v2209_v29  ;;  %v160_v29 = vld [vmem:[%s3333_s1 + $0x3f0] sm:$0xff] }
  0x85   :  { %1753 = vmatpush2.bf16.msra.mxu1 %v2342_v28  ;;  %v156_v28 = vld [vmem:[%s3333_s1 + $0x3d0] sm:$0xff] }
  0x86   :  { %1804 = vmatprep.subr.bf16.mxu1 %v2337_v30  ;;  %1714 = vmatmul.mubr.bf16.vlgmr.msra.gmra.mxu0 %v2686_v18  ;;  %v284_v30 = vld [vmem:[%s3333_s1 + $0x7d0] sm:$0xff]  ;;  %v2273_v34 = vcombine.high %v156_v28, %v160_v29  ;;  %v2272_v40 = vcombine.low %v156_v28, %v160_v29 }
  0x87   :  { %1764 = vmatpush1.bf16.msra.mxu0 %v2208_v35  ;;  %1795 = vmatprep.mubr.bf16.mxu0 %v2568_v3  ;;  %v2401_v35 = vcombine.high %v284_v30, %v288_v31  ;;  %v280_v39 = vld [vmem:[%s3333_s1 + $0x7b0] sm:$0xff]  ;;  %v2400_v41 = vcombine.low %v284_v30, %v288_v31 }
  0x88   :  { %1755 = vmatmul.mubr.bf16.vlgmr.msra.gmra.mxu1 %v2702_v59  ;;  %1765 = vmatprep.subr.bf16.mxu0 %v2201_v37  ;;  %v152_v37 = vld [vmem:[%s3333_s1 + $0x3b0] sm:$0xff] }
  0x89   :  { %1805 = vmatpush1.bf16.msra.mxu1 %v2336_v36  ;;  %1836 = vmatprep.mubr.bf16.mxu1 %v2579_v9  ;;  %v148_v36 = vld [vmem:[%s3333_s1 + $0x390] sm:$0xff] }
  0x8a   :  { %1806 = vmatprep.subr.bf16.mxu1 %v2329_v38  ;;  %v276_v38 = vld [vmem:[%s3333_s1 + $0x790] sm:$0xff]  ;;  %v2265_v42 = vcombine.high %v148_v36, %v152_v37  ;;  %v2264_v49 = vcombine.low %v148_v36, %v152_v37  ;;  %v225_v36 = vld [vmem:[%s3333_s1 + $0x5f8] sm:$0xff] }
  0x8b   :  { %1766 = vmatpush1.bf16.msra.mxu0 %v2200_v43  ;;  %v2393_v43 = vcombine.high %v276_v38, %v280_v39  ;;  %v272_v48 = vld [vmem:[%s3333_s1 + $0x770] sm:$0xff]  ;;  %v2392_v50 = vcombine.low %v276_v38, %v280_v39 }
  0x8c   :  { %1767 = vmatprep.subr.bf16.mxu0 %v2193_v45  ;;  %v144_v45 = vld [vmem:[%s3333_s1 + $0x370] sm:$0xff] }
  0x8d   :  { %1807 = vmatpush1.bf16.msra.mxu1 %v2328_v44  ;;  %v140_v44 = vld [vmem:[%s3333_s1 + $0x350] sm:$0xff] }
  0x8e   :  { %1808 = vmatprep.subr.bf16.mxu1 %v2321_v46  ;;  %v268_v46 = vld [vmem:[%s3333_s1 + $0x750] sm:$0xff]  ;;  %v2257_v51 = vcombine.high %v140_v44, %v144_v45  ;;  %v2256_v58 = vcombine.low %v140_v44, %v144_v45  ;;  %v217_v44 = vld [vmem:[%s3333_s1 + $0x5b8] sm:$0xff] }
  0x8f   :  { %1768 = vmatpush1.bf16.msra.mxu0 %v2192_v52  ;;  %v2385_v52 = vcombine.high %v268_v46, %v272_v48  ;;  %v264_v57 = vld [vmem:[%s3333_s1 + $0x730] sm:$0xff]  ;;  %v2384_v60 = vcombine.low %v268_v46, %v272_v48 }
  0x90   :  { %1769 = vmatprep.subr.bf16.mxu0 %v2185_v54  ;;  %v136_v54 = vld [vmem:[%s3333_s1 + $0x330] sm:$0xff] }
  0x91   :  { %1809 = vmatpush1.bf16.msra.mxu1 %v2320_v53  ;;  %v132_v53 = vld [vmem:[%s3333_s1 + $0x310] sm:$0xff] }
  0x92   :  { %1810 = vmatprep.subr.bf16.mxu1 %v2313_v55  ;;  %v260_v55 = vld [vmem:[%s3333_s1 + $0x710] sm:$0xff]  ;;  %v2249_v61 = vcombine.high %v132_v53, %v136_v54  ;;  %v2248_v4 = vcombine.low %v132_v53, %v136_v54  ;;  %v209_v53 = vld [vmem:[%s3333_s1 + $0x578] sm:$0xff] }
  0x93   :  { %1770 = vmatpush1.bf16.msra.mxu0 %v2184_v62  ;;  %v2377_v62 = vcombine.high %v260_v55, %v264_v57  ;;  %v256_v2 = vld [vmem:[%s3333_s1 + $0x6f0] sm:$0xff]  ;;  %v2376_v5 = vcombine.low %v260_v55, %v264_v57 }
  0x94   :  { %1771 = vmatprep.subr.bf16.mxu0 %v2177_v0  ;;  %v128_v0 = vld [vmem:[%s3333_s1 + $0x2f0] sm:$0xff] }
  0x95   :  { %1811 = vmatpush1.bf16.msra.mxu1 %v2312_v63  ;;  %v124_v63 = vld [vmem:[%s3333_s1 + $0x2d0] sm:$0xff] }
  0x96   :  { %1812 = vmatprep.subr.bf16.mxu1 %v2305_v1  ;;  %v252_v1 = vld [vmem:[%s3333_s1 + $0x6d0] sm:$0xff]  ;;  %v2241_v6 = vcombine.high %v124_v63, %v128_v0  ;;  %v2240_v13 = vcombine.low %v124_v63, %v128_v0  ;;  %v201_v63 = vld [vmem:[%s3333_s1 + $0x538] sm:$0xff] }
  0x97   :  { %1772 = vmatpush1.bf16.msra.mxu0 %v2176_v7  ;;  %v2369_v7 = vcombine.high %v252_v1, %v256_v2  ;;  %v248_v12 = vld [vmem:[%s3333_s1 + $0x6b0] sm:$0xff]  ;;  %v2368_v14 = vcombine.low %v252_v1, %v256_v2 }
  0x98   :  { %1773 = vmatprep.subr.bf16.mxu0 %v2169_v10  ;;  %v120_v10 = vld [vmem:[%s3333_s1 + $0x2b0] sm:$0xff] }
  0x99   :  { %1813 = vmatpush1.bf16.msra.mxu1 %v2304_v8  ;;  %v116_v8 = vld [vmem:[%s3333_s1 + $0x290] sm:$0xff] }
  0x9a   :  { %1814 = vmatprep.subr.bf16.mxu1 %v2297_v11  ;;  %v244_v11 = vld [vmem:[%s3333_s1 + $0x690] sm:$0xff]  ;;  %v2233_v15 = vcombine.high %v116_v8, %v120_v10  ;;  %v2232_v22 = vcombine.low %v116_v8, %v120_v10 }
  0x9b   :  { %1774 = vmatpush1.bf16.msra.mxu0 %v2168_v16  ;;  %v2361_v16 = vcombine.high %v244_v11, %v248_v12  ;;  %v240_v21 = vld [vmem:[%s3333_s1 + $0x670] sm:$0xff]  ;;  %v2360_v23 = vcombine.low %v244_v11, %v248_v12  ;;  %v53_v12 = vld [vmem:[%s3333_s1 + $0x98] sm:$0xff] }
  0x9c   :  { %1775 = vmatprep.subr.bf16.mxu0 %v2161_v19  ;;  %v112_v19 = vld [vmem:[%s3333_s1 + $0x270] sm:$0xff] }
  0x9d   :  { %1815 = vmatpush1.bf16.msra.mxu1 %v2296_v17  ;;  %v108_v17 = vld [vmem:[%s3333_s1 + $0x250] sm:$0xff] }
  0x9e   :  { %1816 = vmatprep.subr.bf16.mxu1 %v2289_v20  ;;  %v236_v20 = vld [vmem:[%s3333_s1 + $0x650] sm:$0xff]  ;;  %v2225_v24 = vcombine.high %v108_v17, %v112_v19  ;;  %v2224_v29 = vcombine.low %v108_v17, %v112_v19 }
  0x9f   :  { %1776 = vmatpush1.bf16.msra.mxu0 %v2160_v56  ;;  %v2353_v56 = vcombine.high %v236_v20, %v240_v21  ;;  %v232_v28 = vld [vmem:[%s3333_s1 + $0x630] sm:$0xff]  ;;  %v2352_v30 = vcombine.low %v236_v20, %v240_v21  ;;  %v45_v21 = vld [vmem:[%s3333_s1 + $0x58] sm:$0xff] }
  0xa0   :  { %1777 = vmatprep.subr.bf16.mxu0 %v2153_v26  ;;  %v104_v26 = vld [vmem:[%s3333_s1 + $0x230] sm:$0xff] }
  0xa1   :  { %1817 = vmatpush1.bf16.msra.mxu1 %v2288_v25  ;;  %v100_v25 = vld [vmem:[%s3333_s1 + $0x210] sm:$0xff] }
  0xa2   :  { %1818 = vmatprep.subr.bf16.mxu1 %v2281_v27  ;;  %v228_v27 = vld [vmem:[%s3333_s1 + $0x610] sm:$0xff]  ;;  %v2217_v31 = vcombine.high %v100_v25, %v104_v26  ;;  %v2216_v37 = vcombine.low %v100_v25, %v104_v26 }
  0xa3   :  { %1778 = vmatpush1.bf16.msra.mxu0 %v2152_v32  ;;  %v2345_v32 = vcombine.high %v228_v27, %v232_v28  ;;  %v2344_v38 = vcombine.low %v228_v27, %v232_v28  ;;  %v37_v28 = vld [vmem:[%s3333_s1 + $0x18] sm:$0xff] }
  0xa4   :  { %1779 = vmatprep.subr.bf16.mxu0 %v2273_v34  ;;  %v97_v34 = vld [vmem:[%s3333_s1 + $0x1f8] sm:$0xff] }
  0xa5   :  { %1819 = vmatpush1.bf16.msra.mxu1 %v2280_v33  ;;  %v93_v33 = vld [vmem:[%s3333_s1 + $0x1d8] sm:$0xff] }
  0xa6   :  { %1820 = vmatprep.subr.bf16.mxu1 %v2401_v35  ;;  %v221_v35 = vld [vmem:[%s3333_s1 + $0x5d8] sm:$0xff]  ;;  %v2211_v39 = vcombine.high %v93_v33, %v97_v34  ;;  %v2210_v45 = vcombine.low %v93_v33, %v97_v34 }
  0xa7   :  { %1780 = vmatpush2.bf16.msra.mxu0 %v2272_v40  ;;  %v2339_v40 = vcombine.high %v221_v35, %v225_v36  ;;  %v2338_v46 = vcombine.low %v221_v35, %v225_v36  ;;  %v157_v36 = vld [vmem:[%s3333_s1 + $0x3d8] sm:$0xff] }
  0xa8   :  { %1781 = vmatprep.subr.bf16.mxu0 %v2265_v42  ;;  %v89_v42 = vld [vmem:[%s3333_s1 + $0x1b8] sm:$0xff] }
  0xa9   :  { %1821 = vmatpush2.bf16.msra.mxu1 %v2400_v41  ;;  %v85_v41 = vld [vmem:[%s3333_s1 + $0x198] sm:$0xff] }
  0xaa   :  { %1822 = vmatprep.subr.bf16.mxu1 %v2393_v43  ;;  %v213_v43 = vld [vmem:[%s3333_s1 + $0x598] sm:$0xff]  ;;  %v2203_v48 = vcombine.high %v85_v41, %v89_v42  ;;  %v2202_v54 = vcombine.low %v85_v41, %v89_v42 }
  0xab   :  { %1782 = vmatpush2.bf16.msra.mxu0 %v2264_v49  ;;  %v2331_v49 = vcombine.high %v213_v43, %v217_v44  ;;  %v2330_v55 = vcombine.low %v213_v43, %v217_v44  ;;  %v149_v44 = vld [vmem:[%s3333_s1 + $0x398] sm:$0xff] }
  0xac   :  { %1783 = vmatprep.subr.bf16.mxu0 %v2257_v51  ;;  %v81_v51 = vld [vmem:[%s3333_s1 + $0x178] sm:$0xff] }
  0xad   :  { %1823 = vmatpush2.bf16.msra.mxu1 %v2392_v50  ;;  %v77_v50 = vld [vmem:[%s3333_s1 + $0x158] sm:$0xff] }
  0xae   :  { %1824 = vmatprep.subr.bf16.mxu1 %v2385_v52  ;;  %v205_v52 = vld [vmem:[%s3333_s1 + $0x558] sm:$0xff]  ;;  %v2195_v57 = vcombine.high %v77_v50, %v81_v51  ;;  %v2194_v0 = vcombine.low %v77_v50, %v81_v51 }
  0xaf   :  { %1784 = vmatpush2.bf16.msra.mxu0 %v2256_v58  ;;  %v2323_v58 = vcombine.high %v205_v52, %v209_v53  ;;  %v2322_v1 = vcombine.low %v205_v52, %v209_v53  ;;  %v141_v53 = vld [vmem:[%s3333_s1 + $0x358] sm:$0xff] }
  0xb0   :  { %1785 = vmatprep.subr.bf16.mxu0 %v2249_v61  ;;  %v73_v61 = vld [vmem:[%s3333_s1 + $0x138] sm:$0xff] }
  0xb1   :  { %1825 = vmatpush2.bf16.msra.mxu1 %v2384_v60  ;;  %v69_v60 = vld [vmem:[%s3333_s1 + $0x118] sm:$0xff] }
  0xb2   :  { %1826 = vmatprep.subr.bf16.mxu1 %v2377_v62  ;;  %v197_v62 = vld [vmem:[%s3333_s1 + $0x518] sm:$0xff]  ;;  %v2187_v2 = vcombine.high %v69_v60, %v73_v61 }
  0xb3   :  { %1786 = vmatpush2.bf16.msra.mxu0 %v2248_v4  ;;  %v2315_v4 = vcombine.high %v197_v62, %v201_v63  ;;  %v2314_v8 = vcombine.low %v197_v62, %v201_v63  ;;  %v133_v63 = vld [vmem:[%s3333_s1 + $0x318] sm:$0xff] }
  0xb4   :  { %1787 = vmatprep.subr.bf16.mxu0 %v2241_v6  ;;  %v193_v6 = vld [vmem:[%s3333_s1 + $0x4f8] sm:$0xff] }
  0xb5   :  { %1827 = vmatpush2.bf16.msra.mxu1 %v2376_v5  ;;  %v65_v5 = vld [vmem:[%s3333_s1 + $0xf8] sm:$0xff] }
  0xb6   :  { %1828 = vmatprep.subr.bf16.mxu1 %v2369_v7  ;;  %v2186_v7 = vcombine.low %v69_v60, %v73_v61 }
  0xb7   :  { %1788 = vmatpush2.bf16.msra.mxu0 %v2240_v13  ;;  %v57_v13 = vld [vmem:[%s3333_s1 + $0xb8] sm:$0xff] }
  0xb8   :  { %1789 = vmatprep.subr.bf16.mxu0 %v2233_v15  ;;  %v185_v15 = vld [vmem:[%s3333_s1 + $0x4b8] sm:$0xff]  ;;  %v2171_v19 = vcombine.high %v53_v12, %v57_v13 }
  0xb9   :  { %1829 = vmatpush2.bf16.msra.mxu1 %v2368_v14  ;;  %v181_v14 = vld [vmem:[%s3333_s1 + $0x498] sm:$0xff] }
  0xba   :  { %1830 = vmatprep.subr.bf16.mxu1 %v2361_v16  ;;  %v2299_v20 = vcombine.high %v181_v14, %v185_v15  ;;  %v2298_v25 = vcombine.low %v181_v14, %v185_v15  ;;  %v117_v15 = vld [vmem:[%s3333_s1 + $0x298] sm:$0xff] }
  0xbb   :  { %1790 = vmatpush2.bf16.msra.mxu0 %v2232_v22  ;;  %v49_v22 = vld [vmem:[%s3333_s1 + $0x78] sm:$0xff] }
  0xbc   :  { %1791 = vmatprep.subr.bf16.mxu0 %v2225_v24  ;;  %v177_v24 = vld [vmem:[%s3333_s1 + $0x478] sm:$0xff]  ;;  %v2163_v26 = vcombine.high %v45_v21, %v49_v22 }
  0xbd   :  { %1831 = vmatpush2.bf16.msra.mxu1 %v2360_v23  ;;  %v173_v23 = vld [vmem:[%s3333_s1 + $0x458] sm:$0xff] }
  0xbe   :  { %1832 = vmatprep.subr.bf16.mxu1 %v2353_v56  ;;  %v2170_v56 = vcombine.low %v53_v12, %v57_v13  ;;  %v2291_v27 = vcombine.high %v173_v23, %v177_v24  ;;  %v2290_v33 = vcombine.low %v173_v23, %v177_v24  ;;  %v109_v24 = vld [vmem:[%s3333_s1 + $0x258] sm:$0xff] }
  0xbf   :  { %1792 = vmatpush2.bf16.msra.mxu0 %v2224_v29  ;;  %v41_v29 = vld [vmem:[%s3333_s1 + $0x38] sm:$0xff] }
  0xc0   :  { %1793 = vmatprep.subr.bf16.mxu0 %v2217_v31  ;;  %v169_v31 = vld [vmem:[%s3333_s1 + $0x438] sm:$0xff]  ;;  %v2155_v34 = vcombine.high %v37_v28, %v41_v29 }
  0xc1   :  { %1833 = vmatpush2.bf16.msra.mxu1 %v2352_v30  ;;  %v165_v30 = vld [vmem:[%s3333_s1 + $0x418] sm:$0xff] }
  0xc2   :  { %1834 = vmatprep.subr.bf16.mxu1 %v2345_v32  ;;  %v2162_v32 = vcombine.low %v45_v21, %v49_v22  ;;  %v2283_v35 = vcombine.high %v165_v30, %v169_v31  ;;  %v2282_v41 = vcombine.low %v165_v30, %v169_v31  ;;  %v101_v31 = vld [vmem:[%s3333_s1 + $0x218] sm:$0xff] }
  0xc3   :  { %1794 = vmatpush2.bf16.msra.mxu0 %v2216_v37  ;;  %v161_v37 = vld [vmem:[%s3333_s1 + $0x3f8] sm:$0xff] }
  0xc4   :  { %1845 = vmatprep.subr.bf16.mxu0 %v2211_v39  ;;  %v289_v39 = vld [vmem:[%s3333_s1 + $0x7f8] sm:$0xff]  ;;  %v2275_v42 = vcombine.high %v157_v36, %v161_v37 }
  0xc5   :  { %1835 = vmatpush2.bf16.msra.mxu1 %v2344_v38  ;;  %v285_v38 = vld [vmem:[%s3333_s1 + $0x7d8] sm:$0xff] }
  0xc6   :  { %1886 = vmatprep.subr.bf16.mxu1 %v2339_v40  ;;  %1796 = vmatmul.mubr.bf16.vlgmr.msra.gmra.mxu0 %v2686_v18  ;;  %v2154_v40 = vcombine.low %v37_v28, %v41_v29  ;;  %v2403_v43 = vcombine.high %v285_v38, %v289_v39  ;;  %v2402_v50 = vcombine.low %v285_v38, %v289_v39 }
  0xc7   :  { %1846 = vmatpush1.bf16.msra.mxu0 %v2210_v45  ;;  %1877 = vmatprep.mubr.bf16.mxu0 %v2568_v3  ;;  %v61_v3 = vld [vmem:[%s3333_s1 + $0xd8] sm:$0xff] }
  0xc8   :  { %1837 = vmatmul.mubr.bf16.vlgmr.msra.gmra.mxu1 %v2702_v59  ;;  %1847 = vmatprep.subr.bf16.mxu0 %v2203_v48  ;;  %v2179_v10 = vcombine.high %v61_v3, %v65_v5  ;;  %v2178_v16 = vcombine.low %v61_v3, %v65_v5  ;;  %v153_v45 = vld [vmem:[%s3333_s1 + $0x3b8] sm:$0xff] }
  0xc9   :  { %1887 = vmatpush1.bf16.msra.mxu1 %v2338_v46  ;;  %1918 = vmatprep.mubr.bf16.mxu1 %v2579_v9  ;;  %v189_v9 = vld [vmem:[%s3333_s1 + $0x4d8] sm:$0xff]  ;;  %v2267_v51 = vcombine.high %v149_v44, %v153_v45 }
  0xca   :  { %1888 = vmatprep.subr.bf16.mxu1 %v2331_v49  ;;  %v2307_v11 = vcombine.high %v189_v9, %v193_v6  ;;  %v2306_v17 = vcombine.low %v189_v9, %v193_v6  ;;  %v277_v46 = vld [vmem:[%s3333_s1 + $0x798] sm:$0xff]  ;;  %v2274_v49 = vcombine.low %v157_v36, %v161_v37 }
  0xcb   :  { %1848 = vmatpush1.bf16.msra.mxu0 %v2202_v54  ;;  %v281_v48 = vld [vmem:[%s3333_s1 + $0x7b8] sm:$0xff] }
  0xcc   :  { %1849 = vmatprep.subr.bf16.mxu0 %v2195_v57  ;;  %v2395_v52 = vcombine.high %v277_v46, %v281_v48  ;;  %v145_v54 = vld [vmem:[%s3333_s1 + $0x378] sm:$0xff]  ;;  %v2394_v60 = vcombine.low %v277_v46, %v281_v48 }
  0xcd   :  { %1889 = vmatpush1.bf16.msra.mxu1 %v2330_v55  ;;  %v269_v55 = vld [vmem:[%s3333_s1 + $0x758] sm:$0xff]  ;;  %v2259_v61 = vcombine.high %v141_v53, %v145_v54 }
  0xce   :  { %1890 = vmatprep.subr.bf16.mxu1 %v2323_v58  ;;  %v273_v57 = vld [vmem:[%s3333_s1 + $0x778] sm:$0xff]  ;;  %v2266_v58 = vcombine.low %v149_v44, %v153_v45 }
  0xcf   :  { %1850 = vmatpush1.bf16.msra.mxu0 %v2194_v0  ;;  %v2387_v62 = vcombine.high %v269_v55, %v273_v57  ;;  %v137_v0 = vld [vmem:[%s3333_s1 + $0x338] sm:$0xff]  ;;  %v2386_v3 = vcombine.low %v269_v55, %v273_v57  ;;  %v1999_v55 = vsub.s32 2, %v2531_v47  ;;  %v2431_v57 = vmov 1983009808  }
  0xd0   :  { %1851 = vmatprep.subr.bf16.mxu0 %v2187_v2  ;;  %v265_v2 = vld [vmem:[%s3333_s1 + $0x738] sm:$0xff]  ;;  %v2251_v5 = vcombine.high %v133_v63, %v137_v0 }
  0xd1   :  { %1891 = vmatpush1.bf16.msra.mxu1 %v2322_v1  ;;  %v261_v1 = vld [vmem:[%s3333_s1 + $0x718] sm:$0xff] }
  0xd2   :  { %1892 = vmatprep.subr.bf16.mxu1 %v2315_v4  ;;  %v2258_v4 = vcombine.low %v141_v53, %v145_v54  ;;  %v2379_v9 = vcombine.high %v261_v1, %v265_v2  ;;  %v125_v6 = vld [vmem:[%s3333_s1 + $0x2d8] sm:$0xff]  ;;  %v2378_v12 = vcombine.low %v261_v1, %v265_v2  ;;  %v1991_v53 = vsub.s32 0, %v2531_v47 }
  0xd3   :  { %1852 = vmatpush1.bf16.msra.mxu0 %v2186_v7  ;;  %v129_v7 = vld [vmem:[%s3333_s1 + $0x2f8] sm:$0xff]  ;;  %v1995_v54 = vsub.s32 1, %v2531_v47 }
  0xd4   :  { %1853 = vmatprep.subr.bf16.mxu0 %v2179_v10  ;;  %v257_v10 = vld [vmem:[%s3333_s1 + $0x6f8] sm:$0xff]  ;;  %v2243_v13 = vcombine.high %v125_v6, %v129_v7 }
  0xd5   :  { %1893 = vmatpush1.bf16.msra.mxu1 %v2314_v8  ;;  %v253_v8 = vld [vmem:[%s3333_s1 + $0x6d8] sm:$0xff] }
  0xd6   :  { %1894 = vmatprep.subr.bf16.mxu1 %v2307_v11  ;;  %v2250_v11 = vcombine.low %v133_v63, %v137_v0  ;;  %v2371_v14 = vcombine.high %v253_v8, %v257_v10  ;;  %v2370_v21 = vcombine.low %v253_v8, %v257_v10 }
  0xd7   :  { %1854 = vmatpush1.bf16.msra.mxu0 %v2178_v16  ;;  %v121_v16 = vld [vmem:[%s3333_s1 + $0x2b8] sm:$0xff] }
  0xd8   :  { %1855 = vmatprep.subr.bf16.mxu0 %v2171_v19  ;;  %v249_v19 = vld [vmem:[%s3333_s1 + $0x6b8] sm:$0xff]  ;;  %v2235_v22 = vcombine.high %v117_v15, %v121_v16 }
  0xd9   :  { %1895 = vmatpush1.bf16.msra.mxu1 %v2306_v17  ;;  %v245_v17 = vld [vmem:[%s3333_s1 + $0x698] sm:$0xff] }
  0xda   :  { %1896 = vmatprep.subr.bf16.mxu1 %v2299_v20  ;;  %v2242_v20 = vcombine.low %v125_v6, %v129_v7  ;;  %v2363_v23 = vcombine.high %v245_v17, %v249_v19  ;;  %v2362_v28 = vcombine.low %v245_v17, %v249_v19  ;;  %v2432_v17 = vmov 0.0  }
  0xdb   :  { %1856 = vmatpush1.bf16.msra.mxu0 %v2170_v56  ;;  %v113_v56 = vld [vmem:[%s3333_s1 + $0x278] sm:$0xff]  ;;  %30 = vst.msk [vmem:[#allocation2 + $0x8] sm:$0xff] %vm3292_vm6, %v2432_v17 }
  0xdc   :  { %1857 = vmatprep.subr.bf16.mxu0 %v2163_v26  ;;  %v241_v26 = vld [vmem:[%s3333_s1 + $0x678] sm:$0xff]  ;;  %v2227_v29 = vcombine.high %v109_v24, %v113_v56 }
  0xdd   :  { %1897 = vmatpush1.bf16.msra.mxu1 %v2298_v25  ;;  %v237_v25 = vld [vmem:[%s3333_s1 + $0x658] sm:$0xff] }
  0xde   :  { %1898 = vmatprep.subr.bf16.mxu1 %v2291_v27  ;;  %v2234_v27 = vcombine.low %v117_v15, %v121_v16  ;;  %v2355_v30 = vcombine.high %v237_v25, %v241_v26  ;;  %v2354_v36 = vcombine.low %v237_v25, %v241_v26 }
  0xdf   :  { %1858 = vmatpush1.bf16.msra.mxu0 %v2162_v32  ;;  %v105_v32 = vld [vmem:[%s3333_s1 + $0x238] sm:$0xff] }
  0xe0   :  { %1859 = vmatprep.subr.bf16.mxu0 %v2155_v34  ;;  %v233_v34 = vld [vmem:[%s3333_s1 + $0x638] sm:$0xff]  ;;  %v2219_v37 = vcombine.high %v101_v31, %v105_v32  ;;  %v2218_v39 = vcombine.low %v101_v31, %v105_v32 }
  0xe1   :  { %1899 = vmatpush1.bf16.msra.mxu1 %v2290_v33  ;;  %v229_v33 = vld [vmem:[%s3333_s1 + $0x618] sm:$0xff] }
  0xe2   :  { %1900 = vmatprep.subr.bf16.mxu1 %v2283_v35  ;;  %v2226_v35 = vcombine.low %v109_v24, %v113_v56  ;;  %v2347_v38 = vcombine.high %v229_v33, %v233_v34 }
  0xe3   :  { %1860 = vmatpush1.bf16.msra.mxu0 %v2154_v40  ;;  %v2346_v40 = vcombine.low %v229_v33, %v233_v34 }
  0xe4   :  { %1861 = vmatprep.subr.bf16.mxu0 %v2275_v42 }
  0xe5   :  { %1901 = vmatpush1.bf16.msra.mxu1 %v2282_v41 }
  0xe6   :  { %1902 = vmatprep.subr.bf16.mxu1 %v2403_v43 }
  0xe7   :  { %1862 = vmatpush2.bf16.msra.mxu0 %v2274_v49 }
  0xe8   :  { %1863 = vmatprep.subr.bf16.mxu0 %v2267_v51 }
  0xe9   :  { %1903 = vmatpush2.bf16.msra.mxu1 %v2402_v50 }
  0xea   :  { %1904 = vmatprep.subr.bf16.mxu1 %v2395_v52 }
  0xeb   :  { %1864 = vmatpush2.bf16.msra.mxu0 %v2266_v58  ;;  %v1938_v58 = vunpack.c.l.s4 %v2431_v57 }
  0xec   :  { %1865 = vmatprep.subr.bf16.mxu0 %v2259_v61 }
  0xed   :  { %1905 = vmatpush2.bf16.msra.mxu1 %v2394_v60  ;;  %v3282_v60 = vld [vmem:[%s3335_s3] sm:$0xff]  ;;  %v1939_v1 = vunpack.c.0.s8 %v1938_v58 }
  0xee   :  { %1906 = vmatprep.subr.bf16.mxu1 %v2387_v62 }
  0xef   :  { %1866 = vmatpush2.bf16.msra.mxu0 %v2258_v4  ;;  %v2064_v4 = vrot.slane %v3282_v60, %v1991_v53 }
  0xf0   :  { %1867 = vmatprep.subr.bf16.mxu0 %v2251_v5  ;;  %v2068_v5 = vrot.slane %v3282_v60, %v1995_v54 }
  0xf1   :  { %1907 = vmatpush2.bf16.msra.mxu1 %v2386_v3 }
  0xf2   :  { %1908 = vmatprep.subr.bf16.mxu1 %v2379_v9  ;;  %v2072_v9 = vrot.slane %v3282_v60, %v1999_v55 }
  0xf3   :  { %1868 = vmatpush2.bf16.msra.mxu0 %v2250_v11 }
  0xf4   :  { %1869 = vmatprep.subr.bf16.mxu0 %v2243_v13 }
  0xf5   :  { %1909 = vmatpush2.bf16.msra.mxu1 %v2378_v12 }
  0xf6   :  { %1910 = vmatprep.subr.bf16.mxu1 %v2371_v14  ;;  %v3297_v14 = vsub.s32 %v1939_v1, %v2531_v47 }
  0xf7   :  { %1870 = vmatpush2.bf16.msra.mxu0 %v2242_v20  ;;  %v2093_v20 = vcombine.low %v2064_v4, %v2068_v5 }
  0xf8   :  { %1871 = vmatprep.subr.bf16.mxu0 %v2235_v22 }
  0xf9   :  { %1911 = vmatpush2.bf16.msra.mxu1 %v2370_v21 }
  0xfa   :  { %1912 = vmatprep.subr.bf16.mxu1 %v2363_v23 }
  0xfb   :  { %1872 = vmatpush2.bf16.msra.mxu0 %v2234_v27 }
  0xfc   :  { %1873 = vmatprep.subr.bf16.mxu0 %v2227_v29 }
  0xfd   :  { %1913 = vmatpush2.bf16.msra.mxu1 %v2362_v28  ;;  %v2101_v28 = vrot.slane %v2093_v20, %v3297_v14 }
  0xfe   :  { %1914 = vmatprep.subr.bf16.mxu1 %v2355_v30 }
  0xff   :  { %1874 = vmatpush2.bf16.msra.mxu0 %v2226_v35 }
 0x100   :  { %1875 = vmatprep.subr.bf16.mxu0 %v2219_v37 }
 0x101   :  { %1915 = vmatpush2.bf16.msra.mxu1 %v2354_v36 }
 0x102   :  { %1916 = vmatprep.subr.bf16.mxu1 %v2347_v38 }
 0x103   :  { %1876 = vmatpush2.bf16.msra.mxu0 %v2218_v39 }
 0x105   :  { %1917 = vmatpush2.bf16.msra.mxu1 %v2346_v40 }
 0x106   :  { %v1633_v41 = vpop.f32.mrf.mxu0  ;;  %1878 = vmatmul.mubr.bf16.vlgmr.msra.gmra.mxu0 %v2686_v18  ;;  %v2003_v18 = vsub.s32 3, %v2531_v47 }
 0x108   :  { %v1674_v42 = vpop.f32.mrf.mxu1  ;;  %1919 = vmatmul.mubr.bf16.vlgmr.msra.gmra.mxu1 %v2702_v59  ;;  %v1635_v44 = vpop.f32.mrf.mxu0  ;;  %v3277_v59 = vld [vmem:[%s3334_s2] sm:$0xff]  ;;  %v2076_v6 = vrot.slane %v3282_v60, %v2003_v18  ;;  %s2433_s2 = smov [#allocation3]  }
 0x109   :  { %v1675_v43 = vadd.f32 %v1674_v42, %v1633_v41  ;;  %v1992_v61 = vrot.slane %v3277_v59, %v1991_v53  ;;  %v1996_v62 = vrot.slane %v3277_v59, %v1995_v54  ;;  %v2000_v63 = vrot.slane %v3277_v59, %v1999_v55  ;;  %s2139_s3 = sshll.u32 %s2433_s2, 4  ;;  %s2140_s3 = int_to_ptr.vmem [resolvable:$true] %s2139_s3 }
 0x10a   :  { %v1676_v45 = vpop.f32.mrf.mxu1  ;;  %v1637_v48 = vpop.f32.mrf.mxu0  ;;  %v2004_v0 = vrot.slane %v3277_v59, %v2003_v18  ;;  %v2094_v21 = vcombine.low %v2072_v9, %v2076_v6  ;;  %v2019_v53 = vsub.s32 7, %v2531_v47  ;;  %s2408_s21 = scalar_lea.vmem %s2140_s3, 256  ;;  %p2413_p1 = scmp.lt.s32.totalorder %s2140_s3, %s2140_s3 }
 0x10b   :  { %v1677_v46 = vadd.f32 %v1676_v45, %v1635_v44  ;;  %v2021_v10 = vcombine.low %v1992_v61, %v1996_v62  ;;  %p2409_p0 = scmp.ne.s32.totalorder %s2140_s3, %s2408_s21  ;;  %p2414_p2 = scmp.lt.s32.totalorder %s2408_s21, %s2408_s21 }
 0x10c   :  { %v1678_v49 = vpop.f32.mrf.mxu1  ;;  %v1638_v51 = vpop.f32.mrf.mxu0  ;;  %v2022_v11 = vcombine.low %v2000_v63, %v2004_v0  ;;  %v2108_v29 = vrot.slane %v2094_v21, %v3297_v14 }
 0x10d   :  { %v1935_v50 = vcombine.low %v1675_v43, %v1677_v46  ;;  %v2029_v24 = vrot.slane %v2021_v10, %v3297_v14  ;;  %v2007_v49 = vsub.s32 4, %v2531_v47  ;;  %v2011_v51 = vsub.s32 5, %v2531_v47  ;;  %p2415_p3 = por %p2414_p2, %p2413_p1 }
 0x10e   :  { %v1679_v52 = vpop.f32.mrf.mxu1  ;;  %v2036_v56 = vrot.slane %v2022_v11, %v3297_v14  ;;  %v2109_v32 = vcombine.low %v2101_v28, %v2108_v29 }
 0x10f   :  { %v1943_v26 = vrot.slane %v1935_v50, %v3297_v14  ;;  %v2015_v52 = vsub.s32 6, %v2531_v47  ;;  %v2008_v61 = vrot.slane %v3277_v59, %v2007_v49  ;;  %v2012_v0 = vrot.slane %v3277_v59, %v2011_v51  ;;  %p2416_p4 = pnand %p2415_p3, %p2409_p0 }
 0x110   :  { %v2037_v31 = vcombine.low %v2029_v24, %v2036_v56  ;;  %v2084_v47 = vrot.slane %v3282_v60, %v2011_v51 }
 0x111   :  { %v2016_v1 = vrot.slane %v3277_v59, %v2015_v52  ;;  %v2088_v6 = vrot.slane %v3282_v60, %v2015_v52  ;;  %v2038_v11 = vcombine.low %v2008_v61, %v2012_v0 }
 0x113   :  { %v2046_v17 = vrot.slane %v2038_v11, %v3297_v14 }
 0x146   :  { %v1715_v2 = vpop.f32.mrf.mxu0 }
 0x148   :  { %v1756_v3 = vpop.f32.mrf.mxu1  ;;  %v1717_v8 = vpop.f32.mrf.mxu0 }
 0x149   :  { %v1757_v7 = vadd.f32 %v1756_v3, %v1715_v2  ;;  %v2020_v2 = vrot.slane %v3277_v59, %v2019_v53  ;;  %v2080_v3 = vrot.slane %v3282_v60, %v2007_v49 }
 0x14a   :  { %v1758_v12 = vpop.f32.mrf.mxu1  ;;  %v1719_v16 = vpop.f32.mrf.mxu0 }
 0x14b   :  { %v1759_v15 = vadd.f32 %v1758_v12, %v1717_v8  ;;  %v32_v8 = vld [vmem:[#allocation2 + $0x8] sm:$0xff]  ;;  %v2039_v12 = vcombine.low %v2016_v1, %v2020_v2  ;;  %v2110_v16 = vcombine.low %v2080_v3, %v2084_v47 }
 0x14c   :  { %v1760_v19 = vpop.f32.mrf.mxu1  ;;  %v1720_v23 = vpop.f32.mrf.mxu0 }
 0x14d   :  { %v1936_v22 = vcombine.low %v1757_v7, %v1759_v15  ;;  %v2092_v7 = vrot.slane %v3282_v60, %v2019_v53  ;;  %v2053_v19 = vrot.slane %v2039_v12, %v3297_v14  ;;  %v2118_v20 = vrot.slane %v2110_v16, %v3297_v14 }
 0x14e   :  { %v1761_v25 = vpop.f32.mrf.mxu1 }
 0x14f   :  { %v1950_v27 = vrot.slane %v1936_v22, %v3297_v14  ;;  %v2111_v59 = vcombine.low %v2088_v6, %v2092_v7  ;;  %v2054_v22 = vcombine.low %v2046_v17, %v2053_v19 }
 0x151   :  { %v1951_v30 = vcombine.low %v1943_v26, %v1950_v27  ;;  %v2125_v21 = vrot.slane %v2111_v59, %v3297_v14 }
 0x153   :  { %v2057_v33 = vmul.f32 %v2037_v31, %v1951_v30  ;;  %v2126_v60 = vcombine.low %v2118_v20, %v2125_v21 }
 0x155   :  { %v2129_v34 = vadd.f32 %v2109_v32, %v2057_v33 }
 0x157   :  { %2131 = vst [vmem:[#allocation3] sm:$0xff] %v2129_v34 }
 0x186   :  { %v1797_v35 = vpop.f32.mrf.mxu0 }
 0x188   :  { %v1838_v36 = vpop.f32.mrf.mxu1  ;;  %v1799_v38 = vpop.f32.mrf.mxu0 }
 0x189   :  { %v1839_v37 = vadd.f32 %v1838_v36, %v1797_v35 }
 0x18a   :  { %v1840_v39 = vpop.f32.mrf.mxu1  ;;  %v1801_v41 = vpop.f32.mrf.mxu0 }
 0x18b   :  { %v1841_v40 = vadd.f32 %v1840_v39, %v1799_v38 }
 0x18c   :  { %v1842_v42 = vpop.f32.mrf.mxu1  ;;  %v1802_v44 = vpop.f32.mrf.mxu0 }
 0x18d   :  { %v1952_v43 = vcombine.low %v1839_v37, %v1841_v40 }
 0x18e   :  { %v1843_v45 = vpop.f32.mrf.mxu1 }
 0x18f   :  { %v1960_v5 = vrot.slane %v1952_v43, %v3297_v14 }
 0x1c6   :  { %v1879_v46 = vpop.f32.mrf.mxu0 }
 0x1c8   :  { %v1920_v48 = vpop.f32.mrf.mxu1  ;;  %v1881_v50 = vpop.f32.mrf.mxu0 }
 0x1c9   :  { %v1921_v55 = vadd.f32 %v1920_v48, %v1879_v46 }
 0x1ca   :  { %v1922_v54 = vpop.f32.mrf.mxu1  ;;  %v1883_v57 = vpop.f32.mrf.mxu0 }
 0x1cb   :  { %v1923_v18 = vadd.f32 %v1922_v54, %v1881_v50 }
 0x1cc   :  { %v1924_v58 = vpop.f32.mrf.mxu1  ;;  %v1884_v63 = vpop.f32.mrf.mxu0 }
 0x1cd   :  { %v1953_v62 = vcombine.low %v1921_v55, %v1923_v18 }
 0x1ce   :  { %v1925_v4 = vpop.f32.mrf.mxu1 }
 0x1cf   :  { %v1967_v9 = vrot.slane %v1953_v62, %v3297_v14 }
 0x1d1   :  { %v1968_v10 = vcombine.low %v1960_v5, %v1967_v9 }
 0x1d3   :  { %v1972_v15 = vadd.f32 %v1968_v10, %v32_v8 }
 0x1d5   :  { %1981 = vst.msk [vmem:[#allocation2 + $0x8] sm:$0xff] %vm3292_vm6, %v1972_v15 }
 0x1dc   :  { %v1986_v23 = vld [vmem:[#allocation2 + $0x8] sm:$0xff] }
 0x1dd   :  { %v2058_v24 = vmul.f32 %v2054_v22, %v1986_v23 }
 0x1df   :  { %v2130_v56 = vadd.f32 %v2126_v60, %v2058_v24 }
 0x1e1   :  { %2132 = vst.msk [vmem:[#allocation3 + $0x8] sm:$0xff] %vm3292_vm6, %v2130_v56 }
 0x1e2   :  { %2419 = shalt.err (!%p2416_p4)
}
 0x1e3   :  { %2142 = dma.vmem_to_hbm [thread:$0]  %s2140_s3, 256, %s3336_s4, [#allocation4]  }
 0x1e4   :  { %2428 = dma.done.wait [#allocation4], 256  }
 0x1e5   :  { %2429 = vsyncadd [#allocation4], 4294967040 }
 0x1e6   :  { %2146 = vsyncpa [#allocation4], 1 }

</bundles_post_ra>
